<compile_context>
chip_gen: v6e
topology: v6e:2x2x1
jax: 0.10.0
libtpu: 0.0.40
codegen_flags: <defaults>
</compile_context>

<pallas_src>
import functools

import jax
import jax.numpy as jnp
from jax.experimental import pallas as pl
from jax.experimental.pallas import tpu as pltpu


_BN_EPS = 1e-5

# Matmul tile caps: multiples of 256 feed the v6e/v7x 2x256x256 MXU and are
# exact multiples of the v5e 128x128 tiles.
_TM_CAP = 512
_TN_CAP = 256
_TK_CAP = 512
_K_SINGLE_MAX = 1024            # K <= this: one full-K block, zero K padding
_VMEM_LIMIT = 32 * 1024 * 1024  # well under v7x's 64 MiB physical VMEM


def _round_up(x, m):
    return (x + m - 1) // m * m


def _choose_m_tiling(m):
    """Padded row count + row tile (both multiples of 8), biggest tile <= cap."""
    mp = _round_up(max(m, 8), 8)
    if mp <= _TM_CAP:
        return mp, mp
    for d in range(_TM_CAP, _TM_CAP // 2 - 1, -8):     # prefer divisor: no pad
        if mp % d == 0:
            return mp, d
    return _round_up(mp, _TM_CAP), _TM_CAP


def _choose_n_tiling(n):
    np_ = _round_up(max(n, 128), 128)
    if np_ <= _TN_CAP:
        return np_, np_
    for d in range(_TN_CAP, _TN_CAP // 2 - 1, -128):
        if np_ % d == 0:
            return np_, d
    return _round_up(np_, _TN_CAP), _TN_CAP


def _choose_k_tiling(k):
    if k <= _K_SINGLE_MAX:
        return k, k                 # full-dim block: legal, no 128 padding
    kp = _round_up(k, 128)
    for d in range(_TK_CAP, 127, -128):
        if kp % d == 0:
            return kp, d
    return kp, 128


def _largest_divisor_leq(n, cap):
    cap = max(1, min(n, cap))
    for d in range(cap, 0, -1):
        if n % d == 0:
            return d
    return 1


# ---------------------------------------------------------------------------
# Pallas kernels
# ---------------------------------------------------------------------------

def _matmul_affine_kernel(x_ref, w_ref, scale_ref, bias_ref, o_ref, acc_ref, *,
                          apply_relu):
    """out = maybe_relu((x @ w) * scale + bias); scale/bias per output column."""
    k = pl.program_id(2)

    @pl.when(k == 0)
    def _():
        acc_ref[...] = jnp.zeros_like(acc_ref)

    acc_ref[...] += jnp.dot(x_ref[...], w_ref[...],
                            preferred_element_type=jnp.float32)

    @pl.when(k == pl.num_programs(2) - 1)
    def _():
        y = acc_ref[...] * scale_ref[...] + bias_ref[...]   # f32 epilogue
        if apply_relu:
            y = jnp.maximum(y, 0.0)
        o_ref[...] = y.astype(o_ref.dtype)


def _maxpool_kernel(x_ref, o_ref):
    # x_ref: (1, th, 2, wo, 2, C) -> max over the two size-2 window axes.
    x = x_ref[...]
    a = jnp.maximum(x[:, :, 0], x[:, :, 1])              # (1, th, wo, 2, C)
    o_ref[...] = jnp.maximum(a[:, :, :, 0], a[:, :, :, 1])


# ---------------------------------------------------------------------------
# Pallas wrappers
# ---------------------------------------------------------------------------

def fused_matmul_affine(x, w, scale, bias, *, relu, out_dtype=jnp.bfloat16):
    """(M,K) @ (K,N) on the MXU (bf16 in, f32 acc), fused per-column affine."""
    m, k = x.shape
    k2, n = w.shape
    assert k == k2

    x = x.astype(jnp.bfloat16)
    w = w.astype(jnp.bfloat16)

    mp, tm = _choose_m_tiling(m)
    np_, tn = _choose_n_tiling(n)
    kp, tk = _choose_k_tiling(k)

    if (mp, kp) != (m, k):
        x = jnp.pad(x, ((0, mp - m), (0, kp - k)))
    if (kp, np_) != (k, n):
        w = jnp.pad(w, ((0, kp - k), (0, np_ - n)))
    sp = jnp.zeros((1, np_), jnp.float32).at[0, :n].set(scale.astype(jnp.float32))
    bp = jnp.zeros((1, np_), jnp.float32).at[0, :n].set(bias.astype(jnp.float32))

    grid = (mp // tm, np_ // tn, kp // tk)

    out = pl.pallas_call(
        functools.partial(_matmul_affine_kernel, apply_relu=relu),
        out_shape=jax.ShapeDtypeStruct((mp, np_), out_dtype),
        grid=grid,
        in_specs=[
            pl.BlockSpec((tm, tk), lambda i, j, kk: (i, kk)),
            pl.BlockSpec((tk, tn), lambda i, j, kk: (kk, j)),
            pl.BlockSpec((1, tn), lambda i, j, kk: (0, j)),
            pl.BlockSpec((1, tn), lambda i, j, kk: (0, j)),
        ],
        out_specs=pl.BlockSpec((tm, tn), lambda i, j, kk: (i, j)),
        scratch_shapes=[pltpu.VMEM((tm, tn), jnp.float32)],
        compiler_params=pltpu.CompilerParams(
            dimension_semantics=("parallel", "parallel", "arbitrary"),
            vmem_limit_bytes=_VMEM_LIMIT),
    )(x, w, sp, bp)
    return out[:m, :n]


def maxpool2x2(x):
    # x: (N, H, W, C) -> (N, H//2, W//2, C), kernel 2x2, stride 2.
    n, h, w, c = x.shape
    assert h % 2 == 0 and w % 2 == 0, "maxpool2x2 requires even H and W"
    ho, wo = h // 2, w // 2
    xr = x.reshape(n, ho, 2, wo, 2, c)      # pure dim-split: no data movement
    bytes_per_out_row = 2 * w * c * x.dtype.itemsize
    th = _largest_divisor_leq(ho, max(1, (2 * 1024 * 1024) // bytes_per_out_row))
    out = pl.pallas_call(
        _maxpool_kernel,
        out_shape=jax.ShapeDtypeStruct((n, ho, wo, c), x.dtype),
        grid=(n, ho // th),
        in_specs=[pl.BlockSpec((1, th, 2, wo, 2, c),
                               lambda i, j: (i, j, 0, 0, 0, 0))],
        out_specs=pl.BlockSpec((1, th, wo, c), lambda i, j: (i, j, 0, 0)),
        compiler_params=pltpu.CompilerParams(
            dimension_semantics=("parallel", "parallel"),
            vmem_limit_bytes=_VMEM_LIMIT),
    )(xr)
    return out


# ---------------------------------------------------------------------------
# Module building blocks (glue = reshape/im2col; compute = Pallas kernels)
# ---------------------------------------------------------------------------

def conv3x3_bn_relu(x, wm, scale, bias):
    """down_block: Conv2d(k=3, s=1, p=1) + BatchNorm (inference) + ReLU."""
    n, h, wd, cin = x.shape
    cout = wm.shape[1]
    xp = jnp.pad(x, ((0, 0), (1, 1), (1, 1), (0, 0)))
    # TODO(synk): im2col is still materialized by XLA in HBM (bf16); an
    # in-kernel halo-DMA conv would cut input traffic ~9x further.
    cols = [xp[:, di:di + h, dj:dj + wd, :] for di in range(3) for dj in range(3)]
    xc = jnp.concatenate(cols, axis=-1).reshape(n * h * wd, 9 * cin)
    y = fused_matmul_affine(xc, wm, scale, bias, relu=True,
                            out_dtype=jnp.bfloat16)
    return y.reshape(n, h, wd, cout)


def conv1x1(x, wm, bias):
    """Plain Conv2d(k=1) -- the final upconv5 (f32 output)."""
    n, h, wd, cin = x.shape
    cout = wm.shape[1]
    y = fused_matmul_affine(x.reshape(n * h * wd, cin), wm,
                            jnp.ones((cout,), jnp.float32), bias,
                            relu=False, out_dtype=jnp.float32)
    return y.reshape(n, h, wd, cout)


def up_block_apply(x, wm, scale4, bias4):
    """up_block: ConvTranspose2d(k=2, s=2) + BatchNorm (inference) + Dropout(eval)."""
    n, hi, wi, cin = x.shape
    cout = wm.shape[1] // 4
    y = fused_matmul_affine(x.reshape(n * hi * wi, cin), wm, scale4, bias4,
                            relu=False, out_dtype=jnp.bfloat16)
    y = (y.reshape(n, hi, wi, 2, 2, cout)
           .transpose(0, 1, 3, 2, 4, 5)
           .reshape(n, 2 * hi, 2 * wi, cout))
    return y


def center_crop(t, ref):
    """NHWC version of the PyTorch center_crop helper."""
    h, w = ref.shape[1], ref.shape[2]
    hs = int((t.shape[1] + 1 - h) / 2)
    ws = int((t.shape[2] + 1 - w) / 2)
    return t[:, hs:hs + h, ws:ws + w, :]


# ---------------------------------------------------------------------------
# Unet forward
# ---------------------------------------------------------------------------

def unet_forward(params, x):
    # x: (N, H, W, 3) NHWC (the PyTorch module permutes NHWC -> NCHW itself).
    x = x.astype(jnp.bfloat16)

    out1 = conv3x3_bn_relu(x, *params["conv1"])
    state1 = maxpool2x2(out1)
    out2 = conv3x3_bn_relu(state1, *params["conv2"])
    state2 = maxpool2x2(out2)
    out3 = conv3x3_bn_relu(state2, *params["conv3"])
    state3 = maxpool2x2(out3)
    out4 = conv3x3_bn_relu(state3, *params["conv4"])
    state4 = maxpool2x2(out4)
    out5 = conv3x3_bn_relu(state4, *params["conv5"])

    # TODO(synk): the skip-connection concat is still a host-side HBM copy; it
    # could be folded into the matmul K-grid as two K-chunks of the same output.
    state5 = up_block_apply(out5, *params["up1"])
    out6 = conv3x3_bn_relu(
        jnp.concatenate([center_crop(out4, state5), state5], axis=-1),
        *params["upconv1"])
    state6 = up_block_apply(out6, *params["up2"])
    out7 = conv3x3_bn_relu(
        jnp.concatenate([center_crop(out3, state6), state6], axis=-1),
        *params["upconv2"])
    state7 = up_block_apply(out7, *params["up3"])
    out8 = conv3x3_bn_relu(
        jnp.concatenate([center_crop(out2, state7), state7], axis=-1),
        *params["upconv3"])
    state8 = up_block_apply(out8, *params["up4"])
    out9 = conv3x3_bn_relu(
        jnp.concatenate([center_crop(out1, state8), state8], axis=-1),
        *params["upconv4"])

    outputs = conv1x1(out9, *params["upconv5"])       # (N, H, W, 1) f32
    return jnp.transpose(outputs, (0, 3, 1, 2))       # -> NCHW (N, 1, H, W)


# ---------------------------------------------------------------------------
# Parameters: PyTorch-layout init + one-time conversion to matmul-ready form
# ---------------------------------------------------------------------------

def init_params(key, channels=(3, 32, 64, 128, 256, 512)):
    """Raw parameters in PyTorch layouts (incl. BN running stats)."""
    keys = iter(jax.random.split(key, 32))
    params = {}

    def conv_wb(cout, cin, k):
        bound = 1.0 / float(cin * k * k) ** 0.5
        w = jax.random.uniform(next(keys), (cout, cin, k, k), jnp.float32,
                               -bound, bound)
        b = jax.random.uniform(next(keys), (cout,), jnp.float32, -bound, bound)
        return w, b

    def bn(c):
        # gamma, beta, running_mean, running_var (fresh PyTorch defaults)
        return (jnp.ones((c,), jnp.float32), jnp.zeros((c,), jnp.float32),
                jnp.zeros((c,), jnp.float32), jnp.ones((c,), jnp.float32))

    # encoder down_blocks
    for i, name in enumerate(["conv1", "conv2", "conv3", "conv4", "conv5"]):
        cin, cout = channels[i], channels[i + 1]
        w, b = conv_wb(cout, cin, 3)
        params[name] = (w, b, *bn(cout))

    # up_blocks (ConvTranspose2d weight layout: (Cin, Cout, 2, 2))
    up_io = [(channels[5], channels[4]), (channels[4], channels[3]),
             (channels[3], channels[2]), (channels[2], channels[1])]
    for name, (cin, cout) in zip(["up1", "up2", "up3", "up4"], up_io):
        bound = 1.0 / float(cout * 4) ** 0.5
        w = jax.random.uniform(next(keys), (cin, cout, 2, 2), jnp.float32,
                               -bound, bound)
        b = jax.random.uniform(next(keys), (cout,), jnp.float32, -bound, bound)
        params[name] = (w, b, *bn(cout))

    # decoder down_blocks after concatenation
    upconv_io = [(channels[5], channels[4]), (channels[4], channels[3]),
                 (channels[3], channels[2]), (channels[2], channels[1])]
    for name, (cin, cout) in zip(["upconv1", "upconv2", "upconv3", "upconv4"],
                                 upconv_io):
        w, b = conv_wb(cout, cin, 3)
        params[name] = (w, b, *bn(cout))

    # final 1x1 conv (32 -> 1)
    params["upconv5"] = conv_wb(1, channels[1], 1)
    return params


def _fold_bn(b, gamma, beta, mean, var):
    s = gamma / jnp.sqrt(var + _BN_EPS)
    return s, (b - mean) * s + beta


def prepare_params(raw):
    """One-time conversion: bf16 matmul weights + folded f32 BN scale/bias."""
    prep = {}
    for name in ["conv1", "conv2", "conv3", "conv4", "conv5",
                 "upconv1", "upconv2", "upconv3", "upconv4"]:
        w, b, gamma, beta, mean, var = raw[name]
        cout, cin = w.shape[0], w.shape[1]
        wm = jnp.transpose(w, (2, 3, 1, 0)).reshape(9 * cin, cout)
        s, sb = _fold_bn(b, gamma, beta, mean, var)
        prep[name] = (wm.astype(jnp.bfloat16), s, sb)
    for name in ["up1", "up2", "up3", "up4"]:
        w, b, gamma, beta, mean, var = raw[name]
        cin, cout = w.shape[0], w.shape[1]
        wm = jnp.transpose(w, (0, 2, 3, 1)).reshape(cin, 4 * cout)
        s, sb = _fold_bn(b, gamma, beta, mean, var)
        prep[name] = (wm.astype(jnp.bfloat16), jnp.tile(s, 4), jnp.tile(sb, 4))
    w, b = raw["upconv5"]
    cout, cin = w.shape[0], w.shape[1]
    wm = jnp.transpose(w.reshape(cout, cin), (1, 0))
    prep["upconv5"] = (wm.astype(jnp.bfloat16), b)
    return prep


if __name__ == "__main__":
    key = jax.random.PRNGKey(0)
    pkey, xkey = jax.random.split(key)
    params = prepare_params(init_params(pkey))

    # H, W must be divisible by 16 (4 maxpools); keep it small.
    x = jax.random.normal(xkey, (2, 16, 16, 3), jnp.float32)

    out = jax.jit(unet_forward)(params, x)
    out = jax.block_until_ready(out)
    assert out.shape == (2, 1, 16, 16), out.shape
    assert out.dtype == jnp.float32
    print("KERNEL_OK")
</pallas_src>

<mosaic_0001>
module attributes {stable_mosaic.version = 11 : i64} {
  func.func @_maxpool_kernel(%arg0: i32, %arg1: i32, %arg2: memref<1x8x2x8x2x32xbf16, #tpu.memory_space<vmem>>, %arg3: memref<1x8x8x32xbf16, #tpu.memory_space<vmem>>) attributes {dimension_semantics = [#tpu.dimension_semantics<parallel>, #tpu.dimension_semantics<parallel>], iteration_bounds = array<i64: 2, 1>, scalar_prefetch = 0 : i64, scratch_operands = 0 : i64, tpu.core_type = #tpu.core_type<tc>, window_params = [{transform_indices = @transform_0, window_bounds = array<i64: 1, 8, 2, 8, 2, 32>}, {transform_indices = @transform_1, window_bounds = array<i64: 1, 8, 8, 32>}]} {
    %c0 = arith.constant 0 : index
    %c0_0 = arith.constant 0 : index
    %c0_1 = arith.constant 0 : index
    %c0_2 = arith.constant 0 : index
    %c0_3 = arith.constant 0 : index
    %c0_4 = arith.constant 0 : index
    %0 = vector.load %arg2[%c0, %c0_0, %c0_1, %c0_2, %c0_3, %c0_4] : memref<1x8x2x8x2x32xbf16, #tpu.memory_space<vmem>>, vector<1x8x2x8x2x32xbf16>
    %1 = vector.extract_strided_slice %0 {offsets = [0, 0, 0, 0, 0, 0], sizes = [1, 8, 1, 8, 2, 32], strides = [1, 1, 1, 1, 1, 1]} : vector<1x8x2x8x2x32xbf16> to vector<1x8x1x8x2x32xbf16>
    %2 = vector.shape_cast %1 : vector<1x8x1x8x2x32xbf16> to vector<1x8x8x2x32xbf16>
    %3 = vector.extract_strided_slice %0 {offsets = [0, 0, 1, 0, 0, 0], sizes = [1, 8, 1, 8, 2, 32], strides = [1, 1, 1, 1, 1, 1]} : vector<1x8x2x8x2x32xbf16> to vector<1x8x1x8x2x32xbf16>
    %4 = vector.shape_cast %3 : vector<1x8x1x8x2x32xbf16> to vector<1x8x8x2x32xbf16>
    %5 = arith.maximumf %2, %4 : vector<1x8x8x2x32xbf16>
    %6 = vector.extract_strided_slice %5 {offsets = [0, 0, 0, 0, 0], sizes = [1, 8, 8, 1, 32], strides = [1, 1, 1, 1, 1]} : vector<1x8x8x2x32xbf16> to vector<1x8x8x1x32xbf16>
    %7 = vector.shape_cast %6 : vector<1x8x8x1x32xbf16> to vector<1x8x8x32xbf16>
    %8 = vector.extract_strided_slice %5 {offsets = [0, 0, 0, 1, 0], sizes = [1, 8, 8, 1, 32], strides = [1, 1, 1, 1, 1]} : vector<1x8x8x2x32xbf16> to vector<1x8x8x1x32xbf16>
    %9 = vector.shape_cast %8 : vector<1x8x8x1x32xbf16> to vector<1x8x8x32xbf16>
    %10 = arith.maximumf %7, %9 : vector<1x8x8x32xbf16>
    %c0_5 = arith.constant 0 : index
    %c0_6 = arith.constant 0 : index
    %c0_7 = arith.constant 0 : index
    %c0_8 = arith.constant 0 : index
    %11 = vector.load %arg3[%c0_5, %c0_6, %c0_7, %c0_8] : memref<1x8x8x32xbf16, #tpu.memory_space<vmem>>, vector<1x8x8x32xbf16>
    tpu.vector_store %arg3[%c0_5, %c0_6, %c0_7, %c0_8], %10 {strides = array<i32>} : memref<1x8x8x32xbf16, #tpu.memory_space<vmem>>, vector<1x8x8x32xbf16>,
    return
  }
  func.func @transform_0(%arg0: i32, %arg1: i32) -> (i32, i32, i32, i32, i32, i32) {
    %c0_i32 = arith.constant 0 : i32
    %c0_i32_0 = arith.constant 0 : i32
    %c0_i32_1 = arith.constant 0 : i32
    %c0_i32_2 = arith.constant 0 : i32
    %c0_i32_3 = arith.constant 0 : i32
    return %arg0, %arg1, %c0_i32, %c0_i32_0, %c0_i32_1, %c0_i32_2 : i32, i32, i32, i32, i32, i32
  }
  func.func @transform_1(%arg0: i32, %arg1: i32) -> (i32, i32, i32, i32) {
    %c0_i32 = arith.constant 0 : i32
    %c0_i32_0 = arith.constant 0 : i32
    %c0_i32_1 = arith.constant 0 : i32
    return %arg0, %arg1, %c0_i32, %c0_i32_0 : i32, i32, i32, i32
  }
}

module attributes {stable_mosaic.version = 11 : i64} {
  func.func @_matmul_affine_kernel(%arg0: i32, %arg1: i32, %arg2: i32, %arg3: memref<512x27xbf16, #tpu.memory_space<vmem>>, %arg4: memref<27x128xbf16, #tpu.memory_space<vmem>>, %arg5: memref<1x128xf32, #tpu.memory_space<vmem>>, %arg6: memref<1x128xf32, #tpu.memory_space<vmem>>, %arg7: memref<512x128xbf16, #tpu.memory_space<vmem>>, %arg8: memref<512x128xf32, #tpu.memory_space<vmem>>) attributes {dimension_semantics = [#tpu.dimension_semantics<parallel>, #tpu.dimension_semantics<parallel>, #tpu.dimension_semantics<arbitrary>], iteration_bounds = array<i64: 1, 1, 1>, scalar_prefetch = 0 : i64, scratch_operands = 1 : i64, tpu.core_type = #tpu.core_type<tc>, window_params = [{transform_indices = @transform_0, window_bounds = array<i64: 512, 27>}, {transform_indices = @transform_1, window_bounds = array<i64: 27, 128>}, {transform_indices = @transform_2, window_bounds = array<i64: 1, 128>}, {transform_indices = @transform_3, window_bounds = array<i64: 1, 128>}, {transform_indices = @transform_4, window_bounds = array<i64: 512, 128>}]} {
    %c0_i32 = arith.constant 0 : i32
    %0 = arith.cmpi eq, %arg2, %c0_i32 : i32
    %1 = arith.extui %0 : i1 to i32
    %c0_i32_0 = arith.constant 0 : i32
    %2 = arith.cmpi ne, %1, %c0_i32_0 : i32
    scf.if %2 {
      %cst_10 = arith.constant 0.000000e+00 : f32
      %12 = vector.broadcast %cst_10 : f32 to vector<512x128xf32>
      %c0_11 = arith.constant 0 : index
      %c0_12 = arith.constant 0 : index
      %13 = vector.load %arg8[%c0_11, %c0_12] : memref<512x128xf32, #tpu.memory_space<vmem>>, vector<512x128xf32>
      tpu.vector_store %arg8[%c0_11, %c0_12], %12 {strides = array<i32>} : memref<512x128xf32, #tpu.memory_space<vmem>>, vector<512x128xf32>,
    } else {
    }
    %c0 = arith.constant 0 : index
    %c0_1 = arith.constant 0 : index
    %3 = vector.load %arg8[%c0, %c0_1] : memref<512x128xf32, #tpu.memory_space<vmem>>, vector<512x128xf32>
    %c0_2 = arith.constant 0 : index
    %c0_3 = arith.constant 0 : index
    %4 = vector.load %arg3[%c0_2, %c0_3] : memref<512x27xbf16, #tpu.memory_space<vmem>>, vector<512x27xbf16>
    %c0_4 = arith.constant 0 : index
    %c0_5 = arith.constant 0 : index
    %5 = vector.load %arg4[%c0_4, %c0_5] : memref<27x128xbf16, #tpu.memory_space<vmem>>, vector<27x128xbf16>
    %cst = arith.constant dense<0.000000e+00> : vector<512x128xf32>
    %6 = tpu.matmul %4, %5, %cst {dimension_numbers = #tpu.dot_dimension_numbers<[1], [0], [0], [1], [0, 0, 1, 1], [], []>} : vector<512x27xbf16>, vector<27x128xbf16>, vector<512x128xf32> -> vector<512x128xf32>
    %7 = arith.addf %3, %6 : vector<512x128xf32>
    %c0_6 = arith.constant 0 : index
    %c0_7 = arith.constant 0 : index
    %8 = vector.load %arg8[%c0_6, %c0_7] : memref<512x128xf32, #tpu.memory_space<vmem>>, vector<512x128xf32>
    tpu.vector_store %arg8[%c0_6, %c0_7], %7 {strides = array<i32>} : memref<512x128xf32, #tpu.memory_space<vmem>>, vector<512x128xf32>,
    %c0_i32_8 = arith.constant 0 : i32
    %9 = arith.cmpi eq, %arg2, %c0_i32_8 : i32
    %10 = arith.extui %9 : i1 to i32
    %c0_i32_9 = arith.constant 0 : i32
    %11 = arith.cmpi ne, %10, %c0_i32_9 : i32
    scf.if %11 {
      %c0_10 = arith.constant 0 : index
      %c0_11 = arith.constant 0 : index
      %12 = vector.load %arg8[%c0_10, %c0_11] : memref<512x128xf32, #tpu.memory_space<vmem>>, vector<512x128xf32>
      %c0_12 = arith.constant 0 : index
      %c0_13 = arith.constant 0 : index
      %13 = vector.load %arg5[%c0_12, %c0_13] : memref<1x128xf32, #tpu.memory_space<vmem>>, vector<1x128xf32>
      %14 = vector.broadcast %13 : vector<1x128xf32> to vector<512x128xf32>
      %15 = arith.mulf %12, %14 : vector<512x128xf32>
      %c0_14 = arith.constant 0 : index
      %c0_15 = arith.constant 0 : index
      %16 = vector.load %arg6[%c0_14, %c0_15] : memref<1x128xf32, #tpu.memory_space<vmem>>, vector<1x128xf32>
      %17 = vector.broadcast %16 : vector<1x128xf32> to vector<512x128xf32>
      %18 = arith.addf %15, %17 : vector<512x128xf32>
      %cst_16 = arith.constant 0.000000e+00 : f32
      %19 = vector.broadcast %cst_16 : f32 to vector<512x128xf32>
      %20 = arith.maximumf %18, %19 : vector<512x128xf32>
      %21 = arith.truncf %20 : vector<512x128xf32> to vector<512x128xbf16>
      %c0_17 = arith.constant 0 : index
      %c0_18 = arith.constant 0 : index
      %22 = vector.load %arg7[%c0_17, %c0_18] : memref<512x128xbf16, #tpu.memory_space<vmem>>, vector<512x128xbf16>
      tpu.vector_store %arg7[%c0_17, %c0_18], %21 {strides = array<i32>} : memref<512x128xbf16, #tpu.memory_space<vmem>>, vector<512x128xbf16>,
    } else {
    }
    return
  }
  func.func @transform_0(%arg0: i32, %arg1: i32, %arg2: i32) -> (i32, i32) {
    %c0_i32 = arith.constant 0 : i32
    return %arg0, %arg2 : i32, i32
  }
  func.func @transform_1(%arg0: i32, %arg1: i32, %arg2: i32) -> (i32, i32) {
    %c0_i32 = arith.constant 0 : i32
    return %arg2, %arg1 : i32, i32
  }
  func.func @transform_2(%arg0: i32, %arg1: i32, %arg2: i32) -> (i32, i32) {
    %c0_i32 = arith.constant 0 : i32
    %c0_i32_0 = arith.constant 0 : i32
    return %c0_i32, %arg1 : i32, i32
  }
  func.func @transform_3(%arg0: i32, %arg1: i32, %arg2: i32) -> (i32, i32) {
    %c0_i32 = arith.constant 0 : i32
    %c0_i32_0 = arith.constant 0 : i32
    return %c0_i32, %arg1 : i32, i32
  }
  func.func @transform_4(%arg0: i32, %arg1: i32, %arg2: i32) -> (i32, i32) {
    %c0_i32 = arith.constant 0 : i32
    return %arg0, %arg1 : i32, i32
  }
}

module attributes {stable_mosaic.version = 11 : i64} {
  func.func @_maxpool_kernel(%arg0: i32, %arg1: i32, %arg2: memref<1x4x2x4x2x64xbf16, #tpu.memory_space<vmem>>, %arg3: memref<1x4x4x64xbf16, #tpu.memory_space<vmem>>) attributes {dimension_semantics = [#tpu.dimension_semantics<parallel>, #tpu.dimension_semantics<parallel>], iteration_bounds = array<i64: 2, 1>, scalar_prefetch = 0 : i64, scratch_operands = 0 : i64, tpu.core_type = #tpu.core_type<tc>, window_params = [{transform_indices = @transform_0, window_bounds = array<i64: 1, 4, 2, 4, 2, 64>}, {transform_indices = @transform_1, window_bounds = array<i64: 1, 4, 4, 64>}]} {
    %c0 = arith.constant 0 : index
    %c0_0 = arith.constant 0 : index
    %c0_1 = arith.constant 0 : index
    %c0_2 = arith.constant 0 : index
    %c0_3 = arith.constant 0 : index
    %c0_4 = arith.constant 0 : index
    %0 = vector.load %arg2[%c0, %c0_0, %c0_1, %c0_2, %c0_3, %c0_4] : memref<1x4x2x4x2x64xbf16, #tpu.memory_space<vmem>>, vector<1x4x2x4x2x64xbf16>
    %1 = vector.extract_strided_slice %0 {offsets = [0, 0, 0, 0, 0, 0], sizes = [1, 4, 1, 4, 2, 64], strides = [1, 1, 1, 1, 1, 1]} : vector<1x4x2x4x2x64xbf16> to vector<1x4x1x4x2x64xbf16>
    %2 = vector.shape_cast %1 : vector<1x4x1x4x2x64xbf16> to vector<1x4x4x2x64xbf16>
    %3 = vector.extract_strided_slice %0 {offsets = [0, 0, 1, 0, 0, 0], sizes = [1, 4, 1, 4, 2, 64], strides = [1, 1, 1, 1, 1, 1]} : vector<1x4x2x4x2x64xbf16> to vector<1x4x1x4x2x64xbf16>
    %4 = vector.shape_cast %3 : vector<1x4x1x4x2x64xbf16> to vector<1x4x4x2x64xbf16>
    %5 = arith.maximumf %2, %4 : vector<1x4x4x2x64xbf16>
    %6 = vector.extract_strided_slice %5 {offsets = [0, 0, 0, 0, 0], sizes = [1, 4, 4, 1, 64], strides = [1, 1, 1, 1, 1]} : vector<1x4x4x2x64xbf16> to vector<1x4x4x1x64xbf16>
    %7 = vector.shape_cast %6 : vector<1x4x4x1x64xbf16> to vector<1x4x4x64xbf16>
    %8 = vector.extract_strided_slice %5 {offsets = [0, 0, 0, 1, 0], sizes = [1, 4, 4, 1, 64], strides = [1, 1, 1, 1, 1]} : vector<1x4x4x2x64xbf16> to vector<1x4x4x1x64xbf16>
    %9 = vector.shape_cast %8 : vector<1x4x4x1x64xbf16> to vector<1x4x4x64xbf16>
    %10 = arith.maximumf %7, %9 : vector<1x4x4x64xbf16>
    %c0_5 = arith.constant 0 : index
    %c0_6 = arith.constant 0 : index
    %c0_7 = arith.constant 0 : index
    %c0_8 = arith.constant 0 : index
    %11 = vector.load %arg3[%c0_5, %c0_6, %c0_7, %c0_8] : memref<1x4x4x64xbf16, #tpu.memory_space<vmem>>, vector<1x4x4x64xbf16>
    tpu.vector_store %arg3[%c0_5, %c0_6, %c0_7, %c0_8], %10 {strides = array<i32>} : memref<1x4x4x64xbf16, #tpu.memory_space<vmem>>, vector<1x4x4x64xbf16>,
    return
  }
  func.func @transform_0(%arg0: i32, %arg1: i32) -> (i32, i32, i32, i32, i32, i32) {
    %c0_i32 = arith.constant 0 : i32
    %c0_i32_0 = arith.constant 0 : i32
    %c0_i32_1 = arith.constant 0 : i32
    %c0_i32_2 = arith.constant 0 : i32
    %c0_i32_3 = arith.constant 0 : i32
    return %arg0, %arg1, %c0_i32, %c0_i32_0, %c0_i32_1, %c0_i32_2 : i32, i32, i32, i32, i32, i32
  }
  func.func @transform_1(%arg0: i32, %arg1: i32) -> (i32, i32, i32, i32) {
    %c0_i32 = arith.constant 0 : i32
    %c0_i32_0 = arith.constant 0 : i32
    %c0_i32_1 = arith.constant 0 : i32
    return %arg0, %arg1, %c0_i32, %c0_i32_0 : i32, i32, i32, i32
  }
}

module attributes {stable_mosaic.version = 11 : i64} {
  func.func @_matmul_affine_kernel(%arg0: i32, %arg1: i32, %arg2: i32, %arg3: memref<128x288xbf16, #tpu.memory_space<vmem>>, %arg4: memref<288x128xbf16, #tpu.memory_space<vmem>>, %arg5: memref<1x128xf32, #tpu.memory_space<vmem>>, %arg6: memref<1x128xf32, #tpu.memory_space<vmem>>, %arg7: memref<128x128xbf16, #tpu.memory_space<vmem>>, %arg8: memref<128x128xf32, #tpu.memory_space<vmem>>) attributes {dimension_semantics = [#tpu.dimension_semantics<parallel>, #tpu.dimension_semantics<parallel>, #tpu.dimension_semantics<arbitrary>], iteration_bounds = array<i64: 1, 1, 1>, scalar_prefetch = 0 : i64, scratch_operands = 1 : i64, tpu.core_type = #tpu.core_type<tc>, window_params = [{transform_indices = @transform_0, window_bounds = array<i64: 128, 288>}, {transform_indices = @transform_1, window_bounds = array<i64: 288, 128>}, {transform_indices = @transform_2, window_bounds = array<i64: 1, 128>}, {transform_indices = @transform_3, window_bounds = array<i64: 1, 128>}, {transform_indices = @transform_4, window_bounds = array<i64: 128, 128>}]} {
    %c0_i32 = arith.constant 0 : i32
    %0 = arith.cmpi eq, %arg2, %c0_i32 : i32
    %1 = arith.extui %0 : i1 to i32
    %c0_i32_0 = arith.constant 0 : i32
    %2 = arith.cmpi ne, %1, %c0_i32_0 : i32
    scf.if %2 {
      %cst_10 = arith.constant 0.000000e+00 : f32
      %12 = vector.broadcast %cst_10 : f32 to vector<128x128xf32>
      %c0_11 = arith.constant 0 : index
      %c0_12 = arith.constant 0 : index
      %13 = vector.load %arg8[%c0_11, %c0_12] : memref<128x128xf32, #tpu.memory_space<vmem>>, vector<128x128xf32>
      tpu.vector_store %arg8[%c0_11, %c0_12], %12 {strides = array<i32>} : memref<128x128xf32, #tpu.memory_space<vmem>>, vector<128x128xf32>,
    } else {
    }
    %c0 = arith.constant 0 : index
    %c0_1 = arith.constant 0 : index
    %3 = vector.load %arg8[%c0, %c0_1] : memref<128x128xf32, #tpu.memory_space<vmem>>, vector<128x128xf32>
    %c0_2 = arith.constant 0 : index
    %c0_3 = arith.constant 0 : index
    %4 = vector.load %arg3[%c0_2, %c0_3] : memref<128x288xbf16, #tpu.memory_space<vmem>>, vector<128x288xbf16>
    %c0_4 = arith.constant 0 : index
    %c0_5 = arith.constant 0 : index
    %5 = vector.load %arg4[%c0_4, %c0_5] : memref<288x128xbf16, #tpu.memory_space<vmem>>, vector<288x128xbf16>
    %cst = arith.constant dense<0.000000e+00> : vector<128x128xf32>
    %6 = tpu.matmul %4, %5, %cst {dimension_numbers = #tpu.dot_dimension_numbers<[1], [0], [0], [1], [0, 0, 1, 1], [], []>} : vector<128x288xbf16>, vector<288x128xbf16>, vector<128x128xf32> -> vector<128x128xf32>
    %7 = arith.addf %3, %6 : vector<128x128xf32>
    %c0_6 = arith.constant 0 : index
    %c0_7 = arith.constant 0 : index
    %8 = vector.load %arg8[%c0_6, %c0_7] : memref<128x128xf32, #tpu.memory_space<vmem>>, vector<128x128xf32>
    tpu.vector_store %arg8[%c0_6, %c0_7], %7 {strides = array<i32>} : memref<128x128xf32, #tpu.memory_space<vmem>>, vector<128x128xf32>,
    %c0_i32_8 = arith.constant 0 : i32
    %9 = arith.cmpi eq, %arg2, %c0_i32_8 : i32
    %10 = arith.extui %9 : i1 to i32
    %c0_i32_9 = arith.constant 0 : i32
    %11 = arith.cmpi ne, %10, %c0_i32_9 : i32
    scf.if %11 {
      %c0_10 = arith.constant 0 : index
      %c0_11 = arith.constant 0 : index
      %12 = vector.load %arg8[%c0_10, %c0_11] : memref<128x128xf32, #tpu.memory_space<vmem>>, vector<128x128xf32>
      %c0_12 = arith.constant 0 : index
      %c0_13 = arith.constant 0 : index
      %13 = vector.load %arg5[%c0_12, %c0_13] : memref<1x128xf32, #tpu.memory_space<vmem>>, vector<1x128xf32>
      %14 = vector.broadcast %13 : vector<1x128xf32> to vector<128x128xf32>
      %15 = arith.mulf %12, %14 : vector<128x128xf32>
      %c0_14 = arith.constant 0 : index
      %c0_15 = arith.constant 0 : index
      %16 = vector.load %arg6[%c0_14, %c0_15] : memref<1x128xf32, #tpu.memory_space<vmem>>, vector<1x128xf32>
      %17 = vector.broadcast %16 : vector<1x128xf32> to vector<128x128xf32>
      %18 = arith.addf %15, %17 : vector<128x128xf32>
      %cst_16 = arith.constant 0.000000e+00 : f32
      %19 = vector.broadcast %cst_16 : f32 to vector<128x128xf32>
      %20 = arith.maximumf %18, %19 : vector<128x128xf32>
      %21 = arith.truncf %20 : vector<128x128xf32> to vector<128x128xbf16>
      %c0_17 = arith.constant 0 : index
      %c0_18 = arith.constant 0 : index
      %22 = vector.load %arg7[%c0_17, %c0_18] : memref<128x128xbf16, #tpu.memory_space<vmem>>, vector<128x128xbf16>
      tpu.vector_store %arg7[%c0_17, %c0_18], %21 {strides = array<i32>} : memref<128x128xbf16, #tpu.memory_space<vmem>>, vector<128x128xbf16>,
    } else {
    }
    return
  }
  func.func @transform_0(%arg0: i32, %arg1: i32, %arg2: i32) -> (i32, i32) {
    %c0_i32 = arith.constant 0 : i32
    return %arg0, %arg2 : i32, i32
  }
  func.func @transform_1(%arg0: i32, %arg1: i32, %arg2: i32) -> (i32, i32) {
    %c0_i32 = arith.constant 0 : i32
    return %arg2, %arg1 : i32, i32
  }
  func.func @transform_2(%arg0: i32, %arg1: i32, %arg2: i32) -> (i32, i32) {
    %c0_i32 = arith.constant 0 : i32
    %c0_i32_0 = arith.constant 0 : i32
    return %c0_i32, %arg1 : i32, i32
  }
  func.func @transform_3(%arg0: i32, %arg1: i32, %arg2: i32) -> (i32, i32) {
    %c0_i32 = arith.constant 0 : i32
    %c0_i32_0 = arith.constant 0 : i32
    return %c0_i32, %arg1 : i32, i32
  }
  func.func @transform_4(%arg0: i32, %arg1: i32, %arg2: i32) -> (i32, i32) {
    %c0_i32 = arith.constant 0 : i32
    return %arg0, %arg1 : i32, i32
  }
}

module attributes {stable_mosaic.version = 11 : i64} {
  func.func @_matmul_affine_kernel(%arg0: i32, %arg1: i32, %arg2: i32, %arg3: memref<32x576xbf16, #tpu.memory_space<vmem>>, %arg4: memref<576x128xbf16, #tpu.memory_space<vmem>>, %arg5: memref<1x128xf32, #tpu.memory_space<vmem>>, %arg6: memref<1x128xf32, #tpu.memory_space<vmem>>, %arg7: memref<32x128xbf16, #tpu.memory_space<vmem>>, %arg8: memref<32x128xf32, #tpu.memory_space<vmem>>) attributes {dimension_semantics = [#tpu.dimension_semantics<parallel>, #tpu.dimension_semantics<parallel>, #tpu.dimension_semantics<arbitrary>], iteration_bounds = array<i64: 1, 1, 1>, scalar_prefetch = 0 : i64, scratch_operands = 1 : i64, tpu.core_type = #tpu.core_type<tc>, window_params = [{transform_indices = @transform_0, window_bounds = array<i64: 32, 576>}, {transform_indices = @transform_1, window_bounds = array<i64: 576, 128>}, {transform_indices = @transform_2, window_bounds = array<i64: 1, 128>}, {transform_indices = @transform_3, window_bounds = array<i64: 1, 128>}, {transform_indices = @transform_4, window_bounds = array<i64: 32, 128>}]} {
    %c0_i32 = arith.constant 0 : i32
    %0 = arith.cmpi eq, %arg2, %c0_i32 : i32
    %1 = arith.extui %0 : i1 to i32
    %c0_i32_0 = arith.constant 0 : i32
    %2 = arith.cmpi ne, %1, %c0_i32_0 : i32
    scf.if %2 {
      %cst_10 = arith.constant 0.000000e+00 : f32
      %12 = vector.broadcast %cst_10 : f32 to vector<32x128xf32>
      %c0_11 = arith.constant 0 : index
      %c0_12 = arith.constant 0 : index
      %13 = vector.load %arg8[%c0_11, %c0_12] : memref<32x128xf32, #tpu.memory_space<vmem>>, vector<32x128xf32>
      tpu.vector_store %arg8[%c0_11, %c0_12], %12 {strides = array<i32>} : memref<32x128xf32, #tpu.memory_space<vmem>>, vector<32x128xf32>,
    } else {
    }
    %c0 = arith.constant 0 : index
    %c0_1 = arith.constant 0 : index
    %3 = vector.load %arg8[%c0, %c0_1] : memref<32x128xf32, #tpu.memory_space<vmem>>, vector<32x128xf32>
    %c0_2 = arith.constant 0 : index
    %c0_3 = arith.constant 0 : index
    %4 = vector.load %arg3[%c0_2, %c0_3] : memref<32x576xbf16, #tpu.memory_space<vmem>>, vector<32x576xbf16>
    %c0_4 = arith.constant 0 : index
    %c0_5 = arith.constant 0 : index
    %5 = vector.load %arg4[%c0_4, %c0_5] : memref<576x128xbf16, #tpu.memory_space<vmem>>, vector<576x128xbf16>
    %cst = arith.constant dense<0.000000e+00> : vector<32x128xf32>
    %6 = tpu.matmul %4, %5, %cst {dimension_numbers = #tpu.dot_dimension_numbers<[1], [0], [0], [1], [0, 0, 1, 1], [], []>} : vector<32x576xbf16>, vector<576x128xbf16>, vector<32x128xf32> -> vector<32x128xf32>
    %7 = arith.addf %3, %6 : vector<32x128xf32>
    %c0_6 = arith.constant 0 : index
    %c0_7 = arith.constant 0 : index
    %8 = vector.load %arg8[%c0_6, %c0_7] : memref<32x128xf32, #tpu.memory_space<vmem>>, vector<32x128xf32>
    tpu.vector_store %arg8[%c0_6, %c0_7], %7 {strides = array<i32>} : memref<32x128xf32, #tpu.memory_space<vmem>>, vector<32x128xf32>,
    %c0_i32_8 = arith.constant 0 : i32
    %9 = arith.cmpi eq, %arg2, %c0_i32_8 : i32
    %10 = arith.extui %9 : i1 to i32
    %c0_i32_9 = arith.constant 0 : i32
    %11 = arith.cmpi ne, %10, %c0_i32_9 : i32
    scf.if %11 {
      %c0_10 = arith.constant 0 : index
      %c0_11 = arith.constant 0 : index
      %12 = vector.load %arg8[%c0_10, %c0_11] : memref<32x128xf32, #tpu.memory_space<vmem>>, vector<32x128xf32>
      %c0_12 = arith.constant 0 : index
      %c0_13 = arith.constant 0 : index
      %13 = vector.load %arg5[%c0_12, %c0_13] : memref<1x128xf32, #tpu.memory_space<vmem>>, vector<1x128xf32>
      %14 = vector.broadcast %13 : vector<1x128xf32> to vector<32x128xf32>
      %15 = arith.mulf %12, %14 : vector<32x128xf32>
      %c0_14 = arith.constant 0 : index
      %c0_15 = arith.constant 0 : index
      %16 = vector.load %arg6[%c0_14, %c0_15] : memref<1x128xf32, #tpu.memory_space<vmem>>, vector<1x128xf32>
      %17 = vector.broadcast %16 : vector<1x128xf32> to vector<32x128xf32>
      %18 = arith.addf %15, %17 : vector<32x128xf32>
      %cst_16 = arith.constant 0.000000e+00 : f32
      %19 = vector.broadcast %cst_16 : f32 to vector<32x128xf32>
      %20 = arith.maximumf %18, %19 : vector<32x128xf32>
      %21 = arith.truncf %20 : vector<32x128xf32> to vector<32x128xbf16>
      %c0_17 = arith.constant 0 : index
      %c0_18 = arith.constant 0 : index
      %22 = vector.load %arg7[%c0_17, %c0_18] : memref<32x128xbf16, #tpu.memory_space<vmem>>, vector<32x128xbf16>
      tpu.vector_store %arg7[%c0_17, %c0_18], %21 {strides = array<i32>} : memref<32x128xbf16, #tpu.memory_space<vmem>>, vector<32x128xbf16>,
    } else {
    }
    return
  }
  func.func @transform_0(%arg0: i32, %arg1: i32, %arg2: i32) -> (i32, i32) {
    %c0_i32 = arith.constant 0 : i32
    return %arg0, %arg2 : i32, i32
  }
  func.func @transform_1(%arg0: i32, %arg1: i32, %arg2: i32) -> (i32, i32) {
    %c0_i32 = arith.constant 0 : i32
    return %arg2, %arg1 : i32, i32
  }
  func.func @transform_2(%arg0: i32, %arg1: i32, %arg2: i32) -> (i32, i32) {
    %c0_i32 = arith.constant 0 : i32
    %c0_i32_0 = arith.constant 0 : i32
    return %c0_i32, %arg1 : i32, i32
  }
  func.func @transform_3(%arg0: i32, %arg1: i32, %arg2: i32) -> (i32, i32) {
    %c0_i32 = arith.constant 0 : i32
    %c0_i32_0 = arith.constant 0 : i32
    return %c0_i32, %arg1 : i32, i32
  }
  func.func @transform_4(%arg0: i32, %arg1: i32, %arg2: i32) -> (i32, i32) {
    %c0_i32 = arith.constant 0 : i32
    return %arg0, %arg1 : i32, i32
  }
}

module attributes {stable_mosaic.version = 11 : i64} {
  func.func @_maxpool_kernel(%arg0: i32, %arg1: i32, %arg2: memref<1x2x2x2x2x128xbf16, #tpu.memory_space<vmem>>, %arg3: memref<1x2x2x128xbf16, #tpu.memory_space<vmem>>) attributes {dimension_semantics = [#tpu.dimension_semantics<parallel>, #tpu.dimension_semantics<parallel>], iteration_bounds = array<i64: 2, 1>, scalar_prefetch = 0 : i64, scratch_operands = 0 : i64, tpu.core_type = #tpu.core_type<tc>, window_params = [{transform_indices = @transform_0, window_bounds = array<i64: 1, 2, 2, 2, 2, 128>}, {transform_indices = @transform_1, window_bounds = array<i64: 1, 2, 2, 128>}]} {
    %c0 = arith.constant 0 : index
    %c0_0 = arith.constant 0 : index
    %c0_1 = arith.constant 0 : index
    %c0_2 = arith.constant 0 : index
    %c0_3 = arith.constant 0 : index
    %c0_4 = arith.constant 0 : index
    %0 = vector.load %arg2[%c0, %c0_0, %c0_1, %c0_2, %c0_3, %c0_4] : memref<1x2x2x2x2x128xbf16, #tpu.memory_space<vmem>>, vector<1x2x2x2x2x128xbf16>
    %1 = vector.extract_strided_slice %0 {offsets = [0, 0, 0, 0, 0, 0], sizes = [1, 2, 1, 2, 2, 128], strides = [1, 1, 1, 1, 1, 1]} : vector<1x2x2x2x2x128xbf16> to vector<1x2x1x2x2x128xbf16>
    %2 = vector.shape_cast %1 : vector<1x2x1x2x2x128xbf16> to vector<1x2x2x2x128xbf16>
    %3 = vector.extract_strided_slice %0 {offsets = [0, 0, 1, 0, 0, 0], sizes = [1, 2, 1, 2, 2, 128], strides = [1, 1, 1, 1, 1, 1]} : vector<1x2x2x2x2x128xbf16> to vector<1x2x1x2x2x128xbf16>
    %4 = vector.shape_cast %3 : vector<1x2x1x2x2x128xbf16> to vector<1x2x2x2x128xbf16>
    %5 = arith.maximumf %2, %4 : vector<1x2x2x2x128xbf16>
    %6 = vector.extract_strided_slice %5 {offsets = [0, 0, 0, 0, 0], sizes = [1, 2, 2, 1, 128], strides = [1, 1, 1, 1, 1]} : vector<1x2x2x2x128xbf16> to vector<1x2x2x1x128xbf16>
    %7 = vector.shape_cast %6 : vector<1x2x2x1x128xbf16> to vector<1x2x2x128xbf16>
    %8 = vector.extract_strided_slice %5 {offsets = [0, 0, 0, 1, 0], sizes = [1, 2, 2, 1, 128], strides = [1, 1, 1, 1, 1]} : vector<1x2x2x2x128xbf16> to vector<1x2x2x1x128xbf16>
    %9 = vector.shape_cast %8 : vector<1x2x2x1x128xbf16> to vector<1x2x2x128xbf16>
    %10 = arith.maximumf %7, %9 : vector<1x2x2x128xbf16>
    %c0_5 = arith.constant 0 : index
    %c0_6 = arith.constant 0 : index
    %c0_7 = arith.constant 0 : index
    %c0_8 = arith.constant 0 : index
    %11 = vector.load %arg3[%c0_5, %c0_6, %c0_7, %c0_8] : memref<1x2x2x128xbf16, #tpu.memory_space<vmem>>, vector<1x2x2x128xbf16>
    tpu.vector_store %arg3[%c0_5, %c0_6, %c0_7, %c0_8], %10 {strides = array<i32>} : memref<1x2x2x128xbf16, #tpu.memory_space<vmem>>, vector<1x2x2x128xbf16>,
    return
  }
  func.func @transform_0(%arg0: i32, %arg1: i32) -> (i32, i32, i32, i32, i32, i32) {
    %c0_i32 = arith.constant 0 : i32
    %c0_i32_0 = arith.constant 0 : i32
    %c0_i32_1 = arith.constant 0 : i32
    %c0_i32_2 = arith.constant 0 : i32
    %c0_i32_3 = arith.constant 0 : i32
    return %arg0, %arg1, %c0_i32, %c0_i32_0, %c0_i32_1, %c0_i32_2 : i32, i32, i32, i32, i32, i32
  }
  func.func @transform_1(%arg0: i32, %arg1: i32) -> (i32, i32, i32, i32) {
    %c0_i32 = arith.constant 0 : i32
    %c0_i32_0 = arith.constant 0 : i32
    %c0_i32_1 = arith.constant 0 : i32
    return %arg0, %arg1, %c0_i32, %c0_i32_0 : i32, i32, i32, i32
  }
}

module attributes {stable_mosaic.version = 11 : i64} {
  func.func @_maxpool_kernel(%arg0: i32, %arg1: i32, %arg2: memref<1x1x2x1x2x256xbf16, #tpu.memory_space<vmem>>, %arg3: memref<1x1x1x256xbf16, #tpu.memory_space<vmem>>) attributes {dimension_semantics = [#tpu.dimension_semantics<parallel>, #tpu.dimension_semantics<parallel>], iteration_bounds = array<i64: 2, 1>, scalar_prefetch = 0 : i64, scratch_operands = 0 : i64, tpu.core_type = #tpu.core_type<tc>, window_params = [{transform_indices = @transform_0, window_bounds = array<i64: 1, 1, 2, 1, 2, 256>}, {transform_indices = @transform_1, window_bounds = array<i64: 1, 1, 1, 256>}]} {
    %c0 = arith.constant 0 : index
    %c0_0 = arith.constant 0 : index
    %c0_1 = arith.constant 0 : index
    %c0_2 = arith.constant 0 : index
    %c0_3 = arith.constant 0 : index
    %c0_4 = arith.constant 0 : index
    %0 = vector.load %arg2[%c0, %c0_0, %c0_1, %c0_2, %c0_3, %c0_4] : memref<1x1x2x1x2x256xbf16, #tpu.memory_space<vmem>>, vector<1x1x2x1x2x256xbf16>
    %1 = vector.extract_strided_slice %0 {offsets = [0, 0, 0, 0, 0, 0], sizes = [1, 1, 1, 1, 2, 256], strides = [1, 1, 1, 1, 1, 1]} : vector<1x1x2x1x2x256xbf16> to vector<1x1x1x1x2x256xbf16>
    %2 = vector.shape_cast %1 : vector<1x1x1x1x2x256xbf16> to vector<1x1x1x2x256xbf16>
    %3 = vector.extract_strided_slice %0 {offsets = [0, 0, 1, 0, 0, 0], sizes = [1, 1, 1, 1, 2, 256], strides = [1, 1, 1, 1, 1, 1]} : vector<1x1x2x1x2x256xbf16> to vector<1x1x1x1x2x256xbf16>
    %4 = vector.shape_cast %3 : vector<1x1x1x1x2x256xbf16> to vector<1x1x1x2x256xbf16>
    %5 = arith.maximumf %2, %4 : vector<1x1x1x2x256xbf16>
    %6 = vector.extract_strided_slice %5 {offsets = [0, 0, 0, 0, 0], sizes = [1, 1, 1, 1, 256], strides = [1, 1, 1, 1, 1]} : vector<1x1x1x2x256xbf16> to vector<1x1x1x1x256xbf16>
    %7 = vector.shape_cast %6 : vector<1x1x1x1x256xbf16> to vector<1x1x1x256xbf16>
    %8 = vector.extract_strided_slice %5 {offsets = [0, 0, 0, 1, 0], sizes = [1, 1, 1, 1, 256], strides = [1, 1, 1, 1, 1]} : vector<1x1x1x2x256xbf16> to vector<1x1x1x1x256xbf16>
    %9 = vector.shape_cast %8 : vector<1x1x1x1x256xbf16> to vector<1x1x1x256xbf16>
    %10 = arith.maximumf %7, %9 : vector<1x1x1x256xbf16>
    %c0_5 = arith.constant 0 : index
    %c0_6 = arith.constant 0 : index
    %c0_7 = arith.constant 0 : index
    %c0_8 = arith.constant 0 : index
    %11 = vector.load %arg3[%c0_5, %c0_6, %c0_7, %c0_8] : memref<1x1x1x256xbf16, #tpu.memory_space<vmem>>, vector<1x1x1x256xbf16>
    tpu.vector_store %arg3[%c0_5, %c0_6, %c0_7, %c0_8], %10 {strides = array<i32>} : memref<1x1x1x256xbf16, #tpu.memory_space<vmem>>, vector<1x1x1x256xbf16>,
    return
  }
  func.func @transform_0(%arg0: i32, %arg1: i32) -> (i32, i32, i32, i32, i32, i32) {
    %c0_i32 = arith.constant 0 : i32
    %c0_i32_0 = arith.constant 0 : i32
    %c0_i32_1 = arith.constant 0 : i32
    %c0_i32_2 = arith.constant 0 : i32
    %c0_i32_3 = arith.constant 0 : i32
    return %arg0, %arg1, %c0_i32, %c0_i32_0, %c0_i32_1, %c0_i32_2 : i32, i32, i32, i32, i32, i32
  }
  func.func @transform_1(%arg0: i32, %arg1: i32) -> (i32, i32, i32, i32) {
    %c0_i32 = arith.constant 0 : i32
    %c0_i32_0 = arith.constant 0 : i32
    %c0_i32_1 = arith.constant 0 : i32
    return %arg0, %arg1, %c0_i32, %c0_i32_0 : i32, i32, i32, i32
  }
}

module attributes {stable_mosaic.version = 11 : i64} {
  func.func @_matmul_affine_kernel(%arg0: i32, %arg1: i32, %arg2: i32, %arg3: memref<8x384xbf16, #tpu.memory_space<vmem>>, %arg4: memref<384x256xbf16, #tpu.memory_space<vmem>>, %arg5: memref<1x256xf32, #tpu.memory_space<vmem>>, %arg6: memref<1x256xf32, #tpu.memory_space<vmem>>, %arg7: memref<8x256xbf16, #tpu.memory_space<vmem>>, %arg8: memref<8x256xf32, #tpu.memory_space<vmem>>) attributes {dimension_semantics = [#tpu.dimension_semantics<parallel>, #tpu.dimension_semantics<parallel>, #tpu.dimension_semantics<arbitrary>], iteration_bounds = array<i64: 1, 1, 3>, scalar_prefetch = 0 : i64, scratch_operands = 1 : i64, tpu.core_type = #tpu.core_type<tc>, window_params = [{transform_indices = @transform_0, window_bounds = array<i64: 8, 384>}, {transform_indices = @transform_1, window_bounds = array<i64: 384, 256>}, {transform_indices = @transform_2, window_bounds = array<i64: 1, 256>}, {transform_indices = @transform_3, window_bounds = array<i64: 1, 256>}, {transform_indices = @transform_4, window_bounds = array<i64: 8, 256>}]} {
    %c0_i32 = arith.constant 0 : i32
    %0 = arith.cmpi eq, %arg2, %c0_i32 : i32
    %1 = arith.extui %0 : i1 to i32
    %c0_i32_0 = arith.constant 0 : i32
    %2 = arith.cmpi ne, %1, %c0_i32_0 : i32
    scf.if %2 {
      %cst_9 = arith.constant 0.000000e+00 : f32
      %12 = vector.broadcast %cst_9 : f32 to vector<8x256xf32>
      %c0_10 = arith.constant 0 : index
      %c0_11 = arith.constant 0 : index
      %13 = vector.load %arg8[%c0_10, %c0_11] : memref<8x256xf32, #tpu.memory_space<vmem>>, vector<8x256xf32>
      tpu.vector_store %arg8[%c0_10, %c0_11], %12 {strides = array<i32>} : memref<8x256xf32, #tpu.memory_space<vmem>>, vector<8x256xf32>,
    } else {
    }
    %c0 = arith.constant 0 : index
    %c0_1 = arith.constant 0 : index
    %3 = vector.load %arg8[%c0, %c0_1] : memref<8x256xf32, #tpu.memory_space<vmem>>, vector<8x256xf32>
    %c0_2 = arith.constant 0 : index
    %c0_3 = arith.constant 0 : index
    %4 = vector.load %arg3[%c0_2, %c0_3] : memref<8x384xbf16, #tpu.memory_space<vmem>>, vector<8x384xbf16>
    %c0_4 = arith.constant 0 : index
    %c0_5 = arith.constant 0 : index
    %5 = vector.load %arg4[%c0_4, %c0_5] : memref<384x256xbf16, #tpu.memory_space<vmem>>, vector<384x256xbf16>
    %cst = arith.constant dense<0.000000e+00> : vector<8x256xf32>
    %6 = tpu.matmul %4, %5, %cst {dimension_numbers = #tpu.dot_dimension_numbers<[1], [0], [0], [1], [0, 0, 1, 1], [], []>} : vector<8x384xbf16>, vector<384x256xbf16>, vector<8x256xf32> -> vector<8x256xf32>
    %7 = arith.addf %3, %6 : vector<8x256xf32>
    %c0_6 = arith.constant 0 : index
    %c0_7 = arith.constant 0 : index
    %8 = vector.load %arg8[%c0_6, %c0_7] : memref<8x256xf32, #tpu.memory_space<vmem>>, vector<8x256xf32>
    tpu.vector_store %arg8[%c0_6, %c0_7], %7 {strides = array<i32>} : memref<8x256xf32, #tpu.memory_space<vmem>>, vector<8x256xf32>,
    %c2_i32 = arith.constant 2 : i32
    %9 = arith.cmpi eq, %arg2, %c2_i32 : i32
    %10 = arith.extui %9 : i1 to i32
    %c0_i32_8 = arith.constant 0 : i32
    %11 = arith.cmpi ne, %10, %c0_i32_8 : i32
    scf.if %11 {
      %c0_9 = arith.constant 0 : index
      %c0_10 = arith.constant 0 : index
      %12 = vector.load %arg8[%c0_9, %c0_10] : memref<8x256xf32, #tpu.memory_space<vmem>>, vector<8x256xf32>
      %c0_11 = arith.constant 0 : index
      %c0_12 = arith.constant 0 : index
      %13 = vector.load %arg5[%c0_11, %c0_12] : memref<1x256xf32, #tpu.memory_space<vmem>>, vector<1x256xf32>
      %14 = vector.broadcast %13 : vector<1x256xf32> to vector<8x256xf32>
      %15 = arith.mulf %12, %14 : vector<8x256xf32>
      %c0_13 = arith.constant 0 : index
      %c0_14 = arith.constant 0 : index
      %16 = vector.load %arg6[%c0_13, %c0_14] : memref<1x256xf32, #tpu.memory_space<vmem>>, vector<1x256xf32>
      %17 = vector.broadcast %16 : vector<1x256xf32> to vector<8x256xf32>
      %18 = arith.addf %15, %17 : vector<8x256xf32>
      %cst_15 = arith.constant 0.000000e+00 : f32
      %19 = vector.broadcast %cst_15 : f32 to vector<8x256xf32>
      %20 = arith.maximumf %18, %19 : vector<8x256xf32>
      %21 = arith.truncf %20 : vector<8x256xf32> to vector<8x256xbf16>
      %c0_16 = arith.constant 0 : index
      %c0_17 = arith.constant 0 : index
      %22 = vector.load %arg7[%c0_16, %c0_17] : memref<8x256xbf16, #tpu.memory_space<vmem>>, vector<8x256xbf16>
      tpu.vector_store %arg7[%c0_16, %c0_17], %21 {strides = array<i32>} : memref<8x256xbf16, #tpu.memory_space<vmem>>, vector<8x256xbf16>,
    } else {
    }
    return
  }
  func.func @transform_0(%arg0: i32, %arg1: i32, %arg2: i32) -> (i32, i32) {
    %c0_i32 = arith.constant 0 : i32
    return %arg0, %arg2 : i32, i32
  }
  func.func @transform_1(%arg0: i32, %arg1: i32, %arg2: i32) -> (i32, i32) {
    %c0_i32 = arith.constant 0 : i32
    return %arg2, %arg1 : i32, i32
  }
  func.func @transform_2(%arg0: i32, %arg1: i32, %arg2: i32) -> (i32, i32) {
    %c0_i32 = arith.constant 0 : i32
    %c0_i32_0 = arith.constant 0 : i32
    return %c0_i32, %arg1 : i32, i32
  }
  func.func @transform_3(%arg0: i32, %arg1: i32, %arg2: i32) -> (i32, i32) {
    %c0_i32 = arith.constant 0 : i32
    %c0_i32_0 = arith.constant 0 : i32
    return %c0_i32, %arg1 : i32, i32
  }
  func.func @transform_4(%arg0: i32, %arg1: i32, %arg2: i32) -> (i32, i32) {
    %c0_i32 = arith.constant 0 : i32
    return %arg0, %arg1 : i32, i32
  }
}

module attributes {stable_mosaic.version = 11 : i64} {
  func.func @_matmul_affine_kernel(%arg0: i32, %arg1: i32, %arg2: i32, %arg3: memref<8x512xbf16, #tpu.memory_space<vmem>>, %arg4: memref<512x256xbf16, #tpu.memory_space<vmem>>, %arg5: memref<1x256xf32, #tpu.memory_space<vmem>>, %arg6: memref<1x256xf32, #tpu.memory_space<vmem>>, %arg7: memref<8x256xbf16, #tpu.memory_space<vmem>>, %arg8: memref<8x256xf32, #tpu.memory_space<vmem>>) attributes {dimension_semantics = [#tpu.dimension_semantics<parallel>, #tpu.dimension_semantics<parallel>, #tpu.dimension_semantics<arbitrary>], iteration_bounds = array<i64: 1, 4, 1>, scalar_prefetch = 0 : i64, scratch_operands = 1 : i64, tpu.core_type = #tpu.core_type<tc>, window_params = [{transform_indices = @transform_0, window_bounds = array<i64: 8, 512>}, {transform_indices = @transform_1, window_bounds = array<i64: 512, 256>}, {transform_indices = @transform_2, window_bounds = array<i64: 1, 256>}, {transform_indices = @transform_3, window_bounds = array<i64: 1, 256>}, {transform_indices = @transform_4, window_bounds = array<i64: 8, 256>}]} {
    %c0_i32 = arith.constant 0 : i32
    %0 = arith.cmpi eq, %arg2, %c0_i32 : i32
    %1 = arith.extui %0 : i1 to i32
    %c0_i32_0 = arith.constant 0 : i32
    %2 = arith.cmpi ne, %1, %c0_i32_0 : i32
    scf.if %2 {
      %cst_10 = arith.constant 0.000000e+00 : f32
      %12 = vector.broadcast %cst_10 : f32 to vector<8x256xf32>
      %c0_11 = arith.constant 0 : index
      %c0_12 = arith.constant 0 : index
      %13 = vector.load %arg8[%c0_11, %c0_12] : memref<8x256xf32, #tpu.memory_space<vmem>>, vector<8x256xf32>
      tpu.vector_store %arg8[%c0_11, %c0_12], %12 {strides = array<i32>} : memref<8x256xf32, #tpu.memory_space<vmem>>, vector<8x256xf32>,
    } else {
    }
    %c0 = arith.constant 0 : index
    %c0_1 = arith.constant 0 : index
    %3 = vector.load %arg8[%c0, %c0_1] : memref<8x256xf32, #tpu.memory_space<vmem>>, vector<8x256xf32>
    %c0_2 = arith.constant 0 : index
    %c0_3 = arith.constant 0 : index
    %4 = vector.load %arg3[%c0_2, %c0_3] : memref<8x512xbf16, #tpu.memory_space<vmem>>, vector<8x512xbf16>
    %c0_4 = arith.constant 0 : index
    %c0_5 = arith.constant 0 : index
    %5 = vector.load %arg4[%c0_4, %c0_5] : memref<512x256xbf16, #tpu.memory_space<vmem>>, vector<512x256xbf16>
    %cst = arith.constant dense<0.000000e+00> : vector<8x256xf32>
    %6 = tpu.matmul %4, %5, %cst {dimension_numbers = #tpu.dot_dimension_numbers<[1], [0], [0], [1], [0, 0, 1, 1], [], []>} : vector<8x512xbf16>, vector<512x256xbf16>, vector<8x256xf32> -> vector<8x256xf32>
    %7 = arith.addf %3, %6 : vector<8x256xf32>
    %c0_6 = arith.constant 0 : index
    %c0_7 = arith.constant 0 : index
    %8 = vector.load %arg8[%c0_6, %c0_7] : memref<8x256xf32, #tpu.memory_space<vmem>>, vector<8x256xf32>
    tpu.vector_store %arg8[%c0_6, %c0_7], %7 {strides = array<i32>} : memref<8x256xf32, #tpu.memory_space<vmem>>, vector<8x256xf32>,
    %c0_i32_8 = arith.constant 0 : i32
    %9 = arith.cmpi eq, %arg2, %c0_i32_8 : i32
    %10 = arith.extui %9 : i1 to i32
    %c0_i32_9 = arith.constant 0 : i32
    %11 = arith.cmpi ne, %10, %c0_i32_9 : i32
    scf.if %11 {
      %c0_10 = arith.constant 0 : index
      %c0_11 = arith.constant 0 : index
      %12 = vector.load %arg8[%c0_10, %c0_11] : memref<8x256xf32, #tpu.memory_space<vmem>>, vector<8x256xf32>
      %c0_12 = arith.constant 0 : index
      %c0_13 = arith.constant 0 : index
      %13 = vector.load %arg5[%c0_12, %c0_13] : memref<1x256xf32, #tpu.memory_space<vmem>>, vector<1x256xf32>
      %14 = vector.broadcast %13 : vector<1x256xf32> to vector<8x256xf32>
      %15 = arith.mulf %12, %14 : vector<8x256xf32>
      %c0_14 = arith.constant 0 : index
      %c0_15 = arith.constant 0 : index
      %16 = vector.load %arg6[%c0_14, %c0_15] : memref<1x256xf32, #tpu.memory_space<vmem>>, vector<1x256xf32>
      %17 = vector.broadcast %16 : vector<1x256xf32> to vector<8x256xf32>
      %18 = arith.addf %15, %17 : vector<8x256xf32>
      %19 = arith.truncf %18 : vector<8x256xf32> to vector<8x256xbf16>
      %c0_16 = arith.constant 0 : index
      %c0_17 = arith.constant 0 : index
      %20 = vector.load %arg7[%c0_16, %c0_17] : memref<8x256xbf16, #tpu.memory_space<vmem>>, vector<8x256xbf16>
      tpu.vector_store %arg7[%c0_16, %c0_17], %19 {strides = array<i32>} : memref<8x256xbf16, #tpu.memory_space<vmem>>, vector<8x256xbf16>,
    } else {
    }
    return
  }
  func.func @transform_0(%arg0: i32, %arg1: i32, %arg2: i32) -> (i32, i32) {
    %c0_i32 = arith.constant 0 : i32
    return %arg0, %arg2 : i32, i32
  }
  func.func @transform_1(%arg0: i32, %arg1: i32, %arg2: i32) -> (i32, i32) {
    %c0_i32 = arith.constant 0 : i32
    return %arg2, %arg1 : i32, i32
  }
  func.func @transform_2(%arg0: i32, %arg1: i32, %arg2: i32) -> (i32, i32) {
    %c0_i32 = arith.constant 0 : i32
    %c0_i32_0 = arith.constant 0 : i32
    return %c0_i32, %arg1 : i32, i32
  }
  func.func @transform_3(%arg0: i32, %arg1: i32, %arg2: i32) -> (i32, i32) {
    %c0_i32 = arith.constant 0 : i32
    %c0_i32_0 = arith.constant 0 : i32
    return %c0_i32, %arg1 : i32, i32
  }
  func.func @transform_4(%arg0: i32, %arg1: i32, %arg2: i32) -> (i32, i32) {
    %c0_i32 = arith.constant 0 : i32
    return %arg0, %arg1 : i32, i32
  }
}

module attributes {stable_mosaic.version = 11 : i64} {
  func.func @_matmul_affine_kernel(%arg0: i32, %arg1: i32, %arg2: i32, %arg3: memref<8x384xbf16, #tpu.memory_space<vmem>>, %arg4: memref<384x256xbf16, #tpu.memory_space<vmem>>, %arg5: memref<1x256xf32, #tpu.memory_space<vmem>>, %arg6: memref<1x256xf32, #tpu.memory_space<vmem>>, %arg7: memref<8x256xbf16, #tpu.memory_space<vmem>>, %arg8: memref<8x256xf32, #tpu.memory_space<vmem>>) attributes {dimension_semantics = [#tpu.dimension_semantics<parallel>, #tpu.dimension_semantics<parallel>, #tpu.dimension_semantics<arbitrary>], iteration_bounds = array<i64: 1, 2, 6>, scalar_prefetch = 0 : i64, scratch_operands = 1 : i64, tpu.core_type = #tpu.core_type<tc>, window_params = [{transform_indices = @transform_0, window_bounds = array<i64: 8, 384>}, {transform_indices = @transform_1, window_bounds = array<i64: 384, 256>}, {transform_indices = @transform_2, window_bounds = array<i64: 1, 256>}, {transform_indices = @transform_3, window_bounds = array<i64: 1, 256>}, {transform_indices = @transform_4, window_bounds = array<i64: 8, 256>}]} {
    %c0_i32 = arith.constant 0 : i32
    %0 = arith.cmpi eq, %arg2, %c0_i32 : i32
    %1 = arith.extui %0 : i1 to i32
    %c0_i32_0 = arith.constant 0 : i32
    %2 = arith.cmpi ne, %1, %c0_i32_0 : i32
    scf.if %2 {
      %cst_9 = arith.constant 0.000000e+00 : f32
      %12 = vector.broadcast %cst_9 : f32 to vector<8x256xf32>
      %c0_10 = arith.constant 0 : index
      %c0_11 = arith.constant 0 : index
      %13 = vector.load %arg8[%c0_10, %c0_11] : memref<8x256xf32, #tpu.memory_space<vmem>>, vector<8x256xf32>
      tpu.vector_store %arg8[%c0_10, %c0_11], %12 {strides = array<i32>} : memref<8x256xf32, #tpu.memory_space<vmem>>, vector<8x256xf32>,
    } else {
    }
    %c0 = arith.constant 0 : index
    %c0_1 = arith.constant 0 : index
    %3 = vector.load %arg8[%c0, %c0_1] : memref<8x256xf32, #tpu.memory_space<vmem>>, vector<8x256xf32>
    %c0_2 = arith.constant 0 : index
    %c0_3 = arith.constant 0 : index
    %4 = vector.load %arg3[%c0_2, %c0_3] : memref<8x384xbf16, #tpu.memory_space<vmem>>, vector<8x384xbf16>
    %c0_4 = arith.constant 0 : index
    %c0_5 = arith.constant 0 : index
    %5 = vector.load %arg4[%c0_4, %c0_5] : memref<384x256xbf16, #tpu.memory_space<vmem>>, vector<384x256xbf16>
    %cst = arith.constant dense<0.000000e+00> : vector<8x256xf32>
    %6 = tpu.matmul %4, %5, %cst {dimension_numbers = #tpu.dot_dimension_numbers<[1], [0], [0], [1], [0, 0, 1, 1], [], []>} : vector<8x384xbf16>, vector<384x256xbf16>, vector<8x256xf32> -> vector<8x256xf32>
    %7 = arith.addf %3, %6 : vector<8x256xf32>
    %c0_6 = arith.constant 0 : index
    %c0_7 = arith.constant 0 : index
    %8 = vector.load %arg8[%c0_6, %c0_7] : memref<8x256xf32, #tpu.memory_space<vmem>>, vector<8x256xf32>
    tpu.vector_store %arg8[%c0_6, %c0_7], %7 {strides = array<i32>} : memref<8x256xf32, #tpu.memory_space<vmem>>, vector<8x256xf32>,
    %c5_i32 = arith.constant 5 : i32
    %9 = arith.cmpi eq, %arg2, %c5_i32 : i32
    %10 = arith.extui %9 : i1 to i32
    %c0_i32_8 = arith.constant 0 : i32
    %11 = arith.cmpi ne, %10, %c0_i32_8 : i32
    scf.if %11 {
      %c0_9 = arith.constant 0 : index
      %c0_10 = arith.constant 0 : index
      %12 = vector.load %arg8[%c0_9, %c0_10] : memref<8x256xf32, #tpu.memory_space<vmem>>, vector<8x256xf32>
      %c0_11 = arith.constant 0 : index
      %c0_12 = arith.constant 0 : index
      %13 = vector.load %arg5[%c0_11, %c0_12] : memref<1x256xf32, #tpu.memory_space<vmem>>, vector<1x256xf32>
      %14 = vector.broadcast %13 : vector<1x256xf32> to vector<8x256xf32>
      %15 = arith.mulf %12, %14 : vector<8x256xf32>
      %c0_13 = arith.constant 0 : index
      %c0_14 = arith.constant 0 : index
      %16 = vector.load %arg6[%c0_13, %c0_14] : memref<1x256xf32, #tpu.memory_space<vmem>>, vector<1x256xf32>
      %17 = vector.broadcast %16 : vector<1x256xf32> to vector<8x256xf32>
      %18 = arith.addf %15, %17 : vector<8x256xf32>
      %cst_15 = arith.constant 0.000000e+00 : f32
      %19 = vector.broadcast %cst_15 : f32 to vector<8x256xf32>
      %20 = arith.maximumf %18, %19 : vector<8x256xf32>
      %21 = arith.truncf %20 : vector<8x256xf32> to vector<8x256xbf16>
      %c0_16 = arith.constant 0 : index
      %c0_17 = arith.constant 0 : index
      %22 = vector.load %arg7[%c0_16, %c0_17] : memref<8x256xbf16, #tpu.memory_space<vmem>>, vector<8x256xbf16>
      tpu.vector_store %arg7[%c0_16, %c0_17], %21 {strides = array<i32>} : memref<8x256xbf16, #tpu.memory_space<vmem>>, vector<8x256xbf16>,
    } else {
    }
    return
  }
  func.func @transform_0(%arg0: i32, %arg1: i32, %arg2: i32) -> (i32, i32) {
    %c0_i32 = arith.constant 0 : i32
    return %arg0, %arg2 : i32, i32
  }
  func.func @transform_1(%arg0: i32, %arg1: i32, %arg2: i32) -> (i32, i32) {
    %c0_i32 = arith.constant 0 : i32
    return %arg2, %arg1 : i32, i32
  }
  func.func @transform_2(%arg0: i32, %arg1: i32, %arg2: i32) -> (i32, i32) {
    %c0_i32 = arith.constant 0 : i32
    %c0_i32_0 = arith.constant 0 : i32
    return %c0_i32, %arg1 : i32, i32
  }
  func.func @transform_3(%arg0: i32, %arg1: i32, %arg2: i32) -> (i32, i32) {
    %c0_i32 = arith.constant 0 : i32
    %c0_i32_0 = arith.constant 0 : i32
    return %c0_i32, %arg1 : i32, i32
  }
  func.func @transform_4(%arg0: i32, %arg1: i32, %arg2: i32) -> (i32, i32) {
    %c0_i32 = arith.constant 0 : i32
    return %arg0, %arg1 : i32, i32
  }
}

module attributes {stable_mosaic.version = 11 : i64} {
  func.func @_matmul_affine_kernel(%arg0: i32, %arg1: i32, %arg2: i32, %arg3: memref<8x512xbf16, #tpu.memory_space<vmem>>, %arg4: memref<512x256xbf16, #tpu.memory_space<vmem>>, %arg5: memref<1x256xf32, #tpu.memory_space<vmem>>, %arg6: memref<1x256xf32, #tpu.memory_space<vmem>>, %arg7: memref<8x256xbf16, #tpu.memory_space<vmem>>, %arg8: memref<8x256xf32, #tpu.memory_space<vmem>>) attributes {dimension_semantics = [#tpu.dimension_semantics<parallel>, #tpu.dimension_semantics<parallel>, #tpu.dimension_semantics<arbitrary>], iteration_bounds = array<i64: 1, 1, 9>, scalar_prefetch = 0 : i64, scratch_operands = 1 : i64, tpu.core_type = #tpu.core_type<tc>, window_params = [{transform_indices = @transform_0, window_bounds = array<i64: 8, 512>}, {transform_indices = @transform_1, window_bounds = array<i64: 512, 256>}, {transform_indices = @transform_2, window_bounds = array<i64: 1, 256>}, {transform_indices = @transform_3, window_bounds = array<i64: 1, 256>}, {transform_indices = @transform_4, window_bounds = array<i64: 8, 256>}]} {
    %c0_i32 = arith.constant 0 : i32
    %0 = arith.cmpi eq, %arg2, %c0_i32 : i32
    %1 = arith.extui %0 : i1 to i32
    %c0_i32_0 = arith.constant 0 : i32
    %2 = arith.cmpi ne, %1, %c0_i32_0 : i32
    scf.if %2 {
      %cst_9 = arith.constant 0.000000e+00 : f32
      %12 = vector.broadcast %cst_9 : f32 to vector<8x256xf32>
      %c0_10 = arith.constant 0 : index
      %c0_11 = arith.constant 0 : index
      %13 = vector.load %arg8[%c0_10, %c0_11] : memref<8x256xf32, #tpu.memory_space<vmem>>, vector<8x256xf32>
      tpu.vector_store %arg8[%c0_10, %c0_11], %12 {strides = array<i32>} : memref<8x256xf32, #tpu.memory_space<vmem>>, vector<8x256xf32>,
    } else {
    }
    %c0 = arith.constant 0 : index
    %c0_1 = arith.constant 0 : index
    %3 = vector.load %arg8[%c0, %c0_1] : memref<8x256xf32, #tpu.memory_space<vmem>>, vector<8x256xf32>
    %c0_2 = arith.constant 0 : index
    %c0_3 = arith.constant 0 : index
    %4 = vector.load %arg3[%c0_2, %c0_3] : memref<8x512xbf16, #tpu.memory_space<vmem>>, vector<8x512xbf16>
    %c0_4 = arith.constant 0 : index
    %c0_5 = arith.constant 0 : index
    %5 = vector.load %arg4[%c0_4, %c0_5] : memref<512x256xbf16, #tpu.memory_space<vmem>>, vector<512x256xbf16>
    %cst = arith.constant dense<0.000000e+00> : vector<8x256xf32>
    %6 = tpu.matmul %4, %5, %cst {dimension_numbers = #tpu.dot_dimension_numbers<[1], [0], [0], [1], [0, 0, 1, 1], [], []>} : vector<8x512xbf16>, vector<512x256xbf16>, vector<8x256xf32> -> vector<8x256xf32>
    %7 = arith.addf %3, %6 : vector<8x256xf32>
    %c0_6 = arith.constant 0 : index
    %c0_7 = arith.constant 0 : index
    %8 = vector.load %arg8[%c0_6, %c0_7] : memref<8x256xf32, #tpu.memory_space<vmem>>, vector<8x256xf32>
    tpu.vector_store %arg8[%c0_6, %c0_7], %7 {strides = array<i32>} : memref<8x256xf32, #tpu.memory_space<vmem>>, vector<8x256xf32>,
    %c8_i32 = arith.constant 8 : i32
    %9 = arith.cmpi eq, %arg2, %c8_i32 : i32
    %10 = arith.extui %9 : i1 to i32
    %c0_i32_8 = arith.constant 0 : i32
    %11 = arith.cmpi ne, %10, %c0_i32_8 : i32
    scf.if %11 {
      %c0_9 = arith.constant 0 : index
      %c0_10 = arith.constant 0 : index
      %12 = vector.load %arg8[%c0_9, %c0_10] : memref<8x256xf32, #tpu.memory_space<vmem>>, vector<8x256xf32>
      %c0_11 = arith.constant 0 : index
      %c0_12 = arith.constant 0 : index
      %13 = vector.load %arg5[%c0_11, %c0_12] : memref<1x256xf32, #tpu.memory_space<vmem>>, vector<1x256xf32>
      %14 = vector.broadcast %13 : vector<1x256xf32> to vector<8x256xf32>
      %15 = arith.mulf %12, %14 : vector<8x256xf32>
      %c0_13 = arith.constant 0 : index
      %c0_14 = arith.constant 0 : index
      %16 = vector.load %arg6[%c0_13, %c0_14] : memref<1x256xf32, #tpu.memory_space<vmem>>, vector<1x256xf32>
      %17 = vector.broadcast %16 : vector<1x256xf32> to vector<8x256xf32>
      %18 = arith.addf %15, %17 : vector<8x256xf32>
      %cst_15 = arith.constant 0.000000e+00 : f32
      %19 = vector.broadcast %cst_15 : f32 to vector<8x256xf32>
      %20 = arith.maximumf %18, %19 : vector<8x256xf32>
      %21 = arith.truncf %20 : vector<8x256xf32> to vector<8x256xbf16>
      %c0_16 = arith.constant 0 : index
      %c0_17 = arith.constant 0 : index
      %22 = vector.load %arg7[%c0_16, %c0_17] : memref<8x256xbf16, #tpu.memory_space<vmem>>, vector<8x256xbf16>
      tpu.vector_store %arg7[%c0_16, %c0_17], %21 {strides = array<i32>} : memref<8x256xbf16, #tpu.memory_space<vmem>>, vector<8x256xbf16>,
    } else {
    }
    return
  }
  func.func @transform_0(%arg0: i32, %arg1: i32, %arg2: i32) -> (i32, i32) {
    %c0_i32 = arith.constant 0 : i32
    return %arg0, %arg2 : i32, i32
  }
  func.func @transform_1(%arg0: i32, %arg1: i32, %arg2: i32) -> (i32, i32) {
    %c0_i32 = arith.constant 0 : i32
    return %arg2, %arg1 : i32, i32
  }
  func.func @transform_2(%arg0: i32, %arg1: i32, %arg2: i32) -> (i32, i32) {
    %c0_i32 = arith.constant 0 : i32
    %c0_i32_0 = arith.constant 0 : i32
    return %c0_i32, %arg1 : i32, i32
  }
  func.func @transform_3(%arg0: i32, %arg1: i32, %arg2: i32) -> (i32, i32) {
    %c0_i32 = arith.constant 0 : i32
    %c0_i32_0 = arith.constant 0 : i32
    return %c0_i32, %arg1 : i32, i32
  }
  func.func @transform_4(%arg0: i32, %arg1: i32, %arg2: i32) -> (i32, i32) {
    %c0_i32 = arith.constant 0 : i32
    return %arg0, %arg1 : i32, i32
  }
}

module attributes {stable_mosaic.version = 11 : i64} {
  func.func @_matmul_affine_kernel(%arg0: i32, %arg1: i32, %arg2: i32, %arg3: memref<8x256xbf16, #tpu.memory_space<vmem>>, %arg4: memref<256x256xbf16, #tpu.memory_space<vmem>>, %arg5: memref<1x256xf32, #tpu.memory_space<vmem>>, %arg6: memref<1x256xf32, #tpu.memory_space<vmem>>, %arg7: memref<8x256xbf16, #tpu.memory_space<vmem>>, %arg8: memref<8x256xf32, #tpu.memory_space<vmem>>) attributes {dimension_semantics = [#tpu.dimension_semantics<parallel>, #tpu.dimension_semantics<parallel>, #tpu.dimension_semantics<arbitrary>], iteration_bounds = array<i64: 1, 2, 1>, scalar_prefetch = 0 : i64, scratch_operands = 1 : i64, tpu.core_type = #tpu.core_type<tc>, window_params = [{transform_indices = @transform_0, window_bounds = array<i64: 8, 256>}, {transform_indices = @transform_1, window_bounds = array<i64: 256, 256>}, {transform_indices = @transform_2, window_bounds = array<i64: 1, 256>}, {transform_indices = @transform_3, window_bounds = array<i64: 1, 256>}, {transform_indices = @transform_4, window_bounds = array<i64: 8, 256>}]} {
    %c0_i32 = arith.constant 0 : i32
    %0 = arith.cmpi eq, %arg2, %c0_i32 : i32
    %1 = arith.extui %0 : i1 to i32
    %c0_i32_0 = arith.constant 0 : i32
    %2 = arith.cmpi ne, %1, %c0_i32_0 : i32
    scf.if %2 {
      %cst_10 = arith.constant 0.000000e+00 : f32
      %12 = vector.broadcast %cst_10 : f32 to vector<8x256xf32>
      %c0_11 = arith.constant 0 : index
      %c0_12 = arith.constant 0 : index
      %13 = vector.load %arg8[%c0_11, %c0_12] : memref<8x256xf32, #tpu.memory_space<vmem>>, vector<8x256xf32>
      tpu.vector_store %arg8[%c0_11, %c0_12], %12 {strides = array<i32>} : memref<8x256xf32, #tpu.memory_space<vmem>>, vector<8x256xf32>,
    } else {
    }
    %c0 = arith.constant 0 : index
    %c0_1 = arith.constant 0 : index
    %3 = vector.load %arg8[%c0, %c0_1] : memref<8x256xf32, #tpu.memory_space<vmem>>, vector<8x256xf32>
    %c0_2 = arith.constant 0 : index
    %c0_3 = arith.constant 0 : index
    %4 = vector.load %arg3[%c0_2, %c0_3] : memref<8x256xbf16, #tpu.memory_space<vmem>>, vector<8x256xbf16>
    %c0_4 = arith.constant 0 : index
    %c0_5 = arith.constant 0 : index
    %5 = vector.load %arg4[%c0_4, %c0_5] : memref<256x256xbf16, #tpu.memory_space<vmem>>, vector<256x256xbf16>
    %cst = arith.constant dense<0.000000e+00> : vector<8x256xf32>
    %6 = tpu.matmul %4, %5, %cst {dimension_numbers = #tpu.dot_dimension_numbers<[1], [0], [0], [1], [0, 0, 1, 1], [], []>} : vector<8x256xbf16>, vector<256x256xbf16>, vector<8x256xf32> -> vector<8x256xf32>
    %7 = arith.addf %3, %6 : vector<8x256xf32>
    %c0_6 = arith.constant 0 : index
    %c0_7 = arith.constant 0 : index
    %8 = vector.load %arg8[%c0_6, %c0_7] : memref<8x256xf32, #tpu.memory_space<vmem>>, vector<8x256xf32>
    tpu.vector_store %arg8[%c0_6, %c0_7], %7 {strides = array<i32>} : memref<8x256xf32, #tpu.memory_space<vmem>>, vector<8x256xf32>,
    %c0_i32_8 = arith.constant 0 : i32
    %9 = arith.cmpi eq, %arg2, %c0_i32_8 : i32
    %10 = arith.extui %9 : i1 to i32
    %c0_i32_9 = arith.constant 0 : i32
    %11 = arith.cmpi ne, %10, %c0_i32_9 : i32
    scf.if %11 {
      %c0_10 = arith.constant 0 : index
      %c0_11 = arith.constant 0 : index
      %12 = vector.load %arg8[%c0_10, %c0_11] : memref<8x256xf32, #tpu.memory_space<vmem>>, vector<8x256xf32>
      %c0_12 = arith.constant 0 : index
      %c0_13 = arith.constant 0 : index
      %13 = vector.load %arg5[%c0_12, %c0_13] : memref<1x256xf32, #tpu.memory_space<vmem>>, vector<1x256xf32>
      %14 = vector.broadcast %13 : vector<1x256xf32> to vector<8x256xf32>
      %15 = arith.mulf %12, %14 : vector<8x256xf32>
      %c0_14 = arith.constant 0 : index
      %c0_15 = arith.constant 0 : index
      %16 = vector.load %arg6[%c0_14, %c0_15] : memref<1x256xf32, #tpu.memory_space<vmem>>, vector<1x256xf32>
      %17 = vector.broadcast %16 : vector<1x256xf32> to vector<8x256xf32>
      %18 = arith.addf %15, %17 : vector<8x256xf32>
      %19 = arith.truncf %18 : vector<8x256xf32> to vector<8x256xbf16>
      %c0_16 = arith.constant 0 : index
      %c0_17 = arith.constant 0 : index
      %20 = vector.load %arg7[%c0_16, %c0_17] : memref<8x256xbf16, #tpu.memory_space<vmem>>, vector<8x256xbf16>
      tpu.vector_store %arg7[%c0_16, %c0_17], %19 {strides = array<i32>} : memref<8x256xbf16, #tpu.memory_space<vmem>>, vector<8x256xbf16>,
    } else {
    }
    return
  }
  func.func @transform_0(%arg0: i32, %arg1: i32, %arg2: i32) -> (i32, i32) {
    %c0_i32 = arith.constant 0 : i32
    return %arg0, %arg2 : i32, i32
  }
  func.func @transform_1(%arg0: i32, %arg1: i32, %arg2: i32) -> (i32, i32) {
    %c0_i32 = arith.constant 0 : i32
    return %arg2, %arg1 : i32, i32
  }
  func.func @transform_2(%arg0: i32, %arg1: i32, %arg2: i32) -> (i32, i32) {
    %c0_i32 = arith.constant 0 : i32
    %c0_i32_0 = arith.constant 0 : i32
    return %c0_i32, %arg1 : i32, i32
  }
  func.func @transform_3(%arg0: i32, %arg1: i32, %arg2: i32) -> (i32, i32) {
    %c0_i32 = arith.constant 0 : i32
    %c0_i32_0 = arith.constant 0 : i32
    return %c0_i32, %arg1 : i32, i32
  }
  func.func @transform_4(%arg0: i32, %arg1: i32, %arg2: i32) -> (i32, i32) {
    %c0_i32 = arith.constant 0 : i32
    return %arg0, %arg1 : i32, i32
  }
}

module attributes {stable_mosaic.version = 11 : i64} {
  func.func @_matmul_affine_kernel(%arg0: i32, %arg1: i32, %arg2: i32, %arg3: memref<32x384xbf16, #tpu.memory_space<vmem>>, %arg4: memref<384x128xbf16, #tpu.memory_space<vmem>>, %arg5: memref<1x128xf32, #tpu.memory_space<vmem>>, %arg6: memref<1x128xf32, #tpu.memory_space<vmem>>, %arg7: memref<32x128xbf16, #tpu.memory_space<vmem>>, %arg8: memref<32x128xf32, #tpu.memory_space<vmem>>) attributes {dimension_semantics = [#tpu.dimension_semantics<parallel>, #tpu.dimension_semantics<parallel>, #tpu.dimension_semantics<arbitrary>], iteration_bounds = array<i64: 1, 1, 6>, scalar_prefetch = 0 : i64, scratch_operands = 1 : i64, tpu.core_type = #tpu.core_type<tc>, window_params = [{transform_indices = @transform_0, window_bounds = array<i64: 32, 384>}, {transform_indices = @transform_1, window_bounds = array<i64: 384, 128>}, {transform_indices = @transform_2, window_bounds = array<i64: 1, 128>}, {transform_indices = @transform_3, window_bounds = array<i64: 1, 128>}, {transform_indices = @transform_4, window_bounds = array<i64: 32, 128>}]} {
    %c0_i32 = arith.constant 0 : i32
    %0 = arith.cmpi eq, %arg2, %c0_i32 : i32
    %1 = arith.extui %0 : i1 to i32
    %c0_i32_0 = arith.constant 0 : i32
    %2 = arith.cmpi ne, %1, %c0_i32_0 : i32
    scf.if %2 {
      %cst_9 = arith.constant 0.000000e+00 : f32
      %12 = vector.broadcast %cst_9 : f32 to vector<32x128xf32>
      %c0_10 = arith.constant 0 : index
      %c0_11 = arith.constant 0 : index
      %13 = vector.load %arg8[%c0_10, %c0_11] : memref<32x128xf32, #tpu.memory_space<vmem>>, vector<32x128xf32>
      tpu.vector_store %arg8[%c0_10, %c0_11], %12 {strides = array<i32>} : memref<32x128xf32, #tpu.memory_space<vmem>>, vector<32x128xf32>,
    } else {
    }
    %c0 = arith.constant 0 : index
    %c0_1 = arith.constant 0 : index
    %3 = vector.load %arg8[%c0, %c0_1] : memref<32x128xf32, #tpu.memory_space<vmem>>, vector<32x128xf32>
    %c0_2 = arith.constant 0 : index
    %c0_3 = arith.constant 0 : index
    %4 = vector.load %arg3[%c0_2, %c0_3] : memref<32x384xbf16, #tpu.memory_space<vmem>>, vector<32x384xbf16>
    %c0_4 = arith.constant 0 : index
    %c0_5 = arith.constant 0 : index
    %5 = vector.load %arg4[%c0_4, %c0_5] : memref<384x128xbf16, #tpu.memory_space<vmem>>, vector<384x128xbf16>
    %cst = arith.constant dense<0.000000e+00> : vector<32x128xf32>
    %6 = tpu.matmul %4, %5, %cst {dimension_numbers = #tpu.dot_dimension_numbers<[1], [0], [0], [1], [0, 0, 1, 1], [], []>} : vector<32x384xbf16>, vector<384x128xbf16>, vector<32x128xf32> -> vector<32x128xf32>
    %7 = arith.addf %3, %6 : vector<32x128xf32>
    %c0_6 = arith.constant 0 : index
    %c0_7 = arith.constant 0 : index
    %8 = vector.load %arg8[%c0_6, %c0_7] : memref<32x128xf32, #tpu.memory_space<vmem>>, vector<32x128xf32>
    tpu.vector_store %arg8[%c0_6, %c0_7], %7 {strides = array<i32>} : memref<32x128xf32, #tpu.memory_space<vmem>>, vector<32x128xf32>,
    %c5_i32 = arith.constant 5 : i32
    %9 = arith.cmpi eq, %arg2, %c5_i32 : i32
    %10 = arith.extui %9 : i1 to i32
    %c0_i32_8 = arith.constant 0 : i32
    %11 = arith.cmpi ne, %10, %c0_i32_8 : i32
    scf.if %11 {
      %c0_9 = arith.constant 0 : index
      %c0_10 = arith.constant 0 : index
      %12 = vector.load %arg8[%c0_9, %c0_10] : memref<32x128xf32, #tpu.memory_space<vmem>>, vector<32x128xf32>
      %c0_11 = arith.constant 0 : index
      %c0_12 = arith.constant 0 : index
      %13 = vector.load %arg5[%c0_11, %c0_12] : memref<1x128xf32, #tpu.memory_space<vmem>>, vector<1x128xf32>
      %14 = vector.broadcast %13 : vector<1x128xf32> to vector<32x128xf32>
      %15 = arith.mulf %12, %14 : vector<32x128xf32>
      %c0_13 = arith.constant 0 : index
      %c0_14 = arith.constant 0 : index
      %16 = vector.load %arg6[%c0_13, %c0_14] : memref<1x128xf32, #tpu.memory_space<vmem>>, vector<1x128xf32>
      %17 = vector.broadcast %16 : vector<1x128xf32> to vector<32x128xf32>
      %18 = arith.addf %15, %17 : vector<32x128xf32>
      %cst_15 = arith.constant 0.000000e+00 : f32
      %19 = vector.broadcast %cst_15 : f32 to vector<32x128xf32>
      %20 = arith.maximumf %18, %19 : vector<32x128xf32>
      %21 = arith.truncf %20 : vector<32x128xf32> to vector<32x128xbf16>
      %c0_16 = arith.constant 0 : index
      %c0_17 = arith.constant 0 : index
      %22 = vector.load %arg7[%c0_16, %c0_17] : memref<32x128xbf16, #tpu.memory_space<vmem>>, vector<32x128xbf16>
      tpu.vector_store %arg7[%c0_16, %c0_17], %21 {strides = array<i32>} : memref<32x128xbf16, #tpu.memory_space<vmem>>, vector<32x128xbf16>,
    } else {
    }
    return
  }
  func.func @transform_0(%arg0: i32, %arg1: i32, %arg2: i32) -> (i32, i32) {
    %c0_i32 = arith.constant 0 : i32
    return %arg0, %arg2 : i32, i32
  }
  func.func @transform_1(%arg0: i32, %arg1: i32, %arg2: i32) -> (i32, i32) {
    %c0_i32 = arith.constant 0 : i32
    return %arg2, %arg1 : i32, i32
  }
  func.func @transform_2(%arg0: i32, %arg1: i32, %arg2: i32) -> (i32, i32) {
    %c0_i32 = arith.constant 0 : i32
    %c0_i32_0 = arith.constant 0 : i32
    return %c0_i32, %arg1 : i32, i32
  }
  func.func @transform_3(%arg0: i32, %arg1: i32, %arg2: i32) -> (i32, i32) {
    %c0_i32 = arith.constant 0 : i32
    %c0_i32_0 = arith.constant 0 : i32
    return %c0_i32, %arg1 : i32, i32
  }
  func.func @transform_4(%arg0: i32, %arg1: i32, %arg2: i32) -> (i32, i32) {
    %c0_i32 = arith.constant 0 : i32
    return %arg0, %arg1 : i32, i32
  }
}

module attributes {stable_mosaic.version = 11 : i64} {
  func.func @_matmul_affine_kernel(%arg0: i32, %arg1: i32, %arg2: i32, %arg3: memref<32x128xbf16, #tpu.memory_space<vmem>>, %arg4: memref<128x256xbf16, #tpu.memory_space<vmem>>, %arg5: memref<1x256xf32, #tpu.memory_space<vmem>>, %arg6: memref<1x256xf32, #tpu.memory_space<vmem>>, %arg7: memref<32x256xbf16, #tpu.memory_space<vmem>>, %arg8: memref<32x256xf32, #tpu.memory_space<vmem>>) attributes {dimension_semantics = [#tpu.dimension_semantics<parallel>, #tpu.dimension_semantics<parallel>, #tpu.dimension_semantics<arbitrary>], iteration_bounds = array<i64: 1, 1, 1>, scalar_prefetch = 0 : i64, scratch_operands = 1 : i64, tpu.core_type = #tpu.core_type<tc>, window_params = [{transform_indices = @transform_0, window_bounds = array<i64: 32, 128>}, {transform_indices = @transform_1, window_bounds = array<i64: 128, 256>}, {transform_indices = @transform_2, window_bounds = array<i64: 1, 256>}, {transform_indices = @transform_3, window_bounds = array<i64: 1, 256>}, {transform_indices = @transform_4, window_bounds = array<i64: 32, 256>}]} {
    %c0_i32 = arith.constant 0 : i32
    %0 = arith.cmpi eq, %arg2, %c0_i32 : i32
    %1 = arith.extui %0 : i1 to i32
    %c0_i32_0 = arith.constant 0 : i32
    %2 = arith.cmpi ne, %1, %c0_i32_0 : i32
    scf.if %2 {
      %cst_10 = arith.constant 0.000000e+00 : f32
      %12 = vector.broadcast %cst_10 : f32 to vector<32x256xf32>
      %c0_11 = arith.constant 0 : index
      %c0_12 = arith.constant 0 : index
      %13 = vector.load %arg8[%c0_11, %c0_12] : memref<32x256xf32, #tpu.memory_space<vmem>>, vector<32x256xf32>
      tpu.vector_store %arg8[%c0_11, %c0_12], %12 {strides = array<i32>} : memref<32x256xf32, #tpu.memory_space<vmem>>, vector<32x256xf32>,
    } else {
    }
    %c0 = arith.constant 0 : index
    %c0_1 = arith.constant 0 : index
    %3 = vector.load %arg8[%c0, %c0_1] : memref<32x256xf32, #tpu.memory_space<vmem>>, vector<32x256xf32>
    %c0_2 = arith.constant 0 : index
    %c0_3 = arith.constant 0 : index
    %4 = vector.load %arg3[%c0_2, %c0_3] : memref<32x128xbf16, #tpu.memory_space<vmem>>, vector<32x128xbf16>
    %c0_4 = arith.constant 0 : index
    %c0_5 = arith.constant 0 : index
    %5 = vector.load %arg4[%c0_4, %c0_5] : memref<128x256xbf16, #tpu.memory_space<vmem>>, vector<128x256xbf16>
    %cst = arith.constant dense<0.000000e+00> : vector<32x256xf32>
    %6 = tpu.matmul %4, %5, %cst {dimension_numbers = #tpu.dot_dimension_numbers<[1], [0], [0], [1], [0, 0, 1, 1], [], []>} : vector<32x128xbf16>, vector<128x256xbf16>, vector<32x256xf32> -> vector<32x256xf32>
    %7 = arith.addf %3, %6 : vector<32x256xf32>
    %c0_6 = arith.constant 0 : index
    %c0_7 = arith.constant 0 : index
    %8 = vector.load %arg8[%c0_6, %c0_7] : memref<32x256xf32, #tpu.memory_space<vmem>>, vector<32x256xf32>
    tpu.vector_store %arg8[%c0_6, %c0_7], %7 {strides = array<i32>} : memref<32x256xf32, #tpu.memory_space<vmem>>, vector<32x256xf32>,
    %c0_i32_8 = arith.constant 0 : i32
    %9 = arith.cmpi eq, %arg2, %c0_i32_8 : i32
    %10 = arith.extui %9 : i1 to i32
    %c0_i32_9 = arith.constant 0 : i32
    %11 = arith.cmpi ne, %10, %c0_i32_9 : i32
    scf.if %11 {
      %c0_10 = arith.constant 0 : index
      %c0_11 = arith.constant 0 : index
      %12 = vector.load %arg8[%c0_10, %c0_11] : memref<32x256xf32, #tpu.memory_space<vmem>>, vector<32x256xf32>
      %c0_12 = arith.constant 0 : index
      %c0_13 = arith.constant 0 : index
      %13 = vector.load %arg5[%c0_12, %c0_13] : memref<1x256xf32, #tpu.memory_space<vmem>>, vector<1x256xf32>
      %14 = vector.broadcast %13 : vector<1x256xf32> to vector<32x256xf32>
      %15 = arith.mulf %12, %14 : vector<32x256xf32>
      %c0_14 = arith.constant 0 : index
      %c0_15 = arith.constant 0 : index
      %16 = vector.load %arg6[%c0_14, %c0_15] : memref<1x256xf32, #tpu.memory_space<vmem>>, vector<1x256xf32>
      %17 = vector.broadcast %16 : vector<1x256xf32> to vector<32x256xf32>
      %18 = arith.addf %15, %17 : vector<32x256xf32>
      %19 = arith.truncf %18 : vector<32x256xf32> to vector<32x256xbf16>
      %c0_16 = arith.constant 0 : index
      %c0_17 = arith.constant 0 : index
      %20 = vector.load %arg7[%c0_16, %c0_17] : memref<32x256xbf16, #tpu.memory_space<vmem>>, vector<32x256xbf16>
      tpu.vector_store %arg7[%c0_16, %c0_17], %19 {strides = array<i32>} : memref<32x256xbf16, #tpu.memory_space<vmem>>, vector<32x256xbf16>,
    } else {
    }
    return
  }
  func.func @transform_0(%arg0: i32, %arg1: i32, %arg2: i32) -> (i32, i32) {
    %c0_i32 = arith.constant 0 : i32
    return %arg0, %arg2 : i32, i32
  }
  func.func @transform_1(%arg0: i32, %arg1: i32, %arg2: i32) -> (i32, i32) {
    %c0_i32 = arith.constant 0 : i32
    return %arg2, %arg1 : i32, i32
  }
  func.func @transform_2(%arg0: i32, %arg1: i32, %arg2: i32) -> (i32, i32) {
    %c0_i32 = arith.constant 0 : i32
    %c0_i32_0 = arith.constant 0 : i32
    return %c0_i32, %arg1 : i32, i32
  }
  func.func @transform_3(%arg0: i32, %arg1: i32, %arg2: i32) -> (i32, i32) {
    %c0_i32 = arith.constant 0 : i32
    %c0_i32_0 = arith.constant 0 : i32
    return %c0_i32, %arg1 : i32, i32
  }
  func.func @transform_4(%arg0: i32, %arg1: i32, %arg2: i32) -> (i32, i32) {
    %c0_i32 = arith.constant 0 : i32
    return %arg0, %arg1 : i32, i32
  }
}

module attributes {stable_mosaic.version = 11 : i64} {
  func.func @_matmul_affine_kernel(%arg0: i32, %arg1: i32, %arg2: i32, %arg3: memref<128x384xbf16, #tpu.memory_space<vmem>>, %arg4: memref<384x128xbf16, #tpu.memory_space<vmem>>, %arg5: memref<1x128xf32, #tpu.memory_space<vmem>>, %arg6: memref<1x128xf32, #tpu.memory_space<vmem>>, %arg7: memref<128x128xbf16, #tpu.memory_space<vmem>>, %arg8: memref<128x128xf32, #tpu.memory_space<vmem>>) attributes {dimension_semantics = [#tpu.dimension_semantics<parallel>, #tpu.dimension_semantics<parallel>, #tpu.dimension_semantics<arbitrary>], iteration_bounds = array<i64: 1, 1, 3>, scalar_prefetch = 0 : i64, scratch_operands = 1 : i64, tpu.core_type = #tpu.core_type<tc>, window_params = [{transform_indices = @transform_0, window_bounds = array<i64: 128, 384>}, {transform_indices = @transform_1, window_bounds = array<i64: 384, 128>}, {transform_indices = @transform_2, window_bounds = array<i64: 1, 128>}, {transform_indices = @transform_3, window_bounds = array<i64: 1, 128>}, {transform_indices = @transform_4, window_bounds = array<i64: 128, 128>}]} {
    %c0_i32 = arith.constant 0 : i32
    %0 = arith.cmpi eq, %arg2, %c0_i32 : i32
    %1 = arith.extui %0 : i1 to i32
    %c0_i32_0 = arith.constant 0 : i32
    %2 = arith.cmpi ne, %1, %c0_i32_0 : i32
    scf.if %2 {
      %cst_9 = arith.constant 0.000000e+00 : f32
      %12 = vector.broadcast %cst_9 : f32 to vector<128x128xf32>
      %c0_10 = arith.constant 0 : index
      %c0_11 = arith.constant 0 : index
      %13 = vector.load %arg8[%c0_10, %c0_11] : memref<128x128xf32, #tpu.memory_space<vmem>>, vector<128x128xf32>
      tpu.vector_store %arg8[%c0_10, %c0_11], %12 {strides = array<i32>} : memref<128x128xf32, #tpu.memory_space<vmem>>, vector<128x128xf32>,
    } else {
    }
    %c0 = arith.constant 0 : index
    %c0_1 = arith.constant 0 : index
    %3 = vector.load %arg8[%c0, %c0_1] : memref<128x128xf32, #tpu.memory_space<vmem>>, vector<128x128xf32>
    %c0_2 = arith.constant 0 : index
    %c0_3 = arith.constant 0 : index
    %4 = vector.load %arg3[%c0_2, %c0_3] : memref<128x384xbf16, #tpu.memory_space<vmem>>, vector<128x384xbf16>
    %c0_4 = arith.constant 0 : index
    %c0_5 = arith.constant 0 : index
    %5 = vector.load %arg4[%c0_4, %c0_5] : memref<384x128xbf16, #tpu.memory_space<vmem>>, vector<384x128xbf16>
    %cst = arith.constant dense<0.000000e+00> : vector<128x128xf32>
    %6 = tpu.matmul %4, %5, %cst {dimension_numbers = #tpu.dot_dimension_numbers<[1], [0], [0], [1], [0, 0, 1, 1], [], []>} : vector<128x384xbf16>, vector<384x128xbf16>, vector<128x128xf32> -> vector<128x128xf32>
    %7 = arith.addf %3, %6 : vector<128x128xf32>
    %c0_6 = arith.constant 0 : index
    %c0_7 = arith.constant 0 : index
    %8 = vector.load %arg8[%c0_6, %c0_7] : memref<128x128xf32, #tpu.memory_space<vmem>>, vector<128x128xf32>
    tpu.vector_store %arg8[%c0_6, %c0_7], %7 {strides = array<i32>} : memref<128x128xf32, #tpu.memory_space<vmem>>, vector<128x128xf32>,
    %c2_i32 = arith.constant 2 : i32
    %9 = arith.cmpi eq, %arg2, %c2_i32 : i32
    %10 = arith.extui %9 : i1 to i32
    %c0_i32_8 = arith.constant 0 : i32
    %11 = arith.cmpi ne, %10, %c0_i32_8 : i32
    scf.if %11 {
      %c0_9 = arith.constant 0 : index
      %c0_10 = arith.constant 0 : index
      %12 = vector.load %arg8[%c0_9, %c0_10] : memref<128x128xf32, #tpu.memory_space<vmem>>, vector<128x128xf32>
      %c0_11 = arith.constant 0 : index
      %c0_12 = arith.constant 0 : index
      %13 = vector.load %arg5[%c0_11, %c0_12] : memref<1x128xf32, #tpu.memory_space<vmem>>, vector<1x128xf32>
      %14 = vector.broadcast %13 : vector<1x128xf32> to vector<128x128xf32>
      %15 = arith.mulf %12, %14 : vector<128x128xf32>
      %c0_13 = arith.constant 0 : index
      %c0_14 = arith.constant 0 : index
      %16 = vector.load %arg6[%c0_13, %c0_14] : memref<1x128xf32, #tpu.memory_space<vmem>>, vector<1x128xf32>
      %17 = vector.broadcast %16 : vector<1x128xf32> to vector<128x128xf32>
      %18 = arith.addf %15, %17 : vector<128x128xf32>
      %cst_15 = arith.constant 0.000000e+00 : f32
      %19 = vector.broadcast %cst_15 : f32 to vector<128x128xf32>
      %20 = arith.maximumf %18, %19 : vector<128x128xf32>
      %21 = arith.truncf %20 : vector<128x128xf32> to vector<128x128xbf16>
      %c0_16 = arith.constant 0 : index
      %c0_17 = arith.constant 0 : index
      %22 = vector.load %arg7[%c0_16, %c0_17] : memref<128x128xbf16, #tpu.memory_space<vmem>>, vector<128x128xbf16>
      tpu.vector_store %arg7[%c0_16, %c0_17], %21 {strides = array<i32>} : memref<128x128xbf16, #tpu.memory_space<vmem>>, vector<128x128xbf16>,
    } else {
    }
    return
  }
  func.func @transform_0(%arg0: i32, %arg1: i32, %arg2: i32) -> (i32, i32) {
    %c0_i32 = arith.constant 0 : i32
    return %arg0, %arg2 : i32, i32
  }
  func.func @transform_1(%arg0: i32, %arg1: i32, %arg2: i32) -> (i32, i32) {
    %c0_i32 = arith.constant 0 : i32
    return %arg2, %arg1 : i32, i32
  }
  func.func @transform_2(%arg0: i32, %arg1: i32, %arg2: i32) -> (i32, i32) {
    %c0_i32 = arith.constant 0 : i32
    %c0_i32_0 = arith.constant 0 : i32
    return %c0_i32, %arg1 : i32, i32
  }
  func.func @transform_3(%arg0: i32, %arg1: i32, %arg2: i32) -> (i32, i32) {
    %c0_i32 = arith.constant 0 : i32
    %c0_i32_0 = arith.constant 0 : i32
    return %c0_i32, %arg1 : i32, i32
  }
  func.func @transform_4(%arg0: i32, %arg1: i32, %arg2: i32) -> (i32, i32) {
    %c0_i32 = arith.constant 0 : i32
    return %arg0, %arg1 : i32, i32
  }
}

module attributes {stable_mosaic.version = 11 : i64} {
  func.func @_matmul_affine_kernel(%arg0: i32, %arg1: i32, %arg2: i32, %arg3: memref<128x64xbf16, #tpu.memory_space<vmem>>, %arg4: memref<64x128xbf16, #tpu.memory_space<vmem>>, %arg5: memref<1x128xf32, #tpu.memory_space<vmem>>, %arg6: memref<1x128xf32, #tpu.memory_space<vmem>>, %arg7: memref<128x128xbf16, #tpu.memory_space<vmem>>, %arg8: memref<128x128xf32, #tpu.memory_space<vmem>>) attributes {dimension_semantics = [#tpu.dimension_semantics<parallel>, #tpu.dimension_semantics<parallel>, #tpu.dimension_semantics<arbitrary>], iteration_bounds = array<i64: 1, 1, 1>, scalar_prefetch = 0 : i64, scratch_operands = 1 : i64, tpu.core_type = #tpu.core_type<tc>, window_params = [{transform_indices = @transform_0, window_bounds = array<i64: 128, 64>}, {transform_indices = @transform_1, window_bounds = array<i64: 64, 128>}, {transform_indices = @transform_2, window_bounds = array<i64: 1, 128>}, {transform_indices = @transform_3, window_bounds = array<i64: 1, 128>}, {transform_indices = @transform_4, window_bounds = array<i64: 128, 128>}]} {
    %c0_i32 = arith.constant 0 : i32
    %0 = arith.cmpi eq, %arg2, %c0_i32 : i32
    %1 = arith.extui %0 : i1 to i32
    %c0_i32_0 = arith.constant 0 : i32
    %2 = arith.cmpi ne, %1, %c0_i32_0 : i32
    scf.if %2 {
      %cst_10 = arith.constant 0.000000e+00 : f32
      %12 = vector.broadcast %cst_10 : f32 to vector<128x128xf32>
      %c0_11 = arith.constant 0 : index
      %c0_12 = arith.constant 0 : index
      %13 = vector.load %arg8[%c0_11, %c0_12] : memref<128x128xf32, #tpu.memory_space<vmem>>, vector<128x128xf32>
      tpu.vector_store %arg8[%c0_11, %c0_12], %12 {strides = array<i32>} : memref<128x128xf32, #tpu.memory_space<vmem>>, vector<128x128xf32>,
    } else {
    }
    %c0 = arith.constant 0 : index
    %c0_1 = arith.constant 0 : index
    %3 = vector.load %arg8[%c0, %c0_1] : memref<128x128xf32, #tpu.memory_space<vmem>>, vector<128x128xf32>
    %c0_2 = arith.constant 0 : index
    %c0_3 = arith.constant 0 : index
    %4 = vector.load %arg3[%c0_2, %c0_3] : memref<128x64xbf16, #tpu.memory_space<vmem>>, vector<128x64xbf16>
    %c0_4 = arith.constant 0 : index
    %c0_5 = arith.constant 0 : index
    %5 = vector.load %arg4[%c0_4, %c0_5] : memref<64x128xbf16, #tpu.memory_space<vmem>>, vector<64x128xbf16>
    %cst = arith.constant dense<0.000000e+00> : vector<128x128xf32>
    %6 = tpu.matmul %4, %5, %cst {dimension_numbers = #tpu.dot_dimension_numbers<[1], [0], [0], [1], [0, 0, 1, 1], [], []>} : vector<128x64xbf16>, vector<64x128xbf16>, vector<128x128xf32> -> vector<128x128xf32>
    %7 = arith.addf %3, %6 : vector<128x128xf32>
    %c0_6 = arith.constant 0 : index
    %c0_7 = arith.constant 0 : index
    %8 = vector.load %arg8[%c0_6, %c0_7] : memref<128x128xf32, #tpu.memory_space<vmem>>, vector<128x128xf32>
    tpu.vector_store %arg8[%c0_6, %c0_7], %7 {strides = array<i32>} : memref<128x128xf32, #tpu.memory_space<vmem>>, vector<128x128xf32>,
    %c0_i32_8 = arith.constant 0 : i32
    %9 = arith.cmpi eq, %arg2, %c0_i32_8 : i32
    %10 = arith.extui %9 : i1 to i32
    %c0_i32_9 = arith.constant 0 : i32
    %11 = arith.cmpi ne, %10, %c0_i32_9 : i32
    scf.if %11 {
      %c0_10 = arith.constant 0 : index
      %c0_11 = arith.constant 0 : index
      %12 = vector.load %arg8[%c0_10, %c0_11] : memref<128x128xf32, #tpu.memory_space<vmem>>, vector<128x128xf32>
      %c0_12 = arith.constant 0 : index
      %c0_13 = arith.constant 0 : index
      %13 = vector.load %arg5[%c0_12, %c0_13] : memref<1x128xf32, #tpu.memory_space<vmem>>, vector<1x128xf32>
      %14 = vector.broadcast %13 : vector<1x128xf32> to vector<128x128xf32>
      %15 = arith.mulf %12, %14 : vector<128x128xf32>
      %c0_14 = arith.constant 0 : index
      %c0_15 = arith.constant 0 : index
      %16 = vector.load %arg6[%c0_14, %c0_15] : memref<1x128xf32, #tpu.memory_space<vmem>>, vector<1x128xf32>
      %17 = vector.broadcast %16 : vector<1x128xf32> to vector<128x128xf32>
      %18 = arith.addf %15, %17 : vector<128x128xf32>
      %19 = arith.truncf %18 : vector<128x128xf32> to vector<128x128xbf16>
      %c0_16 = arith.constant 0 : index
      %c0_17 = arith.constant 0 : index
      %20 = vector.load %arg7[%c0_16, %c0_17] : memref<128x128xbf16, #tpu.memory_space<vmem>>, vector<128x128xbf16>
      tpu.vector_store %arg7[%c0_16, %c0_17], %19 {strides = array<i32>} : memref<128x128xbf16, #tpu.memory_space<vmem>>, vector<128x128xbf16>,
    } else {
    }
    return
  }
  func.func @transform_0(%arg0: i32, %arg1: i32, %arg2: i32) -> (i32, i32) {
    %c0_i32 = arith.constant 0 : i32
    return %arg0, %arg2 : i32, i32
  }
  func.func @transform_1(%arg0: i32, %arg1: i32, %arg2: i32) -> (i32, i32) {
    %c0_i32 = arith.constant 0 : i32
    return %arg2, %arg1 : i32, i32
  }
  func.func @transform_2(%arg0: i32, %arg1: i32, %arg2: i32) -> (i32, i32) {
    %c0_i32 = arith.constant 0 : i32
    %c0_i32_0 = arith.constant 0 : i32
    return %c0_i32, %arg1 : i32, i32
  }
  func.func @transform_3(%arg0: i32, %arg1: i32, %arg2: i32) -> (i32, i32) {
    %c0_i32 = arith.constant 0 : i32
    %c0_i32_0 = arith.constant 0 : i32
    return %c0_i32, %arg1 : i32, i32
  }
  func.func @transform_4(%arg0: i32, %arg1: i32, %arg2: i32) -> (i32, i32) {
    %c0_i32 = arith.constant 0 : i32
    return %arg0, %arg1 : i32, i32
  }
}

module attributes {stable_mosaic.version = 11 : i64} {
  func.func @_matmul_affine_kernel(%arg0: i32, %arg1: i32, %arg2: i32, %arg3: memref<512x576xbf16, #tpu.memory_space<vmem>>, %arg4: memref<576x128xbf16, #tpu.memory_space<vmem>>, %arg5: memref<1x128xf32, #tpu.memory_space<vmem>>, %arg6: memref<1x128xf32, #tpu.memory_space<vmem>>, %arg7: memref<512x128xbf16, #tpu.memory_space<vmem>>, %arg8: memref<512x128xf32, #tpu.memory_space<vmem>>) attributes {dimension_semantics = [#tpu.dimension_semantics<parallel>, #tpu.dimension_semantics<parallel>, #tpu.dimension_semantics<arbitrary>], iteration_bounds = array<i64: 1, 1, 1>, scalar_prefetch = 0 : i64, scratch_operands = 1 : i64, tpu.core_type = #tpu.core_type<tc>, window_params = [{transform_indices = @transform_0, window_bounds = array<i64: 512, 576>}, {transform_indices = @transform_1, window_bounds = array<i64: 576, 128>}, {transform_indices = @transform_2, window_bounds = array<i64: 1, 128>}, {transform_indices = @transform_3, window_bounds = array<i64: 1, 128>}, {transform_indices = @transform_4, window_bounds = array<i64: 512, 128>}]} {
    %c0_i32 = arith.constant 0 : i32
    %0 = arith.cmpi eq, %arg2, %c0_i32 : i32
    %1 = arith.extui %0 : i1 to i32
    %c0_i32_0 = arith.constant 0 : i32
    %2 = arith.cmpi ne, %1, %c0_i32_0 : i32
    scf.if %2 {
      %cst_10 = arith.constant 0.000000e+00 : f32
      %12 = vector.broadcast %cst_10 : f32 to vector<512x128xf32>
      %c0_11 = arith.constant 0 : index
      %c0_12 = arith.constant 0 : index
      %13 = vector.load %arg8[%c0_11, %c0_12] : memref<512x128xf32, #tpu.memory_space<vmem>>, vector<512x128xf32>
      tpu.vector_store %arg8[%c0_11, %c0_12], %12 {strides = array<i32>} : memref<512x128xf32, #tpu.memory_space<vmem>>, vector<512x128xf32>,
    } else {
    }
    %c0 = arith.constant 0 : index
    %c0_1 = arith.constant 0 : index
    %3 = vector.load %arg8[%c0, %c0_1] : memref<512x128xf32, #tpu.memory_space<vmem>>, vector<512x128xf32>
    %c0_2 = arith.constant 0 : index
    %c0_3 = arith.constant 0 : index
    %4 = vector.load %arg3[%c0_2, %c0_3] : memref<512x576xbf16, #tpu.memory_space<vmem>>, vector<512x576xbf16>
    %c0_4 = arith.constant 0 : index
    %c0_5 = arith.constant 0 : index
    %5 = vector.load %arg4[%c0_4, %c0_5] : memref<576x128xbf16, #tpu.memory_space<vmem>>, vector<576x128xbf16>
    %cst = arith.constant dense<0.000000e+00> : vector<512x128xf32>
    %6 = tpu.matmul %4, %5, %cst {dimension_numbers = #tpu.dot_dimension_numbers<[1], [0], [0], [1], [0, 0, 1, 1], [], []>} : vector<512x576xbf16>, vector<576x128xbf16>, vector<512x128xf32> -> vector<512x128xf32>
    %7 = arith.addf %3, %6 : vector<512x128xf32>
    %c0_6 = arith.constant 0 : index
    %c0_7 = arith.constant 0 : index
    %8 = vector.load %arg8[%c0_6, %c0_7] : memref<512x128xf32, #tpu.memory_space<vmem>>, vector<512x128xf32>
    tpu.vector_store %arg8[%c0_6, %c0_7], %7 {strides = array<i32>} : memref<512x128xf32, #tpu.memory_space<vmem>>, vector<512x128xf32>,
    %c0_i32_8 = arith.constant 0 : i32
    %9 = arith.cmpi eq, %arg2, %c0_i32_8 : i32
    %10 = arith.extui %9 : i1 to i32
    %c0_i32_9 = arith.constant 0 : i32
    %11 = arith.cmpi ne, %10, %c0_i32_9 : i32
    scf.if %11 {
      %c0_10 = arith.constant 0 : index
      %c0_11 = arith.constant 0 : index
      %12 = vector.load %arg8[%c0_10, %c0_11] : memref<512x128xf32, #tpu.memory_space<vmem>>, vector<512x128xf32>
      %c0_12 = arith.constant 0 : index
      %c0_13 = arith.constant 0 : index
      %13 = vector.load %arg5[%c0_12, %c0_13] : memref<1x128xf32, #tpu.memory_space<vmem>>, vector<1x128xf32>
      %14 = vector.broadcast %13 : vector<1x128xf32> to vector<512x128xf32>
      %15 = arith.mulf %12, %14 : vector<512x128xf32>
      %c0_14 = arith.constant 0 : index
      %c0_15 = arith.constant 0 : index
      %16 = vector.load %arg6[%c0_14, %c0_15] : memref<1x128xf32, #tpu.memory_space<vmem>>, vector<1x128xf32>
      %17 = vector.broadcast %16 : vector<1x128xf32> to vector<512x128xf32>
      %18 = arith.addf %15, %17 : vector<512x128xf32>
      %cst_16 = arith.constant 0.000000e+00 : f32
      %19 = vector.broadcast %cst_16 : f32 to vector<512x128xf32>
      %20 = arith.maximumf %18, %19 : vector<512x128xf32>
      %21 = arith.truncf %20 : vector<512x128xf32> to vector<512x128xbf16>
      %c0_17 = arith.constant 0 : index
      %c0_18 = arith.constant 0 : index
      %22 = vector.load %arg7[%c0_17, %c0_18] : memref<512x128xbf16, #tpu.memory_space<vmem>>, vector<512x128xbf16>
      tpu.vector_store %arg7[%c0_17, %c0_18], %21 {strides = array<i32>} : memref<512x128xbf16, #tpu.memory_space<vmem>>, vector<512x128xbf16>,
    } else {
    }
    return
  }
  func.func @transform_0(%arg0: i32, %arg1: i32, %arg2: i32) -> (i32, i32) {
    %c0_i32 = arith.constant 0 : i32
    return %arg0, %arg2 : i32, i32
  }
  func.func @transform_1(%arg0: i32, %arg1: i32, %arg2: i32) -> (i32, i32) {
    %c0_i32 = arith.constant 0 : i32
    return %arg2, %arg1 : i32, i32
  }
  func.func @transform_2(%arg0: i32, %arg1: i32, %arg2: i32) -> (i32, i32) {
    %c0_i32 = arith.constant 0 : i32
    %c0_i32_0 = arith.constant 0 : i32
    return %c0_i32, %arg1 : i32, i32
  }
  func.func @transform_3(%arg0: i32, %arg1: i32, %arg2: i32) -> (i32, i32) {
    %c0_i32 = arith.constant 0 : i32
    %c0_i32_0 = arith.constant 0 : i32
    return %c0_i32, %arg1 : i32, i32
  }
  func.func @transform_4(%arg0: i32, %arg1: i32, %arg2: i32) -> (i32, i32) {
    %c0_i32 = arith.constant 0 : i32
    return %arg0, %arg1 : i32, i32
  }
}

module attributes {stable_mosaic.version = 11 : i64} {
  func.func @_matmul_affine_kernel(%arg0: i32, %arg1: i32, %arg2: i32, %arg3: memref<512x32xbf16, #tpu.memory_space<vmem>>, %arg4: memref<32x128xbf16, #tpu.memory_space<vmem>>, %arg5: memref<1x128xf32, #tpu.memory_space<vmem>>, %arg6: memref<1x128xf32, #tpu.memory_space<vmem>>, %arg7: memref<512x128xf32, #tpu.memory_space<vmem>>, %arg8: memref<512x128xf32, #tpu.memory_space<vmem>>) attributes {dimension_semantics = [#tpu.dimension_semantics<parallel>, #tpu.dimension_semantics<parallel>, #tpu.dimension_semantics<arbitrary>], iteration_bounds = array<i64: 1, 1, 1>, scalar_prefetch = 0 : i64, scratch_operands = 1 : i64, tpu.core_type = #tpu.core_type<tc>, window_params = [{transform_indices = @transform_0, window_bounds = array<i64: 512, 32>}, {transform_indices = @transform_1, window_bounds = array<i64: 32, 128>}, {transform_indices = @transform_2, window_bounds = array<i64: 1, 128>}, {transform_indices = @transform_3, window_bounds = array<i64: 1, 128>}, {transform_indices = @transform_4, window_bounds = array<i64: 512, 128>}]} {
    %c0_i32 = arith.constant 0 : i32
    %0 = arith.cmpi eq, %arg2, %c0_i32 : i32
    %1 = arith.extui %0 : i1 to i32
    %c0_i32_0 = arith.constant 0 : i32
    %2 = arith.cmpi ne, %1, %c0_i32_0 : i32
    scf.if %2 {
      %cst_10 = arith.constant 0.000000e+00 : f32
      %12 = vector.broadcast %cst_10 : f32 to vector<512x128xf32>
      %c0_11 = arith.constant 0 : index
      %c0_12 = arith.constant 0 : index
      %13 = vector.load %arg8[%c0_11, %c0_12] : memref<512x128xf32, #tpu.memory_space<vmem>>, vector<512x128xf32>
      tpu.vector_store %arg8[%c0_11, %c0_12], %12 {strides = array<i32>} : memref<512x128xf32, #tpu.memory_space<vmem>>, vector<512x128xf32>,
    } else {
    }
    %c0 = arith.constant 0 : index
    %c0_1 = arith.constant 0 : index
    %3 = vector.load %arg8[%c0, %c0_1] : memref<512x128xf32, #tpu.memory_space<vmem>>, vector<512x128xf32>
    %c0_2 = arith.constant 0 : index
    %c0_3 = arith.constant 0 : index
    %4 = vector.load %arg3[%c0_2, %c0_3] : memref<512x32xbf16, #tpu.memory_space<vmem>>, vector<512x32xbf16>
    %c0_4 = arith.constant 0 : index
    %c0_5 = arith.constant 0 : index
    %5 = vector.load %arg4[%c0_4, %c0_5] : memref<32x128xbf16, #tpu.memory_space<vmem>>, vector<32x128xbf16>
    %cst = arith.constant dense<0.000000e+00> : vector<512x128xf32>
    %6 = tpu.matmul %4, %5, %cst {dimension_numbers = #tpu.dot_dimension_numbers<[1], [0], [0], [1], [0, 0, 1, 1], [], []>} : vector<512x32xbf16>, vector<32x128xbf16>, vector<512x128xf32> -> vector<512x128xf32>
    %7 = arith.addf %3, %6 : vector<512x128xf32>
    %c0_6 = arith.constant 0 : index
    %c0_7 = arith.constant 0 : index
    %8 = vector.load %arg8[%c0_6, %c0_7] : memref<512x128xf32, #tpu.memory_space<vmem>>, vector<512x128xf32>
    tpu.vector_store %arg8[%c0_6, %c0_7], %7 {strides = array<i32>} : memref<512x128xf32, #tpu.memory_space<vmem>>, vector<512x128xf32>,
    %c0_i32_8 = arith.constant 0 : i32
    %9 = arith.cmpi eq, %arg2, %c0_i32_8 : i32
    %10 = arith.extui %9 : i1 to i32
    %c0_i32_9 = arith.constant 0 : i32
    %11 = arith.cmpi ne, %10, %c0_i32_9 : i32
    scf.if %11 {
      %c0_10 = arith.constant 0 : index
      %c0_11 = arith.constant 0 : index
      %12 = vector.load %arg8[%c0_10, %c0_11] : memref<512x128xf32, #tpu.memory_space<vmem>>, vector<512x128xf32>
      %c0_12 = arith.constant 0 : index
      %c0_13 = arith.constant 0 : index
      %13 = vector.load %arg5[%c0_12, %c0_13] : memref<1x128xf32, #tpu.memory_space<vmem>>, vector<1x128xf32>
      %14 = vector.broadcast %13 : vector<1x128xf32> to vector<512x128xf32>
      %15 = arith.mulf %12, %14 : vector<512x128xf32>
      %c0_14 = arith.constant 0 : index
      %c0_15 = arith.constant 0 : index
      %16 = vector.load %arg6[%c0_14, %c0_15] : memref<1x128xf32, #tpu.memory_space<vmem>>, vector<1x128xf32>
      %17 = vector.broadcast %16 : vector<1x128xf32> to vector<512x128xf32>
      %18 = arith.addf %15, %17 : vector<512x128xf32>
      %c0_16 = arith.constant 0 : index
      %c0_17 = arith.constant 0 : index
      %19 = vector.load %arg7[%c0_16, %c0_17] : memref<512x128xf32, #tpu.memory_space<vmem>>, vector<512x128xf32>
      tpu.vector_store %arg7[%c0_16, %c0_17], %18 {strides = array<i32>} : memref<512x128xf32, #tpu.memory_space<vmem>>, vector<512x128xf32>,
    } else {
    }
    return
  }
  func.func @transform_0(%arg0: i32, %arg1: i32, %arg2: i32) -> (i32, i32) {
    %c0_i32 = arith.constant 0 : i32
    return %arg0, %arg2 : i32, i32
  }
  func.func @transform_1(%arg0: i32, %arg1: i32, %arg2: i32) -> (i32, i32) {
    %c0_i32 = arith.constant 0 : i32
    return %arg2, %arg1 : i32, i32
  }
  func.func @transform_2(%arg0: i32, %arg1: i32, %arg2: i32) -> (i32, i32) {
    %c0_i32 = arith.constant 0 : i32
    %c0_i32_0 = arith.constant 0 : i32
    return %c0_i32, %arg1 : i32, i32
  }
  func.func @transform_3(%arg0: i32, %arg1: i32, %arg2: i32) -> (i32, i32) {
    %c0_i32 = arith.constant 0 : i32
    %c0_i32_0 = arith.constant 0 : i32
    return %c0_i32, %arg1 : i32, i32
  }
  func.func @transform_4(%arg0: i32, %arg1: i32, %arg2: i32) -> (i32, i32) {
    %c0_i32 = arith.constant 0 : i32
    return %arg0, %arg1 : i32, i32
  }
}

</mosaic_0001>

<bundles_post_ra>
// kernel: unet_forward.19
= control target key start
LH: loop header
LB: loop body
LE: loop exit
PB: predicated region body
PF: predicated region fallthrough
CT: control target
= control target key end

     0   :  { %s2186_s6 = smov 0   ;;  %s2188_s7 = smov 0   ;;  %s3537_s0 = inlined_call_operand.vmem [shape: bf16[2,8,2,8,2,32], index: 0, kind: input, shape index: {}]   ;;  %s3538_s1 = inlined_call_operand.vmem [shape: bf16[2,8,8,32], index: 1, kind: output, shape index: {}]  }
   0x1   :  { %s2190_s8 = smov 0  }
   0x2 LB: > { %s23_s9 = sadd.s32 1, %s2169_s7  ;;  %p2055_p0 = scmp.ge.s32.totalorder %s2173_s8, 1  ;;  %s2173_s8 = sphi %s2190_s8, %s11_s8   ;;  %s2169_s7 = sphi %s2188_s7, %s3854_s7   ;;  %s2165_s6 = sphi %s2186_s6, %s3853_s6  }
   0x3   : > { %p25_p1 = scmp.ge.s32.totalorder %s23_s9, 2  ;;  %p108_p2 = scmp.lt.s32.totalorder %s2173_s8, 3 }
   0x5   : > { %s3856_s9 = smov (%p25_p1, %s23_s9), 0  ;;  %p109_p3 = pnand %p2055_p0, %p108_p2 }
   0x7   : > { %112 = sbr.rel (%p109_p3) target bundleno = 185 (0xb9), region = 24 }
   0xc   : > { %p137_p4 = scmp.lt.s32.totalorder %s2165_s6, 1  ;;  %v863_v0 = vlaneseq  ;;  %v2175_v1 = vmov 1935823168   ;;  %vm1821_vm0 = vcmask 1041409   ;;  %vm1824_vm1 = vcmask 1042434  }
   0xd   : > { %v861_v2 = vunpack.c.l.s4 %v2175_v1  ;;  %vm1827_vm2 = vcmask 1043459   ;;  %vm1830_vm3 = vcmask 1044484   ;;  %vm1833_vm4 = vcmask 1045509  }
   0xe   : > { %s3858_s6 = smov (!%p137_p4, %s2165_s6), 1  ;;  %v864_v3 = vshrl.u32 %v863_v0, 7  ;;  %vm1836_vm5 = vcmask 1046534   ;;  %vm1839_vm6 = vcmask 1047559   ;;  %vm1955_vm7 = vcmask 257024  }
   0xf   : > { %s2056_s10 = sshll.u32 %s3858_s6, 7  ;;  %v862_v18 = vunpack.c.0.s8 %v861_v2  ;;  %s2125_s14 = sshll.u32 %s3858_s6, 5 }
  0x10   : > { %s2210_s13 = scalar_lea.vmem %s3537_s0, %s2056_s10  ;;  %s154_s17 = scalar_lea.vmem %s3538_s1, %s2125_s14 }
  0x11   : > { %v156_v4 = vld [vmem:[%s2210_s13] sm:$0x1]  ;;  %v157_v5 = vld [vmem:[%s2210_s13 + $0x1] sm:$0x1]  ;;  %v158_v6 = vld [vmem:[%s2210_s13 + $0x2] sm:$0x1]  ;;  %v2290_v54 = vsub.s32 %v862_v18, %v864_v3 }
  0x12   : > { %v164_v7 = vld [vmem:[%s2210_s13 + $0x8] sm:$0x1]  ;;  %v165_v8 = vld [vmem:[%s2210_s13 + $0x9] sm:$0x1]  ;;  %v166_v9 = vld [vmem:[%s2210_s13 + $0xa] sm:$0x1] }
  0x13   : > { %v159_v10 = vld [vmem:[%s2210_s13 + $0x3] sm:$0x1]  ;;  %v160_v11 = vld [vmem:[%s2210_s13 + $0x4] sm:$0x1]  ;;  %v161_v12 = vld [vmem:[%s2210_s13 + $0x5] sm:$0x1]  ;;  %v2284_v51 = vmax.bf16 %v164_v7, %v156_v4  ;;  %v2286_v52 = vmax.bf16 %v165_v8, %v157_v5  ;;  %v2288_v53 = vmax.bf16 %v166_v9, %v158_v6 }
  0x14   : > { %v162_v13 = vld [vmem:[%s2210_s13 + $0x6] sm:$0x1]  ;;  %v167_v14 = vld [vmem:[%s2210_s13 + $0xb] sm:$0x1]  ;;  %v168_v15 = vld [vmem:[%s2210_s13 + $0xc] sm:$0x1] }
  0x15   : > { %v169_v16 = vld [vmem:[%s2210_s13 + $0xd] sm:$0x1]  ;;  %v170_v17 = vld [vmem:[%s2210_s13 + $0xe] sm:$0x1]  ;;  %v163_v19 = vld [vmem:[%s2210_s13 + $0x7] sm:$0x1]  ;;  %v2316_v63 = vmax.bf16 %v167_v14, %v159_v10  ;;  %v2318_v0 = vmax.bf16 %v168_v15, %v160_v11 }
  0x16   : > { %v171_v20 = vld [vmem:[%s2210_s13 + $0xf] sm:$0x1]  ;;  %v172_v21 = vld [vmem:[%s2210_s13 + $0x10] sm:$0x1]  ;;  %v173_v22 = vld [vmem:[%s2210_s13 + $0x11] sm:$0x1]  ;;  %v2320_v1 = vmax.bf16 %v169_v16, %v161_v12  ;;  %v2322_v2 = vmax.bf16 %v170_v17, %v162_v13 }
  0x17   : > { %v174_v23 = vld [vmem:[%s2210_s13 + $0x12] sm:$0x1]  ;;  %v180_v24 = vld [vmem:[%s2210_s13 + $0x18] sm:$0x1]  ;;  %v181_v25 = vld [vmem:[%s2210_s13 + $0x19] sm:$0x1]  ;;  %v2340_v11 = vmax.bf16 %v171_v20, %v163_v19 }
  0x18   : > { %v182_v26 = vld [vmem:[%s2210_s13 + $0x1a] sm:$0x1]  ;;  %v175_v27 = vld [vmem:[%s2210_s13 + $0x13] sm:$0x1]  ;;  %v176_v28 = vld [vmem:[%s2210_s13 + $0x14] sm:$0x1]  ;;  %v2342_v12 = vmax.bf16 %v180_v24, %v172_v21  ;;  %v2344_v13 = vmax.bf16 %v181_v25, %v173_v22 }
  0x19   : > { %v177_v29 = vld [vmem:[%s2210_s13 + $0x15] sm:$0x1]  ;;  %v178_v30 = vld [vmem:[%s2210_s13 + $0x16] sm:$0x1]  ;;  %v183_v31 = vld [vmem:[%s2210_s13 + $0x1b] sm:$0x1]  ;;  %v2346_v14 = vmax.bf16 %v182_v26, %v174_v23 }
  0x1a   : > { %v184_v32 = vld [vmem:[%s2210_s13 + $0x1c] sm:$0x1]  ;;  %v185_v33 = vld [vmem:[%s2210_s13 + $0x1d] sm:$0x1]  ;;  %v186_v34 = vld [vmem:[%s2210_s13 + $0x1e] sm:$0x1]  ;;  %v2366_v23 = vmax.bf16 %v183_v31, %v175_v27 }
  0x1b   : > { %v2243_v35 = vld [vmem:[%s2210_s13 + $0x17] sm:$0x1]  ;;  %v2246_v36 = vld [vmem:[%s2210_s13 + $0x1f] sm:$0x1]  ;;  %v2249_v37 = vld [vmem:[%s2210_s13 + $0x20] sm:$0x1]  ;;  %v2368_v24 = vmax.bf16 %v184_v32, %v176_v28  ;;  %v2370_v25 = vmax.bf16 %v185_v33, %v177_v29  ;;  %v2372_v26 = vmax.bf16 %v186_v34, %v178_v30 }
  0x1c   : > { %v2252_v38 = vld [vmem:[%s2210_s13 + $0x21] sm:$0x1]  ;;  %v2255_v39 = vld [vmem:[%s2210_s13 + $0x22] sm:$0x1]  ;;  %v196_v40 = vld [vmem:[%s2210_s13 + $0x28] sm:$0x1]  ;;  %v2384_v29 = vmax.bf16 %v2246_v36, %v2243_v35 }
  0x1d   : > { %v197_v41 = vld [vmem:[%s2210_s13 + $0x29] sm:$0x1]  ;;  %v198_v42 = vld [vmem:[%s2210_s13 + $0x2a] sm:$0x1]  ;;  %v2261_v43 = vld [vmem:[%s2210_s13 + $0x23] sm:$0x1]  ;;  %v2387_v30 = vmax.bf16 %v196_v40, %v2249_v37 }
  0x1e   : > { %v2264_v44 = vld [vmem:[%s2210_s13 + $0x24] sm:$0x1]  ;;  %v2267_v45 = vld [vmem:[%s2210_s13 + $0x25] sm:$0x1]  ;;  %v2270_v46 = vld [vmem:[%s2210_s13 + $0x26] sm:$0x1]  ;;  %v2390_v32 = vmax.bf16 %v197_v41, %v2252_v38  ;;  %v2393_v33 = vmax.bf16 %v198_v42, %v2255_v39 }
  0x1f   : > { %v2273_v47 = vld [vmem:[%s2210_s13 + $0x2b] sm:$0x1]  ;;  %v2276_v48 = vld [vmem:[%s2210_s13 + $0x2c] sm:$0x1]  ;;  %v2279_v49 = vld [vmem:[%s2210_s13 + $0x2d] sm:$0x1] }
  0x20   : > { %v2282_v50 = vld [vmem:[%s2210_s13 + $0x2e] sm:$0x1]  ;;  %3591 = vst [vmem:[#allocation2_spill] sm:$0xff] %v2290_v54  ;;  %v2293_v55 = vld [vmem:[%s2210_s13 + $0x27] sm:$0x1]  ;;  %3592 = vst [vmem:[#allocation3_spill] sm:$0xff] %v2342_v12  ;;  %v2405_v38 = vmax.bf16 %v2273_v47, %v2261_v43  ;;  %v2409_v39 = vmax.bf16 %v2276_v48, %v2264_v44  ;;  %v2413_v41 = vmax.bf16 %v2279_v49, %v2267_v45 }
  0x21   : > { %v2296_v56 = vld [vmem:[%s2210_s13 + $0x2f] sm:$0x1]  ;;  %v2299_v57 = vld [vmem:[%s2210_s13 + $0x30] sm:$0x1]  ;;  %v2302_v58 = vld [vmem:[%s2210_s13 + $0x31] sm:$0x1]  ;;  %v2417_v42 = vmax.bf16 %v2282_v50, %v2270_v46 }
  0x22   : > { %v2305_v59 = vld [vmem:[%s2210_s13 + $0x32] sm:$0x1]  ;;  %v2308_v60 = vld [vmem:[%s2210_s13 + $0x38] sm:$0x1]  ;;  %v2311_v61 = vld [vmem:[%s2210_s13 + $0x39] sm:$0x1]  ;;  %v2429_v45 = vmax.bf16 %v2296_v56, %v2293_v55 }
  0x23   : > { %v2314_v62 = vld [vmem:[%s2210_s13 + $0x3a] sm:$0x1]  ;;  %v2325_v3 = vld [vmem:[%s2210_s13 + $0x33] sm:$0x1]  ;;  %v2328_v4 = vld [vmem:[%s2210_s13 + $0x34] sm:$0x1]  ;;  %v2433_v46 = vmax.bf16 %v2308_v60, %v2299_v57  ;;  %v2437_v49 = vmax.bf16 %v2311_v61, %v2302_v58 }
  0x24   : > { %v2331_v5 = vld [vmem:[%s2210_s13 + $0x35] sm:$0x1]  ;;  %v2334_v6 = vld [vmem:[%s2210_s13 + $0x36] sm:$0x1]  ;;  %v215_v7 = vld [vmem:[%s2210_s13 + $0x3b] sm:$0x1]  ;;  %v2441_v50 = vmax.bf16 %v2314_v62, %v2305_v59 }
  0x25   : > { %v216_v8 = vld [vmem:[%s2210_s13 + $0x3c] sm:$0x1]  ;;  %v217_v9 = vld [vmem:[%s2210_s13 + $0x3d] sm:$0x1]  ;;  %v218_v10 = vld [vmem:[%s2210_s13 + $0x3e] sm:$0x1]  ;;  %v2450_v57 = vmax.bf16 %v215_v7, %v2325_v3 }
  0x26   : > { %3593 = vst [vmem:[#allocation4_spill] sm:$0xff] %v2344_v13  ;;  %3594 = vst [vmem:[#allocation5_spill] sm:$0xff] %v2346_v14  ;;  %v2349_v15 = vld [vmem:[%s2210_s13 + $0x37] sm:$0x1]  ;;  %v2352_v16 = vld [vmem:[%s2210_s13 + $0x3f] sm:$0x1]  ;;  %v2453_v58 = vmax.bf16 %v216_v8, %v2328_v4  ;;  %v2456_v59 = vmax.bf16 %v217_v9, %v2331_v5  ;;  %v2459_v60 = vmax.bf16 %v218_v10, %v2334_v6 }
  0x27   : > { %v2355_v17 = vld [vmem:[%s2210_s13 + $0x40] sm:$0x1]  ;;  %v2358_v18 = vld [vmem:[%s2210_s13 + $0x41] sm:$0x1]  ;;  %v2361_v19 = vld [vmem:[%s2210_s13 + $0x42] sm:$0x1]  ;;  %v2470_v4 = vmax.bf16 %v2352_v16, %v2349_v15 }
  0x28   : > { %v228_v20 = vld [vmem:[%s2210_s13 + $0x48] sm:$0x1]  ;;  %v229_v21 = vld [vmem:[%s2210_s13 + $0x49] sm:$0x1]  ;;  %v230_v22 = vld [vmem:[%s2210_s13 + $0x4a] sm:$0x1] }
  0x29   : > { %3595 = vst [vmem:[#allocation6_spill] sm:$0xff] %v2366_v23  ;;  %3596 = vst [vmem:[#allocation7_spill] sm:$0xff] %v2368_v24  ;;  %v223_v54 = vld [vmem:[%s2210_s13 + $0x43] sm:$0x1]  ;;  %v224_v14 = vld [vmem:[%s2210_s13 + $0x44] sm:$0x1]  ;;  %v2473_v5 = vmax.bf16 %v228_v20, %v2355_v17  ;;  %v2476_v6 = vmax.bf16 %v229_v21, %v2358_v18  ;;  %v2479_v8 = vmax.bf16 %v230_v22, %v2361_v19 }
  0x2a   : > { %3597 = vst [vmem:[#allocation8_spill] sm:$0xff] %v2370_v25  ;;  %3598 = vst [vmem:[#allocation9_spill] sm:$0xff] %v2372_v26  ;;  %v225_v13 = vld [vmem:[%s2210_s13 + $0x45] sm:$0x1]  ;;  %v226_v12 = vld [vmem:[%s2210_s13 + $0x46] sm:$0x1] }
  0x2b   : > { %v231_v27 = vld [vmem:[%s2210_s13 + $0x4b] sm:$0x1]  ;;  %v232_v31 = vld [vmem:[%s2210_s13 + $0x4c] sm:$0x1]  ;;  %v233_v23 = vld [vmem:[%s2210_s13 + $0x4d] sm:$0x1] }
  0x2c   : > { %v234_v28 = vld [vmem:[%s2210_s13 + $0x4e] sm:$0x1]  ;;  %3599 = vst [vmem:[#allocation10_spill] sm:$0xff] %v2384_v29  ;;  %3600 = vst [vmem:[#allocation11_spill] sm:$0xff] %v2387_v30  ;;  %v227_v34 = vld [vmem:[%s2210_s13 + $0x47] sm:$0x1]  ;;  %v2487_v15 = vmax.bf16 %v232_v31, %v224_v14  ;;  %v2489_v16 = vmax.bf16 %v233_v23, %v225_v13 }
  0x2d   : > { %3601 = vst [vmem:[#allocation12_spill] sm:$0xff] %v2390_v32  ;;  %3602 = vst [vmem:[#allocation13_spill] sm:$0xff] %v2393_v33  ;;  %v235_v26 = vld [vmem:[%s2210_s13 + $0x4f] sm:$0x1]  ;;  %v236_v25 = vld [vmem:[%s2210_s13 + $0x50] sm:$0x1]  ;;  %v2491_v17 = vmax.bf16 %v234_v28, %v226_v12 }
  0x2e   : > { %v237_v35 = vld [vmem:[%s2210_s13 + $0x51] sm:$0x1]  ;;  %v238_v36 = vld [vmem:[%s2210_s13 + $0x52] sm:$0x1]  ;;  %v244_v37 = vld [vmem:[%s2210_s13 + $0x58] sm:$0x1]  ;;  %v2496_v21 = vmax.bf16 %v235_v26, %v227_v34 }
  0x2f   : > { %v245_v40 = vld [vmem:[%s2210_s13 + $0x59] sm:$0x1]  ;;  %v246_v30 = vld [vmem:[%s2210_s13 + $0x5a] sm:$0x1]  ;;  %3603 = vst [vmem:[#allocation14_spill] sm:$0xff] %v2405_v38  ;;  %3604 = vst [vmem:[#allocation15_spill] sm:$0xff] %v2409_v39  ;;  %v2498_v22 = vmax.bf16 %v244_v37, %v236_v25 }
  0x30   : > { %3605 = vst [vmem:[#allocation16_spill] sm:$0xff] %v2413_v41  ;;  %3606 = vst [vmem:[#allocation17_spill] sm:$0xff] %v2417_v42  ;;  %v239_v33 = vld [vmem:[%s2210_s13 + $0x53] sm:$0x1]  ;;  %v240_v43 = vld [vmem:[%s2210_s13 + $0x54] sm:$0x1] }
  0x31   : > { %v241_v47 = vld [vmem:[%s2210_s13 + $0x55] sm:$0x1]  ;;  %v242_v38 = vld [vmem:[%s2210_s13 + $0x56] sm:$0x1]  ;;  %v247_v32 = vld [vmem:[%s2210_s13 + $0x5b] sm:$0x1] }
  0x32   : > { %v248_v44 = vld [vmem:[%s2210_s13 + $0x5c] sm:$0x1]  ;;  %v249_v48 = vld [vmem:[%s2210_s13 + $0x5d] sm:$0x1]  ;;  %v250_v39 = vld [vmem:[%s2210_s13 + $0x5e] sm:$0x1]  ;;  %v2507_v23 = vmax.bf16 %v247_v32, %v239_v33 }
  0x33   : > { %3607 = vst [vmem:[#allocation18_spill] sm:$0xff] %v2429_v45  ;;  %3608 = vst [vmem:[#allocation19_spill] sm:$0xff] %v2433_v46  ;;  %v243_v42 = vld [vmem:[%s2210_s13 + $0x57] sm:$0x1]  ;;  %v251_v55 = vld [vmem:[%s2210_s13 + $0x5f] sm:$0x1]  ;;  %v2511_v31 = vmax.bf16 %v249_v48, %v241_v47  ;;  %v2513_v26 = vmax.bf16 %v250_v39, %v242_v38 }
  0x34   : > { %3609 = vst [vmem:[#allocation20_spill] sm:$0xff] %v2437_v49  ;;  %3610 = vst [vmem:[#allocation21_spill] sm:$0xff] %v2441_v50  ;;  %v252_v56 = vld [vmem:[%s2210_s13 + $0x60] sm:$0x1]  ;;  %v253_v45 = vld [vmem:[%s2210_s13 + $0x61] sm:$0x1]  ;;  %v2518_v34 = vmax.bf16 %v251_v55, %v243_v42 }
  0x35   : > { %v254_v41 = vld [vmem:[%s2210_s13 + $0x62] sm:$0x1]  ;;  %v260_v29 = vld [vmem:[%s2210_s13 + $0x68] sm:$0x1]  ;;  %3611 = vst [vmem:[#allocation22_spill] sm:$0xff] %v2453_v58  ;;  %3612 = vst [vmem:[#allocation23_spill] sm:$0xff] %v2456_v59  ;;  %v2485_v58 = vmax.bf16 %v231_v27, %v223_v54  ;;  %v2502_v54 = vmax.bf16 %v246_v30, %v238_v36  ;;  %v2509_v27 = vmax.bf16 %v248_v44, %v240_v43 }
  0x36   : > { %3613 = vst [vmem:[#allocation24_spill] sm:$0xff] %v2459_v60  ;;  %v255_v61 = vld [vmem:[%s2210_s13 + $0x63] sm:$0x1]  ;;  %v256_v62 = vld [vmem:[%s2210_s13 + $0x64] sm:$0x1]  ;;  %3614 = vst [vmem:[#allocation25_spill] sm:$0xff] %v2479_v8  ;;  %v2500_v8 = vmax.bf16 %v245_v40, %v237_v35  ;;  %v2520_v35 = vmax.bf16 %v260_v29, %v252_v56 }
  0x37   : > { %v257_v50 = vld [vmem:[%s2210_s13 + $0x65] sm:$0x1]  ;;  %v258_v49 = vld [vmem:[%s2210_s13 + $0x66] sm:$0x1]  ;;  %v261_v46 = vld [vmem:[%s2210_s13 + $0x69] sm:$0x1] }
  0x38   : > { %v262_v3 = vld [vmem:[%s2210_s13 + $0x6a] sm:$0x1]  ;;  %v263_v7 = vld [vmem:[%s2210_s13 + $0x6b] sm:$0x1]  ;;  %v259_v9 = vld [vmem:[%s2210_s13 + $0x67] sm:$0x1]  ;;  %v2522_v36 = vmax.bf16 %v261_v46, %v253_v45 }
  0x39   : > { %v264_v10 = vld [vmem:[%s2210_s13 + $0x6c] sm:$0x1]  ;;  %v265_v60 = vld [vmem:[%s2210_s13 + $0x6d] sm:$0x1]  ;;  %v266_v59 = vld [vmem:[%s2210_s13 + $0x6e] sm:$0x1]  ;;  %v2524_v32 = vmax.bf16 %v262_v3, %v254_v41  ;;  %v2529_v38 = vmax.bf16 %v263_v7, %v255_v61 }
  0x3a   : > { %v267_v18 = vld [vmem:[%s2210_s13 + $0x6f] sm:$0x1]  ;;  %v268_v19 = vld [vmem:[%s2210_s13 + $0x70] sm:$0x1]  ;;  %v269_v20 = vld [vmem:[%s2210_s13 + $0x71] sm:$0x1]  ;;  %v2531_v39 = vmax.bf16 %v264_v10, %v256_v62  ;;  %v2533_v43 = vmax.bf16 %v265_v60, %v257_v50  ;;  %v2535_v47 = vmax.bf16 %v266_v59, %v258_v49 }
  0x3b   : > { %v270_v13 = vld [vmem:[%s2210_s13 + $0x72] sm:$0x1]  ;;  %v271_v14 = vld [vmem:[%s2210_s13 + $0x73] sm:$0x1]  ;;  %v272_v12 = vld [vmem:[%s2210_s13 + $0x74] sm:$0x1]  ;;  %v2540_v48 = vmax.bf16 %v267_v18, %v259_v9 }
  0x3c   : > { %v273_v25 = vld [vmem:[%s2210_s13 + $0x75] sm:$0x1]  ;;  %v274_v28 = vld [vmem:[%s2210_s13 + $0x76] sm:$0x1]  ;;  %v275_v30 = vld [vmem:[%s2210_s13 + $0x77] sm:$0x1] }
  0x3d   : > { %v276_v33 = vld [vmem:[%s2210_s13 + $0x78] sm:$0x1]  ;;  %v277_v37 = vld [vmem:[%s2210_s13 + $0x79] sm:$0x1]  ;;  %v278_v40 = vld [vmem:[%s2210_s13 + $0x7a] sm:$0x1] }
  0x3e   : > { %v279_v42 = vld [vmem:[%s2210_s13 + $0x7b] sm:$0x1]  ;;  %v280_v29 = vld [vmem:[%s2210_s13 + $0x7c] sm:$0x1]  ;;  %v281_v44 = vld [vmem:[%s2210_s13 + $0x7d] sm:$0x1]  ;;  %v2542_v45 = vmax.bf16 %v276_v33, %v268_v19  ;;  %v2544_v41 = vmax.bf16 %v277_v37, %v269_v20  ;;  %v2546_v46 = vmax.bf16 %v278_v40, %v270_v13 }
  0x3f   : > { %v282_v55 = vld [vmem:[%s2210_s13 + $0x7e] sm:$0x1]  ;;  %v283_v56 = vld [vmem:[%s2210_s13 + $0x7f] sm:$0x1]  ;;  %v2550_v61 = vmax.bf16 %v279_v42, %v271_v14  ;;  %v2552_v62 = vmax.bf16 %v280_v29, %v272_v12  ;;  %v2554_v50 = vmax.bf16 %v281_v44, %v273_v25  ;;  %v3615_v13 = vld [vmem:[#allocation3_spill] sm:$0xff]  ;;  %v3638_v20 = vshrl.u32 %v2286_v52, 16 }
  0x40   : > { %v2557_v59 = vmax.bf16 %v282_v55, %v274_v28  ;;  %v2559_v60 = vmax.bf16 %v283_v56, %v275_v30  ;;  %v3616_v12 = vld [vmem:[#allocation4_spill] sm:$0xff]  ;;  %v3622_v10 = vld [vmem:[#allocation11_spill] sm:$0xff]  ;;  %v3628_v33 = vld [vmem:[#allocation17_spill] sm:$0xff]  ;;  %v3637_v55 = vshrl.u32 %v2284_v51, 16  ;;  %v3639_v25 = vshrl.u32 %v2288_v53, 16 }
  0x41   : > { %v3626_v49 = vld [vmem:[#allocation15_spill] sm:$0xff]  ;;  %v3627_v28 = vld [vmem:[#allocation16_spill] sm:$0xff]  ;;  %v3632_v56 = vld [vmem:[#allocation21_spill] sm:$0xff]  ;;  %v2632_v19 = vmax.bf16 %v3638_v20, %v2286_v52  ;;  %v3640_v40 = vshrl.u32 %v2316_v63, 16  ;;  %v3641_v29 = vshrl.u32 %v2318_v0, 16  ;;  %v3643_v20 = vshrl.u32 %v2322_v2, 16 }
  0x42   : > { %v3630_v42 = vld [vmem:[#allocation19_spill] sm:$0xff]  ;;  %v3631_v44 = vld [vmem:[#allocation20_spill] sm:$0xff]  ;;  %v3633_v9 = vld [vmem:[#allocation22_spill] sm:$0xff]  ;;  %v2627_v18 = vmax.bf16 %v3637_v55, %v2284_v51  ;;  %v2637_v30 = vmax.bf16 %v3639_v25, %v2288_v53  ;;  %v3642_v55 = vshrl.u32 %v2320_v1, 16  ;;  %v3645_v25 = vshrl.u32 %v2340_v11, 16 }
  0x43   : > { %v3634_v7 = vld [vmem:[#allocation23_spill] sm:$0xff]  ;;  %v3635_v3 = vld [vmem:[#allocation24_spill] sm:$0xff]  ;;  %v3636_v24 = vld [vmem:[#allocation25_spill] sm:$0xff]  ;;  %v2642_v37 = vmax.bf16 %v3640_v40, %v2316_v63  ;;  %v2647_v51 = vmax.bf16 %v3641_v29, %v2318_v0  ;;  %v2657_v53 = vmax.bf16 %v3643_v20, %v2322_v2  ;;  %v3647_v40 = vshrl.u32 %v3615_v13, 16 }
  0x44   : > { %v2652_v52 = vmax.bf16 %v3642_v55, %v2320_v1  ;;  %v2662_v63 = vmax.bf16 %v3645_v25, %v2340_v11  ;;  %v3649_v29 = vshrl.u32 %v3616_v12, 16  ;;  %v3651_v55 = vld [vmem:[#allocation5_spill] sm:$0xff]  ;;  %v3654_v20 = vld [vmem:[#allocation6_spill] sm:$0xff]  ;;  %v3656_v25 = vld [vmem:[#allocation7_spill] sm:$0xff] }
  0x45   : > { %3644 = vst [vmem:[#allocation3_spill] sm:$0xff] %v2657_v53  ;;  %v2667_v0 = vmax.bf16 %v3647_v40, %v3615_v13  ;;  %v3652_v14 = vshrl.u32 %v3651_v55, 16  ;;  %v3655_v53 = vshrl.u32 %v3654_v20, 16  ;;  %v3659_v40 = vld [vmem:[#allocation8_spill] sm:$0xff] }
  0x46   : > { %3646 = vst [vmem:[#allocation4_spill] sm:$0xff] %v2662_v63  ;;  %v2672_v1 = vmax.bf16 %v3649_v29, %v3616_v12  ;;  %v3657_v63 = vshrl.u32 %v3656_v25, 16  ;;  %v3662_v29 = vld [vmem:[#allocation9_spill] sm:$0xff] }
  0x47   : > { %3648 = vst [vmem:[#allocation11_spill] sm:$0xff] %v2667_v0  ;;  %v2677_v2 = vmax.bf16 %v3652_v14, %v3651_v55  ;;  %v2682_v11 = vmax.bf16 %v3655_v53, %v3654_v20  ;;  %v3660_v0 = vshrl.u32 %v3659_v40, 16  ;;  %v3665_v55 = vld [vmem:[#allocation10_spill] sm:$0xff]  ;;  %v3667_v20 = vshrl.u32 %v3622_v10, 16 }
  0x48   : > { %3650 = vst [vmem:[#allocation15_spill] sm:$0xff] %v2672_v1  ;;  %v2687_v13 = vmax.bf16 %v3657_v63, %v3656_v25  ;;  %v3663_v1 = vshrl.u32 %v3662_v29, 16  ;;  %v3668_v25 = vld [vmem:[#allocation12_spill] sm:$0xff] }
  0x49   : > { %3653 = vst [vmem:[#allocation16_spill] sm:$0xff] %v2677_v2  ;;  %v2692_v12 = vmax.bf16 %v3660_v0, %v3659_v40  ;;  %v3666_v2 = vshrl.u32 %v3665_v55, 16  ;;  %v2707_v63 = vmax.bf16 %v3667_v20, %v3622_v10  ;;  %v3670_v40 = vld [vmem:[#allocation13_spill] sm:$0xff]  ;;  %v3676_v20 = vshrl.u32 %v3627_v28, 16 }
  0x4a   : > { %3658 = vst [vmem:[#allocation17_spill] sm:$0xff] %v2687_v13  ;;  %v2697_v14 = vmax.bf16 %v3663_v1, %v3662_v29  ;;  %v3669_v13 = vshrl.u32 %v3668_v25, 16  ;;  %v3673_v29 = vld [vmem:[#allocation14_spill] sm:$0xff] }
  0x4b   : > { %3661 = vst [vmem:[#allocation19_spill] sm:$0xff] %v2692_v12  ;;  %v2702_v53 = vmax.bf16 %v3666_v2, %v3665_v55  ;;  %v3671_v12 = vshrl.u32 %v3670_v40, 16  ;;  %v3675_v55 = vshrl.u32 %v3626_v49, 16 }
  0x4c   : > { %3664 = vst [vmem:[#allocation20_spill] sm:$0xff] %v2697_v14  ;;  %v2712_v0 = vmax.bf16 %v3669_v13, %v3668_v25  ;;  %v3674_v14 = vshrl.u32 %v3673_v29, 16  ;;  %v2732_v13 = vmax.bf16 %v3676_v20, %v3627_v28  ;;  %v3677_v25 = vshrl.u32 %v3628_v33, 16 }
  0x4d   : > { %v2717_v1 = vmax.bf16 %v3671_v12, %v3670_v40  ;;  %v2727_v10 = vmax.bf16 %v3675_v55, %v3626_v49  ;;  %v3678_v40 = vld [vmem:[#allocation18_spill] sm:$0xff]  ;;  %v3681_v55 = vshrl.u32 %v3631_v44, 16  ;;  %v3682_v20 = vshrl.u32 %v3632_v56, 16 }
  0x4e   : > { %v2722_v2 = vmax.bf16 %v3674_v14, %v3673_v29  ;;  %v2737_v12 = vmax.bf16 %v3677_v25, %v3628_v33  ;;  %v3680_v29 = vshrl.u32 %v3630_v42, 16  ;;  %v3683_v25 = vshrl.u32 %v2450_v57, 16 }
  0x4f   : > { %3672 = vst [vmem:[#allocation21_spill] sm:$0xff] %v2717_v1  ;;  %v3679_v1 = vshrl.u32 %v3678_v40, 16  ;;  %v2752_v28 = vmax.bf16 %v3681_v55, %v3631_v44  ;;  %v2757_v33 = vmax.bf16 %v3682_v20, %v3632_v56  ;;  %v3686_v55 = vshrl.u32 %v3635_v3, 16 }
  0x50   : > { %v2747_v49 = vmax.bf16 %v3680_v29, %v3630_v42  ;;  %v3685_v29 = vshrl.u32 %v3634_v7, 16  ;;  %v3687_v20 = vshrl.u32 %v2470_v4, 16 }
  0x51   : > { %v2742_v14 = vmax.bf16 %v3679_v1, %v3678_v40  ;;  %v2762_v1 = vmax.bf16 %v3683_v25, %v2450_v57  ;;  %v3684_v40 = vshrl.u32 %v3633_v9, 16  ;;  %v2777_v56 = vmax.bf16 %v3686_v55, %v3635_v3 }
  0x52   : > { %v2772_v44 = vmax.bf16 %v3685_v29, %v3634_v7  ;;  %v2782_v57 = vmax.bf16 %v3687_v20, %v2470_v4  ;;  %v3688_v25 = vshrl.u32 %v2473_v5, 16  ;;  %v3690_v29 = vshrl.u32 %v3636_v24, 16 }
  0x53   : > { %v2767_v42 = vmax.bf16 %v3684_v40, %v3633_v9  ;;  %v3689_v40 = vshrl.u32 %v2476_v6, 16  ;;  %v3691_v55 = vshrl.u32 %v2485_v58, 16  ;;  %v3692_v20 = vshrl.u32 %v2487_v15, 16 }
  0x54   : > { %v2787_v9 = vmax.bf16 %v3688_v25, %v2473_v5  ;;  %v2797_v3 = vmax.bf16 %v3690_v29, %v3636_v24  ;;  %v3693_v25 = vshrl.u32 %v2489_v16, 16  ;;  %v3695_v29 = vshrl.u32 %v2496_v21, 16 }
  0x55   : > { %v2792_v7 = vmax.bf16 %v3689_v40, %v2476_v6  ;;  %v2802_v4 = vmax.bf16 %v3691_v55, %v2485_v58  ;;  %v2807_v5 = vmax.bf16 %v3692_v20, %v2487_v15  ;;  %v3694_v40 = vshrl.u32 %v2491_v17, 16 }
  0x56   : > { %v2812_v6 = vmax.bf16 %v3693_v25, %v2489_v16  ;;  %v2822_v58 = vmax.bf16 %v3695_v29, %v2496_v21  ;;  %v3696_v55 = vshrl.u32 %v2498_v22, 16  ;;  %v3697_v20 = vshrl.u32 %v2500_v8, 16 }
  0x57   : > { %v2817_v24 = vmax.bf16 %v3694_v40, %v2491_v17  ;;  %v3698_v25 = vshrl.u32 %v2502_v54, 16  ;;  %v3699_v40 = vshrl.u32 %v2507_v23, 16  ;;  %v3700_v29 = vshrl.u32 %v2509_v27, 16 }
  0x58   : > { %v2827_v15 = vmax.bf16 %v3696_v55, %v2498_v22  ;;  %v2832_v16 = vmax.bf16 %v3697_v20, %v2500_v8  ;;  %v3701_v55 = vshrl.u32 %v2511_v31, 16  ;;  %v3702_v20 = vshrl.u32 %v2513_v26, 16 }
  0x59   : > { %v2837_v17 = vmax.bf16 %v3698_v25, %v2502_v54  ;;  %v2842_v21 = vmax.bf16 %v3699_v40, %v2507_v23  ;;  %v2847_v22 = vmax.bf16 %v3700_v29, %v2509_v27  ;;  %v3703_v25 = vshrl.u32 %v2518_v34, 16 }
  0x5a   : > { %v2852_v8 = vmax.bf16 %v3701_v55, %v2511_v31  ;;  %v2857_v54 = vmax.bf16 %v3702_v20, %v2513_v26  ;;  %v3704_v40 = vshrl.u32 %v2520_v35, 16  ;;  %v3705_v29 = vshrl.u32 %v2522_v36, 16 }
  0x5b   : > { %v2862_v23 = vmax.bf16 %v3703_v25, %v2518_v34  ;;  %v3706_v55 = vshrl.u32 %v2524_v32, 16  ;;  %v3707_v20 = vshrl.u32 %v2529_v38, 16  ;;  %v3708_v25 = vshrl.u32 %v2531_v39, 16 }
  0x5c   : > { %v2867_v27 = vmax.bf16 %v3704_v40, %v2520_v35  ;;  %v2872_v31 = vmax.bf16 %v3705_v29, %v2522_v36  ;;  %v3709_v40 = vshrl.u32 %v2533_v43, 16  ;;  %v3710_v29 = vshrl.u32 %v2535_v47, 16 }
  0x5d   : > { %v2877_v26 = vmax.bf16 %v3706_v55, %v2524_v32  ;;  %v2882_v34 = vmax.bf16 %v3707_v20, %v2529_v38  ;;  %v2887_v35 = vmax.bf16 %v3708_v25, %v2531_v39  ;;  %v3711_v55 = vshrl.u32 %v2540_v48, 16 }
  0x5e   : > { %v2892_v36 = vmax.bf16 %v3709_v40, %v2533_v43  ;;  %v2897_v32 = vmax.bf16 %v3710_v29, %v2535_v47  ;;  %v3712_v20 = vshrl.u32 %v2542_v45, 16  ;;  %v3713_v25 = vshrl.u32 %v2544_v41, 16 }
  0x5f   : > { %v2902_v38 = vmax.bf16 %v3711_v55, %v2540_v48  ;;  %v3714_v40 = vshrl.u32 %v2546_v46, 16  ;;  %v3715_v29 = vshrl.u32 %v2550_v61, 16  ;;  %v3717_v55 = vshrl.u32 %v2552_v62, 16 }
  0x60   : > { %v2907_v39 = vmax.bf16 %v3712_v20, %v2542_v45  ;;  %v2912_v43 = vmax.bf16 %v3713_v25, %v2544_v41  ;;  %v3718_v20 = vshrl.u32 %v2554_v50, 16  ;;  %v3719_v25 = vshrl.u32 %v2557_v59, 16 }
  0x61   : > { %v2917_v47 = vmax.bf16 %v3714_v40, %v2546_v46  ;;  %v2922_v48 = vmax.bf16 %v3715_v29, %v2550_v61  ;;  %v2927_v45 = vmax.bf16 %v3717_v55, %v2552_v62  ;;  %v3720_v40 = vshrl.u32 %v2559_v60, 16  ;;  %v3721_v29 = vld [vmem:[#allocation2_spill] sm:$0xff] }
  0x62   : > { %v2932_v41 = vmax.bf16 %v3718_v20, %v2554_v50  ;;  %v2937_v46 = vmax.bf16 %v3719_v25, %v2557_v59  ;;  %v880_v62 = vrot.slane %v2632_v19, %v3721_v29  ;;  %v894_v50 = vrot.slane %v2637_v30, %v3721_v29 }
  0x63   : > { %3716 = vst [vmem:[#allocation22_spill] sm:$0xff] %v2922_v48  ;;  %v2942_v61 = vmax.bf16 %v3720_v40, %v2559_v60  ;;  %v866_v48 = vrot.slane %v2627_v18, %v3721_v29  ;;  %v908_v55 = vrot.slane %v2642_v37, %v3721_v29  ;;  %v922_v59 = vrot.slane %v2647_v51, %v3721_v29  ;;  %v3722_v60 = vld [vmem:[#allocation3_spill] sm:$0xff]  ;;  %v3725_v37 = vld [vmem:[#allocation4_spill] sm:$0xff] }
  0x64   : > { %v936_v20 = vrot.slane %v2652_v52, %v3721_v29  ;;  %v950_v25 = vrot.slane %v3722_v60, %v3721_v29  ;;  %v2962_v19 = vrot.slane %v880_v62, %v3721_v29  ;;  %v2965_v30 = vrot.slane %v894_v50, %v3721_v29  ;;  %v3730_v50 = vld [vmem:[#allocation11_spill] sm:$0xff] }
  0x65   : > { %v2959_v18 = vrot.slane %v866_v48, %v3721_v29  ;;  %v964_v40 = vrot.slane %v3725_v37, %v3721_v29  ;;  %v2970_v51 = vrot.slane %v908_v55, %v3721_v29  ;;  %v2973_v52 = vrot.slane %v922_v59, %v3721_v29  ;;  %v3731_v37 = vld [vmem:[#allocation15_spill] sm:$0xff]  ;;  %v3732_v55 = vld [vmem:[#allocation16_spill] sm:$0xff] }
  0x66   : > { %3723 = vst [vmem:[#allocation23_spill] sm:$0xff] %v2962_v19  ;;  %3724 = vst [vmem:[#allocation24_spill] sm:$0xff] %v2965_v30  ;;  %v2976_v60 = vrot.slane %v936_v20, %v3721_v29  ;;  %v2979_v48 = vrot.slane %v950_v25, %v3721_v29  ;;  %v978_v30 = vrot.slane %v3730_v50, %v3721_v29  ;;  %v3733_v20 = vld [vmem:[#allocation17_spill] sm:$0xff]  ;;  %v3734_v25 = vld [vmem:[#allocation19_spill] sm:$0xff] }
  0x67   : > { %3726 = vst [vmem:[#allocation25_spill] sm:$0xff] %v2970_v51  ;;  %v2982_v62 = vrot.slane %v964_v40, %v3721_v29  ;;  %v992_v19 = vrot.slane %v3731_v37, %v3721_v29  ;;  %v1006_v51 = vrot.slane %v3732_v55, %v3721_v29  ;;  %v1020_v59 = vrot.slane %v2682_v11, %v3721_v29  ;;  %v3735_v40 = vld [vmem:[#allocation20_spill] sm:$0xff] }
  0x68   : > { %3727 = vst [vmem:[#allocation5_spill] sm:$0xff] %v2976_v60  ;;  %3728 = vst [vmem:[#allocation6_spill] sm:$0xff] %v2979_v48  ;;  %v1034_v60 = vrot.slane %v3733_v20, %v3721_v29  ;;  %v1048_v48 = vrot.slane %v3734_v25, %v3721_v29  ;;  %v2999_v50 = vrot.slane %v978_v30, %v3721_v29 }
  0x69   : > { %3729 = vst [vmem:[#allocation7_spill] sm:$0xff] %v2982_v62  ;;  %v1062_v62 = vrot.slane %v3735_v40, %v3721_v29  ;;  %v3002_v37 = vrot.slane %v992_v19, %v3721_v29  ;;  %v3005_v55 = vrot.slane %v1006_v51, %v3721_v29  ;;  %v1076_v11 = vrot.slane %v2702_v53, %v3721_v29 }
  0x6a   : > { %v3010_v20 = vrot.slane %v1020_v59, %v3721_v29  ;;  %v3013_v25 = vrot.slane %v1034_v60, %v3721_v29  ;;  %v3016_v40 = vrot.slane %v1048_v48, %v3721_v29  ;;  %v1090_v51 = vrot.slane %v2707_v63, %v3721_v29  ;;  %v3737_v59 = vld [vmem:[#allocation21_spill] sm:$0xff] }
  0x6b   : > { %v3019_v30 = vrot.slane %v1062_v62, %v3721_v29  ;;  %v3022_v19 = vrot.slane %v1076_v11, %v3721_v29  ;;  %v1104_v53 = vrot.slane %v2712_v0, %v3721_v29  ;;  %v1132_v60 = vrot.slane %v2722_v2, %v3721_v29 }
  0x6c   : > { %3736 = vst [vmem:[#allocation8_spill] sm:$0xff] %v3010_v20  ;;  %v1118_v20 = vrot.slane %v3737_v59, %v3721_v29  ;;  %v1146_v48 = vrot.slane %v2727_v10, %v3721_v29  ;;  %v1160_v62 = vrot.slane %v2732_v13, %v3721_v29  ;;  %v1174_v11 = vrot.slane %v2737_v12, %v3721_v29 }
  0x6d   : > { %v3039_v63 = vrot.slane %v1090_v51, %v3721_v29  ;;  %v3042_v0 = vrot.slane %v1104_v53, %v3721_v29  ;;  %v1188_v2 = vrot.slane %v2742_v14, %v3721_v29  ;;  %v3050_v10 = vrot.slane %v1132_v60, %v3721_v29 }
  0x6e   : > { %v3045_v59 = vrot.slane %v1118_v20, %v3721_v29  ;;  %v3053_v13 = vrot.slane %v1146_v48, %v3721_v29  ;;  %v3056_v12 = vrot.slane %v1160_v62, %v3721_v29  ;;  %v3059_v51 = vrot.slane %v1174_v11, %v3721_v29 }
  0x6f   : > { %v3062_v53 = vrot.slane %v1188_v2, %v3721_v29  ;;  %v1202_v20 = vrot.slane %v2747_v49, %v3721_v29  ;;  %v1216_v14 = vrot.slane %v2752_v28, %v3721_v29  ;;  %v1230_v60 = vrot.slane %v2757_v33, %v3721_v29 }
  0x70   : > { %v1244_v48 = vrot.slane %v2762_v1, %v3721_v29  ;;  %v1258_v62 = vrot.slane %v2767_v42, %v3721_v29  ;;  %v1272_v11 = vrot.slane %v2772_v44, %v3721_v29  ;;  %v1286_v2 = vrot.slane %v2777_v56, %v3721_v29 }
  0x71   : > { %v3079_v49 = vrot.slane %v1202_v20, %v3721_v29  ;;  %v3082_v28 = vrot.slane %v1216_v14, %v3721_v29  ;;  %v3085_v33 = vrot.slane %v1230_v60, %v3721_v29  ;;  %v1300_v1 = vrot.slane %v2782_v57, %v3721_v29 }
  0x72   : > { %v3090_v42 = vrot.slane %v1244_v48, %v3721_v29  ;;  %v3093_v44 = vrot.slane %v1258_v62, %v3721_v29  ;;  %v3096_v56 = vrot.slane %v1272_v11, %v3721_v29  ;;  %v3099_v20 = vrot.slane %v1286_v2, %v3721_v29 }
  0x73   : > { %v3102_v14 = vrot.slane %v1300_v1, %v3721_v29  ;;  %v1314_v60 = vrot.slane %v2787_v9, %v3721_v29  ;;  %v1328_v57 = vrot.slane %v2792_v7, %v3721_v29  ;;  %v1342_v48 = vrot.slane %v2797_v3, %v3721_v29 }
  0x74   : > { %v1356_v62 = vrot.slane %v2802_v4, %v3721_v29  ;;  %v1370_v11 = vrot.slane %v2807_v5, %v3721_v29  ;;  %v1384_v2 = vrot.slane %v2812_v6, %v3721_v29  ;;  %v1398_v1 = vrot.slane %v2817_v24, %v3721_v29 }
  0x75   : > { %v3119_v9 = vrot.slane %v1314_v60, %v3721_v29  ;;  %v3122_v7 = vrot.slane %v1328_v57, %v3721_v29  ;;  %v3125_v3 = vrot.slane %v1342_v48, %v3721_v29  ;;  %v1412_v4 = vrot.slane %v2822_v58, %v3721_v29 }
  0x76   : > { %v3130_v5 = vrot.slane %v1356_v62, %v3721_v29  ;;  %v3133_v6 = vrot.slane %v1370_v11, %v3721_v29  ;;  %v3136_v24 = vrot.slane %v1384_v2, %v3721_v29  ;;  %v3139_v60 = vrot.slane %v1398_v1, %v3721_v29 }
  0x77   : > { %v3142_v57 = vrot.slane %v1412_v4, %v3721_v29  ;;  %v1426_v48 = vrot.slane %v2827_v15, %v3721_v29  ;;  %v1440_v58 = vrot.slane %v2832_v16, %v3721_v29  ;;  %v1454_v62 = vrot.slane %v2837_v17, %v3721_v29 }
  0x78   : > { %v1468_v11 = vrot.slane %v2842_v21, %v3721_v29  ;;  %v1482_v2 = vrot.slane %v2847_v22, %v3721_v29  ;;  %v1496_v1 = vrot.slane %v2852_v8, %v3721_v29  ;;  %v1510_v4 = vrot.slane %v2857_v54, %v3721_v29 }
  0x79   : > { %v3159_v15 = vrot.slane %v1426_v48, %v3721_v29  ;;  %v3162_v16 = vrot.slane %v1440_v58, %v3721_v29  ;;  %v3165_v17 = vrot.slane %v1454_v62, %v3721_v29  ;;  %v1524_v21 = vrot.slane %v2862_v23, %v3721_v29 }
  0x7a   : > { %v3170_v22 = vrot.slane %v1468_v11, %v3721_v29  ;;  %v3173_v8 = vrot.slane %v1482_v2, %v3721_v29  ;;  %v3176_v54 = vrot.slane %v1496_v1, %v3721_v29  ;;  %v3179_v48 = vrot.slane %v1510_v4, %v3721_v29 }
  0x7b   : > { %3738 = vst [vmem:[#allocation9_spill] sm:$0xff] %v3159_v15  ;;  %v3182_v58 = vrot.slane %v1524_v21, %v3721_v29  ;;  %v1538_v62 = vrot.slane %v2867_v27, %v3721_v29  ;;  %v1552_v23 = vrot.slane %v2872_v31, %v3721_v29  ;;  %v1566_v11 = vrot.slane %v2877_v26, %v3721_v29 }
  0x7c   : > { %3739 = vst [vmem:[#allocation10_spill] sm:$0xff] %v3170_v22  ;;  %3740 = vst [vmem:[#allocation12_spill] sm:$0xff] %v3173_v8  ;;  %v1580_v2 = vrot.slane %v2882_v34, %v3721_v29  ;;  %v1594_v1 = vrot.slane %v2887_v35, %v3721_v29  ;;  %v1608_v4 = vrot.slane %v2892_v36, %v3721_v29 }
  0x7d   : > { %3741 = vst [vmem:[#allocation13_spill] sm:$0xff] %v3176_v54  ;;  %3742 = vst [vmem:[#allocation14_spill] sm:$0xff] %v3179_v48  ;;  %v1622_v21 = vrot.slane %v2897_v32, %v3721_v29  ;;  %v3199_v27 = vrot.slane %v1538_v62, %v3721_v29  ;;  %v3202_v31 = vrot.slane %v1552_v23, %v3721_v29 }
  0x7e   : > { %3743 = vst [vmem:[#allocation18_spill] sm:$0xff] %v3182_v58  ;;  %v3205_v26 = vrot.slane %v1566_v11, %v3721_v29  ;;  %v1636_v34 = vrot.slane %v2902_v38, %v3721_v29  ;;  %v3210_v35 = vrot.slane %v1580_v2, %v3721_v29  ;;  %v3213_v36 = vrot.slane %v1594_v1, %v3721_v29  ;;  %v3751_v1 = vld [vmem:[#allocation22_spill] sm:$0xff] }
  0x7f   : > { %3744 = vst [vmem:[#allocation2_spill] sm:$0xff] %v3199_v27  ;;  %3745 = vst [vmem:[#allocation3_spill] sm:$0xff] %v3202_v31  ;;  %v3216_v32 = vrot.slane %v1608_v4, %v3721_v29  ;;  %v3219_v62 = vrot.slane %v1622_v21, %v3721_v29  ;;  %v1650_v11 = vrot.slane %v2907_v39, %v3721_v29 }
  0x80   : > { %3746 = vst [vmem:[#allocation4_spill] sm:$0xff] %v3205_v26  ;;  %3747 = vst [vmem:[#allocation11_spill] sm:$0xff] %v3210_v35  ;;  %v3222_v23 = vrot.slane %v1636_v34, %v3721_v29  ;;  %v1664_v38 = vrot.slane %v2912_v43, %v3721_v29  ;;  %v1678_v2 = vrot.slane %v2917_v47, %v3721_v29 }
  0x81   : > { %3748 = vst [vmem:[#allocation15_spill] sm:$0xff] %v3213_v36  ;;  %3749 = vst [vmem:[#allocation16_spill] sm:$0xff] %v3219_v62  ;;  %v1692_v36 = vrot.slane %v3751_v1, %v3721_v29  ;;  %v1706_v4 = vrot.slane %v2927_v45, %v3721_v29  ;;  %v1720_v21 = vrot.slane %v2932_v41, %v3721_v29  ;;  %v3764_v62 = vld [vmem:[#allocation7_spill] sm:$0xff] }
  0x82   : > { %3750 = vst [vmem:[#allocation17_spill] sm:$0xff] %v3222_v23  ;;  %v1734_v34 = vrot.slane %v2937_v46, %v3721_v29  ;;  %v3239_v39 = vrot.slane %v1650_v11, %v3721_v29  ;;  %v3242_v43 = vrot.slane %v1664_v38, %v3721_v29  ;;  %v3245_v47 = vrot.slane %v1678_v2, %v3721_v29  ;;  %v3765_v2 = vld [vmem:[#allocation8_spill] sm:$0xff] }
  0x83   : > { %v1748_v1 = vrot.slane %v2942_v61, %v3721_v29  ;;  %v3250_v45 = vrot.slane %v1692_v36, %v3721_v29  ;;  %v3253_v41 = vrot.slane %v1706_v4, %v3721_v29  ;;  %v3256_v46 = vrot.slane %v1720_v21, %v3721_v29  ;;  %v3760_v61 = vld [vmem:[#allocation24_spill] sm:$0xff]  ;;  %v3761_v36 = vld [vmem:[#allocation25_spill] sm:$0xff]  ;;  %v3763_v21 = vld [vmem:[#allocation6_spill] sm:$0xff] }
  0x84   : > { %3752 = vst [vmem:[#allocation19_spill] sm:$0xff] %v3239_v39  ;;  %3753 = vst [vmem:[#allocation20_spill] sm:$0xff] %v3242_v43  ;;  %v3259_v11 = vrot.slane %v1734_v34, %v3721_v29  ;;  %v3768_v8 = vmov %v3222_v23  ;;  %v3770_v48 = vmov %v3242_v43  ;;  %v3777_v34 = vunpack.c.l.b16 %v3760_v61 }
  0x85   : > { %3754 = vst [vmem:[#allocation21_spill] sm:$0xff] %v3245_v47  ;;  %3755 = vst [vmem:[#allocation22_spill] sm:$0xff] %v3250_v45  ;;  %v3262_v38 = vrot.slane %v1748_v1, %v3721_v29  ;;  %v3759_v47 = vld [vmem:[#allocation23_spill] sm:$0xff]  ;;  %v3774_v26 = vmov %v3256_v46  ;;  %v3778_v29 = vunpack.c.l.b16 %v3761_v36  ;;  %v3779_v23 = vunpack.c.l.b16 %v2973_v52 }
  0x86   : > { %3756 = vst [vmem:[#allocation26_spill] sm:$0xff] %v3253_v41  ;;  %3757 = vst [vmem:[#allocation27_spill] sm:$0xff] %v3256_v46  ;;  %v3762_v41 = vld [vmem:[#allocation5_spill] sm:$0xff]  ;;  %v3775_v35 = vmov %v3259_v11  ;;  %v3776_v46 = vunpack.c.l.b16 %v3759_v47  ;;  %v3781_v15 = vunpack.c.l.b16 %v3763_v21  ;;  %v3782_v4 = vunpack.c.l.b16 %v2959_v18 }
  0x87   : > { %3758 = vst [vmem:[#allocation28_spill] sm:$0xff] %v3259_v11  ;;  %v1823_v11 = vrot.slane %v3777_v34, 6  ;;  %v1826_v54 = vrot.slane %v3778_v29, 5  ;;  %v1829_v1 = vrot.slane %v3779_v23, 4  ;;  %v3780_v43 = vunpack.c.l.b16 %v3762_v41 }
  0x88   : > { %v3766_v45 = vld [vmem:[#allocation15_spill] sm:$0xff]  ;;  %v1820_v22 = vrot.slane %v3776_v46, 7  ;;  %v1835_v39 = vrot.slane %v3781_v15, 2  ;;  %v3783_v46 = vunpack.c.l.b16 %v3764_v62  ;;  %v3784_v52 = vunpack.c.l.b16 %v3002_v37 }
  0x89   : > { %v1832_v31 = vrot.slane %v3780_v43, 3  ;;  %v3785_v43 = vunpack.c.l.b16 %v3005_v55  ;;  %v3786_v21 = vunpack.c.l.b16 %v3765_v2  ;;  %v3788_v62 = vunpack.c.l.b16 %v3016_v40 }
  0x8a   : > { %v1822_v47 = vsel %vm1821_vm0, %v1820_v22, %v3782_v4  ;;  %v1838_v61 = vrot.slane %v3783_v46, 1  ;;  %v1841_v23 = vrot.slane %v3784_v52, 7  ;;  %v3787_v22 = vunpack.c.l.b16 %v3013_v25 }
  0x8b   : > { %v1825_v36 = vsel %vm1824_vm1, %v1823_v11, %v1822_v47  ;;  %v1843_v41 = vrot.slane %v3785_v43, 6  ;;  %v1845_v15 = vrot.slane %v3786_v21, 5  ;;  %v1849_v34 = vrot.slane %v3788_v62, 3 }
  0x8c   : > { %v3771_v58 = vld [vmem:[#allocation21_spill] sm:$0xff]  ;;  %v3772_v27 = vld [vmem:[#allocation22_spill] sm:$0xff]  ;;  %v1828_v18 = vsel %vm1827_vm2, %v1826_v54, %v1825_v36  ;;  %v1847_v4 = vrot.slane %v3787_v22, 4  ;;  %v3789_v29 = vunpack.c.l.b16 %v3019_v30  ;;  %v3790_v47 = vunpack.c.l.b16 %v2999_v50 }
  0x8d   : > { %v1831_v37 = vsel %vm1830_vm3, %v1829_v1, %v1828_v18  ;;  %v3791_v2 = vunpack.c.l.b16 %v3022_v19  ;;  %v3792_v54 = vunpack.c.l.b16 %v3042_v0  ;;  %v3793_v52 = vunpack.c.l.b16 %v3045_v59 }
  0x8e   : > { %v1851_v11 = vrot.slane %v3789_v29, 2  ;;  %v1842_v55 = vsel %vm1821_vm0, %v1841_v23, %v3790_v47  ;;  %v1834_v25 = vsel %vm1833_vm4, %v1832_v31, %v1831_v37  ;;  %v3794_v43 = vunpack.c.l.b16 %v3050_v10 }
  0x8f   : > { %v1853_v46 = vrot.slane %v3791_v2, 1  ;;  %v1855_v36 = vrot.slane %v3792_v54, 7  ;;  %v1844_v40 = vsel %vm1824_vm1, %v1843_v41, %v1842_v55  ;;  %v1857_v30 = vrot.slane %v3793_v52, 6 }
  0x90   : > { %v1859_v1 = vrot.slane %v3794_v43, 5  ;;  %v1837_v50 = vsel %vm1836_vm5, %v1835_v39, %v1834_v25  ;;  %v1846_v23 = vsel %vm1827_vm2, %v1845_v15, %v1844_v40  ;;  %v3795_v19 = vunpack.c.l.b16 %v3039_v63 }
  0x91   : > { %v3796_v0 = vunpack.c.l.b16 %v3053_v13  ;;  %v3381_v31 = vsel %vm1839_vm6, %v1838_v61, %v1837_v50  ;;  %v1848_v59 = vsel %vm1830_vm3, %v1847_v4, %v1846_v23  ;;  %v3797_v10 = vunpack.c.l.b16 %v3056_v12 }
  0x92   : > { %v1856_v21 = vsel %vm1821_vm0, %v1855_v36, %v3795_v19  ;;  %v1850_v39 = vsel %vm1833_vm4, %v1849_v34, %v1848_v59  ;;  %v3798_v63 = vunpack.c.l.b16 %v3059_v51  ;;  %v3799_v13 = vunpack.c.l.b16 %v3062_v53 }
  0x93   : > { %v1861_v18 = vrot.slane %v3796_v0, 4  ;;  %v1858_v41 = vsel %vm1824_vm1, %v1857_v30, %v1856_v21  ;;  %v1863_v22 = vrot.slane %v3797_v10, 3  ;;  %v1852_v61 = vsel %vm1836_vm5, %v1851_v11, %v1850_v39 }
  0x94   : > { %v1860_v15 = vsel %vm1827_vm2, %v1859_v1, %v1858_v41  ;;  %v1865_v62 = vrot.slane %v3798_v63, 2  ;;  %v1867_v29 = vrot.slane %v3799_v13, 1  ;;  %v3800_v4 = vunpack.c.l.b16 %v3082_v28 }
  0x95   : > { %v1862_v37 = vsel %vm1830_vm3, %v1861_v18, %v1860_v15  ;;  %v3801_v12 = vunpack.c.l.b16 %v3085_v33  ;;  %v3400_v34 = vsel %vm1839_vm6, %v1853_v46, %v1852_v61  ;;  %v3802_v51 = vunpack.c.l.b16 %v3090_v42 }
  0x96   : > { %v1869_v47 = vrot.slane %v3800_v4, 7  ;;  %v1864_v2 = vsel %vm1833_vm4, %v1863_v22, %v1862_v37  ;;  %v3803_v53 = vunpack.c.l.b16 %v3093_v44  ;;  %v3804_v25 = vunpack.c.l.b16 %v3079_v49 }
  0x97   : > { %v1871_v55 = vrot.slane %v3801_v12, 6  ;;  %v1873_v54 = vrot.slane %v3802_v51, 5  ;;  %v1866_v11 = vsel %vm1836_vm5, %v1865_v62, %v1864_v2  ;;  %v3805_v33 = vunpack.c.l.b16 %v3096_v56 }
  0x98   : > { %v1875_v36 = vrot.slane %v3803_v53, 4  ;;  %v1870_v28 = vsel %vm1821_vm0, %v1869_v47, %v3804_v25  ;;  %v3806_v46 = vunpack.c.l.b16 %v3099_v20  ;;  %v3416_v30 = vsel %vm1839_vm6, %v1867_v29, %v1866_v11  ;;  %v3818_v29 = vld [vmem:[#allocation10_spill] sm:$0xff]  ;;  %v3820_v47 = vld [vmem:[#allocation9_spill] sm:$0xff] }
  0x99   : > { %v1877_v40 = vrot.slane %v3805_v33, 3  ;;  %v1872_v42 = vsel %vm1824_vm1, %v1871_v55, %v1870_v28  ;;  %v3807_v44 = vunpack.c.l.b16 %v3102_v14  ;;  %v3808_v1 = vunpack.c.l.b16 %v3122_v7  ;;  %v3826_v11 = vld [vmem:[#allocation14_spill] sm:$0xff] }
  0x9a   : > { %v1879_v52 = vrot.slane %v3806_v46, 2  ;;  %v1874_v49 = vsel %vm1827_vm2, %v1873_v54, %v1872_v42  ;;  %v3809_v23 = vunpack.c.l.b16 %v3125_v3  ;;  %v3810_v19 = vunpack.c.l.b16 %v3130_v5  ;;  %v3828_v46 = vld [vmem:[#allocation18_spill] sm:$0xff] }
  0x9b   : > { %v1881_v43 = vrot.slane %v3807_v44, 1  ;;  %v1883_v50 = vrot.slane %v3808_v1, 7  ;;  %v3811_v21 = vunpack.c.l.b16 %v3133_v6  ;;  %v1876_v18 = vsel %vm1830_vm3, %v1875_v36, %v1874_v49  ;;  %v3830_v44 = vld [vmem:[#allocation3_spill] sm:$0xff] }
  0x9c   : > { %v1885_v56 = vrot.slane %v3809_v23, 6  ;;  %v1887_v20 = vrot.slane %v3810_v19, 5  ;;  %v3812_v59 = vunpack.c.l.b16 %v3119_v9  ;;  %v3813_v7 = vunpack.c.l.b16 %v3136_v24  ;;  %v3832_v23 = vld [vmem:[#allocation4_spill] sm:$0xff] }
  0x9d   : > { %v1889_v0 = vrot.slane %v3811_v21, 4  ;;  %v3814_v10 = vunpack.c.l.b16 %v3139_v60  ;;  %v1878_v3 = vsel %vm1833_vm4, %v1877_v40, %v1876_v18  ;;  %v3815_v39 = vunpack.c.l.b16 %v3142_v57 }
  0x9e   : > { %v1884_v14 = vsel %vm1821_vm0, %v1883_v50, %v3812_v59  ;;  %v1891_v41 = vrot.slane %v3813_v7, 3  ;;  %v3816_v15 = vunpack.c.l.b16 %v3162_v16  ;;  %v1880_v9 = vsel %vm1836_vm5, %v1879_v52, %v1878_v3  ;;  %v3822_v16 = vld [vmem:[#allocation12_spill] sm:$0xff]  ;;  %v3836_v59 = vld [vmem:[#allocation2_spill] sm:$0xff] }
  0x9f   : > { %v1893_v22 = vrot.slane %v3814_v10, 2  ;;  %v1886_v5 = vsel %vm1824_vm1, %v1885_v56, %v1884_v14  ;;  %v1895_v6 = vrot.slane %v3815_v39, 1  ;;  %v3817_v24 = vunpack.c.l.b16 %v3165_v17  ;;  %v3824_v17 = vld [vmem:[#allocation13_spill] sm:$0xff] }
  0xa0   : > { %v1897_v63 = vrot.slane %v3816_v15, 7  ;;  %v1888_v62 = vsel %vm1827_vm2, %v1887_v20, %v1886_v5  ;;  %v3819_v60 = vunpack.c.l.b16 %v3818_v29  ;;  %v1882_v37 = vsel %vm1839_vm6, %v1881_v43, %v1880_v9  ;;  %v3834_v20 = vld [vmem:[#allocation11_spill] sm:$0xff] }
  0xa1   : > { %v1899_v13 = vrot.slane %v3817_v24, 6  ;;  %v1890_v4 = vsel %vm1830_vm3, %v1889_v0, %v1888_v62  ;;  %v3821_v57 = vunpack.c.l.b16 %v3820_v47  ;;  %v3823_v55 = vunpack.c.l.b16 %v3822_v16 }
  0xa2   : > { %v1901_v61 = vrot.slane %v3819_v60, 5  ;;  %v1892_v51 = vsel %vm1833_vm4, %v1891_v41, %v1890_v4  ;;  %v3825_v53 = vunpack.c.l.b16 %v3824_v17  ;;  %v3827_v25 = vunpack.c.l.b16 %v3826_v11 }
  0xa3   : > { %v1898_v12 = vsel %vm1821_vm0, %v1897_v63, %v3821_v57  ;;  %v1903_v2 = vrot.slane %v3823_v55, 4  ;;  %v1894_v33 = vsel %vm1836_vm5, %v1893_v22, %v1892_v51  ;;  %v3829_v52 = vunpack.c.l.b16 %v3828_v46  ;;  %v3846_v57 = vld [vmem:[#allocation26_spill] sm:$0xff]  ;;  %v3849_v51 = vld [vmem:[#allocation19_spill] sm:$0xff] }
  0xa4   : > { %v1900_v54 = vsel %vm1824_vm1, %v1899_v13, %v1898_v12  ;;  %v1905_v36 = vrot.slane %v3825_v53, 3  ;;  %v1907_v28 = vrot.slane %v3827_v25, 2  ;;  %v3831_v43 = vunpack.c.l.b16 %v3830_v44 }
  0xa5   : > { %v1902_v40 = vsel %vm1827_vm2, %v1901_v61, %v1900_v54  ;;  %v1909_v42 = vrot.slane %v3829_v52, 1  ;;  %v1896_v50 = vsel %vm1839_vm6, %v1895_v6, %v1894_v33  ;;  %v3833_v56 = vunpack.c.l.b16 %v3832_v23  ;;  %v3840_v6 = vld [vmem:[#allocation16_spill] sm:$0xff] }
  0xa6   : > { %v1911_v1 = vrot.slane %v3831_v43, 7  ;;  %v1904_v49 = vsel %vm1830_vm3, %v1903_v2, %v1902_v40  ;;  %v3835_v21 = vunpack.c.l.b16 %v3834_v20  ;;  %v3837_v14 = vunpack.c.l.b16 %v3836_v59 }
  0xa7   : > { %v1913_v19 = vrot.slane %v3833_v56, 6  ;;  %v1906_v18 = vsel %vm1833_vm4, %v1905_v36, %v1904_v49  ;;  %v3838_v41 = vunpack.c.l.b16 %v3766_v45  ;;  %v3839_v22 = vunpack.c.l.b16 %v3216_v32 }
  0xa8   : > { %v1915_v0 = vrot.slane %v3835_v21, 5  ;;  %v1912_v7 = vsel %vm1821_vm0, %v1911_v1, %v3837_v14  ;;  %v1908_v5 = vsel %vm1836_vm5, %v1907_v28, %v1906_v18  ;;  %v3841_v15 = vunpack.c.l.b16 %v3840_v6 }
  0xa9   : > { %v1917_v10 = vrot.slane %v3838_v41, 4  ;;  %v1919_v3 = vrot.slane %v3839_v22, 3  ;;  %v1914_v39 = vsel %vm1824_vm1, %v1913_v19, %v1912_v7  ;;  %v3842_v9 = vunpack.c.l.b16 %v3768_v8 }
  0xaa   : > { %v1921_v63 = vrot.slane %v3841_v15, 2  ;;  %v1910_v24 = vsel %vm1839_vm6, %v1909_v42, %v1908_v5  ;;  %v1916_v13 = vsel %vm1827_vm2, %v1915_v0, %v1914_v39  ;;  %v3843_v45 = vunpack.c.l.b16 %v3770_v48 }
  0xab   : > { %v1923_v62 = vrot.slane %v3842_v9, 1  ;;  %v3844_v32 = vunpack.c.l.b16 %v3771_v58  ;;  %v1918_v61 = vsel %vm1830_vm3, %v1917_v10, %v1916_v13  ;;  %v3845_v4 = vunpack.c.l.b16 %v3772_v27 }
  0xac   : > { %v1925_v29 = vrot.slane %v3843_v45, 7  ;;  %v3847_v12 = vunpack.c.l.b16 %v3846_v57  ;;  %v3848_v16 = vunpack.c.l.b16 %v3774_v26  ;;  %v1920_v2 = vsel %vm1833_vm4, %v1919_v3, %v1918_v61 }
  0xad   : > { %v1927_v60 = vrot.slane %v3844_v32, 6  ;;  %v1929_v47 = vrot.slane %v3845_v4, 5  ;;  %v3850_v48 = vunpack.c.l.b16 %v3849_v51  ;;  %v3851_v58 = vunpack.c.l.b16 %v3775_v35 }
  0xae   : > { %v1931_v8 = vrot.slane %v3847_v12, 4  ;;  %v1933_v55 = vrot.slane %v3848_v16, 3  ;;  %v3852_v53 = vunpack.c.l.b16 %v3262_v38  ;;  %v1922_v27 = vsel %vm1836_vm5, %v1921_v63, %v1920_v2 }
  0xaf   : > { %v1926_v54 = vsel %vm1821_vm0, %v1925_v29, %v3850_v48  ;;  %v1935_v17 = vrot.slane %v3851_v58, 2  ;;  %v1939_v26 = vpack.c.b16 %v3381_v31, %v3381_v31  ;;  %v1940_v25 = vpack.c.b16 %v3400_v34, %v3400_v34 }
  0xb0   : > { %v1937_v36 = vrot.slane %v3852_v53, 1  ;;  %v1928_v11 = vsel %vm1824_vm1, %v1927_v60, %v1926_v54  ;;  %v1924_v35 = vsel %vm1839_vm6, %v1923_v62, %v1922_v27  ;;  %v1941_v38 = vpack.c.b16 %v3416_v30, %v3416_v30 }
  0xb1   : > { %v1930_v28 = vsel %vm1827_vm2, %v1929_v47, %v1928_v11  ;;  %v1942_v33 = vpack.c.b16 %v1882_v37, %v1882_v37  ;;  %v1943_v46 = vpack.c.b16 %v1896_v50, %v1896_v50  ;;  %v1944_v52 = vpack.c.b16 %v1910_v24, %v1910_v24  ;;  %1956 = vst.msk [vmem:[%s154_s17] sm:$0xf] %vm1955_vm7, %v1939_v26 }
  0xb2   : > { %v1932_v40 = vsel %vm1830_vm3, %v1931_v8, %v1930_v28  ;;  %v1945_v31 = vpack.c.b16 %v1924_v35, %v1924_v35  ;;  %1957 = vst.msk [vmem:[%s154_s17 + $0x4] sm:$0xf] %vm1955_vm7, %v1940_v25  ;;  %1958 = vst.msk [vmem:[%s154_s17 + $0x8] sm:$0xf] %vm1955_vm7, %v1941_v38 }
  0xb3   : > { %v1934_v42 = vsel %vm1833_vm4, %v1933_v55, %v1932_v40  ;;  %1959 = vst.msk [vmem:[%s154_s17 + $0xc] sm:$0xf] %vm1955_vm7, %v1942_v33  ;;  %1960 = vst.msk [vmem:[%s154_s17 + $0x10] sm:$0xf] %vm1955_vm7, %v1943_v46 }
  0xb4   : > { %v1936_v34 = vsel %vm1836_vm5, %v1935_v17, %v1934_v42  ;;  %1961 = vst.msk [vmem:[%s154_s17 + $0x14] sm:$0xf] %vm1955_vm7, %v1944_v52  ;;  %1962 = vst.msk [vmem:[%s154_s17 + $0x18] sm:$0xf] %vm1955_vm7, %v1945_v31 }
  0xb5   : > { %v1938_v30 = vsel %vm1839_vm6, %v1937_v36, %v1936_v34 }
  0xb6   : > { %v1946_v37 = vpack.c.b16 %v1938_v30, %v1938_v30 }
  0xb8   : > { %1963 = vst.msk [vmem:[%s154_s17 + $0x1c] sm:$0xf] %vm1955_vm7, %v1946_v37 }
  0xb9 PF: > { %s11_s8 = sadd.s32 1, %s2173_s8   ;;  %s3853_s6 = smov %s2169_s7 }
  0xba   : > { %p8_p5 = scmp.ge.s32.totalorder %s11_s8, 4   ;;  %s3854_s7 = smov %s3856_s9 }
  0xbc   :  { %10 = sbr.rel (!%p8_p5) target bundleno = 2 (0x2), region = 54 }

// kernel: unet_forward.18
= control target key start
LH: loop header
LB: loop body
LE: loop exit
PB: predicated region body
PF: predicated region fallthrough
CT: control target
= control target key end

     0   :  { %vm486_vm0 = vcmask 1044480   ;;  %vm487_vm1 = vcmask 1045504   ;;  %v2035_v1 = vmov 65535   ;;  %vm389_vm2 = vcmask 220160   ;;  %s2429_s1 = inlined_call_operand.vmem [shape: bf16[27,128], index: 1, kind: input, shape index: {}]   ;;  %s2430_s0 = inlined_call_operand.vmem [shape: bf16[512,27], index: 0, kind: input, shape index: {}]   ;;  %s2431_s2 = inlined_call_operand.vmem [shape: f32[1,128], index: 2, kind: input, shape index: {}]   ;;  %s2432_s3 = inlined_call_operand.vmem [shape: f32[1,128], index: 3, kind: input, shape index: {}]   ;;  %s2433_s4 = inlined_call_operand.vmem [shape: bf16[512,128], index: 4, kind: output, shape index: {}]  }
   0x1   :  { %v2001_v0 = vld [vmem:[%s2429_s1 + $0x8] sm:$0x3f]   ;;  %v488_v2 = vsel %vm486_vm0, 4294967295, %v2035_v1  ;;  %v2003_v4 = vld [vmem:[%s2430_s0] sm:$0xff]   ;;  %v2007_v10 = vld [vmem:[%s2430_s0 + $0x10] sm:$0xff]  }
   0x2   :  { %v489_v3 = vsel %vm487_vm1, %v488_v2, 0  ;;  %v2002_v6 = vld [vmem:[%s2429_s1] sm:$0xff]   ;;  %1932 = vmatprep.mubr.msk.bf16.mxu0 %vm389_vm2, %v2003_v4  ;;  %v2005_v8 = vld [vmem:[%s2430_s0 + $0x8] sm:$0xff]   ;;  %v2008_v11 = vld [vmem:[%s2430_s0 + $0x90] sm:$0xff]  }
   0x3   :  { %v491_v5 = vand.u32 %v2001_v0, %v489_v3  ;;  %v2004_v7 = vld [vmem:[%s2430_s0 + $0x80] sm:$0xff]   ;;  %v2006_v9 = vld [vmem:[%s2430_s0 + $0x88] sm:$0xff]   ;;  %v2009_v12 = vld [vmem:[%s2430_s0 + $0x18] sm:$0xff]  }
   0x4   :  { %1964 = vmatprep.mubr.msk.bf16.mxu1 %vm389_vm2, %v2004_v7  ;;  %v2010_v13 = vld [vmem:[%s2430_s0 + $0x98] sm:$0xff]   ;;  %v2011_v14 = vld [vmem:[%s2430_s0 + $0x20] sm:$0xff]   ;;  %v2013_v16 = vld [vmem:[%s2430_s0 + $0x28] sm:$0xff]  }
   0x5   :  { %1928 = vmatprep.subr.bf16.mxu0 %v491_v5  ;;  %1996 = vmatprep.subr.bf16.mxu1 %v491_v5  ;;  %v2012_v15 = vld [vmem:[%s2430_s0 + $0xa0] sm:$0xff]   ;;  %v2014_v17 = vld [vmem:[%s2430_s0 + $0xa8] sm:$0xff]   ;;  %v2015_v18 = vld [vmem:[%s2430_s0 + $0x30] sm:$0xff]  }
   0x6   :  { %1929 = vmatpush3.bf16.msra.mxu0 %v491_v5  ;;  %1998 = vmatpush3.bf16.msra.mxu1 %v491_v5  ;;  %v2016_v19 = vld [vmem:[%s2430_s0 + $0xb0] sm:$0xff]   ;;  %v2017_v20 = vld [vmem:[%s2430_s0 + $0x38] sm:$0xff]   ;;  %v2019_v22 = vld [vmem:[%s2430_s0 + $0x40] sm:$0xff]  }
   0x7   :  { %1930 = vmatprep.subr.bf16.mxu0 %v2002_v6  ;;  %1997 = vmatprep.subr.bf16.mxu1 %v2002_v6  ;;  %v2018_v21 = vld [vmem:[%s2430_s0 + $0xb8] sm:$0xff]   ;;  %v2020_v23 = vld [vmem:[%s2430_s0 + $0xc0] sm:$0xff]   ;;  %v2021_v24 = vld [vmem:[%s2430_s0 + $0x48] sm:$0xff]  }
   0x8   :  { %v2022_v25 = vld [vmem:[%s2430_s0 + $0xc8] sm:$0xff]   ;;  %v2023_v26 = vld [vmem:[%s2430_s0 + $0x50] sm:$0xff]   ;;  %v2025_v28 = vld [vmem:[%s2430_s0 + $0x58] sm:$0xff]  }
   0x9   :  { %v2024_v27 = vld [vmem:[%s2430_s0 + $0xd0] sm:$0xff]   ;;  %v2026_v29 = vld [vmem:[%s2430_s0 + $0xd8] sm:$0xff]   ;;  %v2027_v30 = vld [vmem:[%s2430_s0 + $0x60] sm:$0xff]  }
   0xa   :  { %1931 = vmatpush3.bf16.msra.mxu0 %v2002_v6  ;;  %1999 = vmatpush3.bf16.msra.mxu1 %v2002_v6  ;;  %v2028_v31 = vld [vmem:[%s2430_s0 + $0xe0] sm:$0xff]   ;;  %v2029_v32 = vld [vmem:[%s2430_s0 + $0x68] sm:$0xff]   ;;  %v2031_v34 = vld [vmem:[%s2430_s0 + $0x70] sm:$0xff]  }
   0xb   :  { %v2030_v33 = vld [vmem:[%s2430_s0 + $0xe8] sm:$0xff]   ;;  %v2032_v35 = vld [vmem:[%s2430_s0 + $0xf0] sm:$0xff]   ;;  %v2033_v36 = vld [vmem:[%s2430_s0 + $0x78] sm:$0xff]  }
   0xc   :  { %v2034_v37 = vld [vmem:[%s2430_s0 + $0xf8] sm:$0xff]   ;;  %v2198_v38 = vld [vmem:[%s2431_s2] ss:$0 sm:$0xff] }
   0xd   :  { %1933 = vmatmul.mubr.msk.bf16.vlgmr.msra.gmra.mxu0 %vm389_vm2, %v2005_v8  ;;  %1965 = vmatmul.mubr.msk.bf16.vlgmr.msra.gmra.mxu1 %vm389_vm2, %v2006_v9  ;;  %v2205_v43 = vld [vmem:[%s2432_s3] ss:$0 sm:$0xff] }
   0xe   :  { %1936 = vmatprep.mubr.msk.bf16.mxu0 %vm389_vm2, %v2007_v10  ;;  %1968 = vmatprep.mubr.msk.bf16.mxu1 %vm389_vm2, %v2008_v11 }
  0x15   :  { %1937 = vmatmul.mubr.msk.bf16.gmra.mxu0 %vm389_vm2, %v2009_v12  ;;  %1969 = vmatmul.mubr.msk.bf16.gmra.mxu1 %vm389_vm2, %v2010_v13 }
  0x16   :  { %1940 = vmatprep.mubr.msk.bf16.mxu0 %vm389_vm2, %v2011_v14  ;;  %1972 = vmatprep.mubr.msk.bf16.mxu1 %vm389_vm2, %v2012_v15 }
  0x1d   :  { %1941 = vmatmul.mubr.msk.bf16.gmra.mxu0 %vm389_vm2, %v2013_v16  ;;  %1973 = vmatmul.mubr.msk.bf16.gmra.mxu1 %vm389_vm2, %v2014_v17 }
  0x1e   :  { %1944 = vmatprep.mubr.msk.bf16.mxu0 %vm389_vm2, %v2015_v18  ;;  %1976 = vmatprep.mubr.msk.bf16.mxu1 %vm389_vm2, %v2016_v19 }
  0x25   :  { %1945 = vmatmul.mubr.msk.bf16.gmra.mxu0 %vm389_vm2, %v2017_v20  ;;  %1977 = vmatmul.mubr.msk.bf16.gmra.mxu1 %vm389_vm2, %v2018_v21 }
  0x26   :  { %1948 = vmatprep.mubr.msk.bf16.mxu0 %vm389_vm2, %v2019_v22  ;;  %1980 = vmatprep.mubr.msk.bf16.mxu1 %vm389_vm2, %v2020_v23 }
  0x2d   :  { %1949 = vmatmul.mubr.msk.bf16.gmra.mxu0 %vm389_vm2, %v2021_v24  ;;  %1981 = vmatmul.mubr.msk.bf16.gmra.mxu1 %vm389_vm2, %v2022_v25 }
  0x2e   :  { %1952 = vmatprep.mubr.msk.bf16.mxu0 %vm389_vm2, %v2023_v26  ;;  %1984 = vmatprep.mubr.msk.bf16.mxu1 %vm389_vm2, %v2024_v27 }
  0x35   :  { %1953 = vmatmul.mubr.msk.bf16.gmra.mxu0 %vm389_vm2, %v2025_v28  ;;  %1985 = vmatmul.mubr.msk.bf16.gmra.mxu1 %vm389_vm2, %v2026_v29 }
  0x36   :  { %1956 = vmatprep.mubr.msk.bf16.mxu0 %vm389_vm2, %v2027_v30  ;;  %1988 = vmatprep.mubr.msk.bf16.mxu1 %vm389_vm2, %v2028_v31 }
  0x3d   :  { %1957 = vmatmul.mubr.msk.bf16.gmra.mxu0 %vm389_vm2, %v2029_v32  ;;  %1989 = vmatmul.mubr.msk.bf16.gmra.mxu1 %vm389_vm2, %v2030_v33 }
  0x3e   :  { %1960 = vmatprep.mubr.msk.bf16.mxu0 %vm389_vm2, %v2031_v34  ;;  %1992 = vmatprep.mubr.msk.bf16.mxu1 %vm389_vm2, %v2032_v35 }
  0x45   :  { %1961 = vmatmul.mubr.msk.bf16.gmra.mxu0 %vm389_vm2, %v2033_v36  ;;  %1993 = vmatmul.mubr.msk.bf16.gmra.mxu1 %vm389_vm2, %v2034_v37 }
  0xcd   :  { %v1934_v39 = vpop.f32.mrf.mxu0  ;;  %v1966_v40 = vpop.f32.mrf.mxu1 }
  0xce   :  { %v986_v41 = vmul.f32 %v1934_v39, %v2198_v38  ;;  %v1018_v42 = vmul.f32 %v1966_v40, %v2198_v38 }
  0xcf   :  { %v527_v44 = vpop.f32.mrf.mxu0  ;;  %v655_v45 = vpop.f32.mrf.mxu1 }
  0xd0   :  { %v984_v46 = vmul.f32 %v2198_v38, %v527_v44  ;;  %v1016_v47 = vmul.f32 %v2198_v38, %v655_v45  ;;  %v1057_v50 = vadd.f32 %v2205_v43, %v986_v41  ;;  %v1089_v51 = vadd.f32 %v2205_v43, %v1018_v42 }
  0xd1   :  { %v1935_v48 = vpop.f32.mrf.mxu0  ;;  %v1967_v49 = vpop.f32.mrf.mxu1 }
  0xd2   :  { %v987_v52 = vmul.f32 %v1935_v48, %v2198_v38  ;;  %v1019_v53 = vmul.f32 %v1967_v49, %v2198_v38  ;;  %v1055_v56 = vadd.f32 %v2205_v43, %v984_v46  ;;  %v1087_v57 = vadd.f32 %v2205_v43, %v1016_v47 }
  0xd3   :  { %v530_v54 = vpop.f32.mrf.mxu0  ;;  %v658_v55 = vpop.f32.mrf.mxu1  ;;  %v1121_v0 = vmax.f32 %v1057_v50, 0.0  ;;  %v1153_v1 = vmax.f32 %v1089_v51, 0.0 }
  0xd4   :  { %v985_v58 = vmul.f32 %v2198_v38, %v530_v54  ;;  %v1017_v59 = vmul.f32 %v2198_v38, %v658_v55  ;;  %v1058_v60 = vadd.f32 %v2205_v43, %v987_v52  ;;  %v1090_v61 = vadd.f32 %v2205_v43, %v1019_v53 }
  0xd5   :  { %v1938_v62 = vpop.f32.mrf.mxu0  ;;  %v1970_v63 = vpop.f32.mrf.mxu1  ;;  %v1119_v10 = vmax.f32 %v1055_v56, 0.0  ;;  %v1151_v11 = vmax.f32 %v1087_v57, 0.0 }
  0xd6   :  { %v1056_v2 = vadd.f32 %v2205_v43, %v985_v58  ;;  %v1088_v3 = vadd.f32 %v2205_v43, %v1017_v59  ;;  %v1122_v4 = vmax.f32 %v1058_v60, 0.0  ;;  %v1154_v5 = vmax.f32 %v1090_v61, 0.0 }
  0xd7   :  { %v990_v6 = vmul.f32 %v1938_v62, %v2198_v38  ;;  %v1022_v7 = vmul.f32 %v1970_v63, %v2198_v38  ;;  %v543_v8 = vpop.f32.mrf.mxu0  ;;  %v671_v9 = vpop.f32.mrf.mxu1 }
  0xd8   :  { %v1120_v12 = vmax.f32 %v1056_v2, 0.0  ;;  %v1152_v13 = vmax.f32 %v1088_v3, 0.0  ;;  %v1711_v14 = vpack.c.bf16 %v1122_v4, %v1121_v0  ;;  %v1791_v15 = vpack.c.bf16 %v1154_v5, %v1153_v1 }
  0xd9   :  { %v988_v16 = vmul.f32 %v2198_v38, %v543_v8  ;;  %v1020_v17 = vmul.f32 %v2198_v38, %v671_v9  ;;  %v1939_v18 = vpop.f32.mrf.mxu0  ;;  %v1971_v19 = vpop.f32.mrf.mxu1  ;;  %v1061_v22 = vadd.f32 %v2205_v43, %v990_v6  ;;  %v1093_v23 = vadd.f32 %v2205_v43, %v1022_v7 }
  0xda   :  { %v1706_v20 = vpack.c.bf16 %v1120_v12, %v1119_v10  ;;  %v1786_v21 = vpack.c.bf16 %v1152_v13, %v1151_v11  ;;  %1863 = vst [vmem:[%s2433_s4 + $0x8] sm:$0xff] %v1711_v14   ;;  %1879 = vst [vmem:[%s2433_s4 + $0x88] sm:$0xff] %v1791_v15   ;;  %v991_v24 = vmul.f32 %v1939_v18, %v2198_v38 }
  0xdb   :  { %v1023_v25 = vmul.f32 %v1971_v19, %v2198_v38  ;;  %v546_v26 = vpop.f32.mrf.mxu0  ;;  %v674_v27 = vpop.f32.mrf.mxu1  ;;  %v1059_v28 = vadd.f32 %v2205_v43, %v988_v16  ;;  %v1091_v29 = vadd.f32 %v2205_v43, %v1020_v17  ;;  %v1125_v41 = vmax.f32 %v1061_v22, 0.0 }
  0xdc   :  { %1707 = vst [vmem:[%s2433_s4] sm:$0xff] %v1706_v20   ;;  %1878 = vst [vmem:[%s2433_s4 + $0x80] sm:$0xff] %v1786_v21   ;;  %v989_v30 = vmul.f32 %v2198_v38, %v546_v26  ;;  %v1021_v31 = vmul.f32 %v2198_v38, %v674_v27  ;;  %v1062_v32 = vadd.f32 %v2205_v43, %v991_v24  ;;  %v1157_v42 = vmax.f32 %v1093_v23, 0.0 }
  0xdd   :  { %v1094_v33 = vadd.f32 %v2205_v43, %v1023_v25  ;;  %v1942_v34 = vpop.f32.mrf.mxu0  ;;  %v1974_v35 = vpop.f32.mrf.mxu1  ;;  %v1123_v48 = vmax.f32 %v1059_v28, 0.0  ;;  %v1155_v49 = vmax.f32 %v1091_v29, 0.0 }
  0xde   :  { %v1060_v36 = vadd.f32 %v2205_v43, %v989_v30  ;;  %v1092_v37 = vadd.f32 %v2205_v43, %v1021_v31  ;;  %v994_v39 = vmul.f32 %v1942_v34, %v2198_v38  ;;  %v1026_v40 = vmul.f32 %v1974_v35, %v2198_v38 }
  0xdf   :  { %v1126_v44 = vmax.f32 %v1062_v32, 0.0  ;;  %v1158_v45 = vmax.f32 %v1094_v33, 0.0  ;;  %v559_v46 = vpop.f32.mrf.mxu0  ;;  %v687_v47 = vpop.f32.mrf.mxu1 }
  0xe0   :  { %v1124_v50 = vmax.f32 %v1060_v36, 0.0  ;;  %v1156_v51 = vmax.f32 %v1092_v37, 0.0  ;;  %v992_v54 = vmul.f32 %v2198_v38, %v559_v46  ;;  %v1024_v55 = vmul.f32 %v2198_v38, %v687_v47 }
  0xe1   :  { %v1721_v52 = vpack.c.bf16 %v1126_v44, %v1125_v41  ;;  %v1801_v53 = vpack.c.bf16 %v1158_v45, %v1157_v42  ;;  %v1943_v56 = vpop.f32.mrf.mxu0  ;;  %v1975_v57 = vpop.f32.mrf.mxu1  ;;  %v1065_v60 = vadd.f32 %v2205_v43, %v994_v39  ;;  %v1097_v61 = vadd.f32 %v2205_v43, %v1026_v40 }
  0xe2   :  { %v1716_v58 = vpack.c.bf16 %v1124_v50, %v1123_v48  ;;  %v1796_v59 = vpack.c.bf16 %v1156_v51, %v1155_v49  ;;  %v995_v62 = vmul.f32 %v1943_v56, %v2198_v38  ;;  %v1027_v63 = vmul.f32 %v1975_v57, %v2198_v38 }
  0xe3   :  { %1865 = vst [vmem:[%s2433_s4 + $0x18] sm:$0xff] %v1721_v52   ;;  %1881 = vst [vmem:[%s2433_s4 + $0x98] sm:$0xff] %v1801_v53   ;;  %v562_v0 = vpop.f32.mrf.mxu0  ;;  %v690_v1 = vpop.f32.mrf.mxu1  ;;  %v1063_v2 = vadd.f32 %v2205_v43, %v992_v54  ;;  %v1095_v3 = vadd.f32 %v2205_v43, %v1024_v55  ;;  %v1129_v10 = vmax.f32 %v1065_v60, 0.0  ;;  %v1161_v11 = vmax.f32 %v1097_v61, 0.0 }
  0xe4   :  { %1864 = vst [vmem:[%s2433_s4 + $0x10] sm:$0xff] %v1716_v58   ;;  %1880 = vst [vmem:[%s2433_s4 + $0x90] sm:$0xff] %v1796_v59   ;;  %v993_v4 = vmul.f32 %v2198_v38, %v562_v0  ;;  %v1025_v5 = vmul.f32 %v2198_v38, %v690_v1  ;;  %v1066_v6 = vadd.f32 %v2205_v43, %v995_v62 }
  0xe5   :  { %v1098_v7 = vadd.f32 %v2205_v43, %v1027_v63  ;;  %v1946_v8 = vpop.f32.mrf.mxu0  ;;  %v1978_v9 = vpop.f32.mrf.mxu1  ;;  %v1127_v20 = vmax.f32 %v1063_v2, 0.0  ;;  %v1159_v21 = vmax.f32 %v1095_v3, 0.0 }
  0xe6   :  { %v1064_v12 = vadd.f32 %v2205_v43, %v993_v4  ;;  %v1096_v13 = vadd.f32 %v2205_v43, %v1025_v5  ;;  %v1130_v14 = vmax.f32 %v1066_v6, 0.0  ;;  %v998_v16 = vmul.f32 %v1946_v8, %v2198_v38 }
  0xe7   :  { %v1162_v15 = vmax.f32 %v1098_v7, 0.0  ;;  %v1030_v17 = vmul.f32 %v1978_v9, %v2198_v38  ;;  %v575_v18 = vpop.f32.mrf.mxu0  ;;  %v703_v19 = vpop.f32.mrf.mxu1 }
  0xe8   :  { %v1128_v22 = vmax.f32 %v1064_v12, 0.0  ;;  %v1160_v23 = vmax.f32 %v1096_v13, 0.0  ;;  %v1731_v24 = vpack.c.bf16 %v1130_v14, %v1129_v10  ;;  %v996_v26 = vmul.f32 %v2198_v38, %v575_v18 }
  0xe9   :  { %v1811_v25 = vpack.c.bf16 %v1162_v15, %v1161_v11  ;;  %v1028_v27 = vmul.f32 %v2198_v38, %v703_v19  ;;  %v1947_v28 = vpop.f32.mrf.mxu0  ;;  %v1979_v29 = vpop.f32.mrf.mxu1  ;;  %v1069_v32 = vadd.f32 %v2205_v43, %v998_v16  ;;  %v1101_v33 = vadd.f32 %v2205_v43, %v1030_v17 }
  0xea   :  { %v1726_v30 = vpack.c.bf16 %v1128_v22, %v1127_v20  ;;  %v1806_v31 = vpack.c.bf16 %v1160_v23, %v1159_v21  ;;  %1867 = vst [vmem:[%s2433_s4 + $0x28] sm:$0xff] %v1731_v24   ;;  %v999_v34 = vmul.f32 %v1947_v28, %v2198_v38  ;;  %v1031_v35 = vmul.f32 %v1979_v29, %v2198_v38 }
  0xeb   :  { %1883 = vst [vmem:[%s2433_s4 + $0xa8] sm:$0xff] %v1811_v25   ;;  %v578_v36 = vpop.f32.mrf.mxu0  ;;  %v706_v37 = vpop.f32.mrf.mxu1  ;;  %v1067_v39 = vadd.f32 %v2205_v43, %v996_v26  ;;  %v1099_v40 = vadd.f32 %v2205_v43, %v1028_v27  ;;  %v1133_v52 = vmax.f32 %v1069_v32, 0.0  ;;  %v1165_v53 = vmax.f32 %v1101_v33, 0.0 }
  0xec   :  { %1866 = vst [vmem:[%s2433_s4 + $0x20] sm:$0xff] %v1726_v30   ;;  %1882 = vst [vmem:[%s2433_s4 + $0xa0] sm:$0xff] %v1806_v31   ;;  %v997_v41 = vmul.f32 %v2198_v38, %v578_v36  ;;  %v1029_v42 = vmul.f32 %v2198_v38, %v706_v37  ;;  %v1070_v44 = vadd.f32 %v2205_v43, %v999_v34 }
  0xed   :  { %v1102_v45 = vadd.f32 %v2205_v43, %v1031_v35  ;;  %v1950_v46 = vpop.f32.mrf.mxu0  ;;  %v1982_v47 = vpop.f32.mrf.mxu1  ;;  %v1131_v58 = vmax.f32 %v1067_v39, 0.0  ;;  %v1163_v59 = vmax.f32 %v1099_v40, 0.0 }
  0xee   :  { %v1068_v48 = vadd.f32 %v2205_v43, %v997_v41  ;;  %v1100_v49 = vadd.f32 %v2205_v43, %v1029_v42  ;;  %v1002_v50 = vmul.f32 %v1950_v46, %v2198_v38  ;;  %v1034_v51 = vmul.f32 %v1982_v47, %v2198_v38 }
  0xef   :  { %v1134_v54 = vmax.f32 %v1070_v44, 0.0  ;;  %v1166_v55 = vmax.f32 %v1102_v45, 0.0  ;;  %v591_v56 = vpop.f32.mrf.mxu0  ;;  %v719_v57 = vpop.f32.mrf.mxu1 }
  0xf0   :  { %v1132_v60 = vmax.f32 %v1068_v48, 0.0  ;;  %v1164_v61 = vmax.f32 %v1100_v49, 0.0  ;;  %v1000_v0 = vmul.f32 %v2198_v38, %v591_v56  ;;  %v1032_v1 = vmul.f32 %v2198_v38, %v719_v57 }
  0xf1   :  { %v1741_v62 = vpack.c.bf16 %v1134_v54, %v1133_v52  ;;  %v1821_v63 = vpack.c.bf16 %v1166_v55, %v1165_v53  ;;  %v1951_v2 = vpop.f32.mrf.mxu0  ;;  %v1983_v3 = vpop.f32.mrf.mxu1  ;;  %v1073_v6 = vadd.f32 %v2205_v43, %v1002_v50  ;;  %v1105_v7 = vadd.f32 %v2205_v43, %v1034_v51 }
  0xf2   :  { %v1736_v4 = vpack.c.bf16 %v1132_v60, %v1131_v58  ;;  %v1816_v5 = vpack.c.bf16 %v1164_v61, %v1163_v59  ;;  %v1003_v8 = vmul.f32 %v1951_v2, %v2198_v38  ;;  %v1035_v9 = vmul.f32 %v1983_v3, %v2198_v38 }
  0xf3   :  { %1869 = vst [vmem:[%s2433_s4 + $0x38] sm:$0xff] %v1741_v62   ;;  %1885 = vst [vmem:[%s2433_s4 + $0xb8] sm:$0xff] %v1821_v63   ;;  %v594_v10 = vpop.f32.mrf.mxu0  ;;  %v722_v11 = vpop.f32.mrf.mxu1  ;;  %v1071_v12 = vadd.f32 %v2205_v43, %v1000_v0  ;;  %v1103_v13 = vadd.f32 %v2205_v43, %v1032_v1  ;;  %v1137_v20 = vmax.f32 %v1073_v6, 0.0  ;;  %v1169_v21 = vmax.f32 %v1105_v7, 0.0 }
  0xf4   :  { %1868 = vst [vmem:[%s2433_s4 + $0x30] sm:$0xff] %v1736_v4   ;;  %1884 = vst [vmem:[%s2433_s4 + $0xb0] sm:$0xff] %v1816_v5   ;;  %v1001_v14 = vmul.f32 %v2198_v38, %v594_v10  ;;  %v1033_v15 = vmul.f32 %v2198_v38, %v722_v11  ;;  %v1074_v16 = vadd.f32 %v2205_v43, %v1003_v8 }
  0xf5   :  { %v1106_v17 = vadd.f32 %v2205_v43, %v1035_v9  ;;  %v1954_v18 = vpop.f32.mrf.mxu0  ;;  %v1986_v19 = vpop.f32.mrf.mxu1  ;;  %v1135_v30 = vmax.f32 %v1071_v12, 0.0  ;;  %v1167_v31 = vmax.f32 %v1103_v13, 0.0 }
  0xf6   :  { %v1072_v22 = vadd.f32 %v2205_v43, %v1001_v14  ;;  %v1104_v23 = vadd.f32 %v2205_v43, %v1033_v15  ;;  %v1138_v24 = vmax.f32 %v1074_v16, 0.0  ;;  %v1006_v26 = vmul.f32 %v1954_v18, %v2198_v38 }
  0xf7   :  { %v1170_v25 = vmax.f32 %v1106_v17, 0.0  ;;  %v1038_v27 = vmul.f32 %v1986_v19, %v2198_v38  ;;  %v607_v28 = vpop.f32.mrf.mxu0  ;;  %v735_v29 = vpop.f32.mrf.mxu1 }
  0xf8   :  { %v1136_v32 = vmax.f32 %v1072_v22, 0.0  ;;  %v1168_v33 = vmax.f32 %v1104_v23, 0.0  ;;  %v1751_v34 = vpack.c.bf16 %v1138_v24, %v1137_v20  ;;  %v1004_v36 = vmul.f32 %v2198_v38, %v607_v28 }
  0xf9   :  { %v1831_v35 = vpack.c.bf16 %v1170_v25, %v1169_v21  ;;  %v1036_v37 = vmul.f32 %v2198_v38, %v735_v29  ;;  %v1955_v39 = vpop.f32.mrf.mxu0  ;;  %v1987_v40 = vpop.f32.mrf.mxu1  ;;  %v1077_v44 = vadd.f32 %v2205_v43, %v1006_v26  ;;  %v1109_v45 = vadd.f32 %v2205_v43, %v1038_v27 }
  0xfa   :  { %v1746_v41 = vpack.c.bf16 %v1136_v32, %v1135_v30  ;;  %v1826_v42 = vpack.c.bf16 %v1168_v33, %v1167_v31  ;;  %1871 = vst [vmem:[%s2433_s4 + $0x48] sm:$0xff] %v1751_v34   ;;  %v1007_v46 = vmul.f32 %v1955_v39, %v2198_v38  ;;  %v1039_v47 = vmul.f32 %v1987_v40, %v2198_v38 }
  0xfb   :  { %1887 = vst [vmem:[%s2433_s4 + $0xc8] sm:$0xff] %v1831_v35   ;;  %v610_v48 = vpop.f32.mrf.mxu0  ;;  %v738_v49 = vpop.f32.mrf.mxu1  ;;  %v1075_v50 = vadd.f32 %v2205_v43, %v1004_v36  ;;  %v1107_v51 = vadd.f32 %v2205_v43, %v1036_v37  ;;  %v1141_v62 = vmax.f32 %v1077_v44, 0.0  ;;  %v1173_v63 = vmax.f32 %v1109_v45, 0.0 }
  0xfc   :  { %1870 = vst [vmem:[%s2433_s4 + $0x40] sm:$0xff] %v1746_v41   ;;  %1886 = vst [vmem:[%s2433_s4 + $0xc0] sm:$0xff] %v1826_v42   ;;  %v1005_v52 = vmul.f32 %v2198_v38, %v610_v48  ;;  %v1037_v53 = vmul.f32 %v2198_v38, %v738_v49  ;;  %v1078_v54 = vadd.f32 %v2205_v43, %v1007_v46 }
  0xfd   :  { %v1110_v55 = vadd.f32 %v2205_v43, %v1039_v47  ;;  %v1958_v56 = vpop.f32.mrf.mxu0  ;;  %v1990_v57 = vpop.f32.mrf.mxu1  ;;  %v1139_v4 = vmax.f32 %v1075_v50, 0.0  ;;  %v1171_v5 = vmax.f32 %v1107_v51, 0.0 }
  0xfe   :  { %v1076_v58 = vadd.f32 %v2205_v43, %v1005_v52  ;;  %v1108_v59 = vadd.f32 %v2205_v43, %v1037_v53  ;;  %v1010_v60 = vmul.f32 %v1958_v56, %v2198_v38  ;;  %v1042_v61 = vmul.f32 %v1990_v57, %v2198_v38 }
  0xff   :  { %v1142_v0 = vmax.f32 %v1078_v54, 0.0  ;;  %v1174_v1 = vmax.f32 %v1110_v55, 0.0  ;;  %v623_v2 = vpop.f32.mrf.mxu0  ;;  %v751_v3 = vpop.f32.mrf.mxu1 }
 0x100   :  { %v1140_v6 = vmax.f32 %v1076_v58, 0.0  ;;  %v1172_v7 = vmax.f32 %v1108_v59, 0.0  ;;  %v1008_v10 = vmul.f32 %v2198_v38, %v623_v2  ;;  %v1040_v11 = vmul.f32 %v2198_v38, %v751_v3 }
 0x101   :  { %v1761_v8 = vpack.c.bf16 %v1142_v0, %v1141_v62  ;;  %v1841_v9 = vpack.c.bf16 %v1174_v1, %v1173_v63  ;;  %v1959_v12 = vpop.f32.mrf.mxu0  ;;  %v1991_v13 = vpop.f32.mrf.mxu1  ;;  %v1081_v16 = vadd.f32 %v2205_v43, %v1010_v60  ;;  %v1113_v17 = vadd.f32 %v2205_v43, %v1042_v61 }
 0x102   :  { %v1756_v14 = vpack.c.bf16 %v1140_v6, %v1139_v4  ;;  %v1836_v15 = vpack.c.bf16 %v1172_v7, %v1171_v5  ;;  %v1011_v18 = vmul.f32 %v1959_v12, %v2198_v38  ;;  %v1043_v19 = vmul.f32 %v1991_v13, %v2198_v38 }
 0x103   :  { %1873 = vst [vmem:[%s2433_s4 + $0x58] sm:$0xff] %v1761_v8   ;;  %1889 = vst [vmem:[%s2433_s4 + $0xd8] sm:$0xff] %v1841_v9   ;;  %v626_v20 = vpop.f32.mrf.mxu0  ;;  %v754_v21 = vpop.f32.mrf.mxu1  ;;  %v1079_v22 = vadd.f32 %v2205_v43, %v1008_v10  ;;  %v1111_v23 = vadd.f32 %v2205_v43, %v1040_v11  ;;  %v1145_v30 = vmax.f32 %v1081_v16, 0.0  ;;  %v1177_v31 = vmax.f32 %v1113_v17, 0.0 }
 0x104   :  { %1872 = vst [vmem:[%s2433_s4 + $0x50] sm:$0xff] %v1756_v14   ;;  %1888 = vst [vmem:[%s2433_s4 + $0xd0] sm:$0xff] %v1836_v15   ;;  %v1009_v24 = vmul.f32 %v2198_v38, %v626_v20  ;;  %v1041_v25 = vmul.f32 %v2198_v38, %v754_v21  ;;  %v1082_v26 = vadd.f32 %v2205_v43, %v1011_v18 }
 0x105   :  { %v1114_v27 = vadd.f32 %v2205_v43, %v1043_v19  ;;  %v1962_v28 = vpop.f32.mrf.mxu0  ;;  %v1994_v29 = vpop.f32.mrf.mxu1  ;;  %v1143_v41 = vmax.f32 %v1079_v22, 0.0  ;;  %v1175_v42 = vmax.f32 %v1111_v23, 0.0 }
 0x106   :  { %v1080_v32 = vadd.f32 %v2205_v43, %v1009_v24  ;;  %v1112_v33 = vadd.f32 %v2205_v43, %v1041_v25  ;;  %v1146_v34 = vmax.f32 %v1082_v26, 0.0  ;;  %v1014_v36 = vmul.f32 %v1962_v28, %v2198_v38 }
 0x107   :  { %v1178_v35 = vmax.f32 %v1114_v27, 0.0  ;;  %v1046_v37 = vmul.f32 %v1994_v29, %v2198_v38  ;;  %v639_v39 = vpop.f32.mrf.mxu0  ;;  %v767_v40 = vpop.f32.mrf.mxu1 }
 0x108   :  { %v1144_v44 = vmax.f32 %v1080_v32, 0.0  ;;  %v1176_v45 = vmax.f32 %v1112_v33, 0.0  ;;  %v1771_v46 = vpack.c.bf16 %v1146_v34, %v1145_v30  ;;  %v1012_v48 = vmul.f32 %v2198_v38, %v639_v39 }
 0x109   :  { %v1851_v47 = vpack.c.bf16 %v1178_v35, %v1177_v31  ;;  %v1044_v49 = vmul.f32 %v2198_v38, %v767_v40  ;;  %v1963_v50 = vpop.f32.mrf.mxu0  ;;  %v1995_v51 = vpop.f32.mrf.mxu1  ;;  %v1085_v54 = vadd.f32 %v2205_v43, %v1014_v36  ;;  %v1117_v55 = vadd.f32 %v2205_v43, %v1046_v37 }
 0x10a   :  { %v1766_v52 = vpack.c.bf16 %v1144_v44, %v1143_v41  ;;  %v1846_v53 = vpack.c.bf16 %v1176_v45, %v1175_v42  ;;  %1875 = vst [vmem:[%s2433_s4 + $0x68] sm:$0xff] %v1771_v46   ;;  %v1015_v56 = vmul.f32 %v1963_v50, %v2198_v38  ;;  %v1047_v57 = vmul.f32 %v1995_v51, %v2198_v38 }
 0x10b   :  { %1891 = vst [vmem:[%s2433_s4 + $0xe8] sm:$0xff] %v1851_v47   ;;  %v642_v58 = vpop.f32.mrf.mxu0  ;;  %v770_v59 = vpop.f32.mrf.mxu1  ;;  %v1083_v60 = vadd.f32 %v2205_v43, %v1012_v48  ;;  %v1115_v61 = vadd.f32 %v2205_v43, %v1044_v49  ;;  %v1149_v4 = vmax.f32 %v1085_v54, 0.0  ;;  %v1181_v5 = vmax.f32 %v1117_v55, 0.0 }
 0x10c   :  { %1874 = vst [vmem:[%s2433_s4 + $0x60] sm:$0xff] %v1766_v52   ;;  %1890 = vst [vmem:[%s2433_s4 + $0xe0] sm:$0xff] %v1846_v53   ;;  %v1013_v62 = vmul.f32 %v2198_v38, %v642_v58  ;;  %v1045_v63 = vmul.f32 %v2198_v38, %v770_v59  ;;  %v1086_v0 = vadd.f32 %v2205_v43, %v1015_v56 }
 0x10d   :  { %v1118_v1 = vadd.f32 %v2205_v43, %v1047_v57  ;;  %v1147_v8 = vmax.f32 %v1083_v60, 0.0  ;;  %v1179_v9 = vmax.f32 %v1115_v61, 0.0 }
 0x10e   :  { %v1084_v2 = vadd.f32 %v2205_v43, %v1013_v62  ;;  %v1116_v3 = vadd.f32 %v2205_v43, %v1045_v63  ;;  %v1150_v6 = vmax.f32 %v1086_v0, 0.0 }
 0x10f   :  { %v1182_v7 = vmax.f32 %v1118_v1, 0.0 }
 0x110   :  { %v1148_v10 = vmax.f32 %v1084_v2, 0.0  ;;  %v1180_v11 = vmax.f32 %v1116_v3, 0.0  ;;  %v1781_v12 = vpack.c.bf16 %v1150_v6, %v1149_v4 }
 0x111   :  { %v1861_v13 = vpack.c.bf16 %v1182_v7, %v1181_v5 }
 0x112   :  { %v1776_v14 = vpack.c.bf16 %v1148_v10, %v1147_v8  ;;  %v1856_v38 = vpack.c.bf16 %v1180_v11, %v1179_v9  ;;  %1877 = vst [vmem:[%s2433_s4 + $0x78] sm:$0xff] %v1781_v12  }
 0x113   :  { %1893 = vst [vmem:[%s2433_s4 + $0xf8] sm:$0xff] %v1861_v13  }
 0x114   :  { %1876 = vst [vmem:[%s2433_s4 + $0x70] sm:$0xff] %v1776_v14   ;;  %1892 = vst [vmem:[%s2433_s4 + $0xf0] sm:$0xff] %v1856_v38  }

// kernel: unet_forward.21
= control target key start
LH: loop header
LB: loop body
LE: loop exit
PB: predicated region body
PF: predicated region fallthrough
CT: control target
= control target key end

     0   :  { %s816_s6 = smov 0   ;;  %s818_s7 = smov 0   ;;  %s949_s0 = inlined_call_operand.vmem [shape: bf16[2,4,2,4,2,64], index: 0, kind: input, shape index: {}]   ;;  %s950_s1 = inlined_call_operand.vmem [shape: bf16[2,4,4,64], index: 1, kind: output, shape index: {}]  }
   0x1   :  { %s820_s8 = smov 0  }
   0x2 LB: > { %s23_s9 = sadd.s32 1, %s798_s7  ;;  %p731_p0 = scmp.ge.s32.totalorder %s802_s8, 1  ;;  %s802_s8 = sphi %s820_s8, %s11_s8   ;;  %s798_s7 = sphi %s818_s7, %s952_s7   ;;  %s794_s6 = sphi %s816_s6, %s951_s6  }
   0x3   : > { %p25_p1 = scmp.ge.s32.totalorder %s23_s9, 2  ;;  %p108_p2 = scmp.lt.s32.totalorder %s802_s8, 3 }
   0x5   : > { %s954_s9 = smov (%p25_p1, %s23_s9), 0  ;;  %p109_p3 = pnand %p731_p0, %p108_p2 }
   0x6   : > { %p137_p4 = scmp.lt.s32.totalorder (!%p109_p3), %s794_s6, 1 }
   0x7   : > { %112 = sbr.rel (%p109_p3) target bundleno = 60 (0x3c), region = 24 }
   0xc   : > { %v335_v0 = vlaneseq  ;;  %s956_s6 = smov (!%p137_p4, %s794_s6), 1  ;;  %v804_v1 = vmov 1935823168   ;;  %v805_v3 = vmov 1983009808   ;;  %vm573_vm0 = vcmask 1041409  }
   0xd   : > { %v333_v2 = vunpack.c.l.s4 %v804_v1  ;;  %v445_v4 = vunpack.c.l.s4 %v805_v3  ;;  %s732_s10 = sshll.u32 %s956_s6, 5  ;;  %vm576_vm1 = vcmask 1042434   ;;  %vm579_vm2 = vcmask 1043459   ;;  %s753_s14 = sshll.u32 %s956_s6, 3 }
   0xe   : > { %s840_s13 = scalar_lea.vmem %s949_s0, %s732_s10  ;;  %v336_v5 = vshrl.u32 %v335_v0, 7  ;;  %vm635_vm3 = vcmask 517120   ;;  %s900_s17 = scalar_lea.vmem %s950_s1, %s753_s14 }
   0xf   : > { %v156_v6 = vld [vmem:[%s840_s13] sm:$0x1]  ;;  %v157_v7 = vld [vmem:[%s840_s13 + $0x1] sm:$0x1]  ;;  %v158_v8 = vld [vmem:[%s840_s13 + $0x2] sm:$0x1]  ;;  %v334_v9 = vunpack.c.0.s8 %v333_v2  ;;  %v446_v10 = vunpack.c.0.s8 %v445_v4 }
  0x10   : > { %v159_v11 = vld [vmem:[%s840_s13 + $0x3] sm:$0x1]  ;;  %v160_v12 = vld [vmem:[%s840_s13 + $0x4] sm:$0x1]  ;;  %v161_v13 = vld [vmem:[%s840_s13 + $0x5] sm:$0x1] }
  0x11   : > { %v162_v14 = vld [vmem:[%s840_s13 + $0x6] sm:$0x1]  ;;  %v163_v15 = vld [vmem:[%s840_s13 + $0x7] sm:$0x1]  ;;  %v188_v16 = vmax.bf16 %v160_v12, %v156_v6  ;;  %v189_v17 = vmax.bf16 %v161_v13, %v157_v7  ;;  %v164_v18 = vld [vmem:[%s840_s13 + $0x8] sm:$0x1]  ;;  %v854_v26 = vsub.s32 %v334_v9, %v336_v5  ;;  %v856_v27 = vsub.s32 %v446_v10, %v336_v5 }
  0x12   : > { %v190_v19 = vmax.bf16 %v162_v14, %v158_v8  ;;  %v191_v20 = vmax.bf16 %v163_v15, %v159_v11  ;;  %v165_v21 = vld [vmem:[%s840_s13 + $0x9] sm:$0x1]  ;;  %v166_v22 = vld [vmem:[%s840_s13 + $0xa] sm:$0x1]  ;;  %v167_v23 = vld [vmem:[%s840_s13 + $0xb] sm:$0x1] }
  0x13   : > { %v205_v24 = vshrl.u32 %v188_v16, 16  ;;  %v210_v25 = vshrl.u32 %v189_v17, 16  ;;  %v168_v28 = vld [vmem:[%s840_s13 + $0xc] sm:$0x1]  ;;  %v169_v29 = vld [vmem:[%s840_s13 + $0xd] sm:$0x1] }
  0x14   : > { %v215_v30 = vshrl.u32 %v190_v19, 16  ;;  %v220_v31 = vshrl.u32 %v191_v20, 16  ;;  %v170_v32 = vld [vmem:[%s840_s13 + $0xe] sm:$0x1]  ;;  %v171_v33 = vld [vmem:[%s840_s13 + $0xf] sm:$0x1]  ;;  %v192_v34 = vmax.bf16 %v168_v28, %v164_v18  ;;  %v193_v35 = vmax.bf16 %v169_v29, %v165_v21 }
  0x15   : > { %v300_v36 = vmax.bf16 %v205_v24, %v188_v16  ;;  %v301_v37 = vmax.bf16 %v210_v25, %v189_v17  ;;  %v194_v38 = vmax.bf16 %v170_v32, %v166_v22  ;;  %v195_v39 = vmax.bf16 %v171_v33, %v167_v23  ;;  %v172_v60 = vld [vmem:[%s840_s13 + $0x10] sm:$0x1]  ;;  %v176_v61 = vld [vmem:[%s840_s13 + $0x14] sm:$0x1]  ;;  %v173_v2 = vld [vmem:[%s840_s13 + $0x11] sm:$0x1] }
  0x16   : > { %v302_v40 = vmax.bf16 %v215_v30, %v190_v19  ;;  %v303_v41 = vmax.bf16 %v220_v31, %v191_v20  ;;  %v225_v42 = vshrl.u32 %v192_v34, 16  ;;  %v230_v43 = vshrl.u32 %v193_v35, 16  ;;  %v174_v7 = vld [vmem:[%s840_s13 + $0x12] sm:$0x1]  ;;  %v175_v8 = vld [vmem:[%s840_s13 + $0x13] sm:$0x1] }
  0x17   : > { %v338_v44 = vrot.slane %v300_v36, %v854_v26  ;;  %v345_v45 = vrot.slane %v301_v37, %v854_v26  ;;  %v235_v46 = vshrl.u32 %v194_v38, 16  ;;  %v240_v47 = vshrl.u32 %v195_v39, 16  ;;  %v177_v9 = vld [vmem:[%s840_s13 + $0x15] sm:$0x1]  ;;  %v178_v13 = vld [vmem:[%s840_s13 + $0x16] sm:$0x1] }
  0x18   : > { %v352_v48 = vrot.slane %v302_v40, %v854_v26  ;;  %v359_v49 = vrot.slane %v303_v41, %v854_v26  ;;  %v304_v50 = vmax.bf16 %v225_v42, %v192_v34  ;;  %v305_v51 = vmax.bf16 %v230_v43, %v193_v35  ;;  %v179_v14 = vld [vmem:[%s840_s13 + $0x17] sm:$0x1]  ;;  %v180_v24 = vld [vmem:[%s840_s13 + $0x18] sm:$0x1]  ;;  %v181_v31 = vld [vmem:[%s840_s13 + $0x19] sm:$0x1] }
  0x19   : > { %v450_v52 = vrot.slane %v338_v44, %v856_v27  ;;  %v457_v53 = vrot.slane %v345_v45, %v856_v27  ;;  %v306_v54 = vmax.bf16 %v235_v46, %v194_v38  ;;  %v307_v55 = vmax.bf16 %v240_v47, %v195_v39  ;;  %v184_v32 = vld [vmem:[%s840_s13 + $0x1c] sm:$0x1]  ;;  %v182_v37 = vld [vmem:[%s840_s13 + $0x1a] sm:$0x1]  ;;  %v183_v42 = vld [vmem:[%s840_s13 + $0x1b] sm:$0x1] }
  0x1a   : > { %v464_v56 = vrot.slane %v352_v48, %v856_v27  ;;  %v471_v57 = vrot.slane %v359_v49, %v856_v27  ;;  %v366_v58 = vrot.slane %v304_v50, %v854_v26  ;;  %v373_v59 = vrot.slane %v305_v51, %v854_v26  ;;  %v185_v43 = vld [vmem:[%s840_s13 + $0x1d] sm:$0x1]  ;;  %v186_v47 = vld [vmem:[%s840_s13 + $0x1e] sm:$0x1]  ;;  %v187_v48 = vld [vmem:[%s840_s13 + $0x1f] sm:$0x1] }
  0x1b   : > { %v556_v62 = vunpack.c.l.b16 %v450_v52  ;;  %v557_v63 = vunpack.c.l.b16 %v457_v53  ;;  %v380_v0 = vrot.slane %v306_v54, %v854_v26  ;;  %v387_v1 = vrot.slane %v307_v55, %v854_v26 }
  0x1c   : > { %v558_v3 = vunpack.c.l.b16 %v464_v56  ;;  %v559_v4 = vunpack.c.l.b16 %v471_v57  ;;  %v478_v5 = vrot.slane %v366_v58, %v856_v27  ;;  %v485_v6 = vrot.slane %v373_v59, %v856_v27 }
  0x1d   : > { %v572_v10 = vrot.slane %v557_v63, 7  ;;  %v492_v11 = vrot.slane %v380_v0, %v856_v27  ;;  %v499_v12 = vrot.slane %v387_v1, %v856_v27  ;;  %v196_v15 = vmax.bf16 %v176_v61, %v172_v60 }
  0x1e   : > { %v575_v16 = vrot.slane %v558_v3, 6  ;;  %v578_v17 = vrot.slane %v559_v4, 5  ;;  %v560_v18 = vunpack.c.l.b16 %v478_v5  ;;  %v561_v19 = vunpack.c.l.b16 %v485_v6 }
  0x1f   : > { %v574_v20 = vsel %vm573_vm0, %v572_v10, %v556_v62  ;;  %v562_v21 = vunpack.c.l.b16 %v492_v11  ;;  %v563_v22 = vunpack.c.l.b16 %v499_v12  ;;  %v197_v23 = vmax.bf16 %v177_v9, %v173_v2 }
  0x20   : > { %v577_v25 = vsel %vm576_vm1, %v575_v16, %v574_v20  ;;  %v581_v28 = vrot.slane %v561_v19, 7  ;;  %v198_v29 = vmax.bf16 %v178_v13, %v174_v7  ;;  %v199_v30 = vmax.bf16 %v179_v14, %v175_v8 }
  0x21   : > { %v580_v33 = vsel %vm579_vm2, %v578_v17, %v577_v25  ;;  %v583_v34 = vrot.slane %v562_v21, 6  ;;  %v585_v35 = vrot.slane %v563_v22, 5  ;;  %v245_v36 = vshrl.u32 %v196_v15, 16 }
  0x22   : > { %v599_v38 = vpack.c.b16 %v580_v33, %v580_v33  ;;  %v582_v39 = vsel %vm573_vm0, %v581_v28, %v560_v18  ;;  %v250_v40 = vshrl.u32 %v197_v23, 16  ;;  %v255_v41 = vshrl.u32 %v198_v29, 16 }
  0x23   : > { %v584_v44 = vsel %vm576_vm1, %v583_v34, %v582_v39  ;;  %v260_v45 = vshrl.u32 %v199_v30, 16  ;;  %v308_v46 = vmax.bf16 %v245_v36, %v196_v15  ;;  %v200_v49 = vmax.bf16 %v184_v32, %v180_v24 }
  0x24   : > { %v609_v50 = vrot.slane %v599_v38, %v856_v27  ;;  %v586_v51 = vsel %vm579_vm2, %v585_v35, %v584_v44  ;;  %v309_v52 = vmax.bf16 %v250_v40, %v197_v23  ;;  %v310_v53 = vmax.bf16 %v255_v41, %v198_v29 }
  0x25   : > { %v600_v54 = vpack.c.b16 %v586_v51, %v586_v51  ;;  %v311_v55 = vmax.bf16 %v260_v45, %v199_v30  ;;  %v394_v56 = vrot.slane %v308_v46, %v854_v26  ;;  %v201_v57 = vmax.bf16 %v185_v43, %v181_v31 }
  0x26   : > { %636 = vst.msk [vmem:[%s900_s17] sm:$0x3] %vm635_vm3, %v609_v50  ;;  %v401_v58 = vrot.slane %v309_v52, %v854_v26  ;;  %v408_v59 = vrot.slane %v310_v53, %v854_v26  ;;  %v202_v60 = vmax.bf16 %v186_v47, %v182_v37  ;;  %v203_v61 = vmax.bf16 %v187_v48, %v183_v42 }
  0x27   : > { %v616_v62 = vrot.slane %v600_v54, %v856_v27  ;;  %v415_v63 = vrot.slane %v311_v55, %v854_v26  ;;  %v506_v0 = vrot.slane %v394_v56, %v856_v27  ;;  %v265_v1 = vshrl.u32 %v200_v49, 16 }
  0x28   : > { %v513_v2 = vrot.slane %v401_v58, %v856_v27  ;;  %v520_v3 = vrot.slane %v408_v59, %v856_v27  ;;  %v270_v4 = vshrl.u32 %v201_v57, 16  ;;  %v275_v5 = vshrl.u32 %v202_v60, 16 }
  0x29   : > { %637 = vst.msk [vmem:[%s900_s17 + $0x2] sm:$0x3] %vm635_vm3, %v616_v62  ;;  %v527_v6 = vrot.slane %v415_v63, %v856_v27  ;;  %v564_v7 = vunpack.c.l.b16 %v506_v0  ;;  %v280_v8 = vshrl.u32 %v203_v61, 16  ;;  %v312_v9 = vmax.bf16 %v265_v1, %v200_v49 }
  0x2a   : > { %v565_v10 = vunpack.c.l.b16 %v513_v2  ;;  %v566_v11 = vunpack.c.l.b16 %v520_v3  ;;  %v313_v12 = vmax.bf16 %v270_v4, %v201_v57  ;;  %v314_v13 = vmax.bf16 %v275_v5, %v202_v60 }
  0x2b   : > { %v567_v14 = vunpack.c.l.b16 %v527_v6  ;;  %v315_v15 = vmax.bf16 %v280_v8, %v203_v61  ;;  %v422_v16 = vrot.slane %v312_v9, %v854_v26 }
  0x2c   : > { %v587_v17 = vrot.slane %v565_v10, 7  ;;  %v589_v18 = vrot.slane %v566_v11, 6  ;;  %v429_v19 = vrot.slane %v313_v12, %v854_v26  ;;  %v436_v20 = vrot.slane %v314_v13, %v854_v26 }
  0x2d   : > { %v591_v21 = vrot.slane %v567_v14, 5  ;;  %v443_v22 = vrot.slane %v315_v15, %v854_v26  ;;  %v534_v23 = vrot.slane %v422_v16, %v856_v27 }
  0x2e   : > { %v588_v24 = vsel %vm573_vm0, %v587_v17, %v564_v7  ;;  %v541_v25 = vrot.slane %v429_v19, %v856_v27  ;;  %v548_v28 = vrot.slane %v436_v20, %v856_v27 }
  0x2f   : > { %v590_v29 = vsel %vm576_vm1, %v589_v18, %v588_v24  ;;  %v555_v30 = vrot.slane %v443_v22, %v856_v27  ;;  %v568_v32 = vunpack.c.l.b16 %v534_v23 }
  0x30   : > { %v592_v31 = vsel %vm579_vm2, %v591_v21, %v590_v29  ;;  %v569_v33 = vunpack.c.l.b16 %v541_v25  ;;  %v570_v34 = vunpack.c.l.b16 %v548_v28 }
  0x31   : > { %v601_v26 = vpack.c.b16 %v592_v31, %v592_v31  ;;  %v571_v35 = vunpack.c.l.b16 %v555_v30 }
  0x32   : > { %v593_v36 = vrot.slane %v569_v33, 7  ;;  %v595_v37 = vrot.slane %v570_v34, 6 }
  0x33   : > { %v623_v38 = vrot.slane %v601_v26, %v856_v27  ;;  %v597_v39 = vrot.slane %v571_v35, 5 }
  0x34   : > { %v594_v40 = vsel %vm573_vm0, %v593_v36, %v568_v32 }
  0x35   : > { %638 = vst.msk [vmem:[%s900_s17 + $0x4] sm:$0x3] %vm635_vm3, %v623_v38  ;;  %v596_v41 = vsel %vm576_vm1, %v595_v37, %v594_v40 }
  0x36   : > { %v598_v42 = vsel %vm579_vm2, %v597_v39, %v596_v41 }
  0x37   : > { %v602_v43 = vpack.c.b16 %v598_v42, %v598_v42 }
  0x39   : > { %v630_v44 = vrot.slane %v602_v43, %v856_v27 }
  0x3b   : > { %639 = vst.msk [vmem:[%s900_s17 + $0x6] sm:$0x3] %vm635_vm3, %v630_v44 }
  0x3c PF: > { %s11_s8 = sadd.s32 1, %s802_s8   ;;  %s951_s6 = smov %s798_s7 }
  0x3d   : > { %p8_p5 = scmp.ge.s32.totalorder %s11_s8, 4   ;;  %s952_s7 = smov %s954_s9 }
  0x3f   :  { %10 = sbr.rel (!%p8_p5) target bundleno = 2 (0x2), region = 54 }

// kernel: unet_forward.23
= control target key start
LH: loop header
LB: loop body
LE: loop exit
PB: predicated region body
PF: predicated region fallthrough
CT: control target
= control target key end

     0   :  { %s455_s6 = smov 0   ;;  %s457_s7 = smov 0   ;;  %s492_s0 = inlined_call_operand.vmem [shape: bf16[2,2,2,2,2,128], index: 0, kind: input, shape index: {}]   ;;  %s493_s1 = inlined_call_operand.vmem [shape: bf16[2,2,2,128], index: 1, kind: output, shape index: {}]  }
   0x1   :  { %s459_s8 = smov 0  }
   0x2 LB: > { %s23_s9 = sadd.s32 1, %s437_s7  ;;  %p382_p0 = scmp.ge.s32.totalorder %s441_s8, 1  ;;  %s441_s8 = sphi %s459_s8, %s11_s8   ;;  %s437_s7 = sphi %s457_s7, %s495_s7   ;;  %s433_s6 = sphi %s455_s6, %s494_s6  }
   0x3   : > { %p25_p1 = scmp.ge.s32.totalorder %s23_s9, 2  ;;  %p108_p2 = scmp.lt.s32.totalorder %s441_s8, 3 }
   0x5   : > { %s497_s9 = smov (%p25_p1, %s23_s9), 0  ;;  %p109_p3 = pnand %p382_p0, %p108_p2 }
   0x6   : > { %p136_p4 = scmp.lt.s32.totalorder (!%p109_p3), %s433_s6, 1 }
   0x7   : > { %112 = sbr.rel (%p109_p3) target bundleno = 38 (0x26), region = 24 }
   0xc   : > { %v201_v0 = vlaneseq  ;;  %s499_s6 = smov (!%p136_p4, %s433_s6), 1  ;;  %v443_v1 = vmov 1935823168   ;;  %v444_v25 = vmov 1966171168   ;;  %vm259_vm0 = vcmask 1041409  }
   0xd   : > { %v199_v2 = vunpack.c.l.s4 %v443_v1  ;;  %s383_s10 = sshll.u32 %s499_s6, 3  ;;  %v266_v26 = vunpack.c.l.s4 %v444_v25  ;;  %s384_s14 = sshll.u32 %s499_s6, 1 }
   0xe   : > { %s143_s13 = scalar_lea.vmem %s492_s0, %s383_s10  ;;  %v202_v3 = vshrl.u32 %v201_v0, 7  ;;  %s152_s17 = scalar_lea.vmem %s493_s1, %s384_s14 }
   0xf   : > { %v154_v4 = vld [vmem:[%s143_s13] sm:$0x1]  ;;  %v155_v5 = vld [vmem:[%s143_s13 + $0x1] sm:$0x1]  ;;  %v156_v6 = vld [vmem:[%s143_s13 + $0x2] sm:$0x1]  ;;  %v200_v7 = vunpack.c.0.s8 %v199_v2  ;;  %v267_v34 = vunpack.c.0.s8 %v266_v26 }
  0x10   : > { %v157_v8 = vld [vmem:[%s143_s13 + $0x3] sm:$0x1]  ;;  %v162_v9 = vmax.bf16 %v156_v6, %v154_v4  ;;  %v158_v10 = vld [vmem:[%s143_s13 + $0x4] sm:$0x1]  ;;  %v159_v11 = vld [vmem:[%s143_s13 + $0x5] sm:$0x1] }
  0x11   : > { %v163_v12 = vmax.bf16 %v157_v8, %v155_v5  ;;  %v160_v13 = vld [vmem:[%s143_s13 + $0x6] sm:$0x1]  ;;  %v161_v14 = vld [vmem:[%s143_s13 + $0x7] sm:$0x1]  ;;  %v203_v19 = vsub.s32 %v200_v7, %v202_v3  ;;  %v270_v42 = vsub.s32 %v267_v34, %v202_v3 }
  0x12   : > { %v167_v15 = vshrl.u32 %v162_v9, 16  ;;  %v164_v16 = vmax.bf16 %v160_v13, %v158_v10  ;;  %v165_v17 = vmax.bf16 %v161_v14, %v159_v11 }
  0x13   : > { %v172_v18 = vshrl.u32 %v163_v12, 16 }
  0x14   : > { %v190_v20 = vmax.bf16 %v167_v15, %v162_v9  ;;  %v177_v21 = vshrl.u32 %v164_v16, 16  ;;  %v182_v22 = vshrl.u32 %v165_v17, 16 }
  0x15   : > { %v191_v23 = vmax.bf16 %v172_v18, %v163_v12 }
  0x16   : > { %v204_v24 = vrot.slane %v190_v20, %v203_v19  ;;  %v192_v27 = vmax.bf16 %v177_v21, %v164_v16  ;;  %v193_v28 = vmax.bf16 %v182_v22, %v165_v17 }
  0x17   : > { %v218_v29 = vrot.slane %v191_v23, %v203_v19 }
  0x18   : > { %v211_v30 = vrot.slane %v204_v24, %v203_v19  ;;  %v232_v31 = vrot.slane %v192_v27, %v203_v19  ;;  %v246_v32 = vrot.slane %v193_v28, %v203_v19 }
  0x19   : > { %v225_v33 = vrot.slane %v218_v29, %v203_v19 }
  0x1a   : > { %v239_v35 = vrot.slane %v232_v31, %v203_v19  ;;  %v253_v36 = vrot.slane %v246_v32, %v203_v19  ;;  %v254_v37 = vunpack.c.l.b16 %v211_v30 }
  0x1b   : > { %v255_v38 = vunpack.c.l.b16 %v225_v33 }
  0x1c   : > { %v256_v39 = vunpack.c.l.b16 %v239_v35  ;;  %v257_v40 = vunpack.c.l.b16 %v253_v36 }
  0x1d   : > { %v258_v41 = vrot.slane %v255_v38, 7 }
  0x1e   : > { %v261_v43 = vrot.slane %v257_v40, 7 }
  0x1f   : > { %v260_v44 = vsel %vm259_vm0, %v258_v41, %v254_v37 }
  0x20   : > { %v263_v45 = vpack.c.b16 %v260_v44, %v260_v44  ;;  %v262_v46 = vsel %vm259_vm0, %v261_v43, %v256_v39 }
  0x21   : > { %v264_v47 = vpack.c.b16 %v262_v46, %v262_v46 }
  0x22   : > { %v271_v48 = vrot.slane %v263_v45, %v270_v42 }
  0x23   : > { %v285_v49 = vrot.slane %v264_v47, %v270_v42 }
  0x24   : > { %389 = vst.sshfl [vmem:[%s152_s17] sm:$0x1 pattern:$0x73625140] %v271_v48 }
  0x25   : > { %390 = vst.sshfl [vmem:[%s152_s17 + $0x1] sm:$0x1 pattern:$0x73625140] %v285_v49 }
  0x26 PF: > { %s11_s8 = sadd.s32 1, %s441_s8   ;;  %s494_s6 = smov %s437_s7 }
  0x27   : > { %p8_p5 = scmp.ge.s32.totalorder %s11_s8, 4   ;;  %s495_s7 = smov %s497_s9 }
  0x29   :  { %10 = sbr.rel (!%p8_p5) target bundleno = 2 (0x2), region = 54 }

// kernel: unet_forward.20
= control target key start
LH: loop header
LB: loop body
LE: loop exit
PB: predicated region body
PF: predicated region fallthrough
CT: control target
= control target key end

     0   :  { %vm350_vm0 = vcmask 261120   ;;  %s1306_s1 = inlined_call_operand.vmem [shape: bf16[288,128], index: 1, kind: input, shape index: {}]   ;;  %s1307_s0 = inlined_call_operand.vmem [shape: bf16[128,288], index: 0, kind: input, shape index: {}]   ;;  %s1308_s2 = inlined_call_operand.vmem [shape: f32[1,128], index: 2, kind: input, shape index: {}]   ;;  %s1309_s3 = inlined_call_operand.vmem [shape: f32[1,128], index: 3, kind: input, shape index: {}]   ;;  %s1310_s4 = inlined_call_operand.vmem [shape: bf16[128,128], index: 4, kind: output, shape index: {}]  }
   0x1   :  { %v1007_v0 = vld [vmem:[%s1306_s1 + $0x78] sm:$0xff]   ;;  %v1009_v2 = vld [vmem:[%s1306_s1 + $0x70] sm:$0xff]   ;;  %v1011_v4 = vld [vmem:[%s1306_s1 + $0x68] sm:$0xff]  }
   0x2   :  { %v1008_v1 = vld [vmem:[%s1306_s1 + $0x38] sm:$0xff]   ;;  %897 = vmatprep.subr.bf16.mxu0 %v1007_v0  ;;  %991 = vmatprep.subr.bf16.mxu1 %v1007_v0  ;;  %v1010_v3 = vld [vmem:[%s1306_s1 + $0x30] sm:$0xff]   ;;  %v1012_v5 = vld [vmem:[%s1306_s1 + $0x28] sm:$0xff]  }
   0x3   :  { %898 = vmatpush3.bf16.msra.mxu0 %v1008_v1  ;;  %999 = vmatpush3.bf16.msra.mxu1 %v1008_v1  ;;  %v1013_v6 = vld [vmem:[%s1306_s1 + $0x60] sm:$0xff]   ;;  %v1015_v8 = vld [vmem:[%s1306_s1 + $0x58] sm:$0xff]   ;;  %v1017_v10 = vld [vmem:[%s1306_s1 + $0x50] sm:$0xff]  }
   0x4   :  { %899 = vmatprep.subr.bf16.mxu0 %v1009_v2  ;;  %992 = vmatprep.subr.bf16.mxu1 %v1009_v2  ;;  %v1014_v7 = vld [vmem:[%s1306_s1 + $0x20] sm:$0xff]   ;;  %v1016_v9 = vld [vmem:[%s1306_s1 + $0x18] sm:$0xff]   ;;  %v1018_v13 = vld [vmem:[%s1306_s1 + $0x10] sm:$0xff]  }
   0x5   :  { %v1025_v11 = vld [vmem:[%s1307_s0 + $0x4] ss:$12 sps:$4 sm:$0xff]   ;;  %v1028_v12 = vld [vmem:[%s1307_s0 + $0x94] ss:$12 sps:$4 sm:$0xff]   ;;  %v1019_v14 = vld [vmem:[%s1306_s1 + $0x48] sm:$0xff]  }
   0x6   :  { %407 = vmatprep.mubr.bf16.mxu0 %v1025_v11  ;;  %455 = vmatprep.mubr.bf16.mxu1 %v1028_v12  ;;  %v1020_v15 = vld [vmem:[%s1306_s1 + $0x8] sm:$0xff]   ;;  %v1021_v16 = vld [vmem:[%s1306_s1 + $0x40] sm:$0xff]   ;;  %v1026_v20 = vld [vmem:[%s1307_s0 + $0x90] ss:$12 sps:$4 sm:$0xff]  }
   0x7   :  { %900 = vmatpush3.bf16.msra.mxu0 %v1010_v3  ;;  %1000 = vmatpush3.bf16.msra.mxu1 %v1010_v3  ;;  %v1022_v17 = vld [vmem:[%s1306_s1] sm:$0xff]   ;;  %v1029_v19 = vld [vmem:[%s1306_s1 + $0x88] sm:$0xff]   ;;  %v1040_v28 = vld [vmem:[%s1307_s0 + $0x30] ss:$12 sps:$4 sm:$0xff]  }
   0x8   :  { %901 = vmatprep.subr.bf16.mxu0 %v1011_v4  ;;  %993 = vmatprep.subr.bf16.mxu1 %v1011_v4  ;;  %v1023_v18 = vld [vmem:[%s1307_s0] ss:$12 sps:$4 sm:$0xff]   ;;  %v1030_v21 = vld [vmem:[%s1307_s0 + $0x1c] ss:$12 sps:$4 sm:$0xff]   ;;  %v1034_v24 = vld [vmem:[%s1307_s0 + $0x18] ss:$12 sps:$4 sm:$0xff]  }
   0x9   :  { %v1032_v22 = vld [vmem:[%s1307_s0 + $0xac] ss:$12 sps:$4 sm:$0xff]   ;;  %v1036_v23 = vld [vmem:[%s1306_s1 + $0x80] sm:$0xff]   ;;  %v1035_v25 = vld [vmem:[%s1307_s0 + $0xa8] ss:$12 sps:$4 sm:$0xff]  }
   0xa   :  { %v1037_v26 = vld [vmem:[%s1307_s0 + $0x34] ss:$12 sps:$4 sm:$0xff]   ;;  %v1042_v30 = vld [vmem:[%s1307_s0 + $0x4c] ss:$12 sps:$4 sm:$0xff]   ;;  %v1046_v33 = vld [vmem:[%s1307_s0 + $0x50] ss:$12 sps:$4 sm:$0xff]  }
   0xb   :  { %902 = vmatpush3.bf16.msra.mxu0 %v1012_v5  ;;  %1001 = vmatpush3.bf16.msra.mxu1 %v1012_v5  ;;  %v1039_v27 = vld [vmem:[%s1307_s0 + $0x8] ss:$12 sps:$4 sm:$0xff]   ;;  %v1041_v29 = vld [vmem:[%s1307_s0 + $0x20] ss:$12 sps:$4 sm:$0xff]   ;;  %v1044_v31 = vld [vmem:[%s1307_s0 + $0x38] ss:$12 sps:$4 sm:$0xff]  }
   0xc   :  { %903 = vmatprep.subr.bf16.mxu0 %v1013_v6  ;;  %994 = vmatprep.subr.bf16.mxu1 %v1013_v6  ;;  %v1045_v32 = vld [vmem:[%s1307_s0 + $0x48] ss:$12 sps:$4 sm:$0xff]   ;;  %v1047_v34 = vld [vmem:[%s1307_s0 + $0x64] ss:$12 sps:$4 sm:$0xff]   ;;  %v1050_v36 = vld [vmem:[%s1307_s0 + $0x60] ss:$12 sps:$4 sm:$0xff]  }
   0xd   :  { %v1049_v35 = vld [vmem:[%s1307_s0 + $0x68] ss:$12 sps:$4 sm:$0xff]   ;;  %v1051_v37 = vld [vmem:[%s1307_s0 + $0x80] ss:$12 sps:$4 sm:$0xff]   ;;  %v1054_v39 = vld [vmem:[%s1307_s0 + $0x98] ss:$12 sps:$4 sm:$0xff]  }
   0xe   :  { %v1052_v38 = vld [vmem:[%s1307_s0 + $0x7c] ss:$12 sps:$4 sm:$0xff]   ;;  %v1055_v40 = vld [vmem:[%s1307_s0 + $0x78] ss:$12 sps:$4 sm:$0xff]   ;;  %v1235_v61 = vld [vmem:[%s1308_s2] ss:$0 sm:$0xff] }
   0xf   :  { %904 = vmatpush3.bf16.msra.mxu0 %v1014_v7  ;;  %1002 = vmatpush3.bf16.msra.mxu1 %v1014_v7  ;;  %v1056_v41 = vld [vmem:[%s1307_s0 + $0xb0] ss:$12 sps:$4 sm:$0xff]   ;;  %v1241_v5 = vld [vmem:[%s1309_s3] ss:$0 sm:$0xff] }
  0x10   :  { %905 = vmatprep.subr.bf16.mxu0 %v1015_v8  ;;  %995 = vmatprep.subr.bf16.mxu1 %v1015_v8 }
  0x13   :  { %906 = vmatpush3.bf16.msra.mxu0 %v1016_v9  ;;  %1003 = vmatpush3.bf16.msra.mxu1 %v1016_v9 }
  0x14   :  { %907 = vmatprep.subr.bf16.mxu0 %v1017_v10  ;;  %996 = vmatprep.subr.bf16.mxu1 %v1017_v10 }
  0x17   :  { %908 = vmatpush3.bf16.msra.mxu0 %v1018_v13  ;;  %1004 = vmatpush3.bf16.msra.mxu1 %v1018_v13 }
  0x18   :  { %909 = vmatprep.subr.bf16.mxu0 %v1019_v14  ;;  %997 = vmatprep.subr.bf16.mxu1 %v1019_v14 }
  0x1b   :  { %910 = vmatpush3.bf16.msra.mxu0 %v1020_v15  ;;  %1005 = vmatpush3.bf16.msra.mxu1 %v1020_v15 }
  0x1c   :  { %911 = vmatprep.subr.bf16.mxu0 %v1021_v16  ;;  %998 = vmatprep.subr.bf16.mxu1 %v1021_v16 }
  0x1f   :  { %912 = vmatpush3.bf16.msra.mxu0 %v1022_v17  ;;  %1006 = vmatpush3.bf16.msra.mxu1 %v1022_v17 }
  0x20   :  { %971 = vmatprep.subr.bf16.mxu1 %v1029_v19 }
  0x22   :  { %408 = vmatmul.mubr.bf16.vlgmr.msra.gmra.mxu0 %v1023_v18  ;;  %456 = vmatmul.mubr.bf16.vlgmr.msra.gmra.mxu1 %v1026_v20 }
  0x23   :  { %972 = vmatpush3.bf16.msra.mxu1 %v1029_v19  ;;  %415 = vmatprep.mubr.bf16.mxu0 %v1030_v21 }
  0x24   :  { %463 = vmatprep.mubr.bf16.mxu1 %v1032_v22  ;;  %973 = vmatprep.subr.bf16.mxu1 %v1036_v23 }
  0x27   :  { %974 = vmatpush3.bf16.msra.mxu1 %v1036_v23 }
  0x2a   :  { %416 = vmatmul.mubr.bf16.gmra.mxu0 %v1034_v24  ;;  %464 = vmatmul.mubr.bf16.gmra.mxu1 %v1035_v25 }
  0x2b   :  { %423 = vmatprep.mubr.bf16.mxu0 %v1037_v26  ;;  %975 = vmatprep.mubr.msk.bf16.mxu1 %vm350_vm0, %v1039_v27 }
  0x32   :  { %424 = vmatmul.mubr.bf16.gmra.mxu0 %v1040_v28  ;;  %976 = vmatmul.mubr.msk.bf16.vlgmr.msra.gmra.mxu1 %vm350_vm0, %v1041_v29 }
  0x33   :  { %431 = vmatprep.mubr.bf16.mxu0 %v1042_v30  ;;  %979 = vmatprep.mubr.msk.bf16.mxu1 %vm350_vm0, %v1044_v31 }
  0x3a   :  { %432 = vmatmul.mubr.bf16.gmra.mxu0 %v1045_v32  ;;  %980 = vmatmul.mubr.msk.bf16.gmra.mxu1 %vm350_vm0, %v1046_v33 }
  0x3b   :  { %439 = vmatprep.mubr.bf16.mxu0 %v1047_v34  ;;  %983 = vmatprep.mubr.msk.bf16.mxu1 %vm350_vm0, %v1049_v35 }
  0x42   :  { %440 = vmatmul.mubr.bf16.gmra.mxu0 %v1050_v36  ;;  %984 = vmatmul.mubr.msk.bf16.gmra.mxu1 %vm350_vm0, %v1051_v37 }
  0x43   :  { %447 = vmatprep.mubr.bf16.mxu0 %v1052_v38  ;;  %987 = vmatprep.mubr.msk.bf16.mxu1 %vm350_vm0, %v1054_v39 }
  0x4a   :  { %448 = vmatmul.mubr.bf16.gmra.mxu0 %v1055_v40  ;;  %988 = vmatmul.mubr.msk.bf16.gmra.mxu1 %vm350_vm0, %v1056_v41 }
  0xe2   :  { %v913_v42 = vpop.f32.mrf.mxu0  ;;  %v1216_v43 = vpop.f32.mrf.mxu1 }
  0xe4   :  { %v914_v44 = vpop.f32.mrf.mxu0  ;;  %v1218_v45 = vpop.f32.mrf.mxu1 }
  0xe5   :  { %v915_v62 = vadd.f32 %v914_v44, %v913_v42 }
  0xe6   :  { %v916_v46 = vpop.f32.mrf.mxu0  ;;  %v1220_v47 = vpop.f32.mrf.mxu1 }
  0xe8   :  { %v917_v48 = vpop.f32.mrf.mxu0  ;;  %v1222_v49 = vpop.f32.mrf.mxu1 }
  0xe9   :  { %v918_v9 = vadd.f32 %v917_v48, %v916_v46 }
  0xea   :  { %v919_v50 = vpop.f32.mrf.mxu0  ;;  %v1224_v51 = vpop.f32.mrf.mxu1 }
  0xec   :  { %v920_v52 = vpop.f32.mrf.mxu0  ;;  %v1226_v53 = vpop.f32.mrf.mxu1 }
  0xed   :  { %v921_v58 = vadd.f32 %v920_v52, %v919_v50 }
  0xee   :  { %v922_v54 = vpop.f32.mrf.mxu0  ;;  %v1228_v55 = vpop.f32.mrf.mxu1 }
  0xf0   :  { %v923_v56 = vpop.f32.mrf.mxu0  ;;  %v1230_v57 = vpop.f32.mrf.mxu1 }
  0xf1   :  { %v924_v2 = vadd.f32 %v923_v56, %v922_v54 }
  0xf2   :  { %v925_v59 = vpop.f32.mrf.mxu0  ;;  %v977_v60 = vpop.f32.mrf.mxu1 }
  0xf3   :  { %v515_v63 = vadd.f32 %v977_v60, %v921_v58 }
  0xf4   :  { %v926_v0 = vpop.f32.mrf.mxu0  ;;  %v506_v1 = vpop.f32.mrf.mxu1 }
  0xf5   :  { %v629_v3 = vmul.f32 %v1235_v61, %v515_v63  ;;  %v507_v4 = vadd.f32 %v915_v62, %v506_v1  ;;  %v927_v18 = vadd.f32 %v926_v0, %v925_v59 }
  0xf6   :  { %v928_v6 = vpop.f32.mrf.mxu0  ;;  %v978_v7 = vpop.f32.mrf.mxu1 }
  0xf7   :  { %v518_v8 = vadd.f32 %v978_v7, %v924_v2  ;;  %v627_v10 = vmul.f32 %v1235_v61, %v507_v4  ;;  %v652_v13 = vadd.f32 %v1241_v5, %v629_v3 }
  0xf8   :  { %v929_v11 = vpop.f32.mrf.mxu0  ;;  %v509_v12 = vpop.f32.mrf.mxu1 }
  0xf9   :  { %v630_v14 = vmul.f32 %v1235_v61, %v518_v8  ;;  %v510_v15 = vadd.f32 %v918_v9, %v509_v12  ;;  %v650_v20 = vadd.f32 %v1241_v5, %v627_v10  ;;  %v668_v24 = vmax.f32 %v652_v13, 0.0 }
  0xfa   :  { %v931_v16 = vpop.f32.mrf.mxu0  ;;  %v981_v17 = vpop.f32.mrf.mxu1  ;;  %v930_v32 = vadd.f32 %v929_v11, %v928_v6  ;;  %v957_v6 = vadd.f32 %v1226_v53, %v1224_v51  ;;  %v951_v51 = vadd.f32 %v1218_v45, %v1216_v43  ;;  %v960_v53 = vadd.f32 %v1230_v57, %v1228_v55 }
  0xfb   :  { %v653_v19 = vadd.f32 %v1241_v5, %v630_v14  ;;  %v628_v21 = vmul.f32 %v1235_v61, %v510_v15  ;;  %v666_v35 = vmax.f32 %v650_v20, 0.0  ;;  %v954_v57 = vadd.f32 %v1222_v49, %v1220_v47 }
  0xfc   :  { %v932_v22 = vpop.f32.mrf.mxu0  ;;  %v522_v23 = vpop.f32.mrf.mxu1 }
  0xfd   :  { %v669_v25 = vmax.f32 %v653_v19, 0.0  ;;  %v933_v26 = vadd.f32 %v932_v22, %v931_v16  ;;  %v523_v27 = vadd.f32 %v927_v18, %v522_v23  ;;  %v651_v28 = vadd.f32 %v1241_v5, %v628_v21 }
  0xfe   :  { %v934_v29 = vpop.f32.mrf.mxu0  ;;  %v982_v30 = vpop.f32.mrf.mxu1 }
  0xff   :  { %v858_v31 = vpack.c.bf16 %v669_v25, %v668_v24  ;;  %v531_v33 = vadd.f32 %v981_v17, %v933_v26  ;;  %v631_v34 = vmul.f32 %v1235_v61, %v523_v27  ;;  %v667_v36 = vmax.f32 %v651_v28, 0.0 }
 0x100   :  { %v935_v37 = vpop.f32.mrf.mxu0  ;;  %v525_v38 = vpop.f32.mrf.mxu1 }
 0x101   :  { %890 = vst [vmem:[%s1310_s4 + $0x8] sm:$0xff] %v858_v31   ;;  %v633_v39 = vmul.f32 %v1235_v61, %v531_v33  ;;  %v936_v40 = vadd.f32 %v935_v37, %v934_v29  ;;  %v526_v41 = vadd.f32 %v930_v32, %v525_v38  ;;  %v853_v42 = vpack.c.bf16 %v667_v36, %v666_v35 }
 0x102   :  { %v937_v44 = vpop.f32.mrf.mxu0  ;;  %v985_v46 = vpop.f32.mrf.mxu1  ;;  %v654_v48 = vadd.f32 %v1241_v5, %v631_v34 }
 0x103   :  { %v534_v50 = vadd.f32 %v982_v30, %v936_v40  ;;  %v632_v52 = vmul.f32 %v1235_v61, %v526_v41  ;;  %854 = vst [vmem:[%s1310_s4] sm:$0xff] %v853_v42   ;;  %v656_v54 = vadd.f32 %v1241_v5, %v633_v39 }
 0x104   :  { %v938_v56 = vpop.f32.mrf.mxu0  ;;  %v538_v58 = vpop.f32.mrf.mxu1  ;;  %v670_v1 = vmax.f32 %v654_v48, 0.0 }
 0x105   :  { %v634_v59 = vmul.f32 %v1235_v61, %v534_v50  ;;  %v655_v60 = vadd.f32 %v1241_v5, %v632_v52  ;;  %v939_v62 = vadd.f32 %v938_v56, %v937_v44  ;;  %v672_v7 = vmax.f32 %v656_v54, 0.0 }
 0x106   :  { %v940_v63 = vpop.f32.mrf.mxu0  ;;  %v986_v0 = vpop.f32.mrf.mxu1 }
 0x107   :  { %v657_v2 = vadd.f32 %v1241_v5, %v634_v59  ;;  %v671_v3 = vmax.f32 %v655_v60, 0.0  ;;  %v539_v4 = vadd.f32 %v939_v62, %v538_v58 }
 0x108   :  { %v941_v8 = vpop.f32.mrf.mxu0  ;;  %v541_v9 = vpop.f32.mrf.mxu1 }
 0x109   :  { %v673_v10 = vmax.f32 %v657_v2, 0.0  ;;  %v863_v11 = vpack.c.bf16 %v671_v3, %v670_v1  ;;  %v635_v12 = vmul.f32 %v1235_v61, %v539_v4  ;;  %v942_v13 = vadd.f32 %v941_v8, %v940_v63 }
 0x10a   :  { %v943_v14 = vpop.f32.mrf.mxu0  ;;  %v989_v15 = vpop.f32.mrf.mxu1 }
 0x10b   :  { %v868_v16 = vpack.c.bf16 %v673_v10, %v672_v7  ;;  %891 = vst [vmem:[%s1310_s4 + $0x10] sm:$0xff] %v863_v11   ;;  %v542_v17 = vadd.f32 %v942_v13, %v541_v9  ;;  %v563_v18 = vadd.f32 %v989_v15, %v957_v6  ;;  %v658_v21 = vadd.f32 %v1241_v5, %v635_v12 }
 0x10c   :  { %v944_v19 = vpop.f32.mrf.mxu0  ;;  %v554_v20 = vpop.f32.mrf.mxu1 }
 0x10d   :  { %892 = vst [vmem:[%s1310_s4 + $0x18] sm:$0xff] %v868_v16   ;;  %v636_v22 = vmul.f32 %v1235_v61, %v542_v17  ;;  %v641_v23 = vmul.f32 %v1235_v61, %v563_v18  ;;  %v945_v24 = vadd.f32 %v944_v19, %v943_v14  ;;  %v555_v25 = vadd.f32 %v951_v51, %v554_v20 }
 0x10e   :  { %v946_v26 = vpop.f32.mrf.mxu0  ;;  %v990_v27 = vpop.f32.mrf.mxu1  ;;  %v674_v31 = vmax.f32 %v658_v21, 0.0 }
 0x10f   :  { %v659_v43 = vadd.f32 %v1241_v5, %v636_v22  ;;  %v547_v45 = vadd.f32 %v985_v46, %v945_v24  ;;  %v566_v55 = vadd.f32 %v990_v27, %v960_v53  ;;  %v639_v28 = vmul.f32 %v1235_v61, %v555_v25 }
 0x110   :  { %v947_v29 = vpop.f32.mrf.mxu0  ;;  %v557_v30 = vpop.f32.mrf.mxu1  ;;  %v664_v33 = vadd.f32 %v1241_v5, %v641_v23 }
 0x111   :  { %v675_v32 = vmax.f32 %v659_v43, 0.0  ;;  %v642_v34 = vmul.f32 %v1235_v61, %v566_v55  ;;  %v637_v35 = vmul.f32 %v1235_v61, %v547_v45  ;;  %v948_v36 = vadd.f32 %v947_v29, %v946_v26 }
 0x112   :  { %v558_v37 = vadd.f32 %v954_v57, %v557_v30  ;;  %v662_v40 = vadd.f32 %v1241_v5, %v639_v28  ;;  %v680_v41 = vmax.f32 %v664_v33, 0.0 }
 0x113   :  { %v873_v38 = vpack.c.bf16 %v675_v32, %v674_v31  ;;  %v665_v39 = vadd.f32 %v1241_v5, %v642_v34  ;;  %v550_v47 = vadd.f32 %v986_v0, %v948_v36  ;;  %v660_v44 = vadd.f32 %v1241_v5, %v637_v35 }
 0x114   :  { %v640_v49 = vmul.f32 %v1235_v61, %v558_v37  ;;  %v678_v52 = vmax.f32 %v662_v40, 0.0 }
 0x115   :  { %893 = vst [vmem:[%s1310_s4 + $0x20] sm:$0xff] %v873_v38   ;;  %v681_v42 = vmax.f32 %v665_v39, 0.0  ;;  %v638_v46 = vmul.f32 %v1235_v61, %v550_v47  ;;  %v676_v58 = vmax.f32 %v660_v44, 0.0 }
 0x116   :  { %v663_v48 = vadd.f32 %v1241_v5, %v640_v49 }
 0x117   :  { %v888_v50 = vpack.c.bf16 %v681_v42, %v680_v41  ;;  %v661_v54 = vadd.f32 %v1241_v5, %v638_v46 }
 0x118   :  { %v679_v56 = vmax.f32 %v663_v48, 0.0 }
 0x119   :  { %896 = vst [vmem:[%s1310_s4 + $0x38] sm:$0xff] %v888_v50   ;;  %v677_v59 = vmax.f32 %v661_v54, 0.0 }
 0x11a   :  { %v883_v60 = vpack.c.bf16 %v679_v56, %v678_v52 }
 0x11b   :  { %v878_v62 = vpack.c.bf16 %v677_v59, %v676_v58 }
 0x11c   :  { %895 = vst [vmem:[%s1310_s4 + $0x30] sm:$0xff] %v883_v60  }
 0x11d   :  { %894 = vst [vmem:[%s1310_s4 + $0x28] sm:$0xff] %v878_v62  }

// kernel: unet_forward.22
= control target key start
LH: loop header
LB: loop body
LE: loop exit
PB: predicated region body
PF: predicated region fallthrough
CT: control target
= control target key end

     0   :  { %vm380_vm0 = vcmask 523264   ;;  %s967_s1 = inlined_call_operand.vmem [shape: bf16[576,128], index: 1, kind: input, shape index: {}]   ;;  %s968_s0 = inlined_call_operand.vmem [shape: bf16[32,576], index: 0, kind: input, shape index: {}]   ;;  %s969_s2 = inlined_call_operand.vmem [shape: f32[1,128], index: 2, kind: input, shape index: {}]   ;;  %s970_s3 = inlined_call_operand.vmem [shape: f32[1,128], index: 3, kind: input, shape index: {}]   ;;  %s971_s4 = inlined_call_operand.vmem [shape: bf16[32,128], index: 4, kind: output, shape index: {}]  }
   0x1   :  { %v742_v0 = vld [vmem:[%s967_s1 + $0x78] sm:$0xff]   ;;  %v746_v4 = vld [vmem:[%s967_s1 + $0x70] sm:$0xff]   ;;  %v750_v8 = vld [vmem:[%s967_s1 + $0x68] sm:$0xff]  }
   0x2   :  { %v743_v1 = vld [vmem:[%s967_s1 + $0xf8] sm:$0xff]   ;;  %668 = vmatprep.subr.bf16.mxu0 %v742_v0  ;;  %v747_v5 = vld [vmem:[%s967_s1 + $0xf0] sm:$0xff]   ;;  %v751_v9 = vld [vmem:[%s967_s1 + $0xe8] sm:$0xff]  }
   0x3   :  { %v744_v2 = vld [vmem:[%s967_s1 + $0x38] sm:$0xff]   ;;  %696 = vmatprep.subr.bf16.mxu1 %v743_v1  ;;  %v748_v6 = vld [vmem:[%s967_s1 + $0x30] sm:$0xff]   ;;  %v752_v10 = vld [vmem:[%s967_s1 + $0x28] sm:$0xff]  }
   0x4   :  { %v745_v3 = vld [vmem:[%s967_s1 + $0xb8] sm:$0xff]   ;;  %669 = vmatpush3.bf16.msra.mxu0 %v744_v2  ;;  %v749_v7 = vld [vmem:[%s967_s1 + $0xb0] sm:$0xff]   ;;  %v753_v11 = vld [vmem:[%s967_s1 + $0xa8] sm:$0xff]  }
   0x5   :  { %697 = vmatpush3.bf16.msra.mxu1 %v745_v3  ;;  %670 = vmatprep.subr.bf16.mxu0 %v746_v4  ;;  %v754_v12 = vld [vmem:[%s967_s1 + $0x60] sm:$0xff]   ;;  %v758_v16 = vld [vmem:[%s967_s1 + $0x58] sm:$0xff]   ;;  %v762_v20 = vld [vmem:[%s967_s1 + $0x50] sm:$0xff]  }
   0x6   :  { %698 = vmatprep.subr.bf16.mxu1 %v747_v5  ;;  %v755_v13 = vld [vmem:[%s967_s1 + $0xe0] sm:$0xff]   ;;  %v759_v17 = vld [vmem:[%s967_s1 + $0xd8] sm:$0xff]   ;;  %v763_v21 = vld [vmem:[%s967_s1 + $0xd0] sm:$0xff]  }
   0x7   :  { %v756_v14 = vld [vmem:[%s967_s1 + $0x20] sm:$0xff]   ;;  %v760_v18 = vld [vmem:[%s967_s1 + $0x18] sm:$0xff]   ;;  %v764_v22 = vld [vmem:[%s967_s1 + $0x10] sm:$0xff]  }
   0x8   :  { %671 = vmatpush3.bf16.msra.mxu0 %v748_v6  ;;  %v757_v15 = vld [vmem:[%s967_s1 + $0xa0] sm:$0xff]   ;;  %v761_v19 = vld [vmem:[%s967_s1 + $0x98] sm:$0xff]   ;;  %v765_v23 = vld [vmem:[%s967_s1 + $0x90] sm:$0xff]  }
   0x9   :  { %699 = vmatpush3.bf16.msra.mxu1 %v749_v7  ;;  %672 = vmatprep.subr.bf16.mxu0 %v750_v8  ;;  %v766_v24 = vld [vmem:[%s967_s1 + $0x48] sm:$0xff]   ;;  %v770_v28 = vld [vmem:[%s967_s1 + $0x40] sm:$0xff]   ;;  %v780_v36 = vld [vmem:[%s967_s1 + $0x118] sm:$0xff]  }
   0xa   :  { %700 = vmatprep.subr.bf16.mxu1 %v751_v9  ;;  %v767_v25 = vld [vmem:[%s967_s1 + $0xc8] sm:$0xff]   ;;  %v771_v29 = vld [vmem:[%s967_s1 + $0xc0] sm:$0xff]   ;;  %v781_v37 = vld [vmem:[%s967_s1 + $0x110] sm:$0xff]  }
   0xb   :  { %v768_v26 = vld [vmem:[%s967_s1 + $0x8] sm:$0xff]   ;;  %v772_v30 = vld [vmem:[%s967_s1] sm:$0xff]  }
   0xc   :  { %673 = vmatpush3.bf16.msra.mxu0 %v752_v10  ;;  %v769_v27 = vld [vmem:[%s967_s1 + $0x88] sm:$0xff]   ;;  %v773_v31 = vld [vmem:[%s967_s1 + $0x80] sm:$0xff]  }
   0xd   :  { %701 = vmatpush3.bf16.msra.mxu1 %v753_v11  ;;  %674 = vmatprep.subr.bf16.mxu0 %v754_v12  ;;  %v774_v32 = vld [vmem:[%s968_s0] ss:$20 sps:$4 sm:$0xff]   ;;  %v776_v33 = vld [vmem:[%s968_s0 + $0x4] ss:$20 sps:$4 sm:$0xff]   ;;  %v777_v34 = vld [vmem:[%s968_s0 + $0x8] ss:$20 sps:$4 sm:$0xff]  }
   0xe   :  { %702 = vmatprep.subr.bf16.mxu1 %v755_v13  ;;  %v779_v35 = vld [vmem:[%s968_s0 + $0xc] ss:$20 sps:$4 sm:$0xff]   ;;  %419 = vmatprep.mubr.bf16.mxu0 %v776_v33  ;;  %v784_v39 = vld [vmem:[%s968_s0 + $0x34] ss:$20 sps:$4 sm:$0xff]   ;;  %v787_v42 = vld [vmem:[%s968_s0 + $0x30] ss:$20 sps:$4 sm:$0xff]  }
   0xf   :  { %468 = vmatprep.mubr.bf16.mxu1 %v779_v35  ;;  %v782_v38 = vld [vmem:[%s968_s0 + $0x2c] ss:$20 sps:$4 sm:$0xff]   ;;  %v786_v40 = vld [vmem:[%s968_s0 + $0x28] ss:$20 sps:$4 sm:$0xff]   ;;  %v790_v43 = vld [vmem:[%s968_s0 + $0x10] ss:$20 sps:$4 sm:$0xff]  }
  0x10   :  { %675 = vmatpush3.bf16.msra.mxu0 %v756_v14  ;;  %v788_v41 = vld [vmem:[%s967_s1 + $0x108] sm:$0xff]   ;;  %v789_v44 = vld [vmem:[%s967_s1 + $0x100] sm:$0xff]  }
  0x11   :  { %703 = vmatpush3.bf16.msra.mxu1 %v757_v15  ;;  %676 = vmatprep.subr.bf16.mxu0 %v758_v16  ;;  %v791_v45 = vld [vmem:[%s968_s0 + $0x38] ss:$20 sps:$4 sm:$0xff]   ;;  %v647_v6 = vld [vmem:[%s969_s2] ss:$0 sm:$0xff] }
  0x12   :  { %704 = vmatprep.subr.bf16.mxu1 %v759_v17  ;;  %v648_v15 = vld [vmem:[%s970_s3] ss:$0 sm:$0xff] }
  0x14   :  { %677 = vmatpush3.bf16.msra.mxu0 %v760_v18 }
  0x15   :  { %705 = vmatpush3.bf16.msra.mxu1 %v761_v19  ;;  %678 = vmatprep.subr.bf16.mxu0 %v762_v20 }
  0x16   :  { %706 = vmatprep.subr.bf16.mxu1 %v763_v21 }
  0x18   :  { %679 = vmatpush3.bf16.msra.mxu0 %v764_v22 }
  0x19   :  { %707 = vmatpush3.bf16.msra.mxu1 %v765_v23  ;;  %680 = vmatprep.subr.bf16.mxu0 %v766_v24 }
  0x1a   :  { %708 = vmatprep.subr.bf16.mxu1 %v767_v25 }
  0x1c   :  { %681 = vmatpush3.bf16.msra.mxu0 %v768_v26 }
  0x1d   :  { %709 = vmatpush3.bf16.msra.mxu1 %v769_v27  ;;  %682 = vmatprep.subr.bf16.mxu0 %v770_v28 }
  0x1e   :  { %710 = vmatprep.subr.bf16.mxu1 %v771_v29 }
  0x20   :  { %683 = vmatpush3.bf16.msra.mxu0 %v772_v30 }
  0x21   :  { %711 = vmatpush3.bf16.msra.mxu1 %v773_v31  ;;  %730 = vmatprep.subr.bf16.mxu0 %v780_v36 }
  0x23   :  { %420 = vmatmul.mubr.bf16.vlgmr.msra.gmra.mxu0 %v774_v32 }
  0x24   :  { %469 = vmatmul.mubr.bf16.vlgmr.msra.gmra.mxu1 %v777_v34  ;;  %731 = vmatpush3.bf16.msra.mxu0 %v780_v36 }
  0x25   :  { %732 = vmatprep.subr.bf16.mxu0 %v781_v37  ;;  %427 = vmatprep.mubr.bf16.mxu0 %v782_v38 }
  0x26   :  { %476 = vmatprep.mubr.bf16.mxu1 %v784_v39 }
  0x28   :  { %733 = vmatpush3.bf16.msra.mxu0 %v781_v37 }
  0x29   :  { %734 = vmatprep.subr.bf16.mxu0 %v788_v41 }
  0x2b   :  { %428 = vmatmul.mubr.bf16.gmra.mxu0 %v786_v40 }
  0x2c   :  { %477 = vmatmul.mubr.bf16.gmra.mxu1 %v787_v42  ;;  %738 = vmatprep.mubr.msk.bf16.mxu0 %vm380_vm0, %v790_v43 }
  0x2d   :  { %735 = vmatpush3.bf16.msra.mxu0 %v788_v41 }
  0x2e   :  { %736 = vmatprep.subr.bf16.mxu0 %v789_v44 }
  0x31   :  { %737 = vmatpush3.bf16.msra.mxu0 %v789_v44 }
  0x34   :  { %739 = vmatmul.mubr.msk.bf16.vlgmr.msra.gmra.mxu0 %vm380_vm0, %v791_v45 }
  0xe3   :  { %v684_v46 = vpop.f32.mrf.mxu0 }
  0xe4   :  { %v712_v47 = vpop.f32.mrf.mxu1 }
  0xe5   :  { %v685_v48 = vpop.f32.mrf.mxu0 }
  0xe6   :  { %v713_v49 = vpop.f32.mrf.mxu1  ;;  %v686_v62 = vadd.f32 %v685_v48, %v684_v46 }
  0xe7   :  { %v687_v50 = vpop.f32.mrf.mxu0  ;;  %v714_v63 = vadd.f32 %v713_v49, %v712_v47 }
  0xe8   :  { %v715_v51 = vpop.f32.mrf.mxu1 }
  0xe9   :  { %v688_v52 = vpop.f32.mrf.mxu0  ;;  %v471_v10 = vadd.f32 %v714_v63, %v686_v62 }
  0xea   :  { %v716_v53 = vpop.f32.mrf.mxu1  ;;  %v689_v7 = vadd.f32 %v688_v52, %v687_v50 }
  0xeb   :  { %v690_v54 = vpop.f32.mrf.mxu0  ;;  %v717_v8 = vadd.f32 %v716_v53, %v715_v51 }
  0xec   :  { %v718_v55 = vpop.f32.mrf.mxu1 }
  0xed   :  { %v691_v56 = vpop.f32.mrf.mxu0  ;;  %v474_v19 = vadd.f32 %v717_v8, %v689_v7 }
  0xee   :  { %v719_v57 = vpop.f32.mrf.mxu1  ;;  %v692_v58 = vadd.f32 %v691_v56, %v690_v54 }
  0xef   :  { %v720_v59 = vadd.f32 %v719_v57, %v718_v55  ;;  %v693_v60 = vpop.f32.mrf.mxu0 }
  0xf0   :  { %v721_v61 = vpop.f32.mrf.mxu1 }
  0xf1   :  { %v694_v0 = vpop.f32.mrf.mxu0  ;;  %v479_v4 = vadd.f32 %v720_v59, %v692_v58 }
  0xf2   :  { %v722_v1 = vpop.f32.mrf.mxu1  ;;  %v695_v2 = vadd.f32 %v694_v0, %v693_v60 }
  0xf3   :  { %v723_v3 = vadd.f32 %v722_v1, %v721_v61 }
  0xf4   :  { %v740_v5 = vpop.f32.mrf.mxu0 }
  0xf5   :  { %v528_v9 = vadd.f32 %v740_v5, %v479_v4  ;;  %v482_v14 = vadd.f32 %v723_v3, %v695_v2 }
  0xf6   :  { %v519_v11 = vpop.f32.mrf.mxu0 }
  0xf7   :  { %v558_v12 = vmul.f32 %v647_v6, %v528_v9  ;;  %v520_v13 = vadd.f32 %v519_v11, %v471_v10 }
  0xf8   :  { %v741_v16 = vpop.f32.mrf.mxu0 }
  0xf9   :  { %v556_v17 = vmul.f32 %v647_v6, %v520_v13  ;;  %v531_v18 = vadd.f32 %v741_v16, %v482_v14  ;;  %v569_v21 = vadd.f32 %v648_v15, %v558_v12 }
  0xfa   :  { %v522_v20 = vpop.f32.mrf.mxu0 }
  0xfb   :  { %v559_v22 = vmul.f32 %v647_v6, %v531_v18  ;;  %v523_v23 = vadd.f32 %v522_v20, %v474_v19  ;;  %v567_v24 = vadd.f32 %v648_v15, %v556_v17  ;;  %v573_v27 = vmax.f32 %v569_v21, 0.0 }
  0xfd   :  { %v570_v25 = vadd.f32 %v648_v15, %v559_v22  ;;  %v557_v26 = vmul.f32 %v647_v6, %v523_v23  ;;  %v571_v30 = vmax.f32 %v567_v24, 0.0 }
  0xff   :  { %v574_v28 = vmax.f32 %v570_v25, 0.0  ;;  %v568_v29 = vadd.f32 %v648_v15, %v557_v26 }
 0x101   :  { %v665_v31 = vpack.c.bf16 %v574_v28, %v573_v27  ;;  %v572_v32 = vmax.f32 %v568_v29, 0.0 }
 0x103   :  { %667 = vst [vmem:[%s971_s4 + $0x8] sm:$0xff] %v665_v31   ;;  %v660_v33 = vpack.c.bf16 %v572_v32, %v571_v30 }
 0x105   :  { %661 = vst [vmem:[%s971_s4] sm:$0xff] %v660_v33  }

// kernel: unet_forward.25
= control target key start
LH: loop header
LB: loop body
LE: loop exit
PB: predicated region body
PF: predicated region fallthrough
CT: control target
= control target key end

     0   :  { %s319_s6 = smov 0   ;;  %s321_s7 = smov 0   ;;  %s349_s0 = inlined_call_operand.vmem [shape: bf16[2,1,2,1,2,256], index: 0, kind: input, shape index: {}]   ;;  %s350_s1 = inlined_call_operand.vmem [shape: bf16[2,1,1,256], index: 1, kind: output, shape index: {}]  }
   0x1   :  { %s323_s8 = smov 0  }
   0x2 LB: > { %s23_s9 = sadd.s32 1, %s303_s7  ;;  %p255_p0 = scmp.ge.s32.totalorder %s307_s8, 1  ;;  %s307_s8 = sphi %s323_s8, %s11_s8   ;;  %s303_s7 = sphi %s321_s7, %s352_s7   ;;  %s299_s6 = sphi %s319_s6, %s351_s6  }
   0x3   : > { %p25_p1 = scmp.ge.s32.totalorder %s23_s9, 2  ;;  %p106_p2 = scmp.lt.s32.totalorder %s307_s8, 3 }
   0x5   : > { %s354_s9 = smov (%p25_p1, %s23_s9), 0  ;;  %p107_p3 = pnand %p255_p0, %p106_p2 }
   0x6   : > { %p132_p4 = scmp.lt.s32.totalorder (!%p107_p3), %s299_s6, 1 }
   0x7   : > { %110 = sbr.rel (%p107_p3) target bundleno = 24 (0x18), region = 24 }
   0xc   : > { %s356_s6 = smov (!%p132_p4, %s299_s6), 1  ;;  %vm158_vm0 = vcmask 1040384   ;;  %vm159_vm1 = vsmask.f32 256  ;;  %vm161_vm2 = vcmask 1041409  }
   0xd   : > { %s256_s10 = sshll.u32 %s356_s6, 2  ;;  %s257_s11 = sshll.u32 %s356_s6, 1  ;;  %vm162_vm3 = vsmask.f32 1280  ;;  %vm160_vm4 = vmand %vm158_vm0, %vm159_vm1 }
   0xe   : > { %s139_s14 = scalar_lea.vmem %s349_s0, %s256_s10  ;;  %s147_s17 = scalar_lea.vmem %s350_s1, %s257_s11  ;;  %vm163_vm5 = vmand %vm161_vm2, %vm162_vm3 }
   0xf   : > { %v148_v0 = vld [vmem:[%s139_s14] sm:$0x3]  ;;  %v149_v1 = vld [vmem:[%s139_s14 + $0x2] sm:$0x3]  ;;  %vm164_vm6 = vmor %vm163_vm5, %vm160_vm4 }
  0x10   : > { %v150_v2 = vmax.bf16 %v149_v1, %v148_v0  ;;  %v165_v4 = vld [vmem:[%s147_s17] sm:$0x3] }
  0x12   : > { %v152_v3 = vshrl.u32 %v150_v2, 16 }
  0x14   : > { %v157_v5 = vmax.bf16 %v152_v3, %v150_v2 }
  0x16   : > { %v166_v6 = vsel %vm164_vm6, %v157_v5, %v165_v4 }
  0x17   : > { %167 = vst [vmem:[%s147_s17] sm:$0x3] %v166_v6 }
  0x18 PF: > { %s11_s8 = sadd.s32 1, %s307_s8   ;;  %s351_s6 = smov %s303_s7 }
  0x19   : > { %p8_p5 = scmp.ge.s32.totalorder %s11_s8, 4   ;;  %s352_s7 = smov %s354_s9 }
  0x1b   :  { %10 = sbr.rel (!%p8_p5) target bundleno = 2 (0x2), region = 54 }

// kernel: unet_forward.24
= control target key start
LH: loop header
LB: loop body
LE: loop exit
PB: predicated region body
PF: predicated region fallthrough
CT: control target
= control target key end

     0   :  { %s1114_s15 = smov 0   ;;  %s1116_s16 = smov 0   ;;  %s1216_s0 = inlined_call_operand.vmem [shape: bf16[8,1152], index: 0, kind: input, shape index: {}]   ;;  %s1217_s1 = inlined_call_operand.vmem [shape: bf16[1152,256], index: 1, kind: input, shape index: {}]   ;;  %s1218_s2 = inlined_call_operand.vmem [shape: f32[1,256], index: 2, kind: input, shape index: {}]   ;;  %s1219_s3 = inlined_call_operand.vmem [shape: f32[1,256], index: 3, kind: input, shape index: {}]   ;;  %s1220_s4 = inlined_call_operand.vmem [shape: bf16[8,256], index: 4, kind: output, shape index: {}]  }
   0x1   :  { %s1118_s17 = smov 0  }
   0x2 LB: > { %s26_s18 = sadd.s32 1, %s1081_s16  ;;  %p898_p0 = scmp.ge.s32.totalorder %s1085_s17, 1  ;;  %s1085_s17 = sphi %s1118_s17, %s14_s17   ;;  %s1081_s16 = sphi %s1116_s16, %s1222_s16   ;;  %s1077_s15 = sphi %s1114_s15, %s1221_s15  }
   0x3   : > { %p27_p1 = scmp.ge.s32.totalorder %s26_s18, 3  ;;  %p229_p2 = scmp.lt.s32.totalorder %s1085_s17, 4 }
   0x5   : > { %s1224_s18 = smov (%p27_p1, %s26_s18), 0  ;;  %p230_p3 = pnand %p898_p0, %p229_p2 }
   0x6   : > { %s281_s19 = smul.u32 (!%p230_p3), 3, %s1077_s15  ;;  %p902_p6 = scmp.ne.s32.totalorder (!%p230_p3), %s1077_s15, 0 }
   0x7   : > { %233 = sbr.rel (%p230_p3) target bundleno = 304 (0x130), region = 36 }
   0x8   : > { %s291_s20 = smul.u32 (!%p230_p3), 48, %s1077_s15  ;;  %p284_p4 = scmp.lt.s32.totalorder (!%p230_p3), %s281_s19, 8 }
   0xa   : > { %p293_p5 = scmp.lt.s32.totalorder (!%p230_p3), %s291_s20, 143 }
   0xc   : > { %s1226_s19 = smov (!%p284_p4, %s281_s19), 8  ;;  %s1228_s20 = smov (!%p293_p5, %s291_s20), 143 }
   0xd   : > { %s899_s21 = sshll.u32 %s1226_s19, 2  ;;  %s960_s25 = sshll.u32 %s1228_s20, 3 }
   0xe   : > { %s1139_s24 = scalar_lea.vmem %s1216_s0, %s899_s21  ;;  %s1144_s28 = scalar_lea.vmem %s1217_s1, %s960_s25 }
   0xf   : > { %327 = sbr.rel (%p902_p6) target bundleno = 22 (0x16), region = 40 }
  0x14   : > { %v1087_v0 = vmov 0.0  }
  0x15   : > { %328 = vst [vmem:[#allocation2] sm:$0xff] %v1087_v0  ;;  %329 = vst [vmem:[#allocation2 + $0x8] sm:$0xff] %v1087_v0 }
  0x16 PF: > { %v988_v1 = vld [vmem:[%s1144_s28 + $0x74] ss:$8 sps:$4 sm:$0xff]   ;;  %v990_v2 = vld [vmem:[%s1144_s28 + $0x70] ss:$8 sps:$4 sm:$0xff]   ;;  %v1088_v3 = vmov 0   ;;  %v332_v34 = vld [vmem:[%s1139_s24] sm:$0xff] }
  0x17   : > { %706 = vmatprep.mubr.bf16.mxu1 %v1088_v3  ;;  %633 = vmatprep.subr.bf16.mxu0 %v988_v1  ;;  %v991_v4 = vld [vmem:[%s1144_s28 + $0x64] ss:$8 sps:$4 sm:$0xff]   ;;  %v993_v5 = vld [vmem:[%s1144_s28 + $0x60] ss:$8 sps:$4 sm:$0xff]   ;;  %v994_v6 = vld [vmem:[%s1144_s28 + $0x54] ss:$8 sps:$4 sm:$0xff]   ;;  %v904_v36 = vcombine.high %v332_v34, %v332_v34  ;;  %v903_v53 = vcombine.low %v332_v34, %v332_v34 }
  0x18   : > { %634 = vmatpush1.bf16.msra.mxu0 %v990_v2  ;;  %v996_v7 = vld [vmem:[%s1144_s28 + $0x50] ss:$8 sps:$4 sm:$0xff]   ;;  %v997_v8 = vld [vmem:[%s1144_s28 + $0x44] ss:$8 sps:$4 sm:$0xff]   ;;  %v1009_v9 = vld [vmem:[%s1144_s28 + $0x174] ss:$8 sps:$4 sm:$0xff]  }
  0x19   : > { %635 = vmatprep.subr.bf16.mxu0 %v991_v4  ;;  %v1011_v10 = vld [vmem:[%s1144_s28 + $0x170] ss:$8 sps:$4 sm:$0xff]   ;;  %v999_v11 = vld [vmem:[%s1144_s28 + $0x40] ss:$8 sps:$4 sm:$0xff]   ;;  %v1000_v12 = vld [vmem:[%s1144_s28 + $0x34] ss:$8 sps:$4 sm:$0xff]   ;;  %674 = vmatprep.subr.bf16.mxu1 %v1009_v9 }
  0x1a   : > { %v1015_v13 = vld [vmem:[%s1144_s28 + $0x164] ss:$8 sps:$4 sm:$0xff]   ;;  %675 = vmatpush1.bf16.msra.mxu1 %v1011_v10  ;;  %v1017_v14 = vld [vmem:[%s1144_s28 + $0x160] ss:$8 sps:$4 sm:$0xff]   ;;  %v1002_v15 = vld [vmem:[%s1144_s28 + $0x30] ss:$8 sps:$4 sm:$0xff]   ;;  %665 = vmatprep.mubr.bf16.mxu0 %v904_v36 }
  0x1b   : > { %676 = vmatprep.subr.bf16.mxu1 %v1015_v13  ;;  %v1021_v16 = vld [vmem:[%s1144_s28 + $0x154] ss:$8 sps:$4 sm:$0xff]   ;;  %v1003_v17 = vld [vmem:[%s1144_s28 + $0x24] ss:$8 sps:$4 sm:$0xff]   ;;  %v1023_v18 = vld [vmem:[%s1144_s28 + $0x150] ss:$8 sps:$4 sm:$0xff]  }
  0x1c   : > { %636 = vmatpush1.bf16.msra.mxu0 %v993_v5  ;;  %v1027_v19 = vld [vmem:[%s1144_s28 + $0x144] ss:$8 sps:$4 sm:$0xff]   ;;  %v1005_v20 = vld [vmem:[%s1144_s28 + $0x20] ss:$8 sps:$4 sm:$0xff]   ;;  %v1006_v21 = vld [vmem:[%s1144_s28 + $0x14] ss:$8 sps:$4 sm:$0xff]  }
  0x1d   : > { %637 = vmatprep.subr.bf16.mxu0 %v994_v6  ;;  %v1029_v22 = vld [vmem:[%s1144_s28 + $0x140] ss:$8 sps:$4 sm:$0xff]   ;;  %v1033_v23 = vld [vmem:[%s1144_s28 + $0x134] ss:$8 sps:$4 sm:$0xff]   ;;  %v1008_v24 = vld [vmem:[%s1144_s28 + $0x10] ss:$8 sps:$4 sm:$0xff]  }
  0x1e   : > { %677 = vmatpush1.bf16.msra.mxu1 %v1017_v14  ;;  %v1012_v25 = vld [vmem:[%s1144_s28 + $0x4] ss:$8 sps:$4 sm:$0xff]   ;;  %v1035_v26 = vld [vmem:[%s1144_s28 + $0x130] ss:$8 sps:$4 sm:$0xff]   ;;  %v1014_v28 = vld [vmem:[%s1144_s28] ss:$8 sps:$4 sm:$0xff]  }
  0x1f   : > { %678 = vmatprep.subr.bf16.mxu1 %v1021_v16  ;;  %v1039_v27 = vld [vmem:[%s1144_s28 + $0x124] ss:$8 sps:$4 sm:$0xff]   ;;  %v1018_v29 = vld [vmem:[%s1144_s28 + $0xf4] ss:$8 sps:$4 sm:$0xff]   ;;  %v1041_v30 = vld [vmem:[%s1144_s28 + $0x120] ss:$8 sps:$4 sm:$0xff]  }
  0x20   : > { %638 = vmatpush1.bf16.msra.mxu0 %v996_v7  ;;  %v1045_v31 = vld [vmem:[%s1144_s28 + $0x114] ss:$8 sps:$4 sm:$0xff]   ;;  %v1020_v32 = vld [vmem:[%s1144_s28 + $0xf0] ss:$8 sps:$4 sm:$0xff]   ;;  %v1024_v33 = vld [vmem:[%s1144_s28 + $0xe4] ss:$8 sps:$4 sm:$0xff]  }
  0x21   : > { %639 = vmatprep.subr.bf16.mxu0 %v997_v8  ;;  %v1047_v35 = vld [vmem:[%s1144_s28 + $0x110] ss:$8 sps:$4 sm:$0xff]   ;;  %v1051_v37 = vld [vmem:[%s1144_s28 + $0x104] ss:$8 sps:$4 sm:$0xff]   ;;  %v1026_v38 = vld [vmem:[%s1144_s28 + $0xe0] ss:$8 sps:$4 sm:$0xff]  }
  0x22   : > { %679 = vmatpush1.bf16.msra.mxu1 %v1023_v18  ;;  %v1030_v39 = vld [vmem:[%s1144_s28 + $0xd4] ss:$8 sps:$4 sm:$0xff]   ;;  %v1053_v40 = vld [vmem:[%s1144_s28 + $0x100] ss:$8 sps:$4 sm:$0xff]   ;;  %v1032_v41 = vld [vmem:[%s1144_s28 + $0xd0] ss:$8 sps:$4 sm:$0xff]  }
  0x23   : > { %680 = vmatprep.subr.bf16.mxu1 %v1027_v19  ;;  %v1036_v42 = vld [vmem:[%s1144_s28 + $0xc4] ss:$8 sps:$4 sm:$0xff]   ;;  %v1057_v43 = vld [vmem:[%s1139_s24 + $0x8] ss:$0 sps:$4 sm:$0xff]   ;;  %v1042_v45 = vld [vmem:[%s1144_s28 + $0xb4] ss:$8 sps:$4 sm:$0xff]  }
  0x24   : > { %640 = vmatpush1.bf16.msra.mxu0 %v999_v11  ;;  %v1038_v44 = vld [vmem:[%s1144_s28 + $0xc0] ss:$8 sps:$4 sm:$0xff]   ;;  %v1044_v46 = vld [vmem:[%s1144_s28 + $0xb0] ss:$8 sps:$4 sm:$0xff]   ;;  %v1048_v47 = vld [vmem:[%s1144_s28 + $0xa4] ss:$8 sps:$4 sm:$0xff]  }
  0x25   : > { %641 = vmatprep.subr.bf16.mxu0 %v1000_v12  ;;  %v1050_v48 = vld [vmem:[%s1144_s28 + $0xa0] ss:$8 sps:$4 sm:$0xff]   ;;  %v1054_v49 = vld [vmem:[%s1144_s28 + $0x94] ss:$8 sps:$4 sm:$0xff]   ;;  %v1056_v50 = vld [vmem:[%s1144_s28 + $0x90] ss:$8 sps:$4 sm:$0xff]  }
  0x26   : > { %681 = vmatpush1.bf16.msra.mxu1 %v1029_v22  ;;  %v1058_v51 = vld [vmem:[%s1144_s28 + $0x84] ss:$8 sps:$4 sm:$0xff]   ;;  %v1060_v52 = vld [vmem:[%s1144_s28 + $0x80] ss:$8 sps:$4 sm:$0xff]   ;;  %p954_p7 = scmp.ne.s32.totalorder %s1077_s15, 2 }
  0x27   : > { %682 = vmatprep.subr.bf16.mxu1 %v1033_v23  ;;  %v330_v58 = vld [vmem:[#allocation2] sm:$0xff]  ;;  %v331_v61 = vld [vmem:[#allocation2 + $0x8] sm:$0xff] }
  0x28   : > { %642 = vmatpush1.bf16.msra.mxu0 %v1002_v15 }
  0x29   : > { %643 = vmatprep.subr.bf16.mxu0 %v1003_v17 }
  0x2a   : > { %683 = vmatpush1.bf16.msra.mxu1 %v1035_v26 }
  0x2b   : > { %684 = vmatprep.subr.bf16.mxu1 %v1039_v27 }
  0x2c   : > { %644 = vmatpush1.bf16.msra.mxu0 %v1005_v20 }
  0x2d   : > { %645 = vmatprep.subr.bf16.mxu0 %v1006_v21 }
  0x2e   : > { %685 = vmatpush1.bf16.msra.mxu1 %v1041_v30 }
  0x2f   : > { %686 = vmatprep.subr.bf16.mxu1 %v1045_v31 }
  0x30   : > { %646 = vmatpush1.bf16.msra.mxu0 %v1008_v24 }
  0x31   : > { %647 = vmatprep.subr.bf16.mxu0 %v1012_v25 }
  0x32   : > { %687 = vmatpush1.bf16.msra.mxu1 %v1047_v35 }
  0x33   : > { %688 = vmatprep.subr.bf16.mxu1 %v1051_v37 }
  0x34   : > { %648 = vmatpush1.bf16.msra.mxu0 %v1014_v28 }
  0x35   : > { %649 = vmatprep.subr.bf16.mxu0 %v1018_v29 }
  0x36   : > { %689 = vmatpush1.bf16.msra.mxu1 %v1053_v40 }
  0x38   : > { %650 = vmatpush2.bf16.msra.mxu0 %v1020_v32 }
  0x39   : > { %651 = vmatprep.subr.bf16.mxu0 %v1024_v33  ;;  %707 = vmatmul.mubr.bf16.vlgmr.msra.gmra.mxu1 %v1057_v43 }
  0x3c   : > { %652 = vmatpush2.bf16.msra.mxu0 %v1026_v38 }
  0x3d   : > { %653 = vmatprep.subr.bf16.mxu0 %v1030_v39 }
  0x40   : > { %654 = vmatpush2.bf16.msra.mxu0 %v1032_v41 }
  0x41   : > { %655 = vmatprep.subr.bf16.mxu0 %v1036_v42 }
  0x44   : > { %656 = vmatpush2.bf16.msra.mxu0 %v1038_v44 }
  0x45   : > { %657 = vmatprep.subr.bf16.mxu0 %v1042_v45 }
  0x48   : > { %658 = vmatpush2.bf16.msra.mxu0 %v1044_v46 }
  0x49   : > { %659 = vmatprep.subr.bf16.mxu0 %v1048_v47 }
  0x4c   : > { %660 = vmatpush2.bf16.msra.mxu0 %v1050_v48 }
  0x4d   : > { %661 = vmatprep.subr.bf16.mxu0 %v1054_v49 }
  0x50   : > { %662 = vmatpush2.bf16.msra.mxu0 %v1056_v50 }
  0x51   : > { %663 = vmatprep.subr.bf16.mxu0 %v1058_v51 }
  0x54   : > { %664 = vmatpush2.bf16.msra.mxu0 %v1060_v52 }
  0x57   : > { %666 = vmatmul.mubr.bf16.vlgmr.msra.gmra.mxu0 %v903_v53 }
  0xf9   : > { %v708_v54 = vpop.f32.mrf.mxu1 }
  0xfb   : > { %v710_v55 = vpop.f32.mrf.mxu1 }
  0xfd   : > { %v712_v56 = vpop.f32.mrf.mxu1 }
  0xff   : > { %v713_v57 = vpop.f32.mrf.mxu1 }
 0x117   : > { %v667_v59 = vpop.f32.mrf.mxu0 }
 0x118   : > { %v709_v60 = vadd.f32 %v708_v54, %v667_v59 }
 0x119   : > { %v669_v62 = vpop.f32.mrf.mxu0 }
 0x11a   : > { %v715_v63 = vadd.f32 %v709_v60, %v330_v58  ;;  %v711_v0 = vadd.f32 %v710_v55, %v669_v62  ;;  %722 = sbr.rel (%p954_p7) target bundleno = 304 (0x130), region = 44 }
 0x11b   : > { %v671_v1 = vpop.f32.mrf.mxu0 }
 0x11c   : > { %717 = vst [vmem:[#allocation2] sm:$0xff] %v715_v63  ;;  %v716_v2 = vadd.f32 %v711_v0, %v331_v61 }
 0x11d   : > { %v672_v3 = vpop.f32.mrf.mxu0 }
 0x11e   : > { %718 = vst [vmem:[#allocation2 + $0x8] sm:$0xff] %v716_v2 }
 0x11f   : > { %v727_v4 = vlaneseq  ;;  %v725_v6 = vld [vmem:[%s1218_s2] sm:$0x3] }
 0x120   : > { %v739_v7 = vld [vmem:[%s1219_s3] sm:$0x3] }
 0x121   : > { %v728_v5 = vshrl.u32 %v727_v4, 7 }
 0x123   : > { %v729_v8 = vsub.s32 0, %v728_v5  ;;  %v733_v9 = vsub.s32 1, %v728_v5  ;;  %v723_v10 = vld [vmem:[#allocation2] sm:$0xff] }
 0x125   : > { %v724_v11 = vld [vmem:[#allocation2 + $0x8] sm:$0xff]  ;;  %v730_v12 = vrot.slane %v725_v6, %v729_v8  ;;  %v734_v13 = vrot.slane %v725_v6, %v733_v9  ;;  %v744_v14 = vrot.slane %v739_v7, %v729_v8  ;;  %v748_v15 = vrot.slane %v739_v7, %v733_v9 }
 0x127   : > { %v737_v16 = vmul.f32 %v730_v12, %v723_v10  ;;  %v738_v17 = vmul.f32 %v734_v13, %v724_v11 }
 0x129   : > { %v751_v18 = vadd.f32 %v744_v14, %v737_v16  ;;  %v752_v19 = vadd.f32 %v748_v15, %v738_v17 }
 0x12b   : > { %v753_v20 = vmax.f32 %v751_v18, 0.0  ;;  %v754_v21 = vmax.f32 %v752_v19, 0.0 }
 0x12d   : > { %v961_v22 = vpack.c.bf16 %v754_v21, %v753_v20 }
 0x12f   : > { %763 = vst [vmem:[%s1220_s4] sm:$0xff] %v961_v22 }
 0x130 PF: > { %s14_s17 = sadd.s32 1, %s1085_s17   ;;  %s1221_s15 = smov %s1081_s16 }
 0x131   : > { %p11_p8 = scmp.ge.s32.totalorder %s14_s17, 5   ;;  %s1222_s16 = smov %s1224_s18 }
 0x133   :  { %13 = sbr.rel (!%p11_p8) target bundleno = 2 (0x2), region = 83 }

// kernel: unet_forward.27
= control target key start
LH: loop header
LB: loop body
LE: loop exit
PB: predicated region body
PF: predicated region fallthrough
CT: control target
= control target key end

     0   :  { %s1557_s15 = smov 0   ;;  %s1559_s16 = smov 0   ;;  %s1844_s0 = inlined_call_operand.vmem [shape: bf16[8,512], index: 0, kind: input, shape index: {}]   ;;  %s1845_s1 = inlined_call_operand.vmem [shape: bf16[512,1024], index: 1, kind: input, shape index: {}]   ;;  %s1846_s2 = inlined_call_operand.vmem [shape: f32[1,1024], index: 2, kind: input, shape index: {}]   ;;  %s1847_s3 = inlined_call_operand.vmem [shape: f32[1,1024], index: 3, kind: input, shape index: {}]   ;;  %s1848_s4 = inlined_call_operand.vmem [shape: bf16[8,1024], index: 4, kind: output, shape index: {}]  }
   0x1   :  { %s1561_s17 = smov 0   ;;  %s1563_s18 = smov 0  }
   0x2   :  { %s1565_s19 = smov 0  }
   0x3 LB: > { %s29_s20 = sadd.s32 1, %s1526_s18  ;;  %p77_p1 = scmp.ne.s32.totalorder %s1518_s16, %s1514_s15  ;;  %s1530_s19 = sphi %s1565_s19, %s14_s19   ;;  %s1526_s18 = sphi %s1563_s18, %s1852_s18   ;;  %s1522_s17 = sphi %s1561_s17, %s1851_s17   ;;  %s1518_s16 = sphi %s1559_s16, %s1850_s16   ;;  %s1514_s15 = sphi %s1557_s15, %s1849_s15  }
   0x4   : > { %p31_p0 = scmp.ge.s32.totalorder %s29_s20, 4  ;;  %p78_p2 = scmp.eq.s32.totalorder %s1530_s19, 0 }
   0x5   : > { %s70_s22 = sadd.s32 1, %s1518_s16  ;;  %p1269_p5 = scmp.ge.s32.totalorder %s1530_s19, 4 }
   0x6   : > { %s1854_s20 = smov (%p31_p0, %s29_s20), 0  ;;  %p79_p3 = por %p78_p2, %p77_p1 }
   0x7   : > { %s66_s21 = ssub.s32 %s1526_s18, %s1854_s20  ;;  %196 = sbr.rel (%p1269_p5) target bundleno = 80 (0x50), region = 20 }
   0x8   : > { %p68_p4 = scmp.eq.s32.totalorder %s66_s21, 0 }
   0xa   : > { %s1592_s23 = scalar_select %p68_p4, %s1518_s16, %s70_s22  }
   0xc   : > { %199 = sbr.rel (!%p79_p3) target bundleno = 80 (0x50), region = 24  ;;  %s201_s24 = sand.u32 (%p79_p3), 1, %s1518_s16  }
   0xd   : > { %s1350_s25 = sshll.u32 (%p79_p3), %s1526_s18, 3  ;;  %s1270_s26 = sshll.u32 (%p79_p3), %s201_s24, 9 }
   0xe   : > { %s1600_s29 = scalar_lea.vmem (%p79_p3), %s1845_s1, %s1350_s25  ;;  %s1605_s30 = scalar_lea.vmem (%p79_p3), [#allocation3], %s1270_s26 }
   0xf   : > { %v364_v0 = vld [vmem:[%s1600_s29] sm:$0xff] (%p79_p3) }
  0x10   : > { %v366_v1 = vld [vmem:[%s1600_s29 + $0x20] sm:$0xff] (%p79_p3)  ;;  %365 = vst [vmem:[%s1605_s30] sm:$0xff] (%p79_p3), %v364_v0 }
  0x11   : > { %v368_v2 = vld [vmem:[%s1600_s29 + $0x40] sm:$0xff]  ;;  %367 = vst [vmem:[%s1605_s30 + $0x8] sm:$0xff] %v366_v1 }
  0x12   : > { %369 = vst [vmem:[%s1605_s30 + $0x10] sm:$0xff] %v368_v2  ;;  %v370_v3 = vld [vmem:[%s1600_s29 + $0x60] sm:$0xff] }
  0x13   : > { %v372_v4 = vld [vmem:[%s1600_s29 + $0x80] sm:$0xff]  ;;  %371 = vst [vmem:[%s1605_s30 + $0x18] sm:$0xff] %v370_v3 }
  0x14   : > { %v374_v5 = vld [vmem:[%s1600_s29 + $0xa0] sm:$0xff]  ;;  %373 = vst [vmem:[%s1605_s30 + $0x20] sm:$0xff] %v372_v4 }
  0x15   : > { %375 = vst [vmem:[%s1605_s30 + $0x28] sm:$0xff] %v374_v5  ;;  %v376_v6 = vld [vmem:[%s1600_s29 + $0xc0] sm:$0xff] }
  0x16   : > { %v378_v7 = vld [vmem:[%s1600_s29 + $0xe0] sm:$0xff]  ;;  %377 = vst [vmem:[%s1605_s30 + $0x30] sm:$0xff] %v376_v6 }
  0x17   : > { %v380_v8 = vld [vmem:[%s1600_s29 + $0x100] sm:$0xff]  ;;  %379 = vst [vmem:[%s1605_s30 + $0x38] sm:$0xff] %v378_v7 }
  0x18   : > { %381 = vst [vmem:[%s1605_s30 + $0x40] sm:$0xff] %v380_v8  ;;  %v382_v9 = vld [vmem:[%s1600_s29 + $0x120] sm:$0xff] }
  0x19   : > { %v384_v10 = vld [vmem:[%s1600_s29 + $0x140] sm:$0xff]  ;;  %383 = vst [vmem:[%s1605_s30 + $0x48] sm:$0xff] %v382_v9 }
  0x1a   : > { %v386_v11 = vld [vmem:[%s1600_s29 + $0x160] sm:$0xff]  ;;  %385 = vst [vmem:[%s1605_s30 + $0x50] sm:$0xff] %v384_v10 }
  0x1b   : > { %387 = vst [vmem:[%s1605_s30 + $0x58] sm:$0xff] %v386_v11  ;;  %v388_v12 = vld [vmem:[%s1600_s29 + $0x180] sm:$0xff] }
  0x1c   : > { %v390_v13 = vld [vmem:[%s1600_s29 + $0x1a0] sm:$0xff]  ;;  %389 = vst [vmem:[%s1605_s30 + $0x60] sm:$0xff] %v388_v12 }
  0x1d   : > { %v392_v14 = vld [vmem:[%s1600_s29 + $0x1c0] sm:$0xff]  ;;  %391 = vst [vmem:[%s1605_s30 + $0x68] sm:$0xff] %v390_v13 }
  0x1e   : > { %393 = vst [vmem:[%s1605_s30 + $0x70] sm:$0xff] %v392_v14  ;;  %v394_v15 = vld [vmem:[%s1600_s29 + $0x1e0] sm:$0xff] }
  0x1f   : > { %v396_v16 = vld [vmem:[%s1600_s29 + $0x200] sm:$0xff]  ;;  %395 = vst [vmem:[%s1605_s30 + $0x78] sm:$0xff] %v394_v15 }
  0x20   : > { %v398_v17 = vld [vmem:[%s1600_s29 + $0x220] sm:$0xff]  ;;  %397 = vst [vmem:[%s1605_s30 + $0x80] sm:$0xff] %v396_v16 }
  0x21   : > { %399 = vst [vmem:[%s1605_s30 + $0x88] sm:$0xff] %v398_v17  ;;  %v400_v18 = vld [vmem:[%s1600_s29 + $0x240] sm:$0xff] }
  0x22   : > { %v402_v19 = vld [vmem:[%s1600_s29 + $0x260] sm:$0xff]  ;;  %401 = vst [vmem:[%s1605_s30 + $0x90] sm:$0xff] %v400_v18 }
  0x23   : > { %v404_v20 = vld [vmem:[%s1600_s29 + $0x280] sm:$0xff]  ;;  %403 = vst [vmem:[%s1605_s30 + $0x98] sm:$0xff] %v402_v19 }
  0x24   : > { %405 = vst [vmem:[%s1605_s30 + $0xa0] sm:$0xff] %v404_v20  ;;  %v406_v21 = vld [vmem:[%s1600_s29 + $0x2a0] sm:$0xff] }
  0x25   : > { %v408_v22 = vld [vmem:[%s1600_s29 + $0x2c0] sm:$0xff]  ;;  %407 = vst [vmem:[%s1605_s30 + $0xa8] sm:$0xff] %v406_v21 }
  0x26   : > { %v410_v23 = vld [vmem:[%s1600_s29 + $0x2e0] sm:$0xff]  ;;  %409 = vst [vmem:[%s1605_s30 + $0xb0] sm:$0xff] %v408_v22 }
  0x27   : > { %411 = vst [vmem:[%s1605_s30 + $0xb8] sm:$0xff] %v410_v23  ;;  %v412_v24 = vld [vmem:[%s1600_s29 + $0x300] sm:$0xff] }
  0x28   : > { %v414_v25 = vld [vmem:[%s1600_s29 + $0x320] sm:$0xff]  ;;  %413 = vst [vmem:[%s1605_s30 + $0xc0] sm:$0xff] %v412_v24 }
  0x29   : > { %v416_v26 = vld [vmem:[%s1600_s29 + $0x340] sm:$0xff]  ;;  %415 = vst [vmem:[%s1605_s30 + $0xc8] sm:$0xff] %v414_v25 }
  0x2a   : > { %417 = vst [vmem:[%s1605_s30 + $0xd0] sm:$0xff] %v416_v26  ;;  %v418_v27 = vld [vmem:[%s1600_s29 + $0x360] sm:$0xff] }
  0x2b   : > { %v420_v28 = vld [vmem:[%s1600_s29 + $0x380] sm:$0xff]  ;;  %419 = vst [vmem:[%s1605_s30 + $0xd8] sm:$0xff] %v418_v27 }
  0x2c   : > { %v422_v29 = vld [vmem:[%s1600_s29 + $0x3a0] sm:$0xff]  ;;  %421 = vst [vmem:[%s1605_s30 + $0xe0] sm:$0xff] %v420_v28 }
  0x2d   : > { %423 = vst [vmem:[%s1605_s30 + $0xe8] sm:$0xff] %v422_v29  ;;  %v424_v30 = vld [vmem:[%s1600_s29 + $0x3c0] sm:$0xff] }
  0x2e   : > { %v426_v31 = vld [vmem:[%s1600_s29 + $0x3e0] sm:$0xff]  ;;  %425 = vst [vmem:[%s1605_s30 + $0xf0] sm:$0xff] %v424_v30 }
  0x2f   : > { %v428_v32 = vld [vmem:[%s1600_s29 + $0x400] sm:$0xff]  ;;  %427 = vst [vmem:[%s1605_s30 + $0xf8] sm:$0xff] %v426_v31 }
  0x30   : > { %429 = vst [vmem:[%s1605_s30 + $0x100] sm:$0xff] %v428_v32  ;;  %v430_v33 = vld [vmem:[%s1600_s29 + $0x420] sm:$0xff] }
  0x31   : > { %v432_v34 = vld [vmem:[%s1600_s29 + $0x440] sm:$0xff]  ;;  %431 = vst [vmem:[%s1605_s30 + $0x108] sm:$0xff] %v430_v33 }
  0x32   : > { %v434_v35 = vld [vmem:[%s1600_s29 + $0x460] sm:$0xff]  ;;  %433 = vst [vmem:[%s1605_s30 + $0x110] sm:$0xff] %v432_v34 }
  0x33   : > { %435 = vst [vmem:[%s1605_s30 + $0x118] sm:$0xff] %v434_v35  ;;  %v436_v36 = vld [vmem:[%s1600_s29 + $0x480] sm:$0xff] }
  0x34   : > { %v438_v37 = vld [vmem:[%s1600_s29 + $0x4a0] sm:$0xff]  ;;  %437 = vst [vmem:[%s1605_s30 + $0x120] sm:$0xff] %v436_v36 }
  0x35   : > { %v440_v38 = vld [vmem:[%s1600_s29 + $0x4c0] sm:$0xff]  ;;  %439 = vst [vmem:[%s1605_s30 + $0x128] sm:$0xff] %v438_v37 }
  0x36   : > { %441 = vst [vmem:[%s1605_s30 + $0x130] sm:$0xff] %v440_v38  ;;  %v442_v39 = vld [vmem:[%s1600_s29 + $0x4e0] sm:$0xff] }
  0x37   : > { %v444_v40 = vld [vmem:[%s1600_s29 + $0x500] sm:$0xff]  ;;  %443 = vst [vmem:[%s1605_s30 + $0x138] sm:$0xff] %v442_v39 }
  0x38   : > { %v446_v41 = vld [vmem:[%s1600_s29 + $0x520] sm:$0xff]  ;;  %445 = vst [vmem:[%s1605_s30 + $0x140] sm:$0xff] %v444_v40 }
  0x39   : > { %447 = vst [vmem:[%s1605_s30 + $0x148] sm:$0xff] %v446_v41  ;;  %v448_v42 = vld [vmem:[%s1600_s29 + $0x540] sm:$0xff] }
  0x3a   : > { %v450_v43 = vld [vmem:[%s1600_s29 + $0x560] sm:$0xff]  ;;  %449 = vst [vmem:[%s1605_s30 + $0x150] sm:$0xff] %v448_v42 }
  0x3b   : > { %v452_v44 = vld [vmem:[%s1600_s29 + $0x580] sm:$0xff]  ;;  %451 = vst [vmem:[%s1605_s30 + $0x158] sm:$0xff] %v450_v43 }
  0x3c   : > { %453 = vst [vmem:[%s1605_s30 + $0x160] sm:$0xff] %v452_v44  ;;  %v454_v45 = vld [vmem:[%s1600_s29 + $0x5a0] sm:$0xff] }
  0x3d   : > { %v456_v46 = vld [vmem:[%s1600_s29 + $0x5c0] sm:$0xff]  ;;  %455 = vst [vmem:[%s1605_s30 + $0x168] sm:$0xff] %v454_v45 }
  0x3e   : > { %v458_v47 = vld [vmem:[%s1600_s29 + $0x5e0] sm:$0xff]  ;;  %457 = vst [vmem:[%s1605_s30 + $0x170] sm:$0xff] %v456_v46 }
  0x3f   : > { %459 = vst [vmem:[%s1605_s30 + $0x178] sm:$0xff] %v458_v47  ;;  %v460_v48 = vld [vmem:[%s1600_s29 + $0x600] sm:$0xff] }
  0x40   : > { %v462_v49 = vld [vmem:[%s1600_s29 + $0x620] sm:$0xff]  ;;  %461 = vst [vmem:[%s1605_s30 + $0x180] sm:$0xff] %v460_v48 }
  0x41   : > { %v464_v50 = vld [vmem:[%s1600_s29 + $0x640] sm:$0xff]  ;;  %463 = vst [vmem:[%s1605_s30 + $0x188] sm:$0xff] %v462_v49 }
  0x42   : > { %465 = vst [vmem:[%s1605_s30 + $0x190] sm:$0xff] %v464_v50  ;;  %v466_v51 = vld [vmem:[%s1600_s29 + $0x660] sm:$0xff] }
  0x43   : > { %v468_v52 = vld [vmem:[%s1600_s29 + $0x680] sm:$0xff]  ;;  %467 = vst [vmem:[%s1605_s30 + $0x198] sm:$0xff] %v466_v51 }
  0x44   : > { %v470_v53 = vld [vmem:[%s1600_s29 + $0x6a0] sm:$0xff]  ;;  %469 = vst [vmem:[%s1605_s30 + $0x1a0] sm:$0xff] %v468_v52 }
  0x45   : > { %471 = vst [vmem:[%s1605_s30 + $0x1a8] sm:$0xff] %v470_v53  ;;  %v472_v54 = vld [vmem:[%s1600_s29 + $0x6c0] sm:$0xff] }
  0x46   : > { %v474_v55 = vld [vmem:[%s1600_s29 + $0x6e0] sm:$0xff]  ;;  %473 = vst [vmem:[%s1605_s30 + $0x1b0] sm:$0xff] %v472_v54 }
  0x47   : > { %v476_v56 = vld [vmem:[%s1600_s29 + $0x700] sm:$0xff]  ;;  %475 = vst [vmem:[%s1605_s30 + $0x1b8] sm:$0xff] %v474_v55 }
  0x48   : > { %477 = vst [vmem:[%s1605_s30 + $0x1c0] sm:$0xff] %v476_v56  ;;  %v478_v57 = vld [vmem:[%s1600_s29 + $0x720] sm:$0xff] }
  0x49   : > { %v480_v58 = vld [vmem:[%s1600_s29 + $0x740] sm:$0xff]  ;;  %479 = vst [vmem:[%s1605_s30 + $0x1c8] sm:$0xff] %v478_v57 }
  0x4a   : > { %v482_v59 = vld [vmem:[%s1600_s29 + $0x760] sm:$0xff]  ;;  %481 = vst [vmem:[%s1605_s30 + $0x1d0] sm:$0xff] %v480_v58 }
  0x4b   : > { %483 = vst [vmem:[%s1605_s30 + $0x1d8] sm:$0xff] %v482_v59  ;;  %v484_v60 = vld [vmem:[%s1600_s29 + $0x780] sm:$0xff] }
  0x4c   : > { %v486_v61 = vld [vmem:[%s1600_s29 + $0x7a0] sm:$0xff]  ;;  %485 = vst [vmem:[%s1605_s30 + $0x1e0] sm:$0xff] %v484_v60 }
  0x4d   : > { %v488_v62 = vld [vmem:[%s1600_s29 + $0x7c0] sm:$0xff]  ;;  %487 = vst [vmem:[%s1605_s30 + $0x1e8] sm:$0xff] %v486_v61 }
  0x4e   : > { %489 = vst [vmem:[%s1605_s30 + $0x1f0] sm:$0xff] %v488_v62  ;;  %v490_v63 = vld [vmem:[%s1600_s29 + $0x7e0] sm:$0xff] }
  0x4f   : > { %491 = vst [vmem:[%s1605_s30 + $0x1f8] sm:$0xff] %v490_v63 }
  0x50 PF: > { %p1273_p6 = scmp.ge.s32.totalorder %s1530_s19, 1  ;;  %p512_p7 = scmp.lt.s32.totalorder %s1530_s19, 5 }
  0x52   : > { %p513_p8 = pnand %p1273_p6, %p512_p7 }
  0x53   : > { %s519_s5 = sand.u32 (!%p513_p8), 1, %s1514_s15   ;;  %s1275_s12 = sshll.u32 (!%p513_p8), %s1522_s17, 1 }
  0x54   : > { %516 = sbr.rel (%p513_p8) target bundleno = 360 (0x168), region = 70  ;;  %s1274_s10 = sshll.u32 (!%p513_p8), %s519_s5, 9 }
  0x55   : > { %s1749_s11 = scalar_lea.vmem (!%p513_p8), [#allocation3], %s1274_s10  ;;  %p578_p9 = scmp.lt.s32.totalorder (!%p513_p8), %s1275_s12, 7 }
  0x59   : > { %v1738_v0 = vld [vmem:[%s1844_s0] sm:$0xff]  ;;  %v1743_v1 = vld [vmem:[%s1844_s0 + $0x8] sm:$0xff]  ;;  %v1392_v4 = vld [vmem:[%s1749_s11 + $0x74] ss:$8 sps:$4 sm:$0xff]   ;;  %s1856_s12 = smov (!%p578_p9, %s1275_s12), 7 }
  0x5a   : > { %v1280_v2 = vcombine.high %v1738_v0, %v1738_v0  ;;  %v1282_v3 = vcombine.high %v1743_v1, %v1743_v1  ;;  %v1394_v5 = vld [vmem:[%s1749_s11 + $0x174] ss:$8 sps:$4 sm:$0xff]   ;;  %1005 = vmatprep.subr.bf16.mxu0 %v1392_v4  ;;  %v1396_v6 = vld [vmem:[%s1749_s11 + $0x70] ss:$8 sps:$4 sm:$0xff]   ;;  %v1398_v8 = vld [vmem:[%s1749_s11 + $0x64] ss:$8 sps:$4 sm:$0xff]   ;;  %s580_s15 = scalar_lea.vmem %s1846_s2, %s1856_s12  ;;  %s585_s24 = scalar_lea.vmem %s1847_s3, %s1856_s12 }
  0x5b   : > { %v1397_v7 = vld [vmem:[%s1749_s11 + $0x170] ss:$8 sps:$4 sm:$0xff]   ;;  %1046 = vmatprep.subr.bf16.mxu1 %v1394_v5  ;;  %1006 = vmatpush1.bf16.msra.mxu0 %v1396_v6  ;;  %v1400_v9 = vld [vmem:[%s1749_s11 + $0x164] ss:$8 sps:$4 sm:$0xff]   ;;  %v1402_v10 = vld [vmem:[%s1749_s11 + $0x60] ss:$8 sps:$4 sm:$0xff]   ;;  %v1279_v6 = vcombine.low %v1738_v0, %v1738_v0 }
  0x5c   : > { %1037 = vmatprep.mubr.bf16.mxu0 %v1280_v2  ;;  %1078 = vmatprep.mubr.bf16.mxu1 %v1282_v3  ;;  %v1403_v11 = vld [vmem:[%s1749_s11 + $0x160] ss:$8 sps:$4 sm:$0xff]   ;;  %v1404_v12 = vld [vmem:[%s1749_s11 + $0x54] ss:$8 sps:$4 sm:$0xff]   ;;  %v1408_v14 = vld [vmem:[%s1749_s11 + $0x50] ss:$8 sps:$4 sm:$0xff]  }
  0x5d   : > { %1047 = vmatpush1.bf16.msra.mxu1 %v1397_v7  ;;  %1007 = vmatprep.subr.bf16.mxu0 %v1398_v8  ;;  %v1406_v13 = vld [vmem:[%s1749_s11 + $0x154] ss:$8 sps:$4 sm:$0xff]   ;;  %v1409_v15 = vld [vmem:[%s1749_s11 + $0x150] ss:$8 sps:$4 sm:$0xff]   ;;  %v1410_v16 = vld [vmem:[%s1749_s11 + $0x44] ss:$8 sps:$4 sm:$0xff]   ;;  %v1281_v7 = vcombine.low %v1743_v1, %v1743_v1  ;;  %v1098_v8 = vlaneseq }
  0x5e   : > { %1048 = vmatprep.subr.bf16.mxu1 %v1400_v9  ;;  %v1412_v17 = vld [vmem:[%s1749_s11 + $0x144] ss:$8 sps:$4 sm:$0xff]   ;;  %v1414_v18 = vld [vmem:[%s1749_s11 + $0x40] ss:$8 sps:$4 sm:$0xff]   ;;  %v1416_v20 = vld [vmem:[%s1749_s11 + $0x34] ss:$8 sps:$4 sm:$0xff]  }
  0x5f   : > { %1008 = vmatpush1.bf16.msra.mxu0 %v1402_v10  ;;  %v1415_v19 = vld [vmem:[%s1749_s11 + $0x140] ss:$8 sps:$4 sm:$0xff]   ;;  %v1418_v21 = vld [vmem:[%s1749_s11 + $0x134] ss:$8 sps:$4 sm:$0xff]   ;;  %v1420_v22 = vld [vmem:[%s1749_s11 + $0x30] ss:$8 sps:$4 sm:$0xff]  }
  0x60   : > { %1009 = vmatprep.subr.bf16.mxu0 %v1404_v12  ;;  %v1421_v23 = vld [vmem:[%s1749_s11 + $0x130] ss:$8 sps:$4 sm:$0xff]   ;;  %v1422_v24 = vld [vmem:[%s1749_s11 + $0x24] ss:$8 sps:$4 sm:$0xff]   ;;  %v1426_v26 = vld [vmem:[%s1749_s11 + $0x20] ss:$8 sps:$4 sm:$0xff]  }
  0x61   : > { %1049 = vmatpush1.bf16.msra.mxu1 %v1403_v11  ;;  %v1424_v25 = vld [vmem:[%s1749_s11 + $0x124] ss:$8 sps:$4 sm:$0xff]   ;;  %v1427_v27 = vld [vmem:[%s1749_s11 + $0x120] ss:$8 sps:$4 sm:$0xff]   ;;  %v1428_v28 = vld [vmem:[%s1749_s11 + $0x14] ss:$8 sps:$4 sm:$0xff]  }
  0x62   : > { %1050 = vmatprep.subr.bf16.mxu1 %v1406_v13  ;;  %v1430_v29 = vld [vmem:[%s1749_s11 + $0x114] ss:$8 sps:$4 sm:$0xff]   ;;  %v1432_v30 = vld [vmem:[%s1749_s11 + $0x10] ss:$8 sps:$4 sm:$0xff]   ;;  %v1434_v32 = vld [vmem:[%s1749_s11 + $0x4] ss:$8 sps:$4 sm:$0xff]  }
  0x63   : > { %1010 = vmatpush1.bf16.msra.mxu0 %v1408_v14  ;;  %v1433_v31 = vld [vmem:[%s1749_s11 + $0x110] ss:$8 sps:$4 sm:$0xff]   ;;  %v1436_v33 = vld [vmem:[%s1749_s11 + $0x104] ss:$8 sps:$4 sm:$0xff]   ;;  %v1438_v34 = vld [vmem:[%s1749_s11] ss:$8 sps:$4 sm:$0xff]  }
  0x64   : > { %1011 = vmatprep.subr.bf16.mxu0 %v1410_v16  ;;  %v1439_v35 = vld [vmem:[%s1749_s11 + $0x100] ss:$8 sps:$4 sm:$0xff]   ;;  %v1440_v36 = vld [vmem:[%s1749_s11 + $0xf4] ss:$8 sps:$4 sm:$0xff]   ;;  %v1444_v38 = vld [vmem:[%s1749_s11 + $0xf0] ss:$8 sps:$4 sm:$0xff]  }
  0x65   : > { %1051 = vmatpush1.bf16.msra.mxu1 %v1409_v15  ;;  %v1442_v37 = vld [vmem:[%s1749_s11 + $0x1f4] ss:$8 sps:$4 sm:$0xff]   ;;  %v1445_v39 = vld [vmem:[%s1749_s11 + $0x1f0] ss:$8 sps:$4 sm:$0xff]   ;;  %v1446_v40 = vld [vmem:[%s1749_s11 + $0xe4] ss:$8 sps:$4 sm:$0xff]  }
  0x66   : > { %1052 = vmatprep.subr.bf16.mxu1 %v1412_v17  ;;  %v1448_v41 = vld [vmem:[%s1749_s11 + $0x1e4] ss:$8 sps:$4 sm:$0xff]   ;;  %v1450_v42 = vld [vmem:[%s1749_s11 + $0xe0] ss:$8 sps:$4 sm:$0xff]   ;;  %v1452_v44 = vld [vmem:[%s1749_s11 + $0xd4] ss:$8 sps:$4 sm:$0xff]  }
  0x67   : > { %1012 = vmatpush1.bf16.msra.mxu0 %v1414_v18  ;;  %v1451_v43 = vld [vmem:[%s1749_s11 + $0x1e0] ss:$8 sps:$4 sm:$0xff]   ;;  %v1454_v45 = vld [vmem:[%s1749_s11 + $0x1d4] ss:$8 sps:$4 sm:$0xff]   ;;  %v1456_v46 = vld [vmem:[%s1749_s11 + $0xd0] ss:$8 sps:$4 sm:$0xff]  }
  0x68   : > { %1013 = vmatprep.subr.bf16.mxu0 %v1416_v20  ;;  %v1457_v47 = vld [vmem:[%s1749_s11 + $0x1d0] ss:$8 sps:$4 sm:$0xff]   ;;  %v1458_v48 = vld [vmem:[%s1749_s11 + $0xc4] ss:$8 sps:$4 sm:$0xff]   ;;  %v1462_v50 = vld [vmem:[%s1749_s11 + $0xc0] ss:$8 sps:$4 sm:$0xff]  }
  0x69   : > { %1053 = vmatpush1.bf16.msra.mxu1 %v1415_v19  ;;  %v1460_v49 = vld [vmem:[%s1749_s11 + $0x1c4] ss:$8 sps:$4 sm:$0xff]   ;;  %v1463_v51 = vld [vmem:[%s1749_s11 + $0x1c0] ss:$8 sps:$4 sm:$0xff]   ;;  %v1464_v52 = vld [vmem:[%s1749_s11 + $0xb4] ss:$8 sps:$4 sm:$0xff]  }
  0x6a   : > { %1054 = vmatprep.subr.bf16.mxu1 %v1418_v21  ;;  %v1466_v53 = vld [vmem:[%s1749_s11 + $0x1b4] ss:$8 sps:$4 sm:$0xff]   ;;  %v1468_v54 = vld [vmem:[%s1749_s11 + $0xb0] ss:$8 sps:$4 sm:$0xff]   ;;  %v1470_v56 = vld [vmem:[%s1749_s11 + $0xa4] ss:$8 sps:$4 sm:$0xff]  }
  0x6b   : > { %1014 = vmatpush1.bf16.msra.mxu0 %v1420_v22  ;;  %v1469_v55 = vld [vmem:[%s1749_s11 + $0x1b0] ss:$8 sps:$4 sm:$0xff]   ;;  %v1472_v57 = vld [vmem:[%s1749_s11 + $0x1a4] ss:$8 sps:$4 sm:$0xff]   ;;  %v1474_v58 = vld [vmem:[%s1749_s11 + $0xa0] ss:$8 sps:$4 sm:$0xff]  }
  0x6c   : > { %1015 = vmatprep.subr.bf16.mxu0 %v1422_v24  ;;  %v1475_v59 = vld [vmem:[%s1749_s11 + $0x1a0] ss:$8 sps:$4 sm:$0xff]   ;;  %v1476_v60 = vld [vmem:[%s1749_s11 + $0x94] ss:$8 sps:$4 sm:$0xff]   ;;  %v1480_v62 = vld [vmem:[%s1749_s11 + $0x90] ss:$8 sps:$4 sm:$0xff]  }
  0x6d   : > { %1055 = vmatpush1.bf16.msra.mxu1 %v1421_v23  ;;  %v1478_v61 = vld [vmem:[%s1749_s11 + $0x194] ss:$8 sps:$4 sm:$0xff]   ;;  %v1481_v63 = vld [vmem:[%s1749_s11 + $0x190] ss:$8 sps:$4 sm:$0xff]   ;;  %v1482_v2 = vld [vmem:[%s1749_s11 + $0x84] ss:$8 sps:$4 sm:$0xff]  }
  0x6e   : > { %1056 = vmatprep.subr.bf16.mxu1 %v1424_v25  ;;  %v1484_v3 = vld [vmem:[%s1749_s11 + $0x184] ss:$8 sps:$4 sm:$0xff]   ;;  %v1486_v4 = vld [vmem:[%s1749_s11 + $0x80] ss:$8 sps:$4 sm:$0xff]   ;;  %v1099_v9 = vshrl.u32 %v1098_v8, 7  ;;  %s1278_s17 = sshll.u32 %s1856_s12, 2 }
  0x6f   : > { %1016 = vmatpush1.bf16.msra.mxu0 %v1426_v26  ;;  %v1487_v5 = vld [vmem:[%s1749_s11 + $0x180] ss:$8 sps:$4 sm:$0xff]   ;;  %s595_s27 = scalar_lea.vmem %s1848_s4, %s1278_s17 }
  0x70   : > { %1017 = vmatprep.subr.bf16.mxu0 %v1428_v28  ;;  %v1100_v10 = vsub.s32 0, %v1099_v9  ;;  %v1096_v11 = vld [vmem:[%s580_s15] sm:$0x3]  ;;  %v1104_v0 = vsub.s32 1, %v1099_v9 }
  0x71   : > { %1057 = vmatpush1.bf16.msra.mxu1 %v1427_v27  ;;  %v1110_v14 = vld [vmem:[%s585_s24] sm:$0x3] }
  0x72   : > { %1058 = vmatprep.subr.bf16.mxu1 %v1430_v29  ;;  %v1101_v1 = vrot.slane %v1096_v11, %v1100_v10  ;;  %v1105_v16 = vrot.slane %v1096_v11, %v1104_v0  ;;  %v1115_v20 = vrot.slane %v1110_v14, %v1100_v10  ;;  %v1119_v22 = vrot.slane %v1110_v14, %v1104_v0 }
  0x73   : > { %1018 = vmatpush1.bf16.msra.mxu0 %v1432_v30 }
  0x74   : > { %1019 = vmatprep.subr.bf16.mxu0 %v1434_v32 }
  0x75   : > { %1059 = vmatpush1.bf16.msra.mxu1 %v1433_v31 }
  0x76   : > { %1060 = vmatprep.subr.bf16.mxu1 %v1436_v33 }
  0x77   : > { %1020 = vmatpush1.bf16.msra.mxu0 %v1438_v34 }
  0x78   : > { %1021 = vmatprep.subr.bf16.mxu0 %v1440_v36 }
  0x79   : > { %1061 = vmatpush1.bf16.msra.mxu1 %v1439_v35 }
  0x7a   : > { %1062 = vmatprep.subr.bf16.mxu1 %v1442_v37 }
  0x7b   : > { %1022 = vmatpush2.bf16.msra.mxu0 %v1444_v38 }
  0x7c   : > { %1023 = vmatprep.subr.bf16.mxu0 %v1446_v40 }
  0x7d   : > { %1063 = vmatpush2.bf16.msra.mxu1 %v1445_v39 }
  0x7e   : > { %1064 = vmatprep.subr.bf16.mxu1 %v1448_v41 }
  0x7f   : > { %1024 = vmatpush2.bf16.msra.mxu0 %v1450_v42 }
  0x80   : > { %1025 = vmatprep.subr.bf16.mxu0 %v1452_v44 }
  0x81   : > { %1065 = vmatpush2.bf16.msra.mxu1 %v1451_v43 }
  0x82   : > { %1066 = vmatprep.subr.bf16.mxu1 %v1454_v45 }
  0x83   : > { %1026 = vmatpush2.bf16.msra.mxu0 %v1456_v46 }
  0x84   : > { %1027 = vmatprep.subr.bf16.mxu0 %v1458_v48 }
  0x85   : > { %1067 = vmatpush2.bf16.msra.mxu1 %v1457_v47 }
  0x86   : > { %1068 = vmatprep.subr.bf16.mxu1 %v1460_v49 }
  0x87   : > { %1028 = vmatpush2.bf16.msra.mxu0 %v1462_v50 }
  0x88   : > { %1029 = vmatprep.subr.bf16.mxu0 %v1464_v52 }
  0x89   : > { %1069 = vmatpush2.bf16.msra.mxu1 %v1463_v51 }
  0x8a   : > { %1070 = vmatprep.subr.bf16.mxu1 %v1466_v53 }
  0x8b   : > { %1030 = vmatpush2.bf16.msra.mxu0 %v1468_v54 }
  0x8c   : > { %1031 = vmatprep.subr.bf16.mxu0 %v1470_v56 }
  0x8d   : > { %1071 = vmatpush2.bf16.msra.mxu1 %v1469_v55 }
  0x8e   : > { %1072 = vmatprep.subr.bf16.mxu1 %v1472_v57 }
  0x8f   : > { %1032 = vmatpush2.bf16.msra.mxu0 %v1474_v58 }
  0x90   : > { %1033 = vmatprep.subr.bf16.mxu0 %v1476_v60 }
  0x91   : > { %1073 = vmatpush2.bf16.msra.mxu1 %v1475_v59 }
  0x92   : > { %1074 = vmatprep.subr.bf16.mxu1 %v1478_v61 }
  0x93   : > { %1034 = vmatpush2.bf16.msra.mxu0 %v1480_v62 }
  0x94   : > { %1035 = vmatprep.subr.bf16.mxu0 %v1482_v2 }
  0x95   : > { %1075 = vmatpush2.bf16.msra.mxu1 %v1481_v63 }
  0x96   : > { %1076 = vmatprep.subr.bf16.mxu1 %v1484_v3 }
  0x97   : > { %1036 = vmatpush2.bf16.msra.mxu0 %v1486_v4 }
  0x99   : > { %1077 = vmatpush2.bf16.msra.mxu1 %v1487_v5 }
  0x9a   : > { %1038 = vmatmul.mubr.bf16.vlgmr.msra.gmra.mxu0 %v1279_v6 }
  0x9c   : > { %1079 = vmatmul.mubr.bf16.vlgmr.msra.gmra.mxu1 %v1281_v7 }
 0x15a   : > { %v1039_v12 = vpop.f32.mrf.mxu0 }
 0x15c   : > { %v1080_v13 = vpop.f32.mrf.mxu1  ;;  %v1041_v17 = vpop.f32.mrf.mxu0 }
 0x15d   : > { %v1081_v15 = vadd.f32 %v1080_v13, %v1039_v12 }
 0x15e   : > { %v1082_v18 = vpop.f32.mrf.mxu1  ;;  %v1043_v23 = vpop.f32.mrf.mxu0 }
 0x15f   : > { %v1108_v19 = vmul.f32 %v1101_v1, %v1081_v15  ;;  %v1083_v21 = vadd.f32 %v1082_v18, %v1041_v17 }
 0x160   : > { %v1084_v24 = vpop.f32.mrf.mxu1  ;;  %v1044_v26 = vpop.f32.mrf.mxu0 }
 0x161   : > { %v1109_v25 = vmul.f32 %v1105_v16, %v1083_v21  ;;  %v1122_v28 = vadd.f32 %v1115_v20, %v1108_v19 }
 0x162   : > { %v1085_v27 = vpop.f32.mrf.mxu1 }
 0x163   : > { %v1123_v29 = vadd.f32 %v1119_v22, %v1109_v25 }
 0x165   : > { %v1351_v30 = vpack.c.bf16 %v1123_v29, %v1122_v28 }
 0x167   : > { %1132 = vst [vmem:[%s595_s27] sm:$0xff] %v1351_v30 }
 0x168 PF: > { %s14_s19 = sadd.s32 1, %s1530_s19   ;;  %s1849_s15 = smov %s1518_s16 }
 0x169   : > { %p11_p10 = scmp.ge.s32.totalorder %s14_s19, 6   ;;  %s1850_s16 = smov %s1592_s23 }
 0x16a   : > { %s1851_s17 = smov %s1526_s18  ;;  %s1852_s18 = smov %s1854_s20 }
 0x16b   :  { %13 = sbr.rel (!%p11_p10) target bundleno = 3 (0x3), region = 126 }

// kernel: unet_forward.26
= control target key start
LH: loop header
LB: loop body
LE: loop exit
PB: predicated region body
PF: predicated region fallthrough
CT: control target
= control target key end

     0   :  { %s1395_s15 = smov 0   ;;  %s1397_s16 = smov 0   ;;  %s1667_s0 = inlined_call_operand.vmem [shape: bf16[8,2304], index: 0, kind: input, shape index: {}]   ;;  %s1668_s1 = inlined_call_operand.vmem [shape: bf16[2304,512], index: 1, kind: input, shape index: {}]   ;;  %s1669_s2 = inlined_call_operand.vmem [shape: f32[1,512], index: 2, kind: input, shape index: {}]   ;;  %s1670_s3 = inlined_call_operand.vmem [shape: f32[1,512], index: 3, kind: input, shape index: {}]   ;;  %s1671_s4 = inlined_call_operand.vmem [shape: bf16[8,512], index: 4, kind: output, shape index: {}]  }
   0x1   :  { %s1399_s17 = smov 0   ;;  %s1401_s18 = smov 0  }
   0x2   :  { %s1403_s19 = smov 0   ;;  %s1405_s20 = smov 0  }
   0x3   :  { %s1407_s21 = smov 0  }
   0x4 LB: > { %s26_s22 = sadd.s32 1, %s1358_s19  ;;  %s29_s23 = sadd.s32 1, %s1362_s20  ;;  %s1366_s21 = sphi %s1407_s21, %s14_s21   ;;  %s1362_s20 = sphi %s1405_s20, %s1677_s20   ;;  %s1358_s19 = sphi %s1403_s19, %s1676_s19   ;;  %s1354_s18 = sphi %s1401_s18, %s1675_s18   ;;  %s1350_s17 = sphi %s1399_s17, %s1674_s17   ;;  %s1346_s16 = sphi %s1397_s16, %s1673_s16   ;;  %s1342_s15 = sphi %s1395_s15, %s1672_s15  }
   0x5   : > { %p27_p0 = scmp.ge.s32.totalorder %s26_s22, 6  ;;  %p77_p1 = scmp.ne.s32.totalorder %s1346_s16, %s1342_s15 }
   0x6   : > { %p78_p2 = scmp.eq.s32.totalorder %s1366_s21, 0  ;;  %s70_s27 = sadd.s32 1, %s1346_s16 }
   0x7   : > { %s1679_s22 = smov (%p27_p0, %s26_s22), 0  ;;  %s1681_s23 = smov (!%p27_p0, %s29_s23), %s1362_s20 }
   0x8   : > { %p79_p3 = por %p78_p2, %p77_p1  ;;  %p31_p4 = scmp.ge.s32.totalorder %s1681_s23, 2 }
   0x9   : > { %s65_s24 = ssub.s32 %s1358_s19, %s1679_s22  ;;  %p1109_p6 = scmp.ge.s32.totalorder %s1366_s21, 12 }
   0xa   : > { %s1683_s23 = smov (%p31_p4, %s1681_s23), 0 }
   0xb   : > { %s66_s25 = ssub.s32 %s1362_s20, %s1683_s23  ;;  %183 = sbr.rel (%p1109_p6) target bundleno = 48 (0x30), region = 16 }
   0xc   : > { %s67_s26 = sor.u32 %s66_s25, %s65_s24 }
   0xd   : > { %p68_p5 = scmp.eq.s32.totalorder %s67_s26, 0 }
   0xf   : > { %s1446_s28 = scalar_select %p68_p5, %s1346_s16, %s70_s27  }
  0x10   : > { %199 = sbr.rel (!%p79_p3) target bundleno = 48 (0x30), region = 24  ;;  %s201_s29 = sand.u32 (%p79_p3), 1, %s1346_s16  }
  0x11   : > { %s1177_s30 = smul.u32 (%p79_p3), 384, %s201_s29  ;;  %s1110_s5 = sshll.u32 (%p79_p3), %s1362_s20, 1 }
  0x12   : > { %s1175_s6 = smul.u32 (%p79_p3), 192, %s1358_s19 }
  0x13   : > { %s1460_s12 = scalar_lea.vmem (%p79_p3), [#allocation3], %s1177_s30 }
  0x14   : > { %s207_s7 = sadd.s32 (%p79_p3), %s1175_s6, %s1110_s5 }
  0x15   : > { %s1112_s8 = sshll.u32 %s207_s7, 2 }
  0x16   : > { %s1455_s11 = scalar_lea.vmem %s1668_s1, %s1112_s8 }
  0x17   : > { %v332_v0 = vld [vmem:[%s1455_s11] sm:$0xff]  ;;  %v334_v1 = vld [vmem:[%s1455_s11 + $0x10] sm:$0xff] }
  0x18   : > { %v336_v2 = vld [vmem:[%s1455_s11 + $0x20] sm:$0xff]  ;;  %333 = vst [vmem:[%s1460_s12] sm:$0xff] %v332_v0  ;;  %335 = vst [vmem:[%s1460_s12 + $0x8] sm:$0xff] %v334_v1  ;;  %v338_v3 = vld [vmem:[%s1455_s11 + $0x30] sm:$0xff] }
  0x19   : > { %337 = vst [vmem:[%s1460_s12 + $0x10] sm:$0xff] %v336_v2  ;;  %v340_v4 = vld [vmem:[%s1455_s11 + $0x40] sm:$0xff]  ;;  %v342_v5 = vld [vmem:[%s1455_s11 + $0x50] sm:$0xff]  ;;  %339 = vst [vmem:[%s1460_s12 + $0x18] sm:$0xff] %v338_v3 }
  0x1a   : > { %341 = vst [vmem:[%s1460_s12 + $0x20] sm:$0xff] %v340_v4  ;;  %343 = vst [vmem:[%s1460_s12 + $0x28] sm:$0xff] %v342_v5  ;;  %v344_v6 = vld [vmem:[%s1455_s11 + $0x60] sm:$0xff]  ;;  %v346_v7 = vld [vmem:[%s1455_s11 + $0x70] sm:$0xff] }
  0x1b   : > { %v348_v8 = vld [vmem:[%s1455_s11 + $0x80] sm:$0xff]  ;;  %345 = vst [vmem:[%s1460_s12 + $0x30] sm:$0xff] %v344_v6  ;;  %347 = vst [vmem:[%s1460_s12 + $0x38] sm:$0xff] %v346_v7  ;;  %v350_v9 = vld [vmem:[%s1455_s11 + $0x90] sm:$0xff] }
  0x1c   : > { %349 = vst [vmem:[%s1460_s12 + $0x40] sm:$0xff] %v348_v8  ;;  %v352_v10 = vld [vmem:[%s1455_s11 + $0xa0] sm:$0xff]  ;;  %v354_v11 = vld [vmem:[%s1455_s11 + $0xb0] sm:$0xff]  ;;  %351 = vst [vmem:[%s1460_s12 + $0x48] sm:$0xff] %v350_v9 }
  0x1d   : > { %353 = vst [vmem:[%s1460_s12 + $0x50] sm:$0xff] %v352_v10  ;;  %355 = vst [vmem:[%s1460_s12 + $0x58] sm:$0xff] %v354_v11  ;;  %v356_v12 = vld [vmem:[%s1455_s11 + $0xc0] sm:$0xff]  ;;  %v358_v13 = vld [vmem:[%s1455_s11 + $0xd0] sm:$0xff] }
  0x1e   : > { %v360_v14 = vld [vmem:[%s1455_s11 + $0xe0] sm:$0xff]  ;;  %357 = vst [vmem:[%s1460_s12 + $0x60] sm:$0xff] %v356_v12  ;;  %359 = vst [vmem:[%s1460_s12 + $0x68] sm:$0xff] %v358_v13  ;;  %v362_v15 = vld [vmem:[%s1455_s11 + $0xf0] sm:$0xff] }
  0x1f   : > { %361 = vst [vmem:[%s1460_s12 + $0x70] sm:$0xff] %v360_v14  ;;  %v364_v16 = vld [vmem:[%s1455_s11 + $0x100] sm:$0xff]  ;;  %v366_v17 = vld [vmem:[%s1455_s11 + $0x110] sm:$0xff]  ;;  %363 = vst [vmem:[%s1460_s12 + $0x78] sm:$0xff] %v362_v15 }
  0x20   : > { %365 = vst [vmem:[%s1460_s12 + $0x80] sm:$0xff] %v364_v16  ;;  %367 = vst [vmem:[%s1460_s12 + $0x88] sm:$0xff] %v366_v17  ;;  %v368_v18 = vld [vmem:[%s1455_s11 + $0x120] sm:$0xff]  ;;  %v370_v19 = vld [vmem:[%s1455_s11 + $0x130] sm:$0xff] }
  0x21   : > { %v372_v20 = vld [vmem:[%s1455_s11 + $0x140] sm:$0xff]  ;;  %369 = vst [vmem:[%s1460_s12 + $0x90] sm:$0xff] %v368_v18  ;;  %371 = vst [vmem:[%s1460_s12 + $0x98] sm:$0xff] %v370_v19  ;;  %v374_v21 = vld [vmem:[%s1455_s11 + $0x150] sm:$0xff] }
  0x22   : > { %373 = vst [vmem:[%s1460_s12 + $0xa0] sm:$0xff] %v372_v20  ;;  %v376_v22 = vld [vmem:[%s1455_s11 + $0x160] sm:$0xff]  ;;  %v378_v23 = vld [vmem:[%s1455_s11 + $0x170] sm:$0xff]  ;;  %375 = vst [vmem:[%s1460_s12 + $0xa8] sm:$0xff] %v374_v21 }
  0x23   : > { %377 = vst [vmem:[%s1460_s12 + $0xb0] sm:$0xff] %v376_v22  ;;  %379 = vst [vmem:[%s1460_s12 + $0xb8] sm:$0xff] %v378_v23  ;;  %v380_v24 = vld [vmem:[%s1455_s11 + $0x180] sm:$0xff]  ;;  %v382_v25 = vld [vmem:[%s1455_s11 + $0x190] sm:$0xff] }
  0x24   : > { %v384_v26 = vld [vmem:[%s1455_s11 + $0x1a0] sm:$0xff]  ;;  %381 = vst [vmem:[%s1460_s12 + $0xc0] sm:$0xff] %v380_v24  ;;  %383 = vst [vmem:[%s1460_s12 + $0xc8] sm:$0xff] %v382_v25  ;;  %v386_v27 = vld [vmem:[%s1455_s11 + $0x1b0] sm:$0xff] }
  0x25   : > { %385 = vst [vmem:[%s1460_s12 + $0xd0] sm:$0xff] %v384_v26  ;;  %v388_v28 = vld [vmem:[%s1455_s11 + $0x1c0] sm:$0xff]  ;;  %v390_v29 = vld [vmem:[%s1455_s11 + $0x1d0] sm:$0xff]  ;;  %387 = vst [vmem:[%s1460_s12 + $0xd8] sm:$0xff] %v386_v27 }
  0x26   : > { %389 = vst [vmem:[%s1460_s12 + $0xe0] sm:$0xff] %v388_v28  ;;  %391 = vst [vmem:[%s1460_s12 + $0xe8] sm:$0xff] %v390_v29  ;;  %v392_v30 = vld [vmem:[%s1455_s11 + $0x1e0] sm:$0xff]  ;;  %v394_v31 = vld [vmem:[%s1455_s11 + $0x1f0] sm:$0xff] }
  0x27   : > { %v396_v32 = vld [vmem:[%s1455_s11 + $0x200] sm:$0xff]  ;;  %393 = vst [vmem:[%s1460_s12 + $0xf0] sm:$0xff] %v392_v30  ;;  %395 = vst [vmem:[%s1460_s12 + $0xf8] sm:$0xff] %v394_v31  ;;  %v398_v33 = vld [vmem:[%s1455_s11 + $0x210] sm:$0xff] }
  0x28   : > { %397 = vst [vmem:[%s1460_s12 + $0x100] sm:$0xff] %v396_v32  ;;  %v400_v34 = vld [vmem:[%s1455_s11 + $0x220] sm:$0xff]  ;;  %v402_v35 = vld [vmem:[%s1455_s11 + $0x230] sm:$0xff]  ;;  %399 = vst [vmem:[%s1460_s12 + $0x108] sm:$0xff] %v398_v33 }
  0x29   : > { %401 = vst [vmem:[%s1460_s12 + $0x110] sm:$0xff] %v400_v34  ;;  %403 = vst [vmem:[%s1460_s12 + $0x118] sm:$0xff] %v402_v35  ;;  %v404_v36 = vld [vmem:[%s1455_s11 + $0x240] sm:$0xff]  ;;  %v406_v37 = vld [vmem:[%s1455_s11 + $0x250] sm:$0xff] }
  0x2a   : > { %v408_v38 = vld [vmem:[%s1455_s11 + $0x260] sm:$0xff]  ;;  %405 = vst [vmem:[%s1460_s12 + $0x120] sm:$0xff] %v404_v36  ;;  %407 = vst [vmem:[%s1460_s12 + $0x128] sm:$0xff] %v406_v37  ;;  %v410_v39 = vld [vmem:[%s1455_s11 + $0x270] sm:$0xff] }
  0x2b   : > { %409 = vst [vmem:[%s1460_s12 + $0x130] sm:$0xff] %v408_v38  ;;  %v412_v40 = vld [vmem:[%s1455_s11 + $0x280] sm:$0xff]  ;;  %v414_v41 = vld [vmem:[%s1455_s11 + $0x290] sm:$0xff]  ;;  %411 = vst [vmem:[%s1460_s12 + $0x138] sm:$0xff] %v410_v39 }
  0x2c   : > { %413 = vst [vmem:[%s1460_s12 + $0x140] sm:$0xff] %v412_v40  ;;  %415 = vst [vmem:[%s1460_s12 + $0x148] sm:$0xff] %v414_v41  ;;  %v416_v42 = vld [vmem:[%s1455_s11 + $0x2a0] sm:$0xff]  ;;  %v418_v43 = vld [vmem:[%s1455_s11 + $0x2b0] sm:$0xff] }
  0x2d   : > { %v420_v44 = vld [vmem:[%s1455_s11 + $0x2c0] sm:$0xff]  ;;  %417 = vst [vmem:[%s1460_s12 + $0x150] sm:$0xff] %v416_v42  ;;  %419 = vst [vmem:[%s1460_s12 + $0x158] sm:$0xff] %v418_v43  ;;  %v422_v45 = vld [vmem:[%s1455_s11 + $0x2d0] sm:$0xff] }
  0x2e   : > { %421 = vst [vmem:[%s1460_s12 + $0x160] sm:$0xff] %v420_v44  ;;  %v424_v46 = vld [vmem:[%s1455_s11 + $0x2e0] sm:$0xff]  ;;  %v426_v47 = vld [vmem:[%s1455_s11 + $0x2f0] sm:$0xff]  ;;  %423 = vst [vmem:[%s1460_s12 + $0x168] sm:$0xff] %v422_v45 }
  0x2f   : > { %425 = vst [vmem:[%s1460_s12 + $0x170] sm:$0xff] %v424_v46  ;;  %427 = vst [vmem:[%s1460_s12 + $0x178] sm:$0xff] %v426_v47 }
  0x30 PF: > { %p1113_p7 = scmp.ge.s32.totalorder %s1366_s21, 1  ;;  %p448_p8 = scmp.lt.s32.totalorder %s1366_s21, 13 }
  0x32   : > { %p449_p9 = pnand %p1113_p7, %p448_p8 }
  0x33   : > { %s455_s13 = sand.u32 (!%p449_p9), 1, %s1342_s15   ;;  %s501_s14 = smul.u32 (!%p449_p9), 3, %s1350_s17 }
  0x34   : > { %452 = sbr.rel (%p449_p9) target bundleno = 349 (0x15d), region = 70  ;;  %s1115_s25 = sshll.u32 (!%p449_p9), %s1354_s18, 1 }
  0x35   : > { %s1178_s24 = smul.u32 (!%p449_p9), 384, %s455_s13  ;;  %p504_p10 = scmp.lt.s32.totalorder (!%p449_p9), %s501_s14, 17 }
  0x36   : > { %p514_p11 = scmp.lt.s32.totalorder (!%p449_p9), %s1115_s25, 3  ;;  %p1119_p12 = scmp.ne.s32.totalorder (!%p449_p9), %s1350_s17, 0 }
  0x37   : > { %s1581_s13 = scalar_lea.vmem (!%p449_p9), [#allocation3], %s1178_s24 }
  0x39   : > { %s1685_s14 = smov (!%p504_p10, %s501_s14), 17  ;;  %s1687_s25 = smov (!%p514_p11, %s1115_s25), 3 }
  0x3a   : > { %s1114_s26 = sshll.u32 %s1685_s14, 2  ;;  %s516_s15 = scalar_lea.vmem %s1669_s2, %s1687_s25 }
  0x3b   : > { %s1565_s30 = scalar_lea.vmem %s1667_s0, %s1114_s26  ;;  %s521_s8 = scalar_lea.vmem %s1670_s3, %s1687_s25 }
  0x3c   : > { %s1118_s9 = sshll.u32 %s1687_s25, 2  ;;  %537 = sbr.rel (%p1119_p12) target bundleno = 67 (0x43), region = 78 }
  0x3d   : > { %s1579_s12 = scalar_lea.vmem %s1671_s4, %s1118_s9 }
  0x41   : > { %v1368_v48 = vmov 0.0  }
  0x42   : > { %538 = vst [vmem:[#allocation2] sm:$0xff] %v1368_v48  ;;  %539 = vst [vmem:[#allocation2 + $0x8] sm:$0xff] %v1368_v48 }
  0x43 PF: > { %v1237_v49 = vld [vmem:[%s1581_s13 + $0x74] ss:$8 sps:$4 sm:$0xff]   ;;  %v1239_v50 = vld [vmem:[%s1581_s13 + $0x70] ss:$8 sps:$4 sm:$0xff]   ;;  %v1369_v51 = vmov 0   ;;  %p1171_p13 = scmp.ne.s32.totalorder %s1350_s17, 5 }
  0x44   : > { %916 = vmatprep.mubr.bf16.mxu1 %v1369_v51  ;;  %843 = vmatprep.subr.bf16.mxu0 %v1237_v49  ;;  %v1240_v52 = vld [vmem:[%s1581_s13 + $0x64] ss:$8 sps:$4 sm:$0xff]   ;;  %v1242_v53 = vld [vmem:[%s1581_s13 + $0x60] ss:$8 sps:$4 sm:$0xff]   ;;  %v1243_v54 = vld [vmem:[%s1581_s13 + $0x54] ss:$8 sps:$4 sm:$0xff]  }
  0x45   : > { %844 = vmatpush1.bf16.msra.mxu0 %v1239_v50  ;;  %v1245_v55 = vld [vmem:[%s1581_s13 + $0x50] ss:$8 sps:$4 sm:$0xff]   ;;  %v1246_v56 = vld [vmem:[%s1581_s13 + $0x44] ss:$8 sps:$4 sm:$0xff]   ;;  %v1258_v57 = vld [vmem:[%s1581_s13 + $0x174] ss:$8 sps:$4 sm:$0xff]  }
  0x46   : > { %845 = vmatprep.subr.bf16.mxu0 %v1240_v52  ;;  %v1260_v58 = vld [vmem:[%s1581_s13 + $0x170] ss:$8 sps:$4 sm:$0xff]   ;;  %v1248_v59 = vld [vmem:[%s1581_s13 + $0x40] ss:$8 sps:$4 sm:$0xff]   ;;  %v1249_v60 = vld [vmem:[%s1581_s13 + $0x34] ss:$8 sps:$4 sm:$0xff]   ;;  %884 = vmatprep.subr.bf16.mxu1 %v1258_v57 }
  0x47   : > { %v1264_v61 = vld [vmem:[%s1581_s13 + $0x164] ss:$8 sps:$4 sm:$0xff]   ;;  %885 = vmatpush1.bf16.msra.mxu1 %v1260_v58  ;;  %v1266_v62 = vld [vmem:[%s1581_s13 + $0x160] ss:$8 sps:$4 sm:$0xff]   ;;  %v1251_v63 = vld [vmem:[%s1581_s13 + $0x30] ss:$8 sps:$4 sm:$0xff]  }
  0x48   : > { %886 = vmatprep.subr.bf16.mxu1 %v1264_v61  ;;  %v1270_v0 = vld [vmem:[%s1581_s13 + $0x154] ss:$8 sps:$4 sm:$0xff]   ;;  %v1252_v1 = vld [vmem:[%s1581_s13 + $0x24] ss:$8 sps:$4 sm:$0xff]   ;;  %v1272_v2 = vld [vmem:[%s1581_s13 + $0x150] ss:$8 sps:$4 sm:$0xff]  }
  0x49   : > { %846 = vmatpush1.bf16.msra.mxu0 %v1242_v53  ;;  %v1276_v3 = vld [vmem:[%s1581_s13 + $0x144] ss:$8 sps:$4 sm:$0xff]   ;;  %v1254_v4 = vld [vmem:[%s1581_s13 + $0x20] ss:$8 sps:$4 sm:$0xff]   ;;  %v1255_v5 = vld [vmem:[%s1581_s13 + $0x14] ss:$8 sps:$4 sm:$0xff]  }
  0x4a   : > { %847 = vmatprep.subr.bf16.mxu0 %v1243_v54  ;;  %v1278_v6 = vld [vmem:[%s1581_s13 + $0x140] ss:$8 sps:$4 sm:$0xff]   ;;  %v1282_v7 = vld [vmem:[%s1581_s13 + $0x134] ss:$8 sps:$4 sm:$0xff]   ;;  %v1257_v8 = vld [vmem:[%s1581_s13 + $0x10] ss:$8 sps:$4 sm:$0xff]  }
  0x4b   : > { %887 = vmatpush1.bf16.msra.mxu1 %v1266_v62  ;;  %v1261_v9 = vld [vmem:[%s1581_s13 + $0x4] ss:$8 sps:$4 sm:$0xff]   ;;  %v1284_v10 = vld [vmem:[%s1581_s13 + $0x130] ss:$8 sps:$4 sm:$0xff]   ;;  %v1263_v12 = vld [vmem:[%s1581_s13] ss:$8 sps:$4 sm:$0xff]  }
  0x4c   : > { %888 = vmatprep.subr.bf16.mxu1 %v1270_v0  ;;  %v1288_v11 = vld [vmem:[%s1581_s13 + $0x124] ss:$8 sps:$4 sm:$0xff]   ;;  %v1267_v13 = vld [vmem:[%s1581_s13 + $0xf4] ss:$8 sps:$4 sm:$0xff]   ;;  %v1290_v14 = vld [vmem:[%s1581_s13 + $0x120] ss:$8 sps:$4 sm:$0xff]  }
  0x4d   : > { %848 = vmatpush1.bf16.msra.mxu0 %v1245_v55  ;;  %v1294_v15 = vld [vmem:[%s1581_s13 + $0x114] ss:$8 sps:$4 sm:$0xff]   ;;  %v1269_v16 = vld [vmem:[%s1581_s13 + $0xf0] ss:$8 sps:$4 sm:$0xff]   ;;  %v1273_v17 = vld [vmem:[%s1581_s13 + $0xe4] ss:$8 sps:$4 sm:$0xff]  }
  0x4e   : > { %849 = vmatprep.subr.bf16.mxu0 %v1246_v56  ;;  %v542_v18 = vld [vmem:[%s1565_s30] sm:$0xff]  ;;  %v1300_v21 = vld [vmem:[%s1581_s13 + $0x104] ss:$8 sps:$4 sm:$0xff]   ;;  %v1275_v22 = vld [vmem:[%s1581_s13 + $0xe0] ss:$8 sps:$4 sm:$0xff]  }
  0x4f   : > { %889 = vmatpush1.bf16.msra.mxu1 %v1272_v2  ;;  %v1296_v19 = vld [vmem:[%s1581_s13 + $0x110] ss:$8 sps:$4 sm:$0xff]   ;;  %v1121_v20 = vcombine.high %v542_v18, %v542_v18  ;;  %v1279_v23 = vld [vmem:[%s1581_s13 + $0xd4] ss:$8 sps:$4 sm:$0xff]   ;;  %v1302_v24 = vld [vmem:[%s1581_s13 + $0x100] ss:$8 sps:$4 sm:$0xff]   ;;  %v1120_v37 = vcombine.low %v542_v18, %v542_v18 }
  0x50   : > { %890 = vmatprep.subr.bf16.mxu1 %v1276_v3  ;;  %v1281_v25 = vld [vmem:[%s1581_s13 + $0xd0] ss:$8 sps:$4 sm:$0xff]   ;;  %v1285_v26 = vld [vmem:[%s1581_s13 + $0xc4] ss:$8 sps:$4 sm:$0xff]   ;;  %v1287_v28 = vld [vmem:[%s1581_s13 + $0xc0] ss:$8 sps:$4 sm:$0xff]  }
  0x51   : > { %850 = vmatpush1.bf16.msra.mxu0 %v1248_v59  ;;  %875 = vmatprep.mubr.bf16.mxu0 %v1121_v20  ;;  %v1306_v27 = vld [vmem:[%s1565_s30 + $0x8] ss:$0 sps:$4 sm:$0xff]   ;;  %v1291_v29 = vld [vmem:[%s1581_s13 + $0xb4] ss:$8 sps:$4 sm:$0xff]   ;;  %v1297_v31 = vld [vmem:[%s1581_s13 + $0xa4] ss:$8 sps:$4 sm:$0xff]  }
  0x52   : > { %851 = vmatprep.subr.bf16.mxu0 %v1249_v60  ;;  %v1293_v30 = vld [vmem:[%s1581_s13 + $0xb0] ss:$8 sps:$4 sm:$0xff]   ;;  %v1299_v32 = vld [vmem:[%s1581_s13 + $0xa0] ss:$8 sps:$4 sm:$0xff]   ;;  %v1303_v33 = vld [vmem:[%s1581_s13 + $0x94] ss:$8 sps:$4 sm:$0xff]  }
  0x53   : > { %891 = vmatpush1.bf16.msra.mxu1 %v1278_v6  ;;  %v1305_v34 = vld [vmem:[%s1581_s13 + $0x90] ss:$8 sps:$4 sm:$0xff]   ;;  %v1307_v35 = vld [vmem:[%s1581_s13 + $0x84] ss:$8 sps:$4 sm:$0xff]   ;;  %v1309_v36 = vld [vmem:[%s1581_s13 + $0x80] ss:$8 sps:$4 sm:$0xff]  }
  0x54   : > { %892 = vmatprep.subr.bf16.mxu1 %v1282_v7  ;;  %v540_v42 = vld [vmem:[#allocation2] sm:$0xff]  ;;  %v541_v45 = vld [vmem:[#allocation2 + $0x8] sm:$0xff] }
  0x55   : > { %852 = vmatpush1.bf16.msra.mxu0 %v1251_v63 }
  0x56   : > { %853 = vmatprep.subr.bf16.mxu0 %v1252_v1 }
  0x57   : > { %893 = vmatpush1.bf16.msra.mxu1 %v1284_v10 }
  0x58   : > { %894 = vmatprep.subr.bf16.mxu1 %v1288_v11 }
  0x59   : > { %854 = vmatpush1.bf16.msra.mxu0 %v1254_v4 }
  0x5a   : > { %855 = vmatprep.subr.bf16.mxu0 %v1255_v5 }
  0x5b   : > { %895 = vmatpush1.bf16.msra.mxu1 %v1290_v14 }
  0x5c   : > { %896 = vmatprep.subr.bf16.mxu1 %v1294_v15 }
  0x5d   : > { %856 = vmatpush1.bf16.msra.mxu0 %v1257_v8 }
  0x5e   : > { %857 = vmatprep.subr.bf16.mxu0 %v1261_v9 }
  0x5f   : > { %897 = vmatpush1.bf16.msra.mxu1 %v1296_v19 }
  0x60   : > { %898 = vmatprep.subr.bf16.mxu1 %v1300_v21 }
  0x61   : > { %858 = vmatpush1.bf16.msra.mxu0 %v1263_v12 }
  0x62   : > { %859 = vmatprep.subr.bf16.mxu0 %v1267_v13 }
  0x63   : > { %899 = vmatpush1.bf16.msra.mxu1 %v1302_v24 }
  0x65   : > { %860 = vmatpush2.bf16.msra.mxu0 %v1269_v16 }
  0x66   : > { %861 = vmatprep.subr.bf16.mxu0 %v1273_v17  ;;  %917 = vmatmul.mubr.bf16.vlgmr.msra.gmra.mxu1 %v1306_v27 }
  0x69   : > { %862 = vmatpush2.bf16.msra.mxu0 %v1275_v22 }
  0x6a   : > { %863 = vmatprep.subr.bf16.mxu0 %v1279_v23 }
  0x6d   : > { %864 = vmatpush2.bf16.msra.mxu0 %v1281_v25 }
  0x6e   : > { %865 = vmatprep.subr.bf16.mxu0 %v1285_v26 }
  0x71   : > { %866 = vmatpush2.bf16.msra.mxu0 %v1287_v28 }
  0x72   : > { %867 = vmatprep.subr.bf16.mxu0 %v1291_v29 }
  0x75   : > { %868 = vmatpush2.bf16.msra.mxu0 %v1293_v30 }
  0x76   : > { %869 = vmatprep.subr.bf16.mxu0 %v1297_v31 }
  0x79   : > { %870 = vmatpush2.bf16.msra.mxu0 %v1299_v32 }
  0x7a   : > { %871 = vmatprep.subr.bf16.mxu0 %v1303_v33 }
  0x7d   : > { %872 = vmatpush2.bf16.msra.mxu0 %v1305_v34 }
  0x7e   : > { %873 = vmatprep.subr.bf16.mxu0 %v1307_v35 }
  0x81   : > { %874 = vmatpush2.bf16.msra.mxu0 %v1309_v36 }
  0x84   : > { %876 = vmatmul.mubr.bf16.vlgmr.msra.gmra.mxu0 %v1120_v37 }
 0x126   : > { %v918_v38 = vpop.f32.mrf.mxu1 }
 0x128   : > { %v920_v39 = vpop.f32.mrf.mxu1 }
 0x12a   : > { %v922_v40 = vpop.f32.mrf.mxu1 }
 0x12c   : > { %v923_v41 = vpop.f32.mrf.mxu1 }
 0x144   : > { %v877_v43 = vpop.f32.mrf.mxu0 }
 0x145   : > { %v919_v44 = vadd.f32 %v918_v38, %v877_v43 }
 0x146   : > { %v879_v46 = vpop.f32.mrf.mxu0 }
 0x147   : > { %v925_v47 = vadd.f32 %v919_v44, %v540_v42  ;;  %v921_v48 = vadd.f32 %v920_v39, %v879_v46  ;;  %932 = sbr.rel (%p1171_p13) target bundleno = 349 (0x15d), region = 82 }
 0x148   : > { %v881_v49 = vpop.f32.mrf.mxu0 }
 0x149   : > { %927 = vst [vmem:[#allocation2] sm:$0xff] %v925_v47  ;;  %v926_v50 = vadd.f32 %v921_v48, %v541_v45 }
 0x14a   : > { %v882_v51 = vpop.f32.mrf.mxu0 }
 0x14b   : > { %928 = vst [vmem:[#allocation2 + $0x8] sm:$0xff] %v926_v50 }
 0x14c   : > { %v937_v52 = vlaneseq  ;;  %v935_v54 = vld [vmem:[%s516_s15] sm:$0x3] }
 0x14d   : > { %v949_v55 = vld [vmem:[%s521_s8] sm:$0x3] }
 0x14e   : > { %v938_v53 = vshrl.u32 %v937_v52, 7 }
 0x150   : > { %v939_v56 = vsub.s32 0, %v938_v53  ;;  %v943_v57 = vsub.s32 1, %v938_v53  ;;  %v933_v58 = vld [vmem:[#allocation2] sm:$0xff] }
 0x152   : > { %v934_v59 = vld [vmem:[#allocation2 + $0x8] sm:$0xff]  ;;  %v940_v60 = vrot.slane %v935_v54, %v939_v56  ;;  %v944_v61 = vrot.slane %v935_v54, %v943_v57  ;;  %v954_v62 = vrot.slane %v949_v55, %v939_v56  ;;  %v958_v63 = vrot.slane %v949_v55, %v943_v57 }
 0x154   : > { %v947_v0 = vmul.f32 %v940_v60, %v933_v58  ;;  %v948_v1 = vmul.f32 %v944_v61, %v934_v59 }
 0x156   : > { %v961_v2 = vadd.f32 %v954_v62, %v947_v0  ;;  %v962_v3 = vadd.f32 %v958_v63, %v948_v1 }
 0x158   : > { %v963_v4 = vmax.f32 %v961_v2, 0.0  ;;  %v964_v5 = vmax.f32 %v962_v3, 0.0 }
 0x15a   : > { %v1176_v6 = vpack.c.bf16 %v964_v5, %v963_v4 }
 0x15c   : > { %973 = vst [vmem:[%s1579_s12] sm:$0xff] %v1176_v6 }
 0x15d PF: > { %s14_s21 = sadd.s32 1, %s1366_s21   ;;  %s1672_s15 = smov %s1346_s16 }
 0x15e   : > { %p11_p0 = scmp.ge.s32.totalorder %s14_s21, 14   ;;  %s1673_s16 = smov %s1446_s28 }
 0x15f   : > { %s1674_s17 = smov %s1358_s19  ;;  %s1675_s18 = smov %s1362_s20 }
 0x160   : > { %s1676_s19 = smov %s1679_s22  ;;  %s1677_s20 = smov %s1683_s23 }
 0x161   :  { %13 = sbr.rel (!%p11_p0) target bundleno = 4 (0x4), region = 126 }

// kernel: unet_forward.28
= control target key start
LH: loop header
LB: loop body
LE: loop exit
PB: predicated region body
PF: predicated region fallthrough
CT: control target
= control target key end

     0   :  { %s1254_s15 = smov 0   ;;  %s1256_s16 = smov 0   ;;  %s1372_s0 = inlined_call_operand.vmem [shape: bf16[8,4608], index: 0, kind: input, shape index: {}]   ;;  %s1373_s1 = inlined_call_operand.vmem [shape: bf16[4608,256], index: 1, kind: input, shape index: {}]   ;;  %s1374_s2 = inlined_call_operand.vmem [shape: f32[1,256], index: 2, kind: input, shape index: {}]   ;;  %s1375_s3 = inlined_call_operand.vmem [shape: f32[1,256], index: 3, kind: input, shape index: {}]   ;;  %s1376_s4 = inlined_call_operand.vmem [shape: bf16[8,256], index: 4, kind: output, shape index: {}]  }
   0x1   :  { %s1258_s17 = smov 0  }
   0x2 LB: > { %s26_s18 = sadd.s32 1, %s1222_s16  ;;  %p996_p0 = scmp.ge.s32.totalorder %s1226_s17, 1  ;;  %s1226_s17 = sphi %s1258_s17, %s14_s17   ;;  %s1222_s16 = sphi %s1256_s16, %s1378_s16   ;;  %s1218_s15 = sphi %s1254_s15, %s1377_s15  }
   0x3   : > { %p27_p1 = scmp.ge.s32.totalorder %s26_s18, 9  ;;  %p229_p2 = scmp.lt.s32.totalorder %s1226_s17, 10 }
   0x5   : > { %s1380_s18 = smov (%p27_p1, %s26_s18), 0  ;;  %p230_p3 = pnand %p996_p0, %p229_p2 }
   0x6   : > { %s997_s19 = sshll.u32 (!%p230_p3), %s1218_s15, 2  ;;  %s999_s20 = sshll.u32 (!%p230_p3), %s1218_s15, 6 }
   0x7   : > { %233 = sbr.rel (%p230_p3) target bundleno = 305 (0x131), region = 36  ;;  %p284_p4 = scmp.lt.s32.totalorder (!%p230_p3), %s997_s19, 35 }
   0x8   : > { %p293_p5 = scmp.lt.s32.totalorder (!%p230_p3), %s999_s20, 575  ;;  %p1002_p6 = scmp.ne.s32.totalorder (!%p230_p3), %s1218_s15, 0 }
   0xc   : > { %s1382_s19 = smov (!%p284_p4, %s997_s19), 35  ;;  %s1384_s20 = smov (!%p293_p5, %s999_s20), 575 }
   0xd   : > { %s998_s21 = sshll.u32 %s1382_s19, 2  ;;  %s1077_s25 = sshll.u32 %s1384_s20, 3 }
   0xe   : > { %s1279_s24 = scalar_lea.vmem %s1372_s0, %s998_s21  ;;  %s1284_s28 = scalar_lea.vmem %s1373_s1, %s1077_s25 }
   0xf   : > { %326 = sbr.rel (%p1002_p6) target bundleno = 22 (0x16), region = 40 }
  0x14   : > { %v1228_v0 = vmov 0.0  }
  0x15   : > { %327 = vst [vmem:[#allocation2] sm:$0xff] %v1228_v0  ;;  %328 = vst [vmem:[#allocation2 + $0x8] sm:$0xff] %v1228_v0 }
  0x16 PF: > { %v1104_v1 = vld [vmem:[%s1284_s28 + $0x74] ss:$8 sps:$4 sm:$0xff]   ;;  %v1108_v3 = vld [vmem:[%s1284_s28 + $0x70] ss:$8 sps:$4 sm:$0xff]   ;;  %v1110_v5 = vld [vmem:[%s1284_s28 + $0x64] ss:$8 sps:$4 sm:$0xff]  }
  0x17   : > { %v1106_v2 = vld [vmem:[%s1284_s28 + $0x174] ss:$8 sps:$4 sm:$0xff]   ;;  %731 = vmatprep.subr.bf16.mxu0 %v1104_v1  ;;  %v1109_v4 = vld [vmem:[%s1284_s28 + $0x170] ss:$8 sps:$4 sm:$0xff]   ;;  %v1112_v6 = vld [vmem:[%s1284_s28 + $0x164] ss:$8 sps:$4 sm:$0xff]  }
  0x18   : > { %772 = vmatprep.subr.bf16.mxu1 %v1106_v2  ;;  %732 = vmatpush1.bf16.msra.mxu0 %v1108_v3  ;;  %v1114_v7 = vld [vmem:[%s1284_s28 + $0x60] ss:$8 sps:$4 sm:$0xff]   ;;  %v1116_v9 = vld [vmem:[%s1284_s28 + $0x54] ss:$8 sps:$4 sm:$0xff]   ;;  %v1120_v11 = vld [vmem:[%s1284_s28 + $0x50] ss:$8 sps:$4 sm:$0xff]  }
  0x19   : > { %773 = vmatpush1.bf16.msra.mxu1 %v1109_v4  ;;  %733 = vmatprep.subr.bf16.mxu0 %v1110_v5  ;;  %v1115_v8 = vld [vmem:[%s1284_s28 + $0x160] ss:$8 sps:$4 sm:$0xff]   ;;  %v1118_v10 = vld [vmem:[%s1284_s28 + $0x154] ss:$8 sps:$4 sm:$0xff]   ;;  %v1121_v12 = vld [vmem:[%s1284_s28 + $0x150] ss:$8 sps:$4 sm:$0xff]  }
  0x1a   : > { %774 = vmatprep.subr.bf16.mxu1 %v1112_v6  ;;  %v1122_v13 = vld [vmem:[%s1284_s28 + $0x44] ss:$8 sps:$4 sm:$0xff]   ;;  %v1126_v15 = vld [vmem:[%s1284_s28 + $0x40] ss:$8 sps:$4 sm:$0xff]   ;;  %v1128_v17 = vld [vmem:[%s1284_s28 + $0x34] ss:$8 sps:$4 sm:$0xff]  }
  0x1b   : > { %v1124_v14 = vld [vmem:[%s1284_s28 + $0x144] ss:$8 sps:$4 sm:$0xff]   ;;  %v1127_v16 = vld [vmem:[%s1284_s28 + $0x140] ss:$8 sps:$4 sm:$0xff]   ;;  %v1130_v18 = vld [vmem:[%s1284_s28 + $0x134] ss:$8 sps:$4 sm:$0xff]  }
  0x1c   : > { %734 = vmatpush1.bf16.msra.mxu0 %v1114_v7  ;;  %v1132_v19 = vld [vmem:[%s1284_s28 + $0x30] ss:$8 sps:$4 sm:$0xff]   ;;  %v1134_v21 = vld [vmem:[%s1284_s28 + $0x24] ss:$8 sps:$4 sm:$0xff]   ;;  %v1138_v23 = vld [vmem:[%s1284_s28 + $0x20] ss:$8 sps:$4 sm:$0xff]  }
  0x1d   : > { %775 = vmatpush1.bf16.msra.mxu1 %v1115_v8  ;;  %735 = vmatprep.subr.bf16.mxu0 %v1116_v9  ;;  %v1133_v20 = vld [vmem:[%s1284_s28 + $0x130] ss:$8 sps:$4 sm:$0xff]   ;;  %v1136_v22 = vld [vmem:[%s1284_s28 + $0x124] ss:$8 sps:$4 sm:$0xff]   ;;  %v1139_v24 = vld [vmem:[%s1284_s28 + $0x120] ss:$8 sps:$4 sm:$0xff]  }
  0x1e   : > { %776 = vmatprep.subr.bf16.mxu1 %v1118_v10  ;;  %v1140_v25 = vld [vmem:[%s1284_s28 + $0x14] ss:$8 sps:$4 sm:$0xff]   ;;  %v1144_v27 = vld [vmem:[%s1284_s28 + $0x10] ss:$8 sps:$4 sm:$0xff]   ;;  %v1146_v29 = vld [vmem:[%s1284_s28 + $0x4] ss:$8 sps:$4 sm:$0xff]  }
  0x1f   : > { %v1142_v26 = vld [vmem:[%s1284_s28 + $0x114] ss:$8 sps:$4 sm:$0xff]   ;;  %v1145_v28 = vld [vmem:[%s1284_s28 + $0x110] ss:$8 sps:$4 sm:$0xff]   ;;  %v1148_v30 = vld [vmem:[%s1284_s28 + $0x104] ss:$8 sps:$4 sm:$0xff]  }
  0x20   : > { %736 = vmatpush1.bf16.msra.mxu0 %v1120_v11  ;;  %v1150_v31 = vld [vmem:[%s1284_s28] ss:$8 sps:$4 sm:$0xff]   ;;  %v1152_v33 = vld [vmem:[%s1284_s28 + $0xf4] ss:$8 sps:$4 sm:$0xff]   ;;  %v1156_v35 = vld [vmem:[%s1284_s28 + $0xf0] ss:$8 sps:$4 sm:$0xff]  }
  0x21   : > { %777 = vmatpush1.bf16.msra.mxu1 %v1121_v12  ;;  %737 = vmatprep.subr.bf16.mxu0 %v1122_v13  ;;  %v1151_v32 = vld [vmem:[%s1284_s28 + $0x100] ss:$8 sps:$4 sm:$0xff]   ;;  %v1154_v34 = vld [vmem:[%s1284_s28 + $0x1f4] ss:$8 sps:$4 sm:$0xff]   ;;  %v1157_v36 = vld [vmem:[%s1284_s28 + $0x1f0] ss:$8 sps:$4 sm:$0xff]  }
  0x22   : > { %778 = vmatprep.subr.bf16.mxu1 %v1124_v14  ;;  %v1158_v37 = vld [vmem:[%s1284_s28 + $0xe4] ss:$8 sps:$4 sm:$0xff]   ;;  %v1162_v39 = vld [vmem:[%s1284_s28 + $0xe0] ss:$8 sps:$4 sm:$0xff]   ;;  %v1164_v41 = vld [vmem:[%s1284_s28 + $0xd4] ss:$8 sps:$4 sm:$0xff]  }
  0x23   : > { %v1160_v38 = vld [vmem:[%s1284_s28 + $0x1e4] ss:$8 sps:$4 sm:$0xff]   ;;  %v1163_v40 = vld [vmem:[%s1284_s28 + $0x1e0] ss:$8 sps:$4 sm:$0xff]   ;;  %v1166_v42 = vld [vmem:[%s1284_s28 + $0x1d4] ss:$8 sps:$4 sm:$0xff]  }
  0x24   : > { %738 = vmatpush1.bf16.msra.mxu0 %v1126_v15  ;;  %v1168_v43 = vld [vmem:[%s1284_s28 + $0xd0] ss:$8 sps:$4 sm:$0xff]   ;;  %v1170_v45 = vld [vmem:[%s1284_s28 + $0xc4] ss:$8 sps:$4 sm:$0xff]   ;;  %v1174_v50 = vld [vmem:[%s1284_s28 + $0xc0] ss:$8 sps:$4 sm:$0xff]  }
  0x25   : > { %779 = vmatpush1.bf16.msra.mxu1 %v1127_v16  ;;  %739 = vmatprep.subr.bf16.mxu0 %v1128_v17  ;;  %v1169_v44 = vld [vmem:[%s1284_s28 + $0x1d0] ss:$8 sps:$4 sm:$0xff]   ;;  %v1172_v46 = vld [vmem:[%s1284_s28 + $0x1c4] ss:$8 sps:$4 sm:$0xff]   ;;  %v1175_v51 = vld [vmem:[%s1284_s28 + $0x1c0] ss:$8 sps:$4 sm:$0xff]  }
  0x26   : > { %780 = vmatprep.subr.bf16.mxu1 %v1130_v18  ;;  %v331_v47 = vld [vmem:[%s1279_s24] sm:$0xff]  ;;  %v332_v49 = vld [vmem:[%s1279_s24 + $0x8] sm:$0xff]  ;;  %v1176_v53 = vld [vmem:[%s1284_s28 + $0xb4] ss:$8 sps:$4 sm:$0xff]   ;;  %p1071_p7 = scmp.ne.s32.totalorder %s1218_s15, 8 }
  0x27   : > { %v1004_v48 = vcombine.high %v331_v47, %v331_v47  ;;  %v1006_v52 = vcombine.high %v332_v49, %v332_v49  ;;  %v1178_v54 = vld [vmem:[%s1284_s28 + $0x1b4] ss:$8 sps:$4 sm:$0xff]   ;;  %v1180_v55 = vld [vmem:[%s1284_s28 + $0xb0] ss:$8 sps:$4 sm:$0xff]   ;;  %v1182_v57 = vld [vmem:[%s1284_s28 + $0xa4] ss:$8 sps:$4 sm:$0xff]   ;;  %v1003_v5 = vcombine.low %v331_v47, %v331_v47  ;;  %v1005_v6 = vcombine.low %v332_v49, %v332_v49 }
  0x28   : > { %740 = vmatpush1.bf16.msra.mxu0 %v1132_v19  ;;  %v1181_v56 = vld [vmem:[%s1284_s28 + $0x1b0] ss:$8 sps:$4 sm:$0xff]   ;;  %v1184_v58 = vld [vmem:[%s1284_s28 + $0x1a4] ss:$8 sps:$4 sm:$0xff]   ;;  %v1186_v59 = vld [vmem:[%s1284_s28 + $0xa0] ss:$8 sps:$4 sm:$0xff]  }
  0x29   : > { %781 = vmatpush1.bf16.msra.mxu1 %v1133_v20  ;;  %741 = vmatprep.subr.bf16.mxu0 %v1134_v21  ;;  %v1187_v60 = vld [vmem:[%s1284_s28 + $0x1a0] ss:$8 sps:$4 sm:$0xff]   ;;  %v1188_v61 = vld [vmem:[%s1284_s28 + $0x94] ss:$8 sps:$4 sm:$0xff]   ;;  %v1192_v63 = vld [vmem:[%s1284_s28 + $0x90] ss:$8 sps:$4 sm:$0xff]  }
  0x2a   : > { %782 = vmatprep.subr.bf16.mxu1 %v1136_v22  ;;  %763 = vmatprep.mubr.bf16.mxu0 %v1004_v48  ;;  %v1190_v62 = vld [vmem:[%s1284_s28 + $0x194] ss:$8 sps:$4 sm:$0xff]   ;;  %v1193_v0 = vld [vmem:[%s1284_s28 + $0x190] ss:$8 sps:$4 sm:$0xff]   ;;  %v1194_v1 = vld [vmem:[%s1284_s28 + $0x84] ss:$8 sps:$4 sm:$0xff]  }
  0x2b   : > { %804 = vmatprep.mubr.bf16.mxu1 %v1006_v52  ;;  %v1196_v2 = vld [vmem:[%s1284_s28 + $0x184] ss:$8 sps:$4 sm:$0xff]   ;;  %v1198_v3 = vld [vmem:[%s1284_s28 + $0x80] ss:$8 sps:$4 sm:$0xff]  }
  0x2c   : > { %742 = vmatpush1.bf16.msra.mxu0 %v1138_v23  ;;  %v1199_v4 = vld [vmem:[%s1284_s28 + $0x180] ss:$8 sps:$4 sm:$0xff]  }
  0x2d   : > { %783 = vmatpush1.bf16.msra.mxu1 %v1139_v24  ;;  %743 = vmatprep.subr.bf16.mxu0 %v1140_v25  ;;  %v329_v8 = vld [vmem:[#allocation2] sm:$0xff]  ;;  %v330_v12 = vld [vmem:[#allocation2 + $0x8] sm:$0xff] }
  0x2e   : > { %784 = vmatprep.subr.bf16.mxu1 %v1142_v26 }
  0x30   : > { %744 = vmatpush1.bf16.msra.mxu0 %v1144_v27 }
  0x31   : > { %785 = vmatpush1.bf16.msra.mxu1 %v1145_v28  ;;  %745 = vmatprep.subr.bf16.mxu0 %v1146_v29 }
  0x32   : > { %786 = vmatprep.subr.bf16.mxu1 %v1148_v30 }
  0x34   : > { %746 = vmatpush1.bf16.msra.mxu0 %v1150_v31 }
  0x35   : > { %787 = vmatpush1.bf16.msra.mxu1 %v1151_v32  ;;  %747 = vmatprep.subr.bf16.mxu0 %v1152_v33 }
  0x36   : > { %788 = vmatprep.subr.bf16.mxu1 %v1154_v34 }
  0x38   : > { %748 = vmatpush2.bf16.msra.mxu0 %v1156_v35 }
  0x39   : > { %789 = vmatpush2.bf16.msra.mxu1 %v1157_v36  ;;  %749 = vmatprep.subr.bf16.mxu0 %v1158_v37 }
  0x3a   : > { %790 = vmatprep.subr.bf16.mxu1 %v1160_v38 }
  0x3c   : > { %750 = vmatpush2.bf16.msra.mxu0 %v1162_v39 }
  0x3d   : > { %791 = vmatpush2.bf16.msra.mxu1 %v1163_v40  ;;  %751 = vmatprep.subr.bf16.mxu0 %v1164_v41 }
  0x3e   : > { %792 = vmatprep.subr.bf16.mxu1 %v1166_v42 }
  0x40   : > { %752 = vmatpush2.bf16.msra.mxu0 %v1168_v43 }
  0x41   : > { %793 = vmatpush2.bf16.msra.mxu1 %v1169_v44  ;;  %753 = vmatprep.subr.bf16.mxu0 %v1170_v45 }
  0x42   : > { %794 = vmatprep.subr.bf16.mxu1 %v1172_v46 }
  0x44   : > { %754 = vmatpush2.bf16.msra.mxu0 %v1174_v50 }
  0x45   : > { %795 = vmatpush2.bf16.msra.mxu1 %v1175_v51  ;;  %755 = vmatprep.subr.bf16.mxu0 %v1176_v53 }
  0x46   : > { %796 = vmatprep.subr.bf16.mxu1 %v1178_v54 }
  0x48   : > { %756 = vmatpush2.bf16.msra.mxu0 %v1180_v55 }
  0x49   : > { %797 = vmatpush2.bf16.msra.mxu1 %v1181_v56  ;;  %757 = vmatprep.subr.bf16.mxu0 %v1182_v57 }
  0x4a   : > { %798 = vmatprep.subr.bf16.mxu1 %v1184_v58 }
  0x4c   : > { %758 = vmatpush2.bf16.msra.mxu0 %v1186_v59 }
  0x4d   : > { %799 = vmatpush2.bf16.msra.mxu1 %v1187_v60  ;;  %759 = vmatprep.subr.bf16.mxu0 %v1188_v61 }
  0x4e   : > { %800 = vmatprep.subr.bf16.mxu1 %v1190_v62 }
  0x50   : > { %760 = vmatpush2.bf16.msra.mxu0 %v1192_v63 }
  0x51   : > { %801 = vmatpush2.bf16.msra.mxu1 %v1193_v0  ;;  %761 = vmatprep.subr.bf16.mxu0 %v1194_v1 }
  0x52   : > { %802 = vmatprep.subr.bf16.mxu1 %v1196_v2 }
  0x54   : > { %762 = vmatpush2.bf16.msra.mxu0 %v1198_v3 }
  0x55   : > { %803 = vmatpush2.bf16.msra.mxu1 %v1199_v4 }
  0x57   : > { %764 = vmatmul.mubr.bf16.vlgmr.msra.gmra.mxu0 %v1003_v5 }
  0x58   : > { %805 = vmatmul.mubr.bf16.vlgmr.msra.gmra.mxu1 %v1005_v6 }
 0x117   : > { %v765_v7 = vpop.f32.mrf.mxu0 }
 0x118   : > { %v806_v9 = vpop.f32.mrf.mxu1 }
 0x119   : > { %v807_v10 = vadd.f32 %v806_v9, %v765_v7  ;;  %v767_v11 = vpop.f32.mrf.mxu0 }
 0x11a   : > { %v808_v13 = vpop.f32.mrf.mxu1 }
 0x11b   : > { %v813_v14 = vadd.f32 %v807_v10, %v329_v8  ;;  %v809_v15 = vadd.f32 %v808_v13, %v767_v11  ;;  %v769_v16 = vpop.f32.mrf.mxu0  ;;  %820 = sbr.rel (%p1071_p7) target bundleno = 305 (0x131), region = 44 }
 0x11c   : > { %v810_v17 = vpop.f32.mrf.mxu1 }
 0x11d   : > { %815 = vst [vmem:[#allocation2] sm:$0xff] %v813_v14  ;;  %v814_v18 = vadd.f32 %v809_v15, %v330_v12  ;;  %v770_v19 = vpop.f32.mrf.mxu0 }
 0x11e   : > { %v811_v20 = vpop.f32.mrf.mxu1 }
 0x11f   : > { %816 = vst [vmem:[#allocation2 + $0x8] sm:$0xff] %v814_v18 }
 0x120   : > { %v825_v21 = vlaneseq  ;;  %v823_v23 = vld [vmem:[%s1374_s2] sm:$0x3] }
 0x121   : > { %v837_v24 = vld [vmem:[%s1375_s3] sm:$0x3] }
 0x122   : > { %v826_v22 = vshrl.u32 %v825_v21, 7 }
 0x124   : > { %v827_v25 = vsub.s32 0, %v826_v22  ;;  %v831_v26 = vsub.s32 1, %v826_v22  ;;  %v821_v27 = vld [vmem:[#allocation2] sm:$0xff] }
 0x126   : > { %v822_v28 = vld [vmem:[#allocation2 + $0x8] sm:$0xff]  ;;  %v828_v29 = vrot.slane %v823_v23, %v827_v25  ;;  %v832_v30 = vrot.slane %v823_v23, %v831_v26  ;;  %v842_v31 = vrot.slane %v837_v24, %v827_v25  ;;  %v846_v32 = vrot.slane %v837_v24, %v831_v26 }
 0x128   : > { %v835_v33 = vmul.f32 %v828_v29, %v821_v27  ;;  %v836_v34 = vmul.f32 %v832_v30, %v822_v28 }
 0x12a   : > { %v849_v35 = vadd.f32 %v842_v31, %v835_v33  ;;  %v850_v36 = vadd.f32 %v846_v32, %v836_v34 }
 0x12c   : > { %v851_v37 = vmax.f32 %v849_v35, 0.0  ;;  %v852_v38 = vmax.f32 %v850_v36, 0.0 }
 0x12e   : > { %v1078_v39 = vpack.c.bf16 %v852_v38, %v851_v37 }
 0x130   : > { %861 = vst [vmem:[%s1376_s4] sm:$0xff] %v1078_v39 }
 0x131 PF: > { %s14_s17 = sadd.s32 1, %s1226_s17   ;;  %s1377_s15 = smov %s1222_s16 }
 0x132   : > { %p11_p8 = scmp.ge.s32.totalorder %s14_s17, 11   ;;  %s1378_s16 = smov %s1380_s18 }
 0x134   :  { %13 = sbr.rel (!%p11_p8) target bundleno = 2 (0x2), region = 83 }

// kernel: unet_forward.29
= control target key start
LH: loop header
LB: loop body
LE: loop exit
PB: predicated region body
PF: predicated region fallthrough
CT: control target
= control target key end

     0   :  { %s1104_s15 = smov 0   ;;  %s1106_s16 = smov 0   ;;  %s1286_s0 = inlined_call_operand.vmem [shape: bf16[8,256], index: 0, kind: input, shape index: {}]   ;;  %s1287_s1 = inlined_call_operand.vmem [shape: bf16[256,512], index: 1, kind: input, shape index: {}]   ;;  %s1288_s2 = inlined_call_operand.vmem [shape: f32[1,512], index: 2, kind: input, shape index: {}]   ;;  %s1289_s3 = inlined_call_operand.vmem [shape: f32[1,512], index: 3, kind: input, shape index: {}]   ;;  %s1290_s4 = inlined_call_operand.vmem [shape: bf16[8,512], index: 4, kind: output, shape index: {}]  }
   0x1   :  { %s1108_s17 = smov 0   ;;  %s1110_s18 = smov 0  }
   0x2   :  { %s1112_s19 = smov 0  }
   0x3 LB: > { %s29_s20 = sadd.s32 1, %s1073_s18  ;;  %p77_p1 = scmp.ne.s32.totalorder %s1065_s16, %s1061_s15  ;;  %s1077_s19 = sphi %s1112_s19, %s14_s19   ;;  %s1073_s18 = sphi %s1110_s18, %s1294_s18   ;;  %s1069_s17 = sphi %s1108_s17, %s1293_s17   ;;  %s1065_s16 = sphi %s1106_s16, %s1292_s16   ;;  %s1061_s15 = sphi %s1104_s15, %s1291_s15  }
   0x4   : > { %p31_p0 = scmp.ge.s32.totalorder %s29_s20, 2  ;;  %p78_p2 = scmp.eq.s32.totalorder %s1077_s19, 0 }
   0x5   : > { %s70_s22 = sadd.s32 1, %s1065_s16  ;;  %p900_p5 = scmp.ge.s32.totalorder %s1077_s19, 2 }
   0x6   : > { %s1296_s20 = smov (%p31_p0, %s29_s20), 0  ;;  %p79_p3 = por %p78_p2, %p77_p1 }
   0x7   : > { %s66_s21 = ssub.s32 %s1073_s18, %s1296_s20  ;;  %196 = sbr.rel (%p900_p5) target bundleno = 32 (0x20), region = 20 }
   0x8   : > { %p68_p4 = scmp.eq.s32.totalorder %s66_s21, 0 }
   0xa   : > { %s1139_s23 = scalar_select %p68_p4, %s1065_s16, %s70_s22  }
   0xc   : > { %199 = sbr.rel (!%p79_p3) target bundleno = 32 (0x20), region = 24  ;;  %s201_s24 = sand.u32 (%p79_p3), 1, %s1065_s16  }
   0xd   : > { %s947_s25 = sshll.u32 (%p79_p3), %s1073_s18, 3  ;;  %s901_s26 = sshll.u32 (%p79_p3), %s201_s24, 8 }
   0xe   : > { %s1147_s29 = scalar_lea.vmem (%p79_p3), %s1287_s1, %s947_s25  ;;  %s1152_s30 = scalar_lea.vmem (%p79_p3), [#allocation3], %s901_s26 }
   0xf   : > { %v300_v0 = vld [vmem:[%s1147_s29] sm:$0xff] (%p79_p3)  ;;  %v302_v1 = vld [vmem:[%s1147_s29 + $0x10] sm:$0xff] (%p79_p3) }
  0x10   : > { %v304_v2 = vld [vmem:[%s1147_s29 + $0x20] sm:$0xff] (%p79_p3)  ;;  %301 = vst [vmem:[%s1152_s30] sm:$0xff] (%p79_p3), %v300_v0  ;;  %303 = vst [vmem:[%s1152_s30 + $0x8] sm:$0xff] (%p79_p3), %v302_v1  ;;  %v306_v3 = vld [vmem:[%s1147_s29 + $0x30] sm:$0xff] (%p79_p3) }
  0x11   : > { %305 = vst [vmem:[%s1152_s30 + $0x10] sm:$0xff] %v304_v2  ;;  %v308_v4 = vld [vmem:[%s1147_s29 + $0x40] sm:$0xff]  ;;  %v310_v5 = vld [vmem:[%s1147_s29 + $0x50] sm:$0xff]  ;;  %307 = vst [vmem:[%s1152_s30 + $0x18] sm:$0xff] %v306_v3 }
  0x12   : > { %309 = vst [vmem:[%s1152_s30 + $0x20] sm:$0xff] %v308_v4  ;;  %311 = vst [vmem:[%s1152_s30 + $0x28] sm:$0xff] %v310_v5  ;;  %v312_v6 = vld [vmem:[%s1147_s29 + $0x60] sm:$0xff]  ;;  %v314_v7 = vld [vmem:[%s1147_s29 + $0x70] sm:$0xff] }
  0x13   : > { %v316_v8 = vld [vmem:[%s1147_s29 + $0x80] sm:$0xff]  ;;  %313 = vst [vmem:[%s1152_s30 + $0x30] sm:$0xff] %v312_v6  ;;  %315 = vst [vmem:[%s1152_s30 + $0x38] sm:$0xff] %v314_v7  ;;  %v318_v9 = vld [vmem:[%s1147_s29 + $0x90] sm:$0xff] }
  0x14   : > { %317 = vst [vmem:[%s1152_s30 + $0x40] sm:$0xff] %v316_v8  ;;  %v320_v10 = vld [vmem:[%s1147_s29 + $0xa0] sm:$0xff]  ;;  %v322_v11 = vld [vmem:[%s1147_s29 + $0xb0] sm:$0xff]  ;;  %319 = vst [vmem:[%s1152_s30 + $0x48] sm:$0xff] %v318_v9 }
  0x15   : > { %321 = vst [vmem:[%s1152_s30 + $0x50] sm:$0xff] %v320_v10  ;;  %323 = vst [vmem:[%s1152_s30 + $0x58] sm:$0xff] %v322_v11  ;;  %v324_v12 = vld [vmem:[%s1147_s29 + $0xc0] sm:$0xff]  ;;  %v326_v13 = vld [vmem:[%s1147_s29 + $0xd0] sm:$0xff] }
  0x16   : > { %v328_v14 = vld [vmem:[%s1147_s29 + $0xe0] sm:$0xff]  ;;  %325 = vst [vmem:[%s1152_s30 + $0x60] sm:$0xff] %v324_v12  ;;  %327 = vst [vmem:[%s1152_s30 + $0x68] sm:$0xff] %v326_v13  ;;  %v330_v15 = vld [vmem:[%s1147_s29 + $0xf0] sm:$0xff] }
  0x17   : > { %329 = vst [vmem:[%s1152_s30 + $0x70] sm:$0xff] %v328_v14  ;;  %v332_v16 = vld [vmem:[%s1147_s29 + $0x100] sm:$0xff]  ;;  %v334_v17 = vld [vmem:[%s1147_s29 + $0x110] sm:$0xff]  ;;  %331 = vst [vmem:[%s1152_s30 + $0x78] sm:$0xff] %v330_v15 }
  0x18   : > { %333 = vst [vmem:[%s1152_s30 + $0x80] sm:$0xff] %v332_v16  ;;  %335 = vst [vmem:[%s1152_s30 + $0x88] sm:$0xff] %v334_v17  ;;  %v336_v18 = vld [vmem:[%s1147_s29 + $0x120] sm:$0xff]  ;;  %v338_v19 = vld [vmem:[%s1147_s29 + $0x130] sm:$0xff] }
  0x19   : > { %v340_v20 = vld [vmem:[%s1147_s29 + $0x140] sm:$0xff]  ;;  %337 = vst [vmem:[%s1152_s30 + $0x90] sm:$0xff] %v336_v18  ;;  %339 = vst [vmem:[%s1152_s30 + $0x98] sm:$0xff] %v338_v19  ;;  %v342_v21 = vld [vmem:[%s1147_s29 + $0x150] sm:$0xff] }
  0x1a   : > { %341 = vst [vmem:[%s1152_s30 + $0xa0] sm:$0xff] %v340_v20  ;;  %v344_v22 = vld [vmem:[%s1147_s29 + $0x160] sm:$0xff]  ;;  %v346_v23 = vld [vmem:[%s1147_s29 + $0x170] sm:$0xff]  ;;  %343 = vst [vmem:[%s1152_s30 + $0xa8] sm:$0xff] %v342_v21 }
  0x1b   : > { %345 = vst [vmem:[%s1152_s30 + $0xb0] sm:$0xff] %v344_v22  ;;  %347 = vst [vmem:[%s1152_s30 + $0xb8] sm:$0xff] %v346_v23  ;;  %v348_v24 = vld [vmem:[%s1147_s29 + $0x180] sm:$0xff]  ;;  %v350_v25 = vld [vmem:[%s1147_s29 + $0x190] sm:$0xff] }
  0x1c   : > { %v352_v26 = vld [vmem:[%s1147_s29 + $0x1a0] sm:$0xff]  ;;  %349 = vst [vmem:[%s1152_s30 + $0xc0] sm:$0xff] %v348_v24  ;;  %351 = vst [vmem:[%s1152_s30 + $0xc8] sm:$0xff] %v350_v25  ;;  %v354_v27 = vld [vmem:[%s1147_s29 + $0x1b0] sm:$0xff] }
  0x1d   : > { %353 = vst [vmem:[%s1152_s30 + $0xd0] sm:$0xff] %v352_v26  ;;  %v356_v28 = vld [vmem:[%s1147_s29 + $0x1c0] sm:$0xff]  ;;  %v358_v29 = vld [vmem:[%s1147_s29 + $0x1d0] sm:$0xff]  ;;  %355 = vst [vmem:[%s1152_s30 + $0xd8] sm:$0xff] %v354_v27 }
  0x1e   : > { %357 = vst [vmem:[%s1152_s30 + $0xe0] sm:$0xff] %v356_v28  ;;  %359 = vst [vmem:[%s1152_s30 + $0xe8] sm:$0xff] %v358_v29  ;;  %v360_v30 = vld [vmem:[%s1147_s29 + $0x1e0] sm:$0xff]  ;;  %v362_v31 = vld [vmem:[%s1147_s29 + $0x1f0] sm:$0xff] }
  0x1f   : > { %361 = vst [vmem:[%s1152_s30 + $0xf0] sm:$0xff] %v360_v30  ;;  %363 = vst [vmem:[%s1152_s30 + $0xf8] sm:$0xff] %v362_v31 }
  0x20 PF: > { %p904_p6 = scmp.ge.s32.totalorder %s1077_s19, 1  ;;  %p384_p7 = scmp.lt.s32.totalorder %s1077_s19, 3 }
  0x22   : > { %p385_p8 = pnand %p904_p6, %p384_p7 }
  0x23   : > { %s391_s5 = sand.u32 (!%p385_p8), 1, %s1061_s15   ;;  %s906_s10 = sshll.u32 (!%p385_p8), %s1069_s17, 1 }
  0x24   : > { %388 = sbr.rel (%p385_p8) target bundleno = 308 (0x134), region = 70  ;;  %s905_s8 = sshll.u32 (!%p385_p8), %s391_s5, 8 }
  0x25   : > { %s1225_s9 = scalar_lea.vmem (!%p385_p8), [#allocation3], %s905_s8  ;;  %p450_p9 = scmp.lt.s32.totalorder (!%p385_p8), %s906_s10, 3 }
  0x29   : > { %v1221_v32 = vld [vmem:[%s1286_s0] sm:$0xff]  ;;  %v989_v34 = vld [vmem:[%s1225_s9 + $0x74] ss:$8 sps:$4 sm:$0xff]   ;;  %v991_v35 = vld [vmem:[%s1225_s9 + $0x70] ss:$8 sps:$4 sm:$0xff]   ;;  %v729_v3 = vlaneseq  ;;  %s1298_s10 = smov (!%p450_p9, %s906_s10), 3 }
  0x2a   : > { %v911_v33 = vcombine.high %v1221_v32, %v1221_v32  ;;  %677 = vmatprep.subr.bf16.mxu0 %v989_v34  ;;  %v992_v36 = vld [vmem:[%s1225_s9 + $0x64] ss:$8 sps:$4 sm:$0xff]   ;;  %v994_v37 = vld [vmem:[%s1225_s9 + $0x60] ss:$8 sps:$4 sm:$0xff]   ;;  %v995_v38 = vld [vmem:[%s1225_s9 + $0x54] ss:$8 sps:$4 sm:$0xff]   ;;  %v910_v2 = vcombine.low %v1221_v32, %v1221_v32  ;;  %s452_s13 = scalar_lea.vmem %s1288_s2, %s1298_s10  ;;  %s457_s21 = scalar_lea.vmem %s1289_s3, %s1298_s10 }
  0x2b   : > { %678 = vmatpush1.bf16.msra.mxu0 %v991_v35  ;;  %v997_v39 = vld [vmem:[%s1225_s9 + $0x50] ss:$8 sps:$4 sm:$0xff]   ;;  %v998_v40 = vld [vmem:[%s1225_s9 + $0x44] ss:$8 sps:$4 sm:$0xff]   ;;  %v1000_v41 = vld [vmem:[%s1225_s9 + $0x40] ss:$8 sps:$4 sm:$0xff]  }
  0x2c   : > { %709 = vmatprep.mubr.bf16.mxu0 %v911_v33  ;;  %679 = vmatprep.subr.bf16.mxu0 %v992_v36  ;;  %v1001_v42 = vld [vmem:[%s1225_s9 + $0x34] ss:$8 sps:$4 sm:$0xff]   ;;  %v1003_v43 = vld [vmem:[%s1225_s9 + $0x30] ss:$8 sps:$4 sm:$0xff]   ;;  %v1004_v44 = vld [vmem:[%s1225_s9 + $0x24] ss:$8 sps:$4 sm:$0xff]  }
  0x2d   : > { %v1006_v45 = vld [vmem:[%s1225_s9 + $0x20] ss:$8 sps:$4 sm:$0xff]   ;;  %v1007_v46 = vld [vmem:[%s1225_s9 + $0x14] ss:$8 sps:$4 sm:$0xff]   ;;  %v1009_v47 = vld [vmem:[%s1225_s9 + $0x10] ss:$8 sps:$4 sm:$0xff]  }
  0x2e   : > { %v1010_v48 = vld [vmem:[%s1225_s9 + $0x4] ss:$8 sps:$4 sm:$0xff]   ;;  %v1012_v49 = vld [vmem:[%s1225_s9] ss:$8 sps:$4 sm:$0xff]   ;;  %v1013_v50 = vld [vmem:[%s1225_s9 + $0xf4] ss:$8 sps:$4 sm:$0xff]  }
  0x2f   : > { %680 = vmatpush1.bf16.msra.mxu0 %v994_v37  ;;  %v1015_v51 = vld [vmem:[%s1225_s9 + $0xf0] ss:$8 sps:$4 sm:$0xff]   ;;  %v1016_v52 = vld [vmem:[%s1225_s9 + $0xe4] ss:$8 sps:$4 sm:$0xff]   ;;  %v1018_v53 = vld [vmem:[%s1225_s9 + $0xe0] ss:$8 sps:$4 sm:$0xff]  }
  0x30   : > { %681 = vmatprep.subr.bf16.mxu0 %v995_v38  ;;  %v1019_v54 = vld [vmem:[%s1225_s9 + $0xd4] ss:$8 sps:$4 sm:$0xff]   ;;  %v1021_v55 = vld [vmem:[%s1225_s9 + $0xd0] ss:$8 sps:$4 sm:$0xff]   ;;  %v1022_v56 = vld [vmem:[%s1225_s9 + $0xc4] ss:$8 sps:$4 sm:$0xff]  }
  0x31   : > { %v1024_v57 = vld [vmem:[%s1225_s9 + $0xc0] ss:$8 sps:$4 sm:$0xff]   ;;  %v1025_v58 = vld [vmem:[%s1225_s9 + $0xb4] ss:$8 sps:$4 sm:$0xff]   ;;  %v1027_v59 = vld [vmem:[%s1225_s9 + $0xb0] ss:$8 sps:$4 sm:$0xff]  }
  0x32   : > { %v1028_v60 = vld [vmem:[%s1225_s9 + $0xa4] ss:$8 sps:$4 sm:$0xff]   ;;  %v1030_v61 = vld [vmem:[%s1225_s9 + $0xa0] ss:$8 sps:$4 sm:$0xff]   ;;  %v1031_v62 = vld [vmem:[%s1225_s9 + $0x94] ss:$8 sps:$4 sm:$0xff]  }
  0x33   : > { %682 = vmatpush1.bf16.msra.mxu0 %v997_v39  ;;  %v1033_v63 = vld [vmem:[%s1225_s9 + $0x90] ss:$8 sps:$4 sm:$0xff]   ;;  %v1034_v0 = vld [vmem:[%s1225_s9 + $0x84] ss:$8 sps:$4 sm:$0xff]   ;;  %v1036_v1 = vld [vmem:[%s1225_s9 + $0x80] ss:$8 sps:$4 sm:$0xff]  }
  0x34   : > { %683 = vmatprep.subr.bf16.mxu0 %v998_v40  ;;  %v730_v4 = vshrl.u32 %v729_v3, 7  ;;  %v727_v6 = vld [vmem:[%s452_s13] sm:$0x3]  ;;  %s909_s17 = sshll.u32 %s1298_s10, 2 }
  0x35   : > { %v741_v9 = vld [vmem:[%s457_s21] sm:$0x3]  ;;  %s467_s25 = scalar_lea.vmem %s1290_s4, %s909_s17 }
  0x36   : > { %v731_v5 = vsub.s32 0, %v730_v4  ;;  %v735_v7 = vsub.s32 1, %v730_v4 }
  0x37   : > { %684 = vmatpush1.bf16.msra.mxu0 %v1000_v41 }
  0x38   : > { %685 = vmatprep.subr.bf16.mxu0 %v1001_v42  ;;  %v732_v8 = vrot.slane %v727_v6, %v731_v5  ;;  %v736_v10 = vrot.slane %v727_v6, %v735_v7  ;;  %v746_v13 = vrot.slane %v741_v9, %v731_v5  ;;  %v750_v14 = vrot.slane %v741_v9, %v735_v7 }
  0x3b   : > { %686 = vmatpush1.bf16.msra.mxu0 %v1003_v43 }
  0x3c   : > { %687 = vmatprep.subr.bf16.mxu0 %v1004_v44 }
  0x3f   : > { %688 = vmatpush1.bf16.msra.mxu0 %v1006_v45 }
  0x40   : > { %689 = vmatprep.subr.bf16.mxu0 %v1007_v46 }
  0x43   : > { %690 = vmatpush1.bf16.msra.mxu0 %v1009_v47 }
  0x44   : > { %691 = vmatprep.subr.bf16.mxu0 %v1010_v48 }
  0x47   : > { %692 = vmatpush1.bf16.msra.mxu0 %v1012_v49 }
  0x48   : > { %693 = vmatprep.subr.bf16.mxu0 %v1013_v50 }
  0x4b   : > { %694 = vmatpush2.bf16.msra.mxu0 %v1015_v51 }
  0x4c   : > { %695 = vmatprep.subr.bf16.mxu0 %v1016_v52 }
  0x4f   : > { %696 = vmatpush2.bf16.msra.mxu0 %v1018_v53 }
  0x50   : > { %697 = vmatprep.subr.bf16.mxu0 %v1019_v54 }
  0x53   : > { %698 = vmatpush2.bf16.msra.mxu0 %v1021_v55 }
  0x54   : > { %699 = vmatprep.subr.bf16.mxu0 %v1022_v56 }
  0x57   : > { %700 = vmatpush2.bf16.msra.mxu0 %v1024_v57 }
  0x58   : > { %701 = vmatprep.subr.bf16.mxu0 %v1025_v58 }
  0x5b   : > { %702 = vmatpush2.bf16.msra.mxu0 %v1027_v59 }
  0x5c   : > { %703 = vmatprep.subr.bf16.mxu0 %v1028_v60 }
  0x5f   : > { %704 = vmatpush2.bf16.msra.mxu0 %v1030_v61 }
  0x60   : > { %705 = vmatprep.subr.bf16.mxu0 %v1031_v62 }
  0x63   : > { %706 = vmatpush2.bf16.msra.mxu0 %v1033_v63 }
  0x64   : > { %707 = vmatprep.subr.bf16.mxu0 %v1034_v0 }
  0x67   : > { %708 = vmatpush2.bf16.msra.mxu0 %v1036_v1 }
  0x6a   : > { %710 = vmatmul.mubr.bf16.vlgmr.msra.gmra.mxu0 %v910_v2 }
 0x12a   : > { %v711_v11 = vpop.f32.mrf.mxu0 }
 0x12b   : > { %v739_v12 = vmul.f32 %v732_v8, %v711_v11 }
 0x12c   : > { %v713_v15 = vpop.f32.mrf.mxu0 }
 0x12d   : > { %v740_v16 = vmul.f32 %v736_v10, %v713_v15  ;;  %v753_v18 = vadd.f32 %v746_v13, %v739_v12 }
 0x12e   : > { %v715_v17 = vpop.f32.mrf.mxu0 }
 0x12f   : > { %v754_v19 = vadd.f32 %v750_v14, %v740_v16 }
 0x130   : > { %v716_v20 = vpop.f32.mrf.mxu0 }
 0x131   : > { %v948_v21 = vpack.c.bf16 %v754_v19, %v753_v18 }
 0x133   : > { %763 = vst [vmem:[%s467_s25] sm:$0xff] %v948_v21 }
 0x134 PF: > { %s14_s19 = sadd.s32 1, %s1077_s19   ;;  %s1291_s15 = smov %s1065_s16 }
 0x135   : > { %p11_p10 = scmp.ge.s32.totalorder %s14_s19, 4   ;;  %s1292_s16 = smov %s1139_s23 }
 0x136   : > { %s1293_s17 = smov %s1073_s18  ;;  %s1294_s18 = smov %s1296_s20 }
 0x137   :  { %13 = sbr.rel (!%p11_p10) target bundleno = 3 (0x3), region = 126 }

// kernel: unet_forward.31
= control target key start
LH: loop header
LB: loop body
LE: loop exit
PB: predicated region body
PF: predicated region fallthrough
CT: control target
= control target key end

     0   :  { %v371_v1 = vmov 0   ;;  %v232_v19 = vlaneseq  ;;  %s469_s1 = inlined_call_operand.vmem [shape: bf16[128,256], index: 1, kind: input, shape index: {}]   ;;  %s470_s0 = inlined_call_operand.vmem [shape: bf16[32,128], index: 0, kind: input, shape index: {}]   ;;  %s471_s2 = inlined_call_operand.vmem [shape: f32[1,256], index: 2, kind: input, shape index: {}]   ;;  %s472_s3 = inlined_call_operand.vmem [shape: f32[1,256], index: 3, kind: input, shape index: {}]   ;;  %s473_s4 = inlined_call_operand.vmem [shape: bf16[32,256], index: 4, kind: output, shape index: {}]  }
   0x1   :  { %v345_v0 = vld [vmem:[%s469_s1 + $0x74] ss:$8 sps:$4 sm:$0xff]   ;;  %182 = vmatprep.mubr.bf16.mxu0 %v371_v1  ;;  %192 = vmatprep.mubr.bf16.mxu1 %v371_v1  ;;  %v347_v2 = vld [vmem:[%s469_s1 + $0x70] ss:$8 sps:$4 sm:$0xff]   ;;  %v348_v3 = vld [vmem:[%s469_s1 + $0x64] ss:$8 sps:$4 sm:$0xff]  }
   0x2   :  { %150 = vmatprep.subr.bf16.mxu0 %v345_v0  ;;  %328 = vmatprep.subr.bf16.mxu1 %v345_v0  ;;  %v350_v4 = vld [vmem:[%s469_s1 + $0x60] ss:$8 sps:$4 sm:$0xff]   ;;  %v351_v5 = vld [vmem:[%s469_s1 + $0x54] ss:$8 sps:$4 sm:$0xff]   ;;  %v353_v6 = vld [vmem:[%s469_s1 + $0x50] ss:$8 sps:$4 sm:$0xff]  }
   0x3   :  { %151 = vmatpush1.bf16.msra.mxu0 %v347_v2  ;;  %336 = vmatpush1.bf16.msra.mxu1 %v347_v2  ;;  %v354_v7 = vld [vmem:[%s469_s1 + $0x44] ss:$8 sps:$4 sm:$0xff]   ;;  %v356_v8 = vld [vmem:[%s469_s1 + $0x40] ss:$8 sps:$4 sm:$0xff]   ;;  %v357_v9 = vld [vmem:[%s469_s1 + $0x34] ss:$8 sps:$4 sm:$0xff]  }
   0x4   :  { %152 = vmatprep.subr.bf16.mxu0 %v348_v3  ;;  %329 = vmatprep.subr.bf16.mxu1 %v348_v3  ;;  %v359_v10 = vld [vmem:[%s469_s1 + $0x30] ss:$8 sps:$4 sm:$0xff]   ;;  %v360_v11 = vld [vmem:[%s469_s1 + $0x24] ss:$8 sps:$4 sm:$0xff]   ;;  %v362_v12 = vld [vmem:[%s469_s1 + $0x20] ss:$8 sps:$4 sm:$0xff]  }
   0x5   :  { %v363_v13 = vld [vmem:[%s469_s1 + $0x14] ss:$8 sps:$4 sm:$0xff]   ;;  %v365_v14 = vld [vmem:[%s469_s1 + $0x10] ss:$8 sps:$4 sm:$0xff]   ;;  %v366_v15 = vld [vmem:[%s469_s1 + $0x4] ss:$8 sps:$4 sm:$0xff]  }
   0x6   :  { %v368_v16 = vld [vmem:[%s469_s1] ss:$8 sps:$4 sm:$0xff]   ;;  %v233_v20 = vshrl.u32 %v232_v19, 7 }
   0x7   :  { %153 = vmatpush1.bf16.msra.mxu0 %v350_v4  ;;  %337 = vmatpush1.bf16.msra.mxu1 %v350_v4  ;;  %v369_v17 = vld [vmem:[%s470_s0] sm:$0xff]   ;;  %v370_v18 = vld [vmem:[%s470_s0 + $0x8] sm:$0xff]  }
   0x8   :  { %154 = vmatprep.subr.bf16.mxu0 %v351_v5  ;;  %330 = vmatprep.subr.bf16.mxu1 %v351_v5  ;;  %v234_v21 = vsub.s32 0, %v233_v20  ;;  %v230_v22 = vld [vmem:[%s471_s2] sm:$0x3]  ;;  %v238_v23 = vsub.s32 1, %v233_v20 }
   0x9   :  { %v250_v25 = vld [vmem:[%s472_s3] sm:$0x3] }
   0xa   :  { %v235_v24 = vrot.slane %v230_v22, %v234_v21  ;;  %v239_v26 = vrot.slane %v230_v22, %v238_v23  ;;  %v255_v30 = vrot.slane %v250_v25, %v234_v21  ;;  %v259_v32 = vrot.slane %v250_v25, %v238_v23 }
   0xb   :  { %155 = vmatpush1.bf16.msra.mxu0 %v353_v6  ;;  %338 = vmatpush1.bf16.msra.mxu1 %v353_v6 }
   0xc   :  { %156 = vmatprep.subr.bf16.mxu0 %v354_v7  ;;  %331 = vmatprep.subr.bf16.mxu1 %v354_v7 }
   0xf   :  { %157 = vmatpush1.bf16.msra.mxu0 %v356_v8  ;;  %339 = vmatpush1.bf16.msra.mxu1 %v356_v8 }
  0x10   :  { %158 = vmatprep.subr.bf16.mxu0 %v357_v9  ;;  %332 = vmatprep.subr.bf16.mxu1 %v357_v9 }
  0x13   :  { %159 = vmatpush1.bf16.msra.mxu0 %v359_v10  ;;  %340 = vmatpush1.bf16.msra.mxu1 %v359_v10 }
  0x14   :  { %160 = vmatprep.subr.bf16.mxu0 %v360_v11  ;;  %333 = vmatprep.subr.bf16.mxu1 %v360_v11 }
  0x17   :  { %161 = vmatpush1.bf16.msra.mxu0 %v362_v12  ;;  %341 = vmatpush1.bf16.msra.mxu1 %v362_v12 }
  0x18   :  { %162 = vmatprep.subr.bf16.mxu0 %v363_v13  ;;  %334 = vmatprep.subr.bf16.mxu1 %v363_v13 }
  0x1b   :  { %163 = vmatpush1.bf16.msra.mxu0 %v365_v14  ;;  %342 = vmatpush1.bf16.msra.mxu1 %v365_v14 }
  0x1c   :  { %164 = vmatprep.subr.bf16.mxu0 %v366_v15  ;;  %335 = vmatprep.subr.bf16.mxu1 %v366_v15 }
  0x1f   :  { %165 = vmatpush1.bf16.msra.mxu0 %v368_v16  ;;  %343 = vmatpush1.bf16.msra.mxu1 %v368_v16 }
  0x22   :  { %183 = vmatmul.mubr.bf16.vlgmr.msra.gmra.mxu0 %v369_v17  ;;  %193 = vmatmul.mubr.bf16.vlgmr.msra.gmra.mxu1 %v370_v18 }
  0xe2   :  { %v184_v27 = vpop.f32.mrf.mxu0  ;;  %v194_v28 = vpop.f32.mrf.mxu1 }
  0xe3   :  { %v242_v29 = vmul.f32 %v235_v24, %v184_v27  ;;  %v246_v31 = vmul.f32 %v235_v24, %v194_v28 }
  0xe4   :  { %v186_v33 = vpop.f32.mrf.mxu0  ;;  %v196_v34 = vpop.f32.mrf.mxu1 }
  0xe5   :  { %v243_v35 = vmul.f32 %v239_v26, %v186_v33  ;;  %v247_v36 = vmul.f32 %v239_v26, %v196_v34  ;;  %v262_v39 = vadd.f32 %v255_v30, %v242_v29  ;;  %v266_v40 = vadd.f32 %v255_v30, %v246_v31 }
  0xe6   :  { %v188_v37 = vpop.f32.mrf.mxu0  ;;  %v198_v38 = vpop.f32.mrf.mxu1 }
  0xe7   :  { %v263_v41 = vadd.f32 %v259_v32, %v243_v35  ;;  %v267_v42 = vadd.f32 %v259_v32, %v247_v36  ;;  %v244_v43 = vmul.f32 %v235_v24, %v188_v37  ;;  %v248_v44 = vmul.f32 %v235_v24, %v198_v38 }
  0xe8   :  { %v190_v45 = vpop.f32.mrf.mxu0  ;;  %v200_v46 = vpop.f32.mrf.mxu1 }
  0xe9   :  { %v324_v47 = vpack.c.bf16 %v263_v41, %v262_v39  ;;  %v326_v48 = vpack.c.bf16 %v267_v42, %v266_v40  ;;  %v245_v49 = vmul.f32 %v239_v26, %v190_v45  ;;  %v249_v50 = vmul.f32 %v239_v26, %v200_v46 }
  0xea   :  { %v264_v51 = vadd.f32 %v255_v30, %v244_v43  ;;  %v268_v52 = vadd.f32 %v255_v30, %v248_v44 }
  0xeb   :  { %294 = vst [vmem:[%s473_s4] sm:$0xff] %v324_v47  ;;  %296 = vst [vmem:[%s473_s4 + $0x10] sm:$0xff] %v326_v48  ;;  %v265_v53 = vadd.f32 %v259_v32, %v245_v49  ;;  %v269_v54 = vadd.f32 %v259_v32, %v249_v50 }
  0xed   :  { %v325_v55 = vpack.c.bf16 %v265_v53, %v264_v51  ;;  %v327_v56 = vpack.c.bf16 %v269_v54, %v268_v52 }
  0xef   :  { %295 = vst [vmem:[%s473_s4 + $0x8] sm:$0xff] %v325_v55  ;;  %297 = vst [vmem:[%s473_s4 + $0x18] sm:$0xff] %v327_v56 }

// kernel: unet_forward.30
= control target key start
LH: loop header
LB: loop body
LE: loop exit
PB: predicated region body
PF: predicated region fallthrough
CT: control target
= control target key end

     0   :  { %s1143_s15 = smov 0   ;;  %s1145_s16 = smov 0   ;;  %s1256_s0 = inlined_call_operand.vmem [shape: bf16[32,2304], index: 0, kind: input, shape index: {}]   ;;  %s1257_s1 = inlined_call_operand.vmem [shape: bf16[2304,128], index: 1, kind: input, shape index: {}]   ;;  %s1258_s2 = inlined_call_operand.vmem [shape: f32[1,128], index: 2, kind: input, shape index: {}]   ;;  %s1259_s3 = inlined_call_operand.vmem [shape: f32[1,128], index: 3, kind: input, shape index: {}]   ;;  %s1260_s4 = inlined_call_operand.vmem [shape: bf16[32,128], index: 4, kind: output, shape index: {}]  }
   0x1   :  { %s1147_s17 = smov 0   ;;  %s1149_s18 = smov 0  }
   0x2   :  { %s1151_s19 = smov 0  }
   0x3 LB: > { %s26_s20 = sadd.s32 1, %s1111_s18  ;;  %p49_p1 = scmp.ne.s32.totalorder %s1103_s16, %s1099_s15  ;;  %s1115_s19 = sphi %s1151_s19, %s14_s19   ;;  %s1111_s18 = sphi %s1149_s18, %s1264_s18   ;;  %s1107_s17 = sphi %s1147_s17, %s1263_s17   ;;  %s1103_s16 = sphi %s1145_s16, %s1262_s16   ;;  %s1099_s15 = sphi %s1143_s15, %s1261_s15  }
   0x4   : > { %p27_p0 = scmp.ge.s32.totalorder %s26_s20, 6  ;;  %p50_p2 = scmp.eq.s32.totalorder %s1115_s19, 0 }
   0x5   : > { %s42_s22 = sadd.s32 1, %s1103_s16  ;;  %p874_p5 = scmp.ge.s32.totalorder %s1115_s19, 6 }
   0x6   : > { %s1266_s20 = smov (%p27_p0, %s26_s20), 0  ;;  %p51_p3 = por %p50_p2, %p49_p1 }
   0x7   : > { %s38_s21 = ssub.s32 %s1111_s18, %s1266_s20  ;;  %195 = sbr.rel (%p874_p5) target bundleno = 21 (0x15), region = 24 }
   0x8   : > { %p40_p4 = scmp.eq.s32.totalorder %s38_s21, 0 }
   0xa   : > { %s1178_s23 = scalar_select %p40_p4, %s1103_s16, %s42_s22  }
   0xc   : > { %198 = sbr.rel (!%p51_p3) target bundleno = 21 (0x15), region = 28  ;;  %s200_s24 = sand.u32 (%p51_p3), 1, %s1103_s16  }
   0xd   : > { %s928_s25 = smul.u32 (%p51_p3), 12, %s1111_s18 }
   0xe   : > { %s1002_s26 = smul.u32 (%p51_p3), 48, %s200_s24 }
   0xf   : > { %s208_s29 = scalar_lea.vmem (%p51_p3), %s1256_s0, %s928_s25 }
  0x10   : > { %v223_v0 = vld [vmem:[%s208_s29] sm:$0xff] (%p51_p3)  ;;  %v225_v1 = vld [vmem:[%s208_s29 + $0x48] sm:$0xff] (%p51_p3)  ;;  %v227_v2 = vld [vmem:[%s208_s29 + $0x90] sm:$0xff] (%p51_p3)  ;;  %s202_s30 = scalar_lea.vmem (%p51_p3), [#allocation3], %s1002_s26 }
  0x11   : > { %224 = vst [vmem:[%s202_s30] sm:$0xff] %v223_v0  ;;  %226 = vst [vmem:[%s202_s30 + $0xc] sm:$0xff] %v225_v1  ;;  %v229_v3 = vld [vmem:[%s208_s29 + $0xd8] sm:$0xff]  ;;  %v876_v4 = vld [vmem:[%s208_s29 + $0x8] sm:$0xf] }
  0x12   : > { %228 = vst [vmem:[%s202_s30 + $0x18] sm:$0xff] %v227_v2  ;;  %v878_v5 = vld [vmem:[%s208_s29 + $0x50] sm:$0xf]  ;;  %230 = vst [vmem:[%s202_s30 + $0x24] sm:$0xff] %v229_v3  ;;  %v880_v6 = vld [vmem:[%s208_s29 + $0x98] sm:$0xf] }
  0x13   : > { %877 = vst [vmem:[%s202_s30 + $0x8] sm:$0xf] %v876_v4  ;;  %879 = vst [vmem:[%s202_s30 + $0x14] sm:$0xf] %v878_v5  ;;  %v882_v7 = vld [vmem:[%s208_s29 + $0xe0] sm:$0xf] }
  0x14   : > { %881 = vst [vmem:[%s202_s30 + $0x20] sm:$0xf] %v880_v6  ;;  %883 = vst [vmem:[%s202_s30 + $0x2c] sm:$0xf] %v882_v7 }
  0x15 PF: > { %p884_p6 = scmp.ge.s32.totalorder %s1115_s19, 1  ;;  %p263_p7 = scmp.lt.s32.totalorder %s1115_s19, 7 }
  0x17   : > { %p264_p8 = pnand %p884_p6, %p263_p7 }
  0x18   : > { %s270_s5 = sand.u32 (!%p264_p8), 1, %s1099_s15   ;;  %s314_s6 = smul.u32 (!%p264_p8), 48, %s1107_s17 }
  0x19   : > { %267 = sbr.rel (%p264_p8) target bundleno = 301 (0x12d), region = 58  ;;  %p886_p10 = scmp.ne.s32.totalorder (!%p264_p8), %s1107_s17, 0 }
  0x1a   : > { %s1003_s7 = smul.u32 (!%p264_p8), 48, %s270_s5  ;;  %p315_p9 = scmp.lt.s32.totalorder (!%p264_p8), %s314_s6, 287 }
  0x1c   : > { %s1195_s12 = scalar_lea.vmem (!%p264_p8), [#allocation3], %s1003_s7 }
  0x1e   : > { %s1268_s6 = smov (!%p315_p9, %s314_s6), 287  ;;  %342 = sbr.rel (%p886_p10) target bundleno = 38 (0x26), region = 66 }
  0x1f   : > { %s885_s8 = sshll.u32 %s1268_s6, 2 }
  0x20   : > { %s1193_s11 = scalar_lea.vmem %s1257_s1, %s885_s8 }
  0x23   : > { %v1117_v8 = vmov 0.0  }
  0x24   : > { %343 = vst [vmem:[#allocation2 + $0x10] sm:$0xff] %v1117_v8  ;;  %344 = vst [vmem:[#allocation2] sm:$0xff] %v1117_v8 }
  0x25   : > { %345 = vst [vmem:[#allocation2 + $0x18] sm:$0xff] %v1117_v8  ;;  %346 = vst [vmem:[#allocation2 + $0x8] sm:$0xff] %v1117_v8 }
  0x26 PF: > { %v1045_v9 = vld [vmem:[%s1193_s11 + $0x78] sm:$0xff]   ;;  %v1048_v12 = vld [vmem:[%s1193_s11 + $0x70] sm:$0xff]   ;;  %v1051_v15 = vld [vmem:[%s1193_s11 + $0x68] sm:$0xff]   ;;  %p917_p11 = scmp.ne.s32.totalorder %s1107_s17, 5 }
  0x27   : > { %v1046_v10 = vld [vmem:[%s1193_s11 + $0x38] sm:$0xff]   ;;  %944 = vmatprep.subr.bf16.mxu0 %v1045_v9  ;;  %v1049_v13 = vld [vmem:[%s1193_s11 + $0x30] sm:$0xff]   ;;  %v1052_v16 = vld [vmem:[%s1193_s11 + $0x28] sm:$0xff]  }
  0x28   : > { %v1047_v11 = vld [vmem:[%s1193_s11 + $0xb8] sm:$0xff]   ;;  %945 = vmatpush3.bf16.msra.mxu0 %v1046_v10  ;;  %v1050_v14 = vld [vmem:[%s1193_s11 + $0xb0] sm:$0xff]   ;;  %v1053_v17 = vld [vmem:[%s1193_s11 + $0xa8] sm:$0xff]  }
  0x29   : > { %982 = vmatprep.subr.bf16.mxu1 %v1047_v11  ;;  %946 = vmatprep.subr.bf16.mxu0 %v1048_v12  ;;  %v1054_v18 = vld [vmem:[%s1193_s11 + $0x60] sm:$0xff]   ;;  %v1057_v21 = vld [vmem:[%s1193_s11 + $0x58] sm:$0xff]   ;;  %v1060_v24 = vld [vmem:[%s1193_s11 + $0x50] sm:$0xff]  }
  0x2a   : > { %983 = vmatpush3.bf16.msra.mxu1 %v1047_v11  ;;  %v1055_v19 = vld [vmem:[%s1193_s11 + $0x20] sm:$0xff]   ;;  %v1059_v22 = vld [vmem:[%s1193_s11 + $0x98] sm:$0xff]   ;;  %v1062_v25 = vld [vmem:[%s1193_s11 + $0x90] sm:$0xff]  }
  0x2b   : > { %984 = vmatprep.subr.bf16.mxu1 %v1050_v14  ;;  %v1056_v20 = vld [vmem:[%s1193_s11 + $0xa0] sm:$0xff]   ;;  %v1058_v23 = vld [vmem:[%s1193_s11 + $0x18] sm:$0xff]   ;;  %v1061_v26 = vld [vmem:[%s1193_s11 + $0x10] sm:$0xff]  }
  0x2c   : > { %947 = vmatpush3.bf16.msra.mxu0 %v1049_v13  ;;  %v1063_v27 = vld [vmem:[%s1193_s11 + $0x48] sm:$0xff]   ;;  %v1066_v30 = vld [vmem:[%s1193_s11 + $0x40] sm:$0xff]   ;;  %v347_v44 = vld [vmem:[#allocation2 + $0x10] sm:$0xff] }
  0x2d   : > { %948 = vmatprep.subr.bf16.mxu0 %v1051_v15  ;;  %v1064_v28 = vld [vmem:[%s1193_s11 + $0x8] sm:$0xff]   ;;  %v1068_v31 = vld [vmem:[%s1193_s11 + $0x80] sm:$0xff]   ;;  %v349_v58 = vld [vmem:[#allocation2 + $0x18] sm:$0xff] }
  0x2e   : > { %985 = vmatpush3.bf16.msra.mxu1 %v1050_v14  ;;  %v1065_v29 = vld [vmem:[%s1193_s11 + $0x88] sm:$0xff]   ;;  %v1071_v32 = vld [vmem:[%s1195_s12 + $0x4] ss:$12 sps:$4 sm:$0xff]  }
  0x2f   : > { %986 = vmatprep.subr.bf16.mxu1 %v1053_v17  ;;  %v1072_v33 = vld [vmem:[%s1195_s12 + $0x8] ss:$12 sps:$4 sm:$0xff]   ;;  %615 = vmatprep.mubr.bf16.mxu0 %v1071_v32  ;;  %v1069_v35 = vld [vmem:[%s1195_s12] ss:$12 sps:$4 sm:$0xff]   ;;  %v1076_v38 = vld [vmem:[%s1195_s12 + $0x18] ss:$12 sps:$4 sm:$0xff]  }
  0x30   : > { %949 = vmatpush3.bf16.msra.mxu0 %v1052_v16  ;;  %v1067_v34 = vld [vmem:[%s1193_s11] sm:$0xff]   ;;  %998 = vmatprep.mubr.bf16.mxu1 %v1072_v33  ;;  %v1074_v36 = vld [vmem:[%s1195_s12 + $0x1c] ss:$12 sps:$4 sm:$0xff]  }
  0x31   : > { %950 = vmatprep.subr.bf16.mxu0 %v1054_v18  ;;  %v1073_v37 = vld [vmem:[%s1195_s12 + $0x20] ss:$12 sps:$4 sm:$0xff]  }
  0x32   : > { %987 = vmatpush3.bf16.msra.mxu1 %v1053_v17  ;;  %v348_v52 = vld [vmem:[#allocation2] sm:$0xff]  ;;  %v350_v0 = vld [vmem:[#allocation2 + $0x8] sm:$0xff] }
  0x33   : > { %988 = vmatprep.subr.bf16.mxu1 %v1056_v20 }
  0x34   : > { %951 = vmatpush3.bf16.msra.mxu0 %v1055_v19 }
  0x35   : > { %952 = vmatprep.subr.bf16.mxu0 %v1057_v21 }
  0x36   : > { %989 = vmatpush3.bf16.msra.mxu1 %v1056_v20 }
  0x37   : > { %990 = vmatprep.subr.bf16.mxu1 %v1059_v22 }
  0x38   : > { %953 = vmatpush3.bf16.msra.mxu0 %v1058_v23 }
  0x39   : > { %954 = vmatprep.subr.bf16.mxu0 %v1060_v24 }
  0x3a   : > { %991 = vmatpush3.bf16.msra.mxu1 %v1059_v22 }
  0x3b   : > { %992 = vmatprep.subr.bf16.mxu1 %v1062_v25 }
  0x3c   : > { %955 = vmatpush3.bf16.msra.mxu0 %v1061_v26 }
  0x3d   : > { %956 = vmatprep.subr.bf16.mxu0 %v1063_v27 }
  0x3e   : > { %993 = vmatpush3.bf16.msra.mxu1 %v1062_v25 }
  0x3f   : > { %994 = vmatprep.subr.bf16.mxu1 %v1065_v29 }
  0x40   : > { %957 = vmatpush3.bf16.msra.mxu0 %v1064_v28 }
  0x41   : > { %958 = vmatprep.subr.bf16.mxu0 %v1066_v30 }
  0x42   : > { %995 = vmatpush3.bf16.msra.mxu1 %v1065_v29 }
  0x43   : > { %996 = vmatprep.subr.bf16.mxu1 %v1068_v31 }
  0x44   : > { %959 = vmatpush3.bf16.msra.mxu0 %v1067_v34 }
  0x46   : > { %997 = vmatpush3.bf16.msra.mxu1 %v1068_v31 }
  0x47   : > { %616 = vmatmul.mubr.bf16.vlgmr.msra.gmra.mxu0 %v1069_v35 }
  0x48   : > { %623 = vmatprep.mubr.bf16.mxu0 %v1074_v36 }
  0x49   : > { %999 = vmatmul.mubr.bf16.vlgmr.msra.gmra.mxu1 %v1073_v37 }
  0x4f   : > { %624 = vmatmul.mubr.bf16.gmra.mxu0 %v1076_v38 }
 0x107   : > { %v960_v39 = vpop.f32.mrf.mxu0 }
 0x109   : > { %v961_v40 = vpop.f32.mrf.mxu0  ;;  %v1000_v41 = vpop.f32.mrf.mxu1 }
 0x10a   : > { %v962_v42 = vadd.f32 %v961_v40, %v960_v39 }
 0x10b   : > { %v963_v43 = vpop.f32.mrf.mxu0  ;;  %v666_v45 = vpop.f32.mrf.mxu1 }
 0x10c   : > { %v667_v46 = vadd.f32 %v962_v42, %v666_v45 }
 0x10d   : > { %v964_v47 = vpop.f32.mrf.mxu0  ;;  %v1001_v48 = vpop.f32.mrf.mxu1 }
 0x10e   : > { %v681_v49 = vadd.f32 %v667_v46, %v347_v44  ;;  %v965_v50 = vadd.f32 %v964_v47, %v963_v43 }
 0x10f   : > { %v966_v51 = vpop.f32.mrf.mxu0  ;;  %v669_v53 = vpop.f32.mrf.mxu1 }
 0x110   : > { %685 = vst [vmem:[#allocation2 + $0x10] sm:$0xff] %v681_v49  ;;  %v670_v54 = vadd.f32 %v965_v50, %v669_v53 }
 0x111   : > { %v967_v55 = vpop.f32.mrf.mxu0 }
 0x112   : > { %v682_v56 = vadd.f32 %v670_v54, %v348_v52  ;;  %v968_v57 = vadd.f32 %v967_v55, %v966_v51 }
 0x113   : > { %v969_v59 = vpop.f32.mrf.mxu0 }
 0x114   : > { %686 = vst [vmem:[#allocation2] sm:$0xff] %v682_v56  ;;  %v675_v60 = vadd.f32 %v1000_v41, %v968_v57 }
 0x115   : > { %v970_v61 = vpop.f32.mrf.mxu0 }
 0x116   : > { %v683_v62 = vadd.f32 %v675_v60, %v349_v58  ;;  %v971_v63 = vadd.f32 %v970_v61, %v969_v59 }
 0x118   : > { %687 = vst [vmem:[#allocation2 + $0x18] sm:$0xff] %v683_v62  ;;  %v678_v1 = vadd.f32 %v1001_v48, %v971_v63  ;;  %692 = sbr.rel (%p917_p11) target bundleno = 301 (0x12d), region = 70 }
 0x11a   : > { %v684_v2 = vadd.f32 %v678_v1, %v350_v0 }
 0x11c   : > { %688 = vst [vmem:[#allocation2 + $0x8] sm:$0xff] %v684_v2 }
 0x11d   : > { %v693_v3 = vld [vmem:[#allocation2 + $0x10] sm:$0xff]  ;;  %v694_v4 = vld [vmem:[#allocation2] sm:$0xff] }
 0x11e   : > { %v918_v5 = vld [vmem:[%s1258_s2] ss:$0 sm:$0xff] }
 0x11f   : > { %v704_v6 = vmul.f32 %v918_v5, %v693_v3  ;;  %v705_v7 = vmul.f32 %v918_v5, %v694_v4  ;;  %v919_v8 = vld [vmem:[%s1259_s3] ss:$0 sm:$0xff]  ;;  %v695_v9 = vld [vmem:[#allocation2 + $0x18] sm:$0xff] }
 0x120   : > { %v706_v11 = vmul.f32 %v918_v5, %v695_v9 }
 0x121   : > { %v715_v13 = vadd.f32 %v919_v8, %v704_v6  ;;  %v716_v14 = vadd.f32 %v919_v8, %v705_v7 }
 0x122   : > { %v717_v15 = vadd.f32 %v919_v8, %v706_v11 }
 0x123   : > { %v696_v10 = vld [vmem:[#allocation2 + $0x8] sm:$0xff]  ;;  %v719_v17 = vmax.f32 %v715_v13, 0.0  ;;  %v720_v18 = vmax.f32 %v716_v14, 0.0 }
 0x124   : > { %v707_v12 = vmul.f32 %v918_v5, %v696_v10  ;;  %v721_v19 = vmax.f32 %v717_v15, 0.0 }
 0x125   : > { %v936_v21 = vpack.c.bf16 %v720_v18, %v719_v17 }
 0x126   : > { %v718_v16 = vadd.f32 %v919_v8, %v707_v12 }
 0x127   : > { %937 = vst [vmem:[%s1260_s4] sm:$0xff] %v936_v21  }
 0x128   : > { %v722_v20 = vmax.f32 %v718_v16, 0.0 }
 0x12a   : > { %v941_v22 = vpack.c.bf16 %v722_v20, %v721_v19 }
 0x12c   : > { %943 = vst [vmem:[%s1260_s4 + $0x8] sm:$0xff] %v941_v22  }
 0x12d PF: > { %s14_s19 = sadd.s32 1, %s1115_s19   ;;  %s1261_s15 = smov %s1103_s16 }
 0x12e   : > { %p11_p12 = scmp.ge.s32.totalorder %s14_s19, 8   ;;  %s1262_s16 = smov %s1178_s23 }
 0x12f   : > { %s1263_s17 = smov %s1111_s18  ;;  %s1264_s18 = smov %s1266_s20 }
 0x130   :  { %13 = sbr.rel (!%p11_p12) target bundleno = 3 (0x3), region = 120 }

// kernel: unet_forward.32
= control target key start
LH: loop header
LB: loop body
LE: loop exit
PB: predicated region body
PF: predicated region fallthrough
CT: control target
= control target key end

     0   :  { %s1743_s15 = smov 0   ;;  %s1745_s16 = smov 0   ;;  %s1996_s0 = inlined_call_operand.vmem [shape: bf16[128,1152], index: 0, kind: input, shape index: {}]   ;;  %s1997_s1 = inlined_call_operand.vmem [shape: bf16[1152,128], index: 1, kind: input, shape index: {}]   ;;  %s1998_s2 = inlined_call_operand.vmem [shape: f32[1,128], index: 2, kind: input, shape index: {}]   ;;  %s1999_s3 = inlined_call_operand.vmem [shape: f32[1,128], index: 3, kind: input, shape index: {}]   ;;  %s2000_s4 = inlined_call_operand.vmem [shape: bf16[128,128], index: 4, kind: output, shape index: {}]  }
   0x1   :  { %s1747_s17 = smov 0   ;;  %s1749_s18 = smov 0  }
   0x2   :  { %s1751_s19 = smov 0  }
   0x3 LB: > { %s26_s20 = sadd.s32 1, %s1711_s18  ;;  %p49_p1 = scmp.ne.s32.totalorder %s1703_s16, %s1699_s15  ;;  %s1715_s19 = sphi %s1751_s19, %s14_s19   ;;  %s1711_s18 = sphi %s1749_s18, %s2004_s18   ;;  %s1707_s17 = sphi %s1747_s17, %s2003_s17   ;;  %s1703_s16 = sphi %s1745_s16, %s2002_s16   ;;  %s1699_s15 = sphi %s1743_s15, %s2001_s15  }
   0x4   : > { %p27_p0 = scmp.ge.s32.totalorder %s26_s20, 3  ;;  %p50_p2 = scmp.eq.s32.totalorder %s1715_s19, 0 }
   0x5   : > { %s42_s22 = sadd.s32 1, %s1703_s16  ;;  %p1294_p5 = scmp.ge.s32.totalorder %s1715_s19, 3 }
   0x6   : > { %s2006_s20 = smov (%p27_p0, %s26_s20), 0  ;;  %p51_p3 = por %p50_p2, %p49_p1 }
   0x7   : > { %s38_s21 = ssub.s32 %s1711_s18, %s2006_s20  ;;  %195 = sbr.rel (%p1294_p5) target bundleno = 35 (0x23), region = 24 }
   0x8   : > { %p40_p4 = scmp.eq.s32.totalorder %s38_s21, 0 }
   0xa   : > { %s1778_s23 = scalar_select %p40_p4, %s1703_s16, %s42_s22  }
   0xc   : > { %198 = sbr.rel (!%p51_p3) target bundleno = 35 (0x23), region = 28  ;;  %s200_s24 = sand.u32 (%p51_p3), 1, %s1703_s16  }
   0xd   : > { %s1402_s25 = smul.u32 (%p51_p3), 12, %s1711_s18 }
   0xe   : > { %s1578_s26 = smul.u32 (%p51_p3), 192, %s200_s24 }
   0xf   : > { %s1786_s29 = scalar_lea.vmem (%p51_p3), %s1996_s0, %s1402_s25 }
  0x10   : > { %v223_v0 = vld [vmem:[%s1786_s29] sm:$0xff] (%p51_p3)  ;;  %v227_v2 = vld [vmem:[%s1786_s29 + $0x48] sm:$0xff] (%p51_p3)  ;;  %s1791_s30 = scalar_lea.vmem (%p51_p3), [#allocation3], %s1578_s26  ;;  %v231_v4 = vld [vmem:[%s1786_s29 + $0x90] sm:$0xff] (%p51_p3) }
  0x11   : > { %v225_v1 = vld [vmem:[%s1786_s29 + $0x24] sm:$0xff]  ;;  %224 = vst [vmem:[%s1791_s30] sm:$0xff] %v223_v0  ;;  %228 = vst [vmem:[%s1791_s30 + $0x18] sm:$0xff] %v227_v2  ;;  %v229_v3 = vld [vmem:[%s1786_s29 + $0x6c] sm:$0xff] }
  0x12   : > { %226 = vst [vmem:[%s1791_s30 + $0xc] sm:$0xff] %v225_v1  ;;  %v233_v5 = vld [vmem:[%s1786_s29 + $0xb4] sm:$0xff]  ;;  %230 = vst [vmem:[%s1791_s30 + $0x24] sm:$0xff] %v229_v3  ;;  %v237_v7 = vld [vmem:[%s1786_s29 + $0xfc] sm:$0xff] }
  0x13   : > { %232 = vst [vmem:[%s1791_s30 + $0x30] sm:$0xff] %v231_v4  ;;  %234 = vst [vmem:[%s1791_s30 + $0x3c] sm:$0xff] %v233_v5  ;;  %v235_v6 = vld [vmem:[%s1786_s29 + $0xd8] sm:$0xff]  ;;  %v239_v8 = vld [vmem:[%s1786_s29 + $0x120] sm:$0xff] }
  0x14   : > { %236 = vst [vmem:[%s1791_s30 + $0x48] sm:$0xff] %v235_v6  ;;  %238 = vst [vmem:[%s1791_s30 + $0x54] sm:$0xff] %v237_v7  ;;  %v241_v9 = vld [vmem:[%s1786_s29 + $0x144] sm:$0xff]  ;;  %v245_v11 = vld [vmem:[%s1786_s29 + $0x18c] sm:$0xff] }
  0x15   : > { %240 = vst [vmem:[%s1791_s30 + $0x60] sm:$0xff] %v239_v8  ;;  %v243_v10 = vld [vmem:[%s1786_s29 + $0x168] sm:$0xff]  ;;  %242 = vst [vmem:[%s1791_s30 + $0x6c] sm:$0xff] %v241_v9  ;;  %v247_v12 = vld [vmem:[%s1786_s29 + $0x1b0] sm:$0xff] }
  0x16   : > { %244 = vst [vmem:[%s1791_s30 + $0x78] sm:$0xff] %v243_v10  ;;  %246 = vst [vmem:[%s1791_s30 + $0x84] sm:$0xff] %v245_v11  ;;  %v249_v13 = vld [vmem:[%s1786_s29 + $0x1d4] sm:$0xff]  ;;  %v253_v15 = vld [vmem:[%s1786_s29 + $0x21c] sm:$0xff] }
  0x17   : > { %v251_v14 = vld [vmem:[%s1786_s29 + $0x1f8] sm:$0xff]  ;;  %248 = vst [vmem:[%s1791_s30 + $0x90] sm:$0xff] %v247_v12  ;;  %250 = vst [vmem:[%s1791_s30 + $0x9c] sm:$0xff] %v249_v13  ;;  %v1296_v16 = vld [vmem:[%s1786_s29 + $0x8] sm:$0xf] }
  0x18   : > { %252 = vst [vmem:[%s1791_s30 + $0xa8] sm:$0xff] %v251_v14  ;;  %v1298_v17 = vld [vmem:[%s1786_s29 + $0x2c] sm:$0xf]  ;;  %254 = vst [vmem:[%s1791_s30 + $0xb4] sm:$0xff] %v253_v15  ;;  %v1300_v18 = vld [vmem:[%s1786_s29 + $0x50] sm:$0xf] }
  0x19   : > { %1297 = vst [vmem:[%s1791_s30 + $0x8] sm:$0xf] %v1296_v16  ;;  %1299 = vst [vmem:[%s1791_s30 + $0x14] sm:$0xf] %v1298_v17  ;;  %v1302_v19 = vld [vmem:[%s1786_s29 + $0x74] sm:$0xf] }
  0x1a   : > { %v1304_v20 = vld [vmem:[%s1786_s29 + $0x98] sm:$0xf]  ;;  %1301 = vst [vmem:[%s1791_s30 + $0x20] sm:$0xf] %v1300_v18  ;;  %1303 = vst [vmem:[%s1791_s30 + $0x2c] sm:$0xf] %v1302_v19 }
  0x1b   : > { %1305 = vst [vmem:[%s1791_s30 + $0x38] sm:$0xf] %v1304_v20  ;;  %v1306_v21 = vld [vmem:[%s1786_s29 + $0xbc] sm:$0xf]  ;;  %v1308_v22 = vld [vmem:[%s1786_s29 + $0xe0] sm:$0xf] }
  0x1c   : > { %v1310_v23 = vld [vmem:[%s1786_s29 + $0x104] sm:$0xf]  ;;  %1307 = vst [vmem:[%s1791_s30 + $0x44] sm:$0xf] %v1306_v21  ;;  %1309 = vst [vmem:[%s1791_s30 + $0x50] sm:$0xf] %v1308_v22 }
  0x1d   : > { %1311 = vst [vmem:[%s1791_s30 + $0x5c] sm:$0xf] %v1310_v23  ;;  %v1312_v24 = vld [vmem:[%s1786_s29 + $0x128] sm:$0xf]  ;;  %v1314_v25 = vld [vmem:[%s1786_s29 + $0x14c] sm:$0xf] }
  0x1e   : > { %v1316_v26 = vld [vmem:[%s1786_s29 + $0x170] sm:$0xf]  ;;  %1313 = vst [vmem:[%s1791_s30 + $0x68] sm:$0xf] %v1312_v24  ;;  %1315 = vst [vmem:[%s1791_s30 + $0x74] sm:$0xf] %v1314_v25 }
  0x1f   : > { %1317 = vst [vmem:[%s1791_s30 + $0x80] sm:$0xf] %v1316_v26  ;;  %v1318_v27 = vld [vmem:[%s1786_s29 + $0x194] sm:$0xf]  ;;  %v1320_v28 = vld [vmem:[%s1786_s29 + $0x1b8] sm:$0xf] }
  0x20   : > { %v1322_v29 = vld [vmem:[%s1786_s29 + $0x1dc] sm:$0xf]  ;;  %1319 = vst [vmem:[%s1791_s30 + $0x8c] sm:$0xf] %v1318_v27  ;;  %1321 = vst [vmem:[%s1791_s30 + $0x98] sm:$0xf] %v1320_v28 }
  0x21   : > { %1323 = vst [vmem:[%s1791_s30 + $0xa4] sm:$0xf] %v1322_v29  ;;  %v1324_v30 = vld [vmem:[%s1786_s29 + $0x200] sm:$0xf]  ;;  %v1326_v31 = vld [vmem:[%s1786_s29 + $0x224] sm:$0xf] }
  0x22   : > { %1325 = vst [vmem:[%s1791_s30 + $0xb0] sm:$0xf] %v1324_v30  ;;  %1327 = vst [vmem:[%s1791_s30 + $0xbc] sm:$0xf] %v1326_v31 }
  0x23 PF: > { %p1328_p6 = scmp.ge.s32.totalorder %s1715_s19, 1  ;;  %p311_p7 = scmp.lt.s32.totalorder %s1715_s19, 4 }
  0x25   : > { %p312_p8 = pnand %p1328_p6, %p311_p7 }
  0x26   : > { %s318_s5 = sand.u32 (!%p312_p8), 1, %s1699_s15   ;;  %s362_s6 = smul.u32 (!%p312_p8), 48, %s1707_s17 }
  0x27   : > { %315 = sbr.rel (%p312_p8) target bundleno = 375 (0x177), region = 58  ;;  %p1330_p10 = scmp.ne.s32.totalorder (!%p312_p8), %s1707_s17, 0 }
  0x28   : > { %s1579_s7 = smul.u32 (!%p312_p8), 192, %s318_s5  ;;  %p363_p9 = scmp.lt.s32.totalorder (!%p312_p8), %s362_s6, 143 }
  0x2a   : > { %s1863_s12 = scalar_lea.vmem (!%p312_p8), [#allocation3], %s1579_s7 }
  0x2c   : > { %s2008_s6 = smov (!%p363_p9, %s362_s6), 143  ;;  %390 = sbr.rel (%p1330_p10) target bundleno = 58 (0x3a), region = 66 }
  0x2d   : > { %s1329_s8 = sshll.u32 %s2008_s6, 2 }
  0x2e   : > { %s1861_s11 = scalar_lea.vmem %s1997_s1, %s1329_s8 }
  0x31   : > { %v1717_v32 = vmov 0.0  }
  0x32   : > { %391 = vst [vmem:[#allocation2 + $0x30] sm:$0xff] %v1717_v32  ;;  %392 = vst [vmem:[#allocation2] sm:$0xff] %v1717_v32 }
  0x33   : > { %393 = vst [vmem:[#allocation2 + $0x58] sm:$0xff] %v1717_v32  ;;  %394 = vst [vmem:[#allocation2 + $0x18] sm:$0xff] %v1717_v32 }
  0x34   : > { %395 = vst [vmem:[#allocation2 + $0x50] sm:$0xff] %v1717_v32  ;;  %396 = vst [vmem:[#allocation2 + $0x68] sm:$0xff] %v1717_v32 }
  0x35   : > { %397 = vst [vmem:[#allocation2 + $0x8] sm:$0xff] %v1717_v32  ;;  %398 = vst [vmem:[#allocation2 + $0x48] sm:$0xff] %v1717_v32 }
  0x36   : > { %399 = vst [vmem:[#allocation2 + $0x40] sm:$0xff] %v1717_v32  ;;  %400 = vst [vmem:[#allocation2 + $0x20] sm:$0xff] %v1717_v32 }
  0x37   : > { %401 = vst [vmem:[#allocation2 + $0x10] sm:$0xff] %v1717_v32  ;;  %402 = vst [vmem:[#allocation2 + $0x38] sm:$0xff] %v1717_v32 }
  0x38   : > { %403 = vst [vmem:[#allocation2 + $0x60] sm:$0xff] %v1717_v32  ;;  %404 = vst [vmem:[#allocation2 + $0x70] sm:$0xff] %v1717_v32 }
  0x39   : > { %405 = vst [vmem:[#allocation2 + $0x78] sm:$0xff] %v1717_v32  ;;  %406 = vst [vmem:[#allocation2 + $0x28] sm:$0xff] %v1717_v32 }
  0x3a PF: > { %v1621_v33 = vld [vmem:[%s1861_s11 + $0x78] sm:$0xff]   ;;  %v1624_v36 = vld [vmem:[%s1861_s11 + $0x70] sm:$0xff]   ;;  %v1627_v39 = vld [vmem:[%s1861_s11 + $0x68] sm:$0xff]   ;;  %p1379_p11 = scmp.ne.s32.totalorder %s1707_s17, 2 }
  0x3b   : > { %v1622_v34 = vld [vmem:[%s1861_s11 + $0x38] sm:$0xff]   ;;  %1466 = vmatprep.subr.bf16.mxu0 %v1621_v33  ;;  %v1625_v37 = vld [vmem:[%s1861_s11 + $0x30] sm:$0xff]   ;;  %v1628_v40 = vld [vmem:[%s1861_s11 + $0x28] sm:$0xff]  }
  0x3c   : > { %v1623_v35 = vld [vmem:[%s1861_s11 + $0xb8] sm:$0xff]   ;;  %1467 = vmatpush3.bf16.msra.mxu0 %v1622_v34  ;;  %v1626_v38 = vld [vmem:[%s1861_s11 + $0xb0] sm:$0xff]   ;;  %v1629_v41 = vld [vmem:[%s1861_s11 + $0xa8] sm:$0xff]  }
  0x3d   : > { %1546 = vmatprep.subr.bf16.mxu1 %v1623_v35  ;;  %1468 = vmatprep.subr.bf16.mxu0 %v1624_v36  ;;  %v1630_v42 = vld [vmem:[%s1861_s11 + $0x60] sm:$0xff]   ;;  %v1633_v45 = vld [vmem:[%s1861_s11 + $0x58] sm:$0xff]   ;;  %v1636_v48 = vld [vmem:[%s1861_s11 + $0x50] sm:$0xff]  }
  0x3e   : > { %1547 = vmatpush3.bf16.msra.mxu1 %v1623_v35  ;;  %v1631_v43 = vld [vmem:[%s1861_s11 + $0x20] sm:$0xff]   ;;  %v1635_v46 = vld [vmem:[%s1861_s11 + $0x98] sm:$0xff]   ;;  %v1638_v49 = vld [vmem:[%s1861_s11 + $0x90] sm:$0xff]  }
  0x3f   : > { %1548 = vmatprep.subr.bf16.mxu1 %v1626_v38  ;;  %v1632_v44 = vld [vmem:[%s1861_s11 + $0xa0] sm:$0xff]   ;;  %v1634_v47 = vld [vmem:[%s1861_s11 + $0x18] sm:$0xff]   ;;  %v1637_v50 = vld [vmem:[%s1861_s11 + $0x10] sm:$0xff]  }
  0x40   : > { %1469 = vmatpush3.bf16.msra.mxu0 %v1625_v37  ;;  %v1639_v51 = vld [vmem:[%s1861_s11 + $0x48] sm:$0xff]   ;;  %v1642_v54 = vld [vmem:[%s1861_s11 + $0x40] sm:$0xff]   ;;  %v1657_v1 = vld [vmem:[%s1863_s12 + $0x50] ss:$12 sps:$4 sm:$0xff]  }
  0x41   : > { %1470 = vmatprep.subr.bf16.mxu0 %v1627_v39  ;;  %v1640_v52 = vld [vmem:[%s1861_s11 + $0x8] sm:$0xff]   ;;  %v1644_v55 = vld [vmem:[%s1861_s11 + $0x80] sm:$0xff]   ;;  %v1655_v3 = vld [vmem:[%s1863_s12 + $0x30] ss:$12 sps:$4 sm:$0xff]  }
  0x42   : > { %1549 = vmatpush3.bf16.msra.mxu1 %v1626_v38  ;;  %v1641_v53 = vld [vmem:[%s1861_s11 + $0x88] sm:$0xff]   ;;  %v1647_v56 = vld [vmem:[%s1863_s12 + $0x4] ss:$12 sps:$4 sm:$0xff]   ;;  %v1653_v0 = vld [vmem:[%s1863_s12 + $0x34] ss:$12 sps:$4 sm:$0xff]  }
  0x43   : > { %1550 = vmatprep.subr.bf16.mxu1 %v1629_v41  ;;  %v1648_v57 = vld [vmem:[%s1863_s12 + $0x8] ss:$12 sps:$4 sm:$0xff]   ;;  %v1643_v58 = vld [vmem:[%s1861_s11] sm:$0xff]   ;;  %807 = vmatprep.mubr.bf16.mxu0 %v1647_v56  ;;  %v1658_v4 = vld [vmem:[%s1863_s12 + $0x4c] ss:$12 sps:$4 sm:$0xff]  }
  0x44   : > { %1471 = vmatpush3.bf16.msra.mxu0 %v1628_v40  ;;  %1562 = vmatprep.mubr.bf16.mxu1 %v1648_v57  ;;  %v1645_v59 = vld [vmem:[%s1863_s12] ss:$12 sps:$4 sm:$0xff]   ;;  %v1650_v60 = vld [vmem:[%s1863_s12 + $0x1c] ss:$12 sps:$4 sm:$0xff]   ;;  %v1656_v62 = vld [vmem:[%s1863_s12 + $0x38] ss:$12 sps:$4 sm:$0xff]  }
  0x45   : > { %1472 = vmatprep.subr.bf16.mxu0 %v1630_v42  ;;  %v1649_v61 = vld [vmem:[%s1863_s12 + $0x20] ss:$12 sps:$4 sm:$0xff]   ;;  %v1652_v63 = vld [vmem:[%s1863_s12 + $0x18] ss:$12 sps:$4 sm:$0xff]   ;;  %v1664_v2 = vld [vmem:[%s1863_s12 + $0x68] ss:$12 sps:$4 sm:$0xff]  }
  0x46   : > { %1551 = vmatpush3.bf16.msra.mxu1 %v1629_v41  ;;  %v1665_v5 = vld [vmem:[%s1863_s12 + $0x80] ss:$12 sps:$4 sm:$0xff]   ;;  %v1672_v6 = vld [vmem:[%s1863_s12 + $0x98] ss:$12 sps:$4 sm:$0xff]   ;;  %v1660_v7 = vld [vmem:[%s1863_s12 + $0x48] ss:$12 sps:$4 sm:$0xff]  }
  0x47   : > { %1552 = vmatprep.subr.bf16.mxu1 %v1632_v44  ;;  %v1661_v8 = vld [vmem:[%s1863_s12 + $0x64] ss:$12 sps:$4 sm:$0xff]   ;;  %v1663_v10 = vld [vmem:[%s1863_s12 + $0x60] ss:$12 sps:$4 sm:$0xff]   ;;  %v1666_v11 = vld [vmem:[%s1863_s12 + $0x7c] ss:$12 sps:$4 sm:$0xff]  }
  0x48   : > { %1473 = vmatpush3.bf16.msra.mxu0 %v1631_v43  ;;  %v1673_v9 = vld [vmem:[%s1863_s12 + $0xb0] ss:$12 sps:$4 sm:$0xff]   ;;  %v1668_v12 = vld [vmem:[%s1863_s12 + $0x78] ss:$12 sps:$4 sm:$0xff]   ;;  %v1669_v13 = vld [vmem:[%s1863_s12 + $0x94] ss:$12 sps:$4 sm:$0xff]  }
  0x49   : > { %1474 = vmatprep.subr.bf16.mxu0 %v1633_v45  ;;  %v1671_v14 = vld [vmem:[%s1863_s12 + $0x90] ss:$12 sps:$4 sm:$0xff]   ;;  %v1674_v15 = vld [vmem:[%s1863_s12 + $0xac] ss:$12 sps:$4 sm:$0xff]   ;;  %v1676_v16 = vld [vmem:[%s1863_s12 + $0xa8] ss:$12 sps:$4 sm:$0xff]  }
  0x4a   : > { %1553 = vmatpush3.bf16.msra.mxu1 %v1632_v44  ;;  %v407_v22 = vld [vmem:[#allocation2 + $0x30] sm:$0xff]  ;;  %v408_v30 = vld [vmem:[#allocation2] sm:$0xff]  ;;  %v409_v37 = vld [vmem:[#allocation2 + $0x58] sm:$0xff] }
  0x4b   : > { %1554 = vmatprep.subr.bf16.mxu1 %v1635_v46  ;;  %v410_v44 = vld [vmem:[#allocation2 + $0x18] sm:$0xff] }
  0x4c   : > { %1475 = vmatpush3.bf16.msra.mxu0 %v1634_v47 }
  0x4d   : > { %1476 = vmatprep.subr.bf16.mxu0 %v1636_v48 }
  0x4e   : > { %1555 = vmatpush3.bf16.msra.mxu1 %v1635_v46 }
  0x4f   : > { %1556 = vmatprep.subr.bf16.mxu1 %v1638_v49 }
  0x50   : > { %1477 = vmatpush3.bf16.msra.mxu0 %v1637_v50 }
  0x51   : > { %1478 = vmatprep.subr.bf16.mxu0 %v1639_v51 }
  0x52   : > { %1557 = vmatpush3.bf16.msra.mxu1 %v1638_v49 }
  0x53   : > { %1558 = vmatprep.subr.bf16.mxu1 %v1641_v53 }
  0x54   : > { %1479 = vmatpush3.bf16.msra.mxu0 %v1640_v52  ;;  %v411_v52 = vld [vmem:[#allocation2 + $0x50] sm:$0xff] }
  0x55   : > { %1480 = vmatprep.subr.bf16.mxu0 %v1642_v54 }
  0x56   : > { %1559 = vmatpush3.bf16.msra.mxu1 %v1641_v53 }
  0x57   : > { %1560 = vmatprep.subr.bf16.mxu1 %v1644_v55 }
  0x58   : > { %1481 = vmatpush3.bf16.msra.mxu0 %v1643_v58 }
  0x5a   : > { %1561 = vmatpush3.bf16.msra.mxu1 %v1644_v55 }
  0x5b   : > { %808 = vmatmul.mubr.bf16.vlgmr.msra.gmra.mxu0 %v1645_v59  ;;  %v412_v59 = vld [vmem:[#allocation2 + $0x68] sm:$0xff] }
  0x5c   : > { %815 = vmatprep.mubr.bf16.mxu0 %v1650_v60 }
  0x5d   : > { %1563 = vmatmul.mubr.bf16.vlgmr.msra.gmra.mxu1 %v1649_v61 }
  0x5e   : > { %1566 = vmatprep.mubr.bf16.mxu1 %v1656_v62 }
  0x63   : > { %816 = vmatmul.mubr.bf16.gmra.mxu0 %v1652_v63 }
  0x64   : > { %823 = vmatprep.mubr.bf16.mxu0 %v1653_v0 }
  0x65   : > { %1567 = vmatmul.mubr.bf16.gmra.mxu1 %v1657_v1  ;;  %v413_v1 = vld [vmem:[#allocation2 + $0x8] sm:$0xff] }
  0x66   : > { %1570 = vmatprep.mubr.bf16.mxu1 %v1664_v2 }
  0x6b   : > { %824 = vmatmul.mubr.bf16.gmra.mxu0 %v1655_v3 }
  0x6c   : > { %831 = vmatprep.mubr.bf16.mxu0 %v1658_v4 }
  0x6d   : > { %1571 = vmatmul.mubr.bf16.gmra.mxu1 %v1665_v5 }
  0x6e   : > { %1574 = vmatprep.mubr.bf16.mxu1 %v1672_v6 }
  0x73   : > { %832 = vmatmul.mubr.bf16.gmra.mxu0 %v1660_v7 }
  0x74   : > { %839 = vmatprep.mubr.bf16.mxu0 %v1661_v8  ;;  %v414_v8 = vld [vmem:[#allocation2 + $0x48] sm:$0xff] }
  0x75   : > { %1575 = vmatmul.mubr.bf16.gmra.mxu1 %v1673_v9 }
  0x7b   : > { %840 = vmatmul.mubr.bf16.gmra.mxu0 %v1663_v10 }
  0x7c   : > { %847 = vmatprep.mubr.bf16.mxu0 %v1666_v11 }
  0x83   : > { %848 = vmatmul.mubr.bf16.gmra.mxu0 %v1668_v12 }
  0x84   : > { %855 = vmatprep.mubr.bf16.mxu0 %v1669_v13 }
  0x8b   : > { %856 = vmatmul.mubr.bf16.gmra.mxu0 %v1671_v14 }
  0x8c   : > { %863 = vmatprep.mubr.bf16.mxu0 %v1674_v15 }
  0x93   : > { %864 = vmatmul.mubr.bf16.gmra.mxu0 %v1676_v16  ;;  %v415_v16 = vld [vmem:[#allocation2 + $0x40] sm:$0xff] }
 0x11b   : > { %v1482_v17 = vpop.f32.mrf.mxu0 }
 0x11d   : > { %v1483_v18 = vpop.f32.mrf.mxu0  ;;  %v1564_v19 = vpop.f32.mrf.mxu1 }
 0x11e   : > { %v1484_v20 = vadd.f32 %v1483_v18, %v1482_v17 }
 0x11f   : > { %v1485_v21 = vpop.f32.mrf.mxu0  ;;  %v906_v23 = vpop.f32.mrf.mxu1 }
 0x120   : > { %v907_v24 = vadd.f32 %v1484_v20, %v906_v23  ;;  %v416_v23 = vld [vmem:[#allocation2 + $0x20] sm:$0xff] }
 0x121   : > { %v1486_v25 = vpop.f32.mrf.mxu0  ;;  %v1565_v26 = vpop.f32.mrf.mxu1 }
 0x122   : > { %v969_v27 = vadd.f32 %v907_v24, %v407_v22  ;;  %v1487_v28 = vadd.f32 %v1486_v25, %v1485_v21 }
 0x123   : > { %v1488_v29 = vpop.f32.mrf.mxu0  ;;  %v909_v31 = vpop.f32.mrf.mxu1 }
 0x124   : > { %985 = vst [vmem:[#allocation2 + $0x30] sm:$0xff] %v969_v27  ;;  %v910_v32 = vadd.f32 %v1487_v28, %v909_v31 }
 0x125   : > { %v1489_v33 = vpop.f32.mrf.mxu0  ;;  %v1568_v34 = vpop.f32.mrf.mxu1 }
 0x126   : > { %v970_v35 = vadd.f32 %v910_v32, %v408_v30  ;;  %v1490_v36 = vadd.f32 %v1489_v33, %v1488_v29  ;;  %v417_v29 = vld [vmem:[#allocation2 + $0x10] sm:$0xff] }
 0x127   : > { %v1491_v38 = vpop.f32.mrf.mxu0  ;;  %v922_v41 = vpop.f32.mrf.mxu1 }
 0x128   : > { %986 = vst [vmem:[#allocation2] sm:$0xff] %v970_v35  ;;  %v915_v39 = vadd.f32 %v1564_v19, %v1490_v36  ;;  %v418_v36 = vld [vmem:[#allocation2 + $0x38] sm:$0xff] }
 0x129   : > { %v1492_v40 = vpop.f32.mrf.mxu0  ;;  %v1569_v48 = vpop.f32.mrf.mxu1 }
 0x12a   : > { %v971_v42 = vadd.f32 %v915_v39, %v409_v37  ;;  %v1493_v43 = vadd.f32 %v1492_v40, %v1491_v38 }
 0x12b   : > { %v1494_v45 = vpop.f32.mrf.mxu0  ;;  %v925_v55 = vpop.f32.mrf.mxu1 }
 0x12c   : > { %987 = vst [vmem:[#allocation2 + $0x58] sm:$0xff] %v971_v42  ;;  %v918_v46 = vadd.f32 %v1565_v26, %v1493_v43 }
 0x12d   : > { %v1495_v47 = vpop.f32.mrf.mxu0  ;;  %v1572_v62 = vpop.f32.mrf.mxu1 }
 0x12e   : > { %v972_v49 = vadd.f32 %v918_v46, %v410_v44  ;;  %v1496_v50 = vadd.f32 %v1495_v47, %v1494_v45  ;;  %v419_v44 = vld [vmem:[#allocation2 + $0x60] sm:$0xff] }
 0x12f   : > { %v1497_v51 = vpop.f32.mrf.mxu0  ;;  %v938_v5 = vpop.f32.mrf.mxu1 }
 0x130   : > { %988 = vst [vmem:[#allocation2 + $0x18] sm:$0xff] %v972_v49  ;;  %v923_v53 = vadd.f32 %v1496_v50, %v922_v41 }
 0x131   : > { %v1498_v54 = vpop.f32.mrf.mxu0  ;;  %v1573_v12 = vpop.f32.mrf.mxu1 }
 0x132   : > { %v973_v56 = vadd.f32 %v923_v53, %v411_v52  ;;  %v1499_v57 = vadd.f32 %v1498_v54, %v1497_v51  ;;  %v420_v51 = vld [vmem:[#allocation2 + $0x70] sm:$0xff] }
 0x133   : > { %v1500_v58 = vpop.f32.mrf.mxu0  ;;  %v941_v19 = vpop.f32.mrf.mxu1 }
 0x134   : > { %989 = vst [vmem:[#allocation2 + $0x50] sm:$0xff] %v973_v56  ;;  %v926_v60 = vadd.f32 %v1499_v57, %v925_v55  ;;  %v421_v56 = vld [vmem:[#allocation2 + $0x78] sm:$0xff] }
 0x135   : > { %v1501_v61 = vpop.f32.mrf.mxu0  ;;  %v1576_v26 = vpop.f32.mrf.mxu1 }
 0x136   : > { %v974_v63 = vadd.f32 %v926_v60, %v412_v59  ;;  %v1502_v0 = vadd.f32 %v1501_v61, %v1500_v58 }
 0x137   : > { %v1503_v2 = vpop.f32.mrf.mxu0  ;;  %v954_v33 = vpop.f32.mrf.mxu1 }
 0x138   : > { %990 = vst [vmem:[#allocation2 + $0x68] sm:$0xff] %v974_v63  ;;  %v931_v3 = vadd.f32 %v1568_v34, %v1502_v0 }
 0x139   : > { %v1504_v4 = vpop.f32.mrf.mxu0  ;;  %v1577_v40 = vpop.f32.mrf.mxu1 }
 0x13a   : > { %v975_v6 = vadd.f32 %v931_v3, %v413_v1  ;;  %v1505_v7 = vadd.f32 %v1504_v4, %v1503_v2 }
 0x13b   : > { %v1506_v9 = vpop.f32.mrf.mxu0  ;;  %v957_v47 = vpop.f32.mrf.mxu1 }
 0x13c   : > { %991 = vst [vmem:[#allocation2 + $0x8] sm:$0xff] %v975_v6  ;;  %v934_v10 = vadd.f32 %v1569_v48, %v1505_v7 }
 0x13d   : > { %v1507_v11 = vpop.f32.mrf.mxu0 }
 0x13e   : > { %v976_v13 = vadd.f32 %v934_v10, %v414_v8  ;;  %v1508_v14 = vadd.f32 %v1507_v11, %v1506_v9 }
 0x13f   : > { %v1509_v15 = vpop.f32.mrf.mxu0 }
 0x140   : > { %992 = vst [vmem:[#allocation2 + $0x48] sm:$0xff] %v976_v13  ;;  %v939_v17 = vadd.f32 %v1508_v14, %v938_v5 }
 0x141   : > { %v1510_v18 = vpop.f32.mrf.mxu0 }
 0x142   : > { %v977_v20 = vadd.f32 %v939_v17, %v415_v16  ;;  %v1511_v21 = vadd.f32 %v1510_v18, %v1509_v15 }
 0x143   : > { %v1512_v22 = vpop.f32.mrf.mxu0 }
 0x144   : > { %993 = vst [vmem:[#allocation2 + $0x40] sm:$0xff] %v977_v20  ;;  %v942_v24 = vadd.f32 %v1511_v21, %v941_v19 }
 0x145   : > { %v1513_v25 = vpop.f32.mrf.mxu0 }
 0x146   : > { %v978_v27 = vadd.f32 %v942_v24, %v416_v23  ;;  %v1514_v28 = vadd.f32 %v1513_v25, %v1512_v22 }
 0x147   : > { %v1515_v30 = vpop.f32.mrf.mxu0 }
 0x148   : > { %994 = vst [vmem:[#allocation2 + $0x20] sm:$0xff] %v978_v27  ;;  %v947_v31 = vadd.f32 %v1572_v62, %v1514_v28  ;;  %v422_v62 = vld [vmem:[#allocation2 + $0x28] sm:$0xff] }
 0x149   : > { %v1516_v32 = vpop.f32.mrf.mxu0 }
 0x14a   : > { %v979_v34 = vadd.f32 %v947_v31, %v417_v29  ;;  %v1517_v35 = vadd.f32 %v1516_v32, %v1515_v30 }
 0x14b   : > { %v1518_v37 = vpop.f32.mrf.mxu0 }
 0x14c   : > { %995 = vst [vmem:[#allocation2 + $0x10] sm:$0xff] %v979_v34  ;;  %v950_v38 = vadd.f32 %v1573_v12, %v1517_v35 }
 0x14d   : > { %v1519_v39 = vpop.f32.mrf.mxu0 }
 0x14e   : > { %v980_v41 = vadd.f32 %v950_v38, %v418_v36  ;;  %v1520_v42 = vadd.f32 %v1519_v39, %v1518_v37 }
 0x14f   : > { %v1521_v43 = vpop.f32.mrf.mxu0 }
 0x150   : > { %996 = vst [vmem:[#allocation2 + $0x38] sm:$0xff] %v980_v41  ;;  %v955_v45 = vadd.f32 %v1520_v42, %v954_v33 }
 0x151   : > { %v1522_v46 = vpop.f32.mrf.mxu0 }
 0x152   : > { %v981_v48 = vadd.f32 %v955_v45, %v419_v44  ;;  %v1523_v49 = vadd.f32 %v1522_v46, %v1521_v43 }
 0x153   : > { %v1524_v50 = vpop.f32.mrf.mxu0 }
 0x154   : > { %997 = vst [vmem:[#allocation2 + $0x60] sm:$0xff] %v981_v48  ;;  %v958_v52 = vadd.f32 %v1523_v49, %v957_v47 }
 0x155   : > { %v1525_v53 = vpop.f32.mrf.mxu0 }
 0x156   : > { %v982_v54 = vadd.f32 %v958_v52, %v420_v51  ;;  %v1526_v55 = vadd.f32 %v1525_v53, %v1524_v50 }
 0x157   : > { %v1527_v57 = vpop.f32.mrf.mxu0 }
 0x158   : > { %998 = vst [vmem:[#allocation2 + $0x70] sm:$0xff] %v982_v54  ;;  %v963_v58 = vadd.f32 %v1576_v26, %v1526_v55 }
 0x159   : > { %v1528_v59 = vpop.f32.mrf.mxu0 }
 0x15a   : > { %v983_v60 = vadd.f32 %v963_v58, %v421_v56  ;;  %v1529_v61 = vadd.f32 %v1528_v59, %v1527_v57 }
 0x15c   : > { %999 = vst [vmem:[#allocation2 + $0x78] sm:$0xff] %v983_v60  ;;  %v966_v63 = vadd.f32 %v1577_v40, %v1529_v61  ;;  %1004 = sbr.rel (%p1379_p11) target bundleno = 375 (0x177), region = 70 }
 0x15e   : > { %v984_v0 = vadd.f32 %v966_v63, %v422_v62 }
 0x160   : > { %1000 = vst [vmem:[#allocation2 + $0x28] sm:$0xff] %v984_v0 }
 0x161   : > { %v1005_v1 = vld [vmem:[#allocation2 + $0x30] sm:$0xff]  ;;  %v1006_v2 = vld [vmem:[#allocation2] sm:$0xff]  ;;  %v1007_v7 = vld [vmem:[#allocation2 + $0x58] sm:$0xff] }
 0x162   : > { %v1918_v3 = vld [vmem:[%s1998_s2] ss:$0 sm:$0xff]  ;;  %v1008_v8 = vld [vmem:[#allocation2 + $0x18] sm:$0xff]  ;;  %v1009_v11 = vld [vmem:[#allocation2 + $0x50] sm:$0xff] }
 0x163   : > { %v1028_v4 = vmul.f32 %v1918_v3, %v1005_v1  ;;  %v1029_v5 = vmul.f32 %v1918_v3, %v1006_v2  ;;  %v1925_v6 = vld [vmem:[%s1999_s3] ss:$0 sm:$0xff]  ;;  %v1030_v9 = vmul.f32 %v1918_v3, %v1007_v7  ;;  %v1031_v10 = vmul.f32 %v1918_v3, %v1008_v8  ;;  %v1010_v12 = vld [vmem:[#allocation2 + $0x68] sm:$0xff]  ;;  %v1015_v33 = vld [vmem:[#allocation2 + $0x10] sm:$0xff] }
 0x164   : > { %v1011_v13 = vld [vmem:[#allocation2 + $0x8] sm:$0xff]  ;;  %v1032_v16 = vmul.f32 %v1918_v3, %v1009_v11  ;;  %v1033_v17 = vmul.f32 %v1918_v3, %v1010_v12  ;;  %v1013_v23 = vld [vmem:[#allocation2 + $0x40] sm:$0xff]  ;;  %v1016_v34 = vld [vmem:[#allocation2 + $0x38] sm:$0xff]  ;;  %v1038_v48 = vmul.f32 %v1918_v3, %v1015_v33 }
 0x165   : > { %v1051_v14 = vadd.f32 %v1925_v6, %v1028_v4  ;;  %v1052_v15 = vadd.f32 %v1925_v6, %v1029_v5  ;;  %v1012_v18 = vld [vmem:[#allocation2 + $0x48] sm:$0xff]  ;;  %v1053_v19 = vadd.f32 %v1925_v6, %v1030_v9  ;;  %v1054_v20 = vadd.f32 %v1925_v6, %v1031_v10  ;;  %v1014_v28 = vld [vmem:[#allocation2 + $0x20] sm:$0xff]  ;;  %v1018_v40 = vld [vmem:[#allocation2 + $0x70] sm:$0xff] }
 0x166   : > { %v1034_v21 = vmul.f32 %v1918_v3, %v1011_v13  ;;  %v1035_v22 = vmul.f32 %v1918_v3, %v1012_v18  ;;  %v1055_v26 = vadd.f32 %v1925_v6, %v1032_v16  ;;  %v1056_v27 = vadd.f32 %v1925_v6, %v1033_v17  ;;  %v1017_v39 = vld [vmem:[#allocation2 + $0x60] sm:$0xff]  ;;  %v1019_v45 = vld [vmem:[#allocation2 + $0x78] sm:$0xff] }
 0x167   : > { %v1067_v24 = vmax.f32 %v1051_v14, 0.0  ;;  %v1068_v25 = vmax.f32 %v1052_v15, 0.0  ;;  %v1069_v29 = vmax.f32 %v1053_v19, 0.0  ;;  %v1070_v30 = vmax.f32 %v1054_v20, 0.0  ;;  %v1020_v50 = vld [vmem:[#allocation2 + $0x28] sm:$0xff] }
 0x168   : > { %v1057_v31 = vadd.f32 %v1925_v6, %v1034_v21  ;;  %v1058_v32 = vadd.f32 %v1925_v6, %v1035_v22  ;;  %v1071_v36 = vmax.f32 %v1055_v26, 0.0  ;;  %v1072_v37 = vmax.f32 %v1056_v27, 0.0 }
 0x169   : > { %v1422_v35 = vpack.c.bf16 %v1068_v25, %v1067_v24  ;;  %v1036_v38 = vmul.f32 %v1918_v3, %v1013_v23  ;;  %v1427_v41 = vpack.c.bf16 %v1070_v30, %v1069_v29  ;;  %v1037_v44 = vmul.f32 %v1918_v3, %v1014_v28 }
 0x16a   : > { %v1073_v42 = vmax.f32 %v1057_v31, 0.0  ;;  %v1074_v43 = vmax.f32 %v1058_v32, 0.0  ;;  %v1432_v46 = vpack.c.bf16 %v1072_v37, %v1071_v36  ;;  %v1039_v49 = vmul.f32 %v1918_v3, %v1016_v34 }
 0x16b   : > { %1423 = vst [vmem:[%s2000_s4] sm:$0xff] %v1422_v35   ;;  %v1059_v47 = vadd.f32 %v1925_v6, %v1036_v38  ;;  %1459 = vst [vmem:[%s2000_s4 + $0x8] sm:$0xff] %v1427_v41   ;;  %v1060_v52 = vadd.f32 %v1925_v6, %v1037_v44  ;;  %v1040_v53 = vmul.f32 %v1918_v3, %v1017_v39 }
 0x16c   : > { %v1437_v51 = vpack.c.bf16 %v1074_v43, %v1073_v42  ;;  %v1041_v54 = vmul.f32 %v1918_v3, %v1018_v40  ;;  %1460 = vst [vmem:[%s2000_s4 + $0x10] sm:$0xff] %v1432_v46   ;;  %v1061_v56 = vadd.f32 %v1925_v6, %v1038_v48  ;;  %v1062_v57 = vadd.f32 %v1925_v6, %v1039_v49 }
 0x16d   : > { %v1075_v55 = vmax.f32 %v1059_v47, 0.0  ;;  %v1042_v58 = vmul.f32 %v1918_v3, %v1019_v45  ;;  %v1076_v59 = vmax.f32 %v1060_v52, 0.0  ;;  %v1063_v60 = vadd.f32 %v1925_v6, %v1040_v53 }
 0x16e   : > { %1461 = vst [vmem:[%s2000_s4 + $0x18] sm:$0xff] %v1437_v51   ;;  %v1064_v61 = vadd.f32 %v1925_v6, %v1041_v54  ;;  %v1043_v62 = vmul.f32 %v1918_v3, %v1020_v50  ;;  %v1077_v63 = vmax.f32 %v1061_v56, 0.0  ;;  %v1078_v0 = vmax.f32 %v1062_v57, 0.0 }
 0x16f   : > { %v1065_v1 = vadd.f32 %v1925_v6, %v1042_v58  ;;  %v1442_v2 = vpack.c.bf16 %v1076_v59, %v1075_v55  ;;  %v1079_v4 = vmax.f32 %v1063_v60, 0.0 }
 0x170   : > { %v1080_v5 = vmax.f32 %v1064_v61, 0.0  ;;  %v1066_v7 = vadd.f32 %v1925_v6, %v1043_v62  ;;  %v1447_v8 = vpack.c.bf16 %v1078_v0, %v1077_v63 }
 0x171   : > { %v1081_v9 = vmax.f32 %v1065_v1, 0.0  ;;  %1462 = vst [vmem:[%s2000_s4 + $0x20] sm:$0xff] %v1442_v2  }
 0x172   : > { %v1452_v10 = vpack.c.bf16 %v1080_v5, %v1079_v4  ;;  %v1082_v11 = vmax.f32 %v1066_v7, 0.0  ;;  %1463 = vst [vmem:[%s2000_s4 + $0x28] sm:$0xff] %v1447_v8  }
 0x174   : > { %1464 = vst [vmem:[%s2000_s4 + $0x30] sm:$0xff] %v1452_v10   ;;  %v1457_v3 = vpack.c.bf16 %v1082_v11, %v1081_v9 }
 0x176   : > { %1465 = vst [vmem:[%s2000_s4 + $0x38] sm:$0xff] %v1457_v3  }
 0x177 PF: > { %s14_s19 = sadd.s32 1, %s1715_s19   ;;  %s2001_s15 = smov %s1703_s16 }
 0x178   : > { %p11_p12 = scmp.ge.s32.totalorder %s14_s19, 5   ;;  %s2002_s16 = smov %s1778_s23 }
 0x179   : > { %s2003_s17 = smov %s1711_s18  ;;  %s2004_s18 = smov %s2006_s20 }
 0x17a   :  { %13 = sbr.rel (!%p11_p12) target bundleno = 3 (0x3), region = 120 }

// kernel: unet_forward.33
= control target key start
LH: loop header
LB: loop body
LE: loop exit
PB: predicated region body
PF: predicated region fallthrough
CT: control target
= control target key end

     0   :  { %vm142_vm0 = vcmask 523264   ;;  %s701_s1 = inlined_call_operand.vmem [shape: bf16[64,128], index: 1, kind: input, shape index: {}]   ;;  %s702_s0 = inlined_call_operand.vmem [shape: bf16[128,64], index: 0, kind: input, shape index: {}]   ;;  %s703_s2 = inlined_call_operand.vmem [shape: f32[1,128], index: 2, kind: input, shape index: {}]   ;;  %s704_s3 = inlined_call_operand.vmem [shape: f32[1,128], index: 3, kind: input, shape index: {}]   ;;  %s705_s4 = inlined_call_operand.vmem [shape: bf16[128,128], index: 4, kind: output, shape index: {}]  }
   0x1   :  { %v590_v0 = vld [vmem:[%s701_s1 + $0x18] sm:$0xff]   ;;  %v591_v1 = vld [vmem:[%s701_s1 + $0x10] sm:$0xff]   ;;  %v592_v2 = vld [vmem:[%s701_s1 + $0x8] sm:$0xff]  }
   0x2   :  { %558 = vmatprep.subr.bf16.mxu0 %v590_v0  ;;  %582 = vmatprep.subr.bf16.mxu1 %v590_v0  ;;  %v594_v3 = vld [vmem:[%s702_s0] sm:$0xff]   ;;  %v596_v6 = vld [vmem:[%s702_s0 + $0x8] sm:$0xff]   ;;  %v598_v8 = vld [vmem:[%s702_s0 + $0x10] sm:$0xff]  }
   0x3   :  { %559 = vmatpush3.bf16.msra.mxu0 %v590_v0  ;;  %586 = vmatpush3.bf16.msra.mxu1 %v590_v0  ;;  %v595_v4 = vld [vmem:[%s702_s0 + $0x20] sm:$0xff]   ;;  %v597_v7 = vld [vmem:[%s702_s0 + $0x28] sm:$0xff]   ;;  %v599_v9 = vld [vmem:[%s702_s0 + $0x30] sm:$0xff]  }
   0x4   :  { %560 = vmatprep.subr.bf16.mxu0 %v591_v1  ;;  %583 = vmatprep.subr.bf16.mxu1 %v591_v1  ;;  %v593_v5 = vld [vmem:[%s701_s1] sm:$0xff]   ;;  %v600_v10 = vld [vmem:[%s702_s0 + $0x18] sm:$0xff]  }
   0x5   :  { %566 = vmatprep.mubr.msk.bf16.mxu0 %vm142_vm0, %v594_v3  ;;  %574 = vmatprep.mubr.msk.bf16.mxu1 %vm142_vm0, %v595_v4  ;;  %v601_v11 = vld [vmem:[%s702_s0 + $0x38] sm:$0xff]   ;;  %v465_v12 = vld [vmem:[%s703_s2] ss:$0 sm:$0xff] }
   0x6   :  { %v466_v19 = vld [vmem:[%s704_s3] ss:$0 sm:$0xff] }
   0x7   :  { %561 = vmatpush3.bf16.msra.mxu0 %v591_v1  ;;  %587 = vmatpush3.bf16.msra.mxu1 %v591_v1 }
   0x8   :  { %562 = vmatprep.subr.bf16.mxu0 %v592_v2  ;;  %584 = vmatprep.subr.bf16.mxu1 %v592_v2 }
   0xb   :  { %563 = vmatpush3.bf16.msra.mxu0 %v592_v2  ;;  %588 = vmatpush3.bf16.msra.mxu1 %v592_v2 }
   0xc   :  { %564 = vmatprep.subr.bf16.mxu0 %v593_v5  ;;  %585 = vmatprep.subr.bf16.mxu1 %v593_v5 }
   0xf   :  { %565 = vmatpush3.bf16.msra.mxu0 %v593_v5  ;;  %589 = vmatpush3.bf16.msra.mxu1 %v593_v5 }
  0x12   :  { %567 = vmatmul.mubr.msk.bf16.vlgmr.msra.gmra.mxu0 %vm142_vm0, %v596_v6  ;;  %575 = vmatmul.mubr.msk.bf16.vlgmr.msra.gmra.mxu1 %vm142_vm0, %v597_v7 }
  0x13   :  { %570 = vmatprep.mubr.msk.bf16.mxu0 %vm142_vm0, %v598_v8  ;;  %578 = vmatprep.mubr.msk.bf16.mxu1 %vm142_vm0, %v599_v9 }
  0x1a   :  { %571 = vmatmul.mubr.msk.bf16.gmra.mxu0 %vm142_vm0, %v600_v10  ;;  %579 = vmatmul.mubr.msk.bf16.gmra.mxu1 %vm142_vm0, %v601_v11 }
  0xd2   :  { %v568_v13 = vpop.f32.mrf.mxu0  ;;  %v576_v14 = vpop.f32.mrf.mxu1 }
  0xd3   :  { %v324_v15 = vmul.f32 %v568_v13, %v465_v12  ;;  %v332_v16 = vmul.f32 %v576_v14, %v465_v12 }
  0xd4   :  { %v201_v17 = vpop.f32.mrf.mxu0  ;;  %v233_v18 = vpop.f32.mrf.mxu1 }
  0xd5   :  { %v322_v20 = vmul.f32 %v465_v12, %v201_v17  ;;  %v330_v21 = vmul.f32 %v465_v12, %v233_v18  ;;  %v347_v26 = vadd.f32 %v466_v19, %v324_v15  ;;  %v355_v27 = vadd.f32 %v466_v19, %v332_v16 }
  0xd6   :  { %v569_v22 = vpop.f32.mrf.mxu0  ;;  %v577_v23 = vpop.f32.mrf.mxu1 }
  0xd7   :  { %v325_v24 = vmul.f32 %v569_v22, %v465_v12  ;;  %v333_v25 = vmul.f32 %v577_v23, %v465_v12  ;;  %v345_v34 = vadd.f32 %v466_v19, %v322_v20  ;;  %v353_v35 = vadd.f32 %v466_v19, %v330_v21 }
  0xd8   :  { %v204_v28 = vpop.f32.mrf.mxu0  ;;  %v236_v29 = vpop.f32.mrf.mxu1 }
  0xd9   :  { %v348_v30 = vadd.f32 %v466_v19, %v325_v24  ;;  %v356_v31 = vadd.f32 %v466_v19, %v333_v25  ;;  %v323_v32 = vmul.f32 %v465_v12, %v204_v28  ;;  %v331_v33 = vmul.f32 %v465_v12, %v236_v29 }
  0xda   :  { %v572_v36 = vpop.f32.mrf.mxu0  ;;  %v580_v37 = vpop.f32.mrf.mxu1 }
  0xdb   :  { %v507_v38 = vpack.c.bf16 %v348_v30, %v347_v26  ;;  %v527_v39 = vpack.c.bf16 %v356_v31, %v355_v27  ;;  %v346_v40 = vadd.f32 %v466_v19, %v323_v32  ;;  %v354_v41 = vadd.f32 %v466_v19, %v331_v33 }
  0xdc   :  { %v328_v42 = vmul.f32 %v572_v36, %v465_v12  ;;  %v336_v43 = vmul.f32 %v580_v37, %v465_v12  ;;  %v217_v44 = vpop.f32.mrf.mxu0  ;;  %v249_v45 = vpop.f32.mrf.mxu1 }
  0xdd   :  { %539 = vst [vmem:[%s705_s4 + $0x8] sm:$0xff] %v507_v38   ;;  %543 = vst [vmem:[%s705_s4 + $0x28] sm:$0xff] %v527_v39   ;;  %v502_v46 = vpack.c.bf16 %v346_v40, %v345_v34  ;;  %v522_v47 = vpack.c.bf16 %v354_v41, %v353_v35  ;;  %v326_v48 = vmul.f32 %v465_v12, %v217_v44 }
  0xde   :  { %v334_v49 = vmul.f32 %v465_v12, %v249_v45  ;;  %v573_v50 = vpop.f32.mrf.mxu0  ;;  %v581_v51 = vpop.f32.mrf.mxu1  ;;  %v351_v54 = vadd.f32 %v466_v19, %v328_v42  ;;  %v359_v55 = vadd.f32 %v466_v19, %v336_v43 }
  0xdf   :  { %503 = vst [vmem:[%s705_s4] sm:$0xff] %v502_v46   ;;  %542 = vst [vmem:[%s705_s4 + $0x20] sm:$0xff] %v522_v47   ;;  %v329_v52 = vmul.f32 %v573_v50, %v465_v12  ;;  %v337_v53 = vmul.f32 %v581_v51, %v465_v12  ;;  %v349_v62 = vadd.f32 %v466_v19, %v326_v48 }
  0xe0   :  { %v220_v56 = vpop.f32.mrf.mxu0  ;;  %v252_v57 = vpop.f32.mrf.mxu1  ;;  %v357_v63 = vadd.f32 %v466_v19, %v334_v49 }
  0xe1   :  { %v352_v58 = vadd.f32 %v466_v19, %v329_v52  ;;  %v360_v59 = vadd.f32 %v466_v19, %v337_v53  ;;  %v327_v60 = vmul.f32 %v465_v12, %v220_v56  ;;  %v335_v61 = vmul.f32 %v465_v12, %v252_v57 }
  0xe3   :  { %v517_v0 = vpack.c.bf16 %v352_v58, %v351_v54  ;;  %v537_v1 = vpack.c.bf16 %v360_v59, %v359_v55  ;;  %v350_v2 = vadd.f32 %v466_v19, %v327_v60  ;;  %v358_v3 = vadd.f32 %v466_v19, %v335_v61 }
  0xe5   :  { %541 = vst [vmem:[%s705_s4 + $0x18] sm:$0xff] %v517_v0   ;;  %545 = vst [vmem:[%s705_s4 + $0x38] sm:$0xff] %v537_v1   ;;  %v512_v4 = vpack.c.bf16 %v350_v2, %v349_v62  ;;  %v532_v5 = vpack.c.bf16 %v358_v3, %v357_v63 }
  0xe7   :  { %540 = vst [vmem:[%s705_s4 + $0x10] sm:$0xff] %v512_v4   ;;  %544 = vst [vmem:[%s705_s4 + $0x30] sm:$0xff] %v532_v5  }

// kernel: unet_forward.35
= control target key start
LH: loop header
LB: loop body
LE: loop exit
PB: predicated region body
PF: predicated region fallthrough
CT: control target
= control target key end

     0   :  { %vm390_vm0 = vcmask 261120   ;;  %s1878_s1 = inlined_call_operand.vmem [shape: bf16[32,128], index: 1, kind: input, shape index: {}]   ;;  %s1879_s0 = inlined_call_operand.vmem [shape: bf16[512,32], index: 0, kind: input, shape index: {}]   ;;  %s1880_s2 = inlined_call_operand.vmem [shape: f32[1,128], index: 2, kind: input, shape index: {}]   ;;  %s1881_s3 = inlined_call_operand.vmem [shape: f32[1,128], index: 3, kind: input, shape index: {}]   ;;  %s1882_s4 = inlined_call_operand.vmem [shape: f32[512,128], index: 4, kind: output, shape index: {}]  }
   0x1   :  { %v1355_v0 = vld [vmem:[%s1878_s1 + $0x8] sm:$0xff]   ;;  %v1356_v1 = vld [vmem:[%s1878_s1] sm:$0xff]   ;;  %v1361_v6 = vld [vmem:[%s1879_s0 + $0x10] sm:$0xff]  }
   0x2   :  { %1283 = vmatprep.subr.bf16.mxu0 %v1355_v0  ;;  %1351 = vmatprep.subr.bf16.mxu1 %v1355_v0  ;;  %v1357_v2 = vld [vmem:[%s1879_s0] sm:$0xff]   ;;  %v1359_v4 = vld [vmem:[%s1879_s0 + $0x8] sm:$0xff]   ;;  %v1362_v7 = vld [vmem:[%s1879_s0 + $0x90] sm:$0xff]  }
   0x3   :  { %1284 = vmatpush3.bf16.msra.mxu0 %v1355_v0  ;;  %1353 = vmatpush3.bf16.msra.mxu1 %v1355_v0  ;;  %v1358_v3 = vld [vmem:[%s1879_s0 + $0x80] sm:$0xff]   ;;  %v1360_v5 = vld [vmem:[%s1879_s0 + $0x88] sm:$0xff]   ;;  %v1363_v8 = vld [vmem:[%s1879_s0 + $0x18] sm:$0xff]  }
   0x4   :  { %1285 = vmatprep.subr.bf16.mxu0 %v1356_v1  ;;  %1352 = vmatprep.subr.bf16.mxu1 %v1356_v1  ;;  %v1364_v9 = vld [vmem:[%s1879_s0 + $0x98] sm:$0xff]   ;;  %v1365_v10 = vld [vmem:[%s1879_s0 + $0x20] sm:$0xff]   ;;  %v1367_v12 = vld [vmem:[%s1879_s0 + $0x28] sm:$0xff]  }
   0x5   :  { %1287 = vmatprep.mubr.msk.bf16.mxu0 %vm390_vm0, %v1357_v2  ;;  %1319 = vmatprep.mubr.msk.bf16.mxu1 %vm390_vm0, %v1358_v3  ;;  %v1366_v11 = vld [vmem:[%s1879_s0 + $0xa0] sm:$0xff]   ;;  %v1368_v13 = vld [vmem:[%s1879_s0 + $0xa8] sm:$0xff]   ;;  %v1369_v14 = vld [vmem:[%s1879_s0 + $0x30] sm:$0xff]  }
   0x6   :  { %v1370_v15 = vld [vmem:[%s1879_s0 + $0xb0] sm:$0xff]   ;;  %v1371_v16 = vld [vmem:[%s1879_s0 + $0x38] sm:$0xff]   ;;  %v1373_v18 = vld [vmem:[%s1879_s0 + $0x40] sm:$0xff]  }
   0x7   :  { %1286 = vmatpush3.bf16.msra.mxu0 %v1356_v1  ;;  %1354 = vmatpush3.bf16.msra.mxu1 %v1356_v1  ;;  %v1372_v17 = vld [vmem:[%s1879_s0 + $0xb8] sm:$0xff]   ;;  %v1374_v19 = vld [vmem:[%s1879_s0 + $0xc0] sm:$0xff]   ;;  %v1375_v20 = vld [vmem:[%s1879_s0 + $0x48] sm:$0xff]  }
   0x8   :  { %v1376_v21 = vld [vmem:[%s1879_s0 + $0xc8] sm:$0xff]   ;;  %v1377_v22 = vld [vmem:[%s1879_s0 + $0x50] sm:$0xff]   ;;  %v1379_v24 = vld [vmem:[%s1879_s0 + $0x58] sm:$0xff]  }
   0x9   :  { %v1378_v23 = vld [vmem:[%s1879_s0 + $0xd0] sm:$0xff]   ;;  %v1380_v25 = vld [vmem:[%s1879_s0 + $0xd8] sm:$0xff]   ;;  %v1381_v26 = vld [vmem:[%s1879_s0 + $0x60] sm:$0xff]  }
   0xa   :  { %1288 = vmatmul.mubr.msk.bf16.vlgmr.msra.gmra.mxu0 %vm390_vm0, %v1359_v4  ;;  %1320 = vmatmul.mubr.msk.bf16.vlgmr.msra.gmra.mxu1 %vm390_vm0, %v1360_v5  ;;  %v1382_v27 = vld [vmem:[%s1879_s0 + $0xe0] sm:$0xff]   ;;  %v1383_v28 = vld [vmem:[%s1879_s0 + $0x68] sm:$0xff]   ;;  %v1385_v30 = vld [vmem:[%s1879_s0 + $0x70] sm:$0xff]  }
   0xb   :  { %1291 = vmatprep.mubr.msk.bf16.mxu0 %vm390_vm0, %v1361_v6  ;;  %1323 = vmatprep.mubr.msk.bf16.mxu1 %vm390_vm0, %v1362_v7  ;;  %v1384_v29 = vld [vmem:[%s1879_s0 + $0xe8] sm:$0xff]   ;;  %v1386_v31 = vld [vmem:[%s1879_s0 + $0xf0] sm:$0xff]   ;;  %v1387_v32 = vld [vmem:[%s1879_s0 + $0x78] sm:$0xff]  }
   0xc   :  { %v1388_v33 = vld [vmem:[%s1879_s0 + $0xf8] sm:$0xff]   ;;  %v1551_v34 = vld [vmem:[%s1880_s2] ss:$0 sm:$0xff] }
   0xd   :  { %v1556_v36 = vld [vmem:[%s1881_s3] ss:$0 sm:$0xff] }
  0x12   :  { %1292 = vmatmul.mubr.msk.bf16.gmra.mxu0 %vm390_vm0, %v1363_v8  ;;  %1324 = vmatmul.mubr.msk.bf16.gmra.mxu1 %vm390_vm0, %v1364_v9 }
  0x13   :  { %1295 = vmatprep.mubr.msk.bf16.mxu0 %vm390_vm0, %v1365_v10  ;;  %1327 = vmatprep.mubr.msk.bf16.mxu1 %vm390_vm0, %v1366_v11 }
  0x1a   :  { %1296 = vmatmul.mubr.msk.bf16.gmra.mxu0 %vm390_vm0, %v1367_v12  ;;  %1328 = vmatmul.mubr.msk.bf16.gmra.mxu1 %vm390_vm0, %v1368_v13 }
  0x1b   :  { %1299 = vmatprep.mubr.msk.bf16.mxu0 %vm390_vm0, %v1369_v14  ;;  %1331 = vmatprep.mubr.msk.bf16.mxu1 %vm390_vm0, %v1370_v15 }
  0x22   :  { %1300 = vmatmul.mubr.msk.bf16.gmra.mxu0 %vm390_vm0, %v1371_v16  ;;  %1332 = vmatmul.mubr.msk.bf16.gmra.mxu1 %vm390_vm0, %v1372_v17 }
  0x23   :  { %1303 = vmatprep.mubr.msk.bf16.mxu0 %vm390_vm0, %v1373_v18  ;;  %1335 = vmatprep.mubr.msk.bf16.mxu1 %vm390_vm0, %v1374_v19 }
  0x2a   :  { %1304 = vmatmul.mubr.msk.bf16.gmra.mxu0 %vm390_vm0, %v1375_v20  ;;  %1336 = vmatmul.mubr.msk.bf16.gmra.mxu1 %vm390_vm0, %v1376_v21 }
  0x2b   :  { %1307 = vmatprep.mubr.msk.bf16.mxu0 %vm390_vm0, %v1377_v22  ;;  %1339 = vmatprep.mubr.msk.bf16.mxu1 %vm390_vm0, %v1378_v23 }
  0x32   :  { %1308 = vmatmul.mubr.msk.bf16.gmra.mxu0 %vm390_vm0, %v1379_v24  ;;  %1340 = vmatmul.mubr.msk.bf16.gmra.mxu1 %vm390_vm0, %v1380_v25 }
  0x33   :  { %1311 = vmatprep.mubr.msk.bf16.mxu0 %vm390_vm0, %v1381_v26  ;;  %1343 = vmatprep.mubr.msk.bf16.mxu1 %vm390_vm0, %v1382_v27 }
  0x3a   :  { %1312 = vmatmul.mubr.msk.bf16.gmra.mxu0 %vm390_vm0, %v1383_v28  ;;  %1344 = vmatmul.mubr.msk.bf16.gmra.mxu1 %vm390_vm0, %v1384_v29 }
  0x3b   :  { %1315 = vmatprep.mubr.msk.bf16.mxu0 %vm390_vm0, %v1385_v30  ;;  %1347 = vmatprep.mubr.msk.bf16.mxu1 %vm390_vm0, %v1386_v31 }
  0x42   :  { %1316 = vmatmul.mubr.msk.bf16.gmra.mxu0 %vm390_vm0, %v1387_v32  ;;  %1348 = vmatmul.mubr.msk.bf16.gmra.mxu1 %vm390_vm0, %v1388_v33 }
  0xca   :  { %v1289_v35 = vpop.f32.mrf.mxu0  ;;  %v1321_v37 = vpop.f32.mrf.mxu1 }
  0xcb   :  { %v980_v38 = vmul.f32 %v1289_v35, %v1551_v34  ;;  %v1012_v39 = vmul.f32 %v1321_v37, %v1551_v34 }
  0xcc   :  { %v521_v40 = vpop.f32.mrf.mxu0  ;;  %v649_v41 = vpop.f32.mrf.mxu1 }
  0xcd   :  { %v1051_v42 = vadd.f32 %v1556_v36, %v980_v38  ;;  %v1083_v43 = vadd.f32 %v1556_v36, %v1012_v39  ;;  %v978_v44 = vmul.f32 %v1551_v34, %v521_v40  ;;  %v1010_v45 = vmul.f32 %v1551_v34, %v649_v41 }
  0xce   :  { %v1290_v46 = vpop.f32.mrf.mxu0  ;;  %v1322_v47 = vpop.f32.mrf.mxu1 }
  0xcf   :  { %1115 = vst [vmem:[%s1882_s4 + $0x10] sm:$0xff] %v1051_v42  ;;  %1147 = vst [vmem:[%s1882_s4 + $0x110] sm:$0xff] %v1083_v43  ;;  %v1049_v48 = vadd.f32 %v1556_v36, %v978_v44  ;;  %v1081_v49 = vadd.f32 %v1556_v36, %v1010_v45  ;;  %v981_v50 = vmul.f32 %v1290_v46, %v1551_v34 }
  0xd0   :  { %v1013_v51 = vmul.f32 %v1322_v47, %v1551_v34  ;;  %v524_v52 = vpop.f32.mrf.mxu0  ;;  %v652_v53 = vpop.f32.mrf.mxu1 }
  0xd1   :  { %1113 = vst [vmem:[%s1882_s4] sm:$0xff] %v1049_v48  ;;  %1145 = vst [vmem:[%s1882_s4 + $0x100] sm:$0xff] %v1081_v49  ;;  %v1052_v54 = vadd.f32 %v1556_v36, %v981_v50  ;;  %v979_v56 = vmul.f32 %v1551_v34, %v524_v52  ;;  %v1011_v57 = vmul.f32 %v1551_v34, %v652_v53 }
  0xd2   :  { %v1084_v55 = vadd.f32 %v1556_v36, %v1013_v51  ;;  %v1293_v58 = vpop.f32.mrf.mxu0  ;;  %v1325_v59 = vpop.f32.mrf.mxu1 }
  0xd3   :  { %1116 = vst [vmem:[%s1882_s4 + $0x18] sm:$0xff] %v1052_v54  ;;  %v1050_v60 = vadd.f32 %v1556_v36, %v979_v56  ;;  %v1082_v61 = vadd.f32 %v1556_v36, %v1011_v57  ;;  %v984_v62 = vmul.f32 %v1293_v58, %v1551_v34  ;;  %v1016_v63 = vmul.f32 %v1325_v59, %v1551_v34 }
  0xd4   :  { %1148 = vst [vmem:[%s1882_s4 + $0x118] sm:$0xff] %v1084_v55  ;;  %v537_v0 = vpop.f32.mrf.mxu0  ;;  %v665_v1 = vpop.f32.mrf.mxu1 }
  0xd5   :  { %1114 = vst [vmem:[%s1882_s4 + $0x8] sm:$0xff] %v1050_v60  ;;  %1146 = vst [vmem:[%s1882_s4 + $0x108] sm:$0xff] %v1082_v61  ;;  %v1055_v2 = vadd.f32 %v1556_v36, %v984_v62  ;;  %v1087_v3 = vadd.f32 %v1556_v36, %v1016_v63  ;;  %v982_v4 = vmul.f32 %v1551_v34, %v537_v0 }
  0xd6   :  { %v1014_v5 = vmul.f32 %v1551_v34, %v665_v1  ;;  %v1294_v6 = vpop.f32.mrf.mxu0  ;;  %v1326_v7 = vpop.f32.mrf.mxu1 }
  0xd7   :  { %1119 = vst [vmem:[%s1882_s4 + $0x30] sm:$0xff] %v1055_v2  ;;  %1151 = vst [vmem:[%s1882_s4 + $0x130] sm:$0xff] %v1087_v3  ;;  %v1053_v8 = vadd.f32 %v1556_v36, %v982_v4  ;;  %v985_v10 = vmul.f32 %v1294_v6, %v1551_v34  ;;  %v1017_v11 = vmul.f32 %v1326_v7, %v1551_v34 }
  0xd8   :  { %v1085_v9 = vadd.f32 %v1556_v36, %v1014_v5  ;;  %v540_v12 = vpop.f32.mrf.mxu0  ;;  %v668_v13 = vpop.f32.mrf.mxu1 }
  0xd9   :  { %1117 = vst [vmem:[%s1882_s4 + $0x20] sm:$0xff] %v1053_v8  ;;  %v1056_v14 = vadd.f32 %v1556_v36, %v985_v10  ;;  %v1088_v15 = vadd.f32 %v1556_v36, %v1017_v11  ;;  %v983_v16 = vmul.f32 %v1551_v34, %v540_v12  ;;  %v1015_v17 = vmul.f32 %v1551_v34, %v668_v13 }
  0xda   :  { %1149 = vst [vmem:[%s1882_s4 + $0x120] sm:$0xff] %v1085_v9  ;;  %v1297_v18 = vpop.f32.mrf.mxu0  ;;  %v1329_v19 = vpop.f32.mrf.mxu1 }
  0xdb   :  { %1120 = vst [vmem:[%s1882_s4 + $0x38] sm:$0xff] %v1056_v14  ;;  %1152 = vst [vmem:[%s1882_s4 + $0x138] sm:$0xff] %v1088_v15  ;;  %v1054_v20 = vadd.f32 %v1556_v36, %v983_v16  ;;  %v1086_v21 = vadd.f32 %v1556_v36, %v1015_v17  ;;  %v988_v22 = vmul.f32 %v1297_v18, %v1551_v34 }
  0xdc   :  { %v1020_v23 = vmul.f32 %v1329_v19, %v1551_v34  ;;  %v553_v24 = vpop.f32.mrf.mxu0  ;;  %v681_v25 = vpop.f32.mrf.mxu1 }
  0xdd   :  { %1118 = vst [vmem:[%s1882_s4 + $0x28] sm:$0xff] %v1054_v20  ;;  %1150 = vst [vmem:[%s1882_s4 + $0x128] sm:$0xff] %v1086_v21  ;;  %v1059_v26 = vadd.f32 %v1556_v36, %v988_v22  ;;  %v986_v28 = vmul.f32 %v1551_v34, %v553_v24  ;;  %v1018_v29 = vmul.f32 %v1551_v34, %v681_v25 }
  0xde   :  { %v1091_v27 = vadd.f32 %v1556_v36, %v1020_v23  ;;  %v1298_v30 = vpop.f32.mrf.mxu0  ;;  %v1330_v31 = vpop.f32.mrf.mxu1 }
  0xdf   :  { %1123 = vst [vmem:[%s1882_s4 + $0x50] sm:$0xff] %v1059_v26  ;;  %v1057_v32 = vadd.f32 %v1556_v36, %v986_v28  ;;  %v1089_v33 = vadd.f32 %v1556_v36, %v1018_v29  ;;  %v989_v35 = vmul.f32 %v1298_v30, %v1551_v34  ;;  %v1021_v37 = vmul.f32 %v1330_v31, %v1551_v34 }
  0xe0   :  { %1155 = vst [vmem:[%s1882_s4 + $0x150] sm:$0xff] %v1091_v27  ;;  %v556_v38 = vpop.f32.mrf.mxu0  ;;  %v684_v39 = vpop.f32.mrf.mxu1 }
  0xe1   :  { %1121 = vst [vmem:[%s1882_s4 + $0x40] sm:$0xff] %v1057_v32  ;;  %1153 = vst [vmem:[%s1882_s4 + $0x140] sm:$0xff] %v1089_v33  ;;  %v1060_v40 = vadd.f32 %v1556_v36, %v989_v35  ;;  %v1092_v41 = vadd.f32 %v1556_v36, %v1021_v37  ;;  %v987_v42 = vmul.f32 %v1551_v34, %v556_v38 }
  0xe2   :  { %v1019_v43 = vmul.f32 %v1551_v34, %v684_v39  ;;  %v1301_v44 = vpop.f32.mrf.mxu0  ;;  %v1333_v45 = vpop.f32.mrf.mxu1 }
  0xe3   :  { %1124 = vst [vmem:[%s1882_s4 + $0x58] sm:$0xff] %v1060_v40  ;;  %1156 = vst [vmem:[%s1882_s4 + $0x158] sm:$0xff] %v1092_v41  ;;  %v1058_v46 = vadd.f32 %v1556_v36, %v987_v42  ;;  %v992_v48 = vmul.f32 %v1301_v44, %v1551_v34  ;;  %v1024_v49 = vmul.f32 %v1333_v45, %v1551_v34 }
  0xe4   :  { %v1090_v47 = vadd.f32 %v1556_v36, %v1019_v43  ;;  %v569_v50 = vpop.f32.mrf.mxu0  ;;  %v697_v51 = vpop.f32.mrf.mxu1 }
  0xe5   :  { %1122 = vst [vmem:[%s1882_s4 + $0x48] sm:$0xff] %v1058_v46  ;;  %v1063_v52 = vadd.f32 %v1556_v36, %v992_v48  ;;  %v1095_v53 = vadd.f32 %v1556_v36, %v1024_v49  ;;  %v990_v54 = vmul.f32 %v1551_v34, %v569_v50  ;;  %v1022_v55 = vmul.f32 %v1551_v34, %v697_v51 }
  0xe6   :  { %1154 = vst [vmem:[%s1882_s4 + $0x148] sm:$0xff] %v1090_v47  ;;  %v1302_v56 = vpop.f32.mrf.mxu0  ;;  %v1334_v57 = vpop.f32.mrf.mxu1 }
  0xe7   :  { %1127 = vst [vmem:[%s1882_s4 + $0x70] sm:$0xff] %v1063_v52  ;;  %1159 = vst [vmem:[%s1882_s4 + $0x170] sm:$0xff] %v1095_v53  ;;  %v1061_v58 = vadd.f32 %v1556_v36, %v990_v54  ;;  %v1093_v59 = vadd.f32 %v1556_v36, %v1022_v55  ;;  %v993_v60 = vmul.f32 %v1302_v56, %v1551_v34 }
  0xe8   :  { %v1025_v61 = vmul.f32 %v1334_v57, %v1551_v34  ;;  %v572_v62 = vpop.f32.mrf.mxu0  ;;  %v700_v63 = vpop.f32.mrf.mxu1 }
  0xe9   :  { %1125 = vst [vmem:[%s1882_s4 + $0x60] sm:$0xff] %v1061_v58  ;;  %1157 = vst [vmem:[%s1882_s4 + $0x160] sm:$0xff] %v1093_v59  ;;  %v1064_v0 = vadd.f32 %v1556_v36, %v993_v60  ;;  %v991_v2 = vmul.f32 %v1551_v34, %v572_v62  ;;  %v1023_v3 = vmul.f32 %v1551_v34, %v700_v63 }
  0xea   :  { %v1096_v1 = vadd.f32 %v1556_v36, %v1025_v61  ;;  %v1305_v4 = vpop.f32.mrf.mxu0  ;;  %v1337_v5 = vpop.f32.mrf.mxu1 }
  0xeb   :  { %1128 = vst [vmem:[%s1882_s4 + $0x78] sm:$0xff] %v1064_v0  ;;  %v1062_v6 = vadd.f32 %v1556_v36, %v991_v2  ;;  %v1094_v7 = vadd.f32 %v1556_v36, %v1023_v3  ;;  %v996_v8 = vmul.f32 %v1305_v4, %v1551_v34  ;;  %v1028_v9 = vmul.f32 %v1337_v5, %v1551_v34 }
  0xec   :  { %1160 = vst [vmem:[%s1882_s4 + $0x178] sm:$0xff] %v1096_v1  ;;  %v585_v10 = vpop.f32.mrf.mxu0  ;;  %v713_v11 = vpop.f32.mrf.mxu1 }
  0xed   :  { %1126 = vst [vmem:[%s1882_s4 + $0x68] sm:$0xff] %v1062_v6  ;;  %1158 = vst [vmem:[%s1882_s4 + $0x168] sm:$0xff] %v1094_v7  ;;  %v1067_v12 = vadd.f32 %v1556_v36, %v996_v8  ;;  %v1099_v13 = vadd.f32 %v1556_v36, %v1028_v9  ;;  %v994_v14 = vmul.f32 %v1551_v34, %v585_v10 }
  0xee   :  { %v1026_v15 = vmul.f32 %v1551_v34, %v713_v11  ;;  %v1306_v16 = vpop.f32.mrf.mxu0  ;;  %v1338_v17 = vpop.f32.mrf.mxu1 }
  0xef   :  { %1131 = vst [vmem:[%s1882_s4 + $0x90] sm:$0xff] %v1067_v12  ;;  %1163 = vst [vmem:[%s1882_s4 + $0x190] sm:$0xff] %v1099_v13  ;;  %v1065_v18 = vadd.f32 %v1556_v36, %v994_v14  ;;  %v997_v20 = vmul.f32 %v1306_v16, %v1551_v34  ;;  %v1029_v21 = vmul.f32 %v1338_v17, %v1551_v34 }
  0xf0   :  { %v1097_v19 = vadd.f32 %v1556_v36, %v1026_v15  ;;  %v588_v22 = vpop.f32.mrf.mxu0  ;;  %v716_v23 = vpop.f32.mrf.mxu1 }
  0xf1   :  { %1129 = vst [vmem:[%s1882_s4 + $0x80] sm:$0xff] %v1065_v18  ;;  %v1068_v24 = vadd.f32 %v1556_v36, %v997_v20  ;;  %v1100_v25 = vadd.f32 %v1556_v36, %v1029_v21  ;;  %v995_v26 = vmul.f32 %v1551_v34, %v588_v22  ;;  %v1027_v27 = vmul.f32 %v1551_v34, %v716_v23 }
  0xf2   :  { %1161 = vst [vmem:[%s1882_s4 + $0x180] sm:$0xff] %v1097_v19  ;;  %v1309_v28 = vpop.f32.mrf.mxu0  ;;  %v1341_v29 = vpop.f32.mrf.mxu1 }
  0xf3   :  { %1132 = vst [vmem:[%s1882_s4 + $0x98] sm:$0xff] %v1068_v24  ;;  %1164 = vst [vmem:[%s1882_s4 + $0x198] sm:$0xff] %v1100_v25  ;;  %v1066_v30 = vadd.f32 %v1556_v36, %v995_v26  ;;  %v1098_v31 = vadd.f32 %v1556_v36, %v1027_v27  ;;  %v1000_v32 = vmul.f32 %v1309_v28, %v1551_v34 }
  0xf4   :  { %v1032_v33 = vmul.f32 %v1341_v29, %v1551_v34  ;;  %v601_v35 = vpop.f32.mrf.mxu0  ;;  %v729_v37 = vpop.f32.mrf.mxu1 }
  0xf5   :  { %1130 = vst [vmem:[%s1882_s4 + $0x88] sm:$0xff] %v1066_v30  ;;  %1162 = vst [vmem:[%s1882_s4 + $0x188] sm:$0xff] %v1098_v31  ;;  %v1071_v38 = vadd.f32 %v1556_v36, %v1000_v32  ;;  %v998_v40 = vmul.f32 %v1551_v34, %v601_v35  ;;  %v1030_v41 = vmul.f32 %v1551_v34, %v729_v37 }
  0xf6   :  { %v1103_v39 = vadd.f32 %v1556_v36, %v1032_v33  ;;  %v1310_v42 = vpop.f32.mrf.mxu0  ;;  %v1342_v43 = vpop.f32.mrf.mxu1 }
  0xf7   :  { %1135 = vst [vmem:[%s1882_s4 + $0xb0] sm:$0xff] %v1071_v38  ;;  %v1069_v44 = vadd.f32 %v1556_v36, %v998_v40  ;;  %v1101_v45 = vadd.f32 %v1556_v36, %v1030_v41  ;;  %v1001_v46 = vmul.f32 %v1310_v42, %v1551_v34  ;;  %v1033_v47 = vmul.f32 %v1342_v43, %v1551_v34 }
  0xf8   :  { %1167 = vst [vmem:[%s1882_s4 + $0x1b0] sm:$0xff] %v1103_v39  ;;  %v604_v48 = vpop.f32.mrf.mxu0  ;;  %v732_v49 = vpop.f32.mrf.mxu1 }
  0xf9   :  { %1133 = vst [vmem:[%s1882_s4 + $0xa0] sm:$0xff] %v1069_v44  ;;  %1165 = vst [vmem:[%s1882_s4 + $0x1a0] sm:$0xff] %v1101_v45  ;;  %v1072_v50 = vadd.f32 %v1556_v36, %v1001_v46  ;;  %v1104_v51 = vadd.f32 %v1556_v36, %v1033_v47  ;;  %v999_v52 = vmul.f32 %v1551_v34, %v604_v48 }
  0xfa   :  { %v1031_v53 = vmul.f32 %v1551_v34, %v732_v49  ;;  %v1313_v54 = vpop.f32.mrf.mxu0  ;;  %v1345_v55 = vpop.f32.mrf.mxu1 }
  0xfb   :  { %1136 = vst [vmem:[%s1882_s4 + $0xb8] sm:$0xff] %v1072_v50  ;;  %1168 = vst [vmem:[%s1882_s4 + $0x1b8] sm:$0xff] %v1104_v51  ;;  %v1070_v56 = vadd.f32 %v1556_v36, %v999_v52  ;;  %v1004_v58 = vmul.f32 %v1313_v54, %v1551_v34  ;;  %v1036_v59 = vmul.f32 %v1345_v55, %v1551_v34 }
  0xfc   :  { %v1102_v57 = vadd.f32 %v1556_v36, %v1031_v53  ;;  %v617_v60 = vpop.f32.mrf.mxu0  ;;  %v745_v61 = vpop.f32.mrf.mxu1 }
  0xfd   :  { %1134 = vst [vmem:[%s1882_s4 + $0xa8] sm:$0xff] %v1070_v56  ;;  %v1075_v62 = vadd.f32 %v1556_v36, %v1004_v58  ;;  %v1107_v63 = vadd.f32 %v1556_v36, %v1036_v59  ;;  %v1002_v0 = vmul.f32 %v1551_v34, %v617_v60  ;;  %v1034_v1 = vmul.f32 %v1551_v34, %v745_v61 }
  0xfe   :  { %1166 = vst [vmem:[%s1882_s4 + $0x1a8] sm:$0xff] %v1102_v57  ;;  %v1314_v2 = vpop.f32.mrf.mxu0  ;;  %v1346_v3 = vpop.f32.mrf.mxu1 }
  0xff   :  { %1139 = vst [vmem:[%s1882_s4 + $0xd0] sm:$0xff] %v1075_v62  ;;  %1171 = vst [vmem:[%s1882_s4 + $0x1d0] sm:$0xff] %v1107_v63  ;;  %v1073_v4 = vadd.f32 %v1556_v36, %v1002_v0  ;;  %v1105_v5 = vadd.f32 %v1556_v36, %v1034_v1  ;;  %v1005_v6 = vmul.f32 %v1314_v2, %v1551_v34 }
 0x100   :  { %v1037_v7 = vmul.f32 %v1346_v3, %v1551_v34  ;;  %v620_v8 = vpop.f32.mrf.mxu0  ;;  %v748_v9 = vpop.f32.mrf.mxu1 }
 0x101   :  { %1137 = vst [vmem:[%s1882_s4 + $0xc0] sm:$0xff] %v1073_v4  ;;  %1169 = vst [vmem:[%s1882_s4 + $0x1c0] sm:$0xff] %v1105_v5  ;;  %v1076_v10 = vadd.f32 %v1556_v36, %v1005_v6  ;;  %v1003_v12 = vmul.f32 %v1551_v34, %v620_v8  ;;  %v1035_v13 = vmul.f32 %v1551_v34, %v748_v9 }
 0x102   :  { %v1108_v11 = vadd.f32 %v1556_v36, %v1037_v7  ;;  %v1317_v14 = vpop.f32.mrf.mxu0  ;;  %v1349_v15 = vpop.f32.mrf.mxu1 }
 0x103   :  { %1140 = vst [vmem:[%s1882_s4 + $0xd8] sm:$0xff] %v1076_v10  ;;  %v1074_v16 = vadd.f32 %v1556_v36, %v1003_v12  ;;  %v1106_v17 = vadd.f32 %v1556_v36, %v1035_v13  ;;  %v1008_v18 = vmul.f32 %v1317_v14, %v1551_v34  ;;  %v1040_v19 = vmul.f32 %v1349_v15, %v1551_v34 }
 0x104   :  { %1172 = vst [vmem:[%s1882_s4 + $0x1d8] sm:$0xff] %v1108_v11  ;;  %v633_v20 = vpop.f32.mrf.mxu0  ;;  %v761_v21 = vpop.f32.mrf.mxu1 }
 0x105   :  { %1138 = vst [vmem:[%s1882_s4 + $0xc8] sm:$0xff] %v1074_v16  ;;  %1170 = vst [vmem:[%s1882_s4 + $0x1c8] sm:$0xff] %v1106_v17  ;;  %v1079_v22 = vadd.f32 %v1556_v36, %v1008_v18  ;;  %v1111_v23 = vadd.f32 %v1556_v36, %v1040_v19  ;;  %v1006_v24 = vmul.f32 %v1551_v34, %v633_v20 }
 0x106   :  { %v1038_v25 = vmul.f32 %v1551_v34, %v761_v21  ;;  %v1318_v26 = vpop.f32.mrf.mxu0  ;;  %v1350_v27 = vpop.f32.mrf.mxu1 }
 0x107   :  { %1143 = vst [vmem:[%s1882_s4 + $0xf0] sm:$0xff] %v1079_v22  ;;  %1175 = vst [vmem:[%s1882_s4 + $0x1f0] sm:$0xff] %v1111_v23  ;;  %v1077_v28 = vadd.f32 %v1556_v36, %v1006_v24  ;;  %v1009_v30 = vmul.f32 %v1318_v26, %v1551_v34  ;;  %v1041_v31 = vmul.f32 %v1350_v27, %v1551_v34 }
 0x108   :  { %v1109_v29 = vadd.f32 %v1556_v36, %v1038_v25  ;;  %v636_v32 = vpop.f32.mrf.mxu0  ;;  %v764_v33 = vpop.f32.mrf.mxu1 }
 0x109   :  { %1141 = vst [vmem:[%s1882_s4 + $0xe0] sm:$0xff] %v1077_v28  ;;  %v1080_v35 = vadd.f32 %v1556_v36, %v1009_v30  ;;  %v1112_v37 = vadd.f32 %v1556_v36, %v1041_v31  ;;  %v1007_v38 = vmul.f32 %v1551_v34, %v636_v32  ;;  %v1039_v39 = vmul.f32 %v1551_v34, %v764_v33 }
 0x10a   :  { %1173 = vst [vmem:[%s1882_s4 + $0x1e0] sm:$0xff] %v1109_v29 }
 0x10b   :  { %1144 = vst [vmem:[%s1882_s4 + $0xf8] sm:$0xff] %v1080_v35  ;;  %1176 = vst [vmem:[%s1882_s4 + $0x1f8] sm:$0xff] %v1112_v37  ;;  %v1078_v40 = vadd.f32 %v1556_v36, %v1007_v38  ;;  %v1110_v41 = vadd.f32 %v1556_v36, %v1039_v39 }
 0x10d   :  { %1142 = vst [vmem:[%s1882_s4 + $0xe8] sm:$0xff] %v1078_v40  ;;  %1174 = vst [vmem:[%s1882_s4 + $0x1e8] sm:$0xff] %v1110_v41 }

// kernel: unet_forward.34
= control target key start
LH: loop header
LB: loop body
LE: loop exit
PB: predicated region body
PF: predicated region fallthrough
CT: control target
= control target key end

     0   :  { %v4069_v0 = vmov 0   ;;  %vm1430_vm0 = vcmask 523264   ;;  %s5357_s1 = inlined_call_operand.vmem [shape: bf16[576,128], index: 1, kind: input, shape index: {}]   ;;  %s5358_s0 = inlined_call_operand.vmem [shape: bf16[512,576], index: 0, kind: input, shape index: {}]   ;;  %s5359_s2 = inlined_call_operand.vmem [shape: f32[1,128], index: 2, kind: input, shape index: {}]   ;;  %s5360_s3 = inlined_call_operand.vmem [shape: f32[1,128], index: 3, kind: input, shape index: {}]   ;;  %s5361_s4 = inlined_call_operand.vmem [shape: bf16[512,128], index: 4, kind: output, shape index: {}]  }
   0x1   :  { %1527 = vmatprep.subr.bf16.mxu0 %v4069_v0  ;;  %3776 = vmatprep.subr.bf16.mxu1 %v4069_v0  ;;  %v3809_v1 = vld [vmem:[%s5357_s1 + $0x38] sm:$0xff]   ;;  %v3810_v2 = vld [vmem:[%s5357_s1 + $0x30] sm:$0xff]   ;;  %v3811_v3 = vld [vmem:[%s5357_s1 + $0x28] sm:$0xff]  }
   0x2   :  { %1528 = vmatpush1.bf16.msra.mxu0 %v3809_v1  ;;  %3792 = vmatpush1.bf16.msra.mxu1 %v3809_v1  ;;  %v3812_v4 = vld [vmem:[%s5357_s1 + $0x20] sm:$0xff]   ;;  %v3813_v5 = vld [vmem:[%s5357_s1 + $0x18] sm:$0xff]   ;;  %v3814_v7 = vld [vmem:[%s5357_s1 + $0x10] sm:$0xff]  }
   0x3   :  { %1529 = vmatprep.subr.bf16.mxu0 %v4069_v0  ;;  %3777 = vmatprep.subr.bf16.mxu1 %v4069_v0  ;;  %v3827_v6 = vld [vmem:[%s5358_s0 + $0x4] ss:$20 sps:$4 sm:$0xff]   ;;  %v3815_v9 = vld [vmem:[%s5357_s1 + $0x8] sm:$0xff]   ;;  %v3818_v12 = vld [vmem:[%s5357_s1 + $0x70] sm:$0xff]  }
   0x4   :  { %v3830_v8 = vld [vmem:[%s5358_s0 + $0x3c4] ss:$20 sps:$4 sm:$0xff]   ;;  %1559 = vmatprep.mubr.bf16.mxu0 %v3827_v6  ;;  %v3819_v13 = vld [vmem:[%s5357_s1 + $0x68] sm:$0xff]   ;;  %v3822_v16 = vld [vmem:[%s5357_s1 + $0x50] sm:$0xff]  }
   0x5   :  { %1751 = vmatprep.mubr.bf16.mxu1 %v3830_v8  ;;  %v3816_v10 = vld [vmem:[%s5357_s1] sm:$0xff]   ;;  %v3817_v11 = vld [vmem:[%s5357_s1 + $0x78] sm:$0xff]   ;;  %v3823_v17 = vld [vmem:[%s5357_s1 + $0x48] sm:$0xff]  }
   0x6   :  { %1530 = vmatpush1.bf16.msra.mxu0 %v3810_v2  ;;  %3793 = vmatpush1.bf16.msra.mxu1 %v3810_v2  ;;  %v3820_v14 = vld [vmem:[%s5357_s1 + $0x60] sm:$0xff]   ;;  %v3821_v15 = vld [vmem:[%s5357_s1 + $0x58] sm:$0xff]   ;;  %v3880_v25 = vld [vmem:[%s5357_s1 + $0x110] sm:$0xff]  }
   0x7   :  { %1531 = vmatprep.subr.bf16.mxu0 %v4069_v0  ;;  %3778 = vmatprep.subr.bf16.mxu1 %v4069_v0  ;;  %v3824_v18 = vld [vmem:[%s5357_s1 + $0x40] sm:$0xff]   ;;  %v3831_v19 = vld [vmem:[%s5357_s1 + $0x118] sm:$0xff]   ;;  %v3833_v26 = vld [vmem:[%s5357_s1 + $0xb0] sm:$0xff]  }
   0x8   :  { %v3825_v20 = vld [vmem:[%s5358_s0] ss:$20 sps:$4 sm:$0xff]   ;;  %v3832_v22 = vld [vmem:[%s5357_s1 + $0xb8] sm:$0xff]   ;;  %v3840_v29 = vld [vmem:[%s5357_s1 + $0xa8] sm:$0xff]  }
   0x9   :  { %v3828_v21 = vld [vmem:[%s5358_s0 + $0x3c0] ss:$20 sps:$4 sm:$0xff]   ;;  %v3838_v27 = vld [vmem:[%s5358_s0 + $0x28] ss:$20 sps:$4 sm:$0xff]   ;;  %v3846_v34 = vld [vmem:[%s5358_s0 + $0x50] ss:$20 sps:$4 sm:$0xff]  }
   0xa   :  { %1532 = vmatpush1.bf16.msra.mxu0 %v3811_v3  ;;  %3794 = vmatpush1.bf16.msra.mxu1 %v3811_v3  ;;  %v3834_v23 = vld [vmem:[%s5358_s0 + $0x2c] ss:$20 sps:$4 sm:$0xff]   ;;  %v3839_v28 = vld [vmem:[%s5358_s0 + $0x3e8] ss:$20 sps:$4 sm:$0xff]   ;;  %v3847_v35 = vld [vmem:[%s5358_s0 + $0x410] ss:$20 sps:$4 sm:$0xff]  }
   0xb   :  { %1533 = vmatprep.subr.bf16.mxu0 %v4069_v0  ;;  %3779 = vmatprep.subr.bf16.mxu1 %v4069_v0  ;;  %v3836_v24 = vld [vmem:[%s5358_s0 + $0x3ec] ss:$20 sps:$4 sm:$0xff]   ;;  %v3842_v31 = vld [vmem:[%s5358_s0 + $0x54] ss:$20 sps:$4 sm:$0xff]   ;;  %v3848_v36 = vld [vmem:[%s5357_s1 + $0x98] sm:$0xff]  }
   0xc   :  { %v3921_v30 = vld [vmem:[%s5357_s1 + $0x108] sm:$0xff]   ;;  %v3841_v33 = vld [vmem:[%s5357_s1 + $0xa0] sm:$0xff]   ;;  %v3850_v37 = vld [vmem:[%s5358_s0 + $0x7c] ss:$20 sps:$4 sm:$0xff]  }
   0xd   :  { %v3844_v32 = vld [vmem:[%s5358_s0 + $0x414] ss:$20 sps:$4 sm:$0xff]   ;;  %v3852_v38 = vld [vmem:[%s5358_s0 + $0x43c] ss:$20 sps:$4 sm:$0xff]   ;;  %v3854_v40 = vld [vmem:[%s5358_s0 + $0x78] ss:$20 sps:$4 sm:$0xff]  }
   0xe   :  { %1534 = vmatpush1.bf16.msra.mxu0 %v3812_v4  ;;  %3795 = vmatpush1.bf16.msra.mxu1 %v3812_v4  ;;  %v3849_v39 = vld [vmem:[%s5357_s1 + $0x90] sm:$0xff]   ;;  %v3855_v41 = vld [vmem:[%s5358_s0 + $0x438] ss:$20 sps:$4 sm:$0xff]   ;;  %v3958_v44 = vld [vmem:[%s5357_s1 + $0x100] sm:$0xff]  }
   0xf   :  { %1535 = vmatprep.subr.bf16.mxu0 %v4069_v0  ;;  %3780 = vmatprep.subr.bf16.mxu1 %v4069_v0  ;;  %v3856_v42 = vld [vmem:[%s5357_s1 + $0x88] sm:$0xff]   ;;  %v3858_v43 = vld [vmem:[%s5358_s0 + $0xa4] ss:$20 sps:$4 sm:$0xff]   ;;  %v3862_v47 = vld [vmem:[%s5358_s0 + $0xa0] ss:$20 sps:$4 sm:$0xff]  }
  0x10   :  { %v3860_v45 = vld [vmem:[%s5358_s0 + $0x464] ss:$20 sps:$4 sm:$0xff]   ;;  %v3863_v48 = vld [vmem:[%s5358_s0 + $0x460] ss:$20 sps:$4 sm:$0xff]   ;;  %v3870_v53 = vld [vmem:[%s5358_s0 + $0xc8] ss:$20 sps:$4 sm:$0xff]  }
  0x11   :  { %v3857_v46 = vld [vmem:[%s5357_s1 + $0x80] sm:$0xff]   ;;  %v3864_v49 = vld [vmem:[%s5357_s1 + $0xf8] sm:$0xff]   ;;  %v3865_v52 = vld [vmem:[%s5357_s1 + $0xf0] sm:$0xff]  }
  0x12   :  { %1536 = vmatpush1.bf16.msra.mxu0 %v3813_v5  ;;  %3796 = vmatpush1.bf16.msra.mxu1 %v3813_v5  ;;  %v3866_v50 = vld [vmem:[%s5358_s0 + $0xcc] ss:$20 sps:$4 sm:$0xff]   ;;  %v3871_v54 = vld [vmem:[%s5358_s0 + $0x488] ss:$20 sps:$4 sm:$0xff]   ;;  %v3878_v59 = vld [vmem:[%s5358_s0 + $0xf0] ss:$20 sps:$4 sm:$0xff]  }
  0x13   :  { %1537 = vmatprep.subr.bf16.mxu0 %v4069_v0  ;;  %3781 = vmatprep.subr.bf16.mxu1 %v4069_v0  ;;  %v3868_v51 = vld [vmem:[%s5358_s0 + $0x48c] ss:$20 sps:$4 sm:$0xff]   ;;  %v3874_v56 = vld [vmem:[%s5358_s0 + $0xf4] ss:$20 sps:$4 sm:$0xff]   ;;  %v3879_v60 = vld [vmem:[%s5358_s0 + $0x4b0] ss:$20 sps:$4 sm:$0xff]  }
  0x14   :  { %v3872_v55 = vld [vmem:[%s5357_s1 + $0xe8] sm:$0xff]   ;;  %v3873_v58 = vld [vmem:[%s5357_s1 + $0xe0] sm:$0xff]   ;;  %v3881_v61 = vld [vmem:[%s5357_s1 + $0xd8] sm:$0xff]  }
  0x15   :  { %v3876_v57 = vld [vmem:[%s5358_s0 + $0x4b4] ss:$20 sps:$4 sm:$0xff]   ;;  %v3883_v62 = vld [vmem:[%s5358_s0 + $0x11c] ss:$20 sps:$4 sm:$0xff]   ;;  %v3887_v2 = vld [vmem:[%s5358_s0 + $0x118] ss:$20 sps:$4 sm:$0xff]  }
  0x16   :  { %1538 = vmatpush1.bf16.msra.mxu0 %v3814_v7  ;;  %3797 = vmatpush1.bf16.msra.mxu1 %v3814_v7  ;;  %v3885_v63 = vld [vmem:[%s5358_s0 + $0x4dc] ss:$20 sps:$4 sm:$0xff]   ;;  %v3888_v3 = vld [vmem:[%s5358_s0 + $0x4d8] ss:$20 sps:$4 sm:$0xff]   ;;  %v3890_v7 = vld [vmem:[%s5357_s1 + $0xc0] sm:$0xff]  }
  0x17   :  { %1539 = vmatprep.subr.bf16.mxu0 %v4069_v0  ;;  %3782 = vmatprep.subr.bf16.mxu1 %v4069_v0  ;;  %v3882_v1 = vld [vmem:[%s5357_s1 + $0xd0] sm:$0xff]   ;;  %v3889_v4 = vld [vmem:[%s5357_s1 + $0xc8] sm:$0xff]   ;;  %v3891_v5 = vld [vmem:[%s5358_s0 + $0x144] ss:$20 sps:$4 sm:$0xff]  }
  0x18   :  { %v3895_v6 = vld [vmem:[%s5358_s0 + $0xc] ss:$20 sps:$4 sm:$0xff]   ;;  %v3893_v8 = vld [vmem:[%s5358_s0 + $0x8] ss:$20 sps:$4 sm:$0xff]  }
  0x1a   :  { %1540 = vmatpush1.bf16.msra.mxu0 %v3815_v9  ;;  %3798 = vmatpush1.bf16.msra.mxu1 %v3815_v9  ;;  %v3896_v9 = vld [vmem:[%s5358_s0 + $0x140] ss:$20 sps:$4 sm:$0xff]  }
  0x1b   :  { %1541 = vmatprep.subr.bf16.mxu0 %v4069_v0  ;;  %3783 = vmatprep.subr.bf16.mxu1 %v4069_v0 }
  0x1e   :  { %1542 = vmatpush1.bf16.msra.mxu0 %v3816_v10  ;;  %3799 = vmatpush1.bf16.msra.mxu1 %v3816_v10  ;;  %v3897_v10 = vld [vmem:[%s5358_s0 + $0x16c] ss:$20 sps:$4 sm:$0xff]  }
  0x1f   :  { %1543 = vmatprep.subr.bf16.mxu0 %v4069_v0  ;;  %3784 = vmatprep.subr.bf16.mxu1 %v4069_v0 }
  0x22   :  { %1544 = vmatpush2.bf16.msra.mxu0 %v3817_v11  ;;  %3800 = vmatpush2.bf16.msra.mxu1 %v3817_v11  ;;  %v3899_v11 = vld [vmem:[%s5358_s0 + $0x34] ss:$20 sps:$4 sm:$0xff]  }
  0x23   :  { %1545 = vmatprep.subr.bf16.mxu0 %v4069_v0  ;;  %3785 = vmatprep.subr.bf16.mxu1 %v4069_v0 }
  0x26   :  { %1546 = vmatpush2.bf16.msra.mxu0 %v3818_v12  ;;  %3801 = vmatpush2.bf16.msra.mxu1 %v3818_v12  ;;  %v3902_v12 = vld [vmem:[%s5358_s0 + $0x30] ss:$20 sps:$4 sm:$0xff]  }
  0x27   :  { %1547 = vmatprep.subr.bf16.mxu0 %v4069_v0  ;;  %3786 = vmatprep.subr.bf16.mxu1 %v4069_v0 }
  0x2a   :  { %1548 = vmatpush2.bf16.msra.mxu0 %v3819_v13  ;;  %3802 = vmatpush2.bf16.msra.mxu1 %v3819_v13  ;;  %v3903_v13 = vld [vmem:[%s5358_s0 + $0x194] ss:$20 sps:$4 sm:$0xff]  }
  0x2b   :  { %1549 = vmatprep.subr.bf16.mxu0 %v4069_v0  ;;  %3787 = vmatprep.subr.bf16.mxu1 %v4069_v0 }
  0x2e   :  { %1550 = vmatpush2.bf16.msra.mxu0 %v3820_v14  ;;  %3803 = vmatpush2.bf16.msra.mxu1 %v3820_v14  ;;  %v3905_v14 = vld [vmem:[%s5358_s0 + $0x5c] ss:$20 sps:$4 sm:$0xff]  }
  0x2f   :  { %1551 = vmatprep.subr.bf16.mxu0 %v4069_v0  ;;  %3788 = vmatprep.subr.bf16.mxu1 %v4069_v0 }
  0x32   :  { %1552 = vmatpush2.bf16.msra.mxu0 %v3821_v15  ;;  %3804 = vmatpush2.bf16.msra.mxu1 %v3821_v15  ;;  %v3907_v15 = vld [vmem:[%s5358_s0 + $0x190] ss:$20 sps:$4 sm:$0xff]  }
  0x33   :  { %1553 = vmatprep.subr.bf16.mxu0 %v4069_v0  ;;  %3789 = vmatprep.subr.bf16.mxu1 %v4069_v0 }
  0x36   :  { %1554 = vmatpush2.bf16.msra.mxu0 %v3822_v16  ;;  %3805 = vmatpush2.bf16.msra.mxu1 %v3822_v16  ;;  %v3908_v16 = vld [vmem:[%s5358_s0 + $0x58] ss:$20 sps:$4 sm:$0xff]  }
  0x37   :  { %1555 = vmatprep.subr.bf16.mxu0 %v4069_v0  ;;  %3790 = vmatprep.subr.bf16.mxu1 %v4069_v0 }
  0x3a   :  { %1556 = vmatpush2.bf16.msra.mxu0 %v3823_v17  ;;  %3806 = vmatpush2.bf16.msra.mxu1 %v3823_v17  ;;  %v3909_v17 = vld [vmem:[%s5358_s0 + $0x1bc] ss:$20 sps:$4 sm:$0xff]  }
  0x3b   :  { %1557 = vmatprep.subr.bf16.mxu0 %v4069_v0  ;;  %3791 = vmatprep.subr.bf16.mxu1 %v4069_v0 }
  0x3e   :  { %1558 = vmatpush2.bf16.msra.mxu0 %v3824_v18  ;;  %3807 = vmatpush2.bf16.msra.mxu1 %v3824_v18  ;;  %v3911_v18 = vld [vmem:[%s5358_s0 + $0x84] ss:$20 sps:$4 sm:$0xff]  }
  0x3f   :  { %1816 = vmatprep.subr.bf16.mxu1 %v4069_v0  ;;  %3704 = vmatprep.subr.bf16.mxu0 %v3831_v19 }
  0x41   :  { %1560 = vmatmul.mubr.bf16.vlgmr.msra.gmra.mxu0 %v3825_v20  ;;  %1752 = vmatmul.mubr.bf16.vlgmr.msra.gmra.mxu1 %v3828_v21  ;;  %v3914_v20 = vld [vmem:[%s5358_s0 + $0x80] ss:$20 sps:$4 sm:$0xff]   ;;  %v3915_v21 = vld [vmem:[%s5358_s0 + $0x1e4] ss:$20 sps:$4 sm:$0xff]  }
  0x42   :  { %1817 = vmatpush1.bf16.msra.mxu1 %v3832_v22  ;;  %3705 = vmatpush3.bf16.msra.mxu0 %v3831_v19  ;;  %v3913_v19 = vld [vmem:[%s5358_s0 + $0x1b8] ss:$20 sps:$4 sm:$0xff]  }
  0x43   :  { %1818 = vmatprep.subr.bf16.mxu1 %v4069_v0  ;;  %1567 = vmatprep.mubr.bf16.mxu0 %v3834_v23  ;;  %v3917_v22 = vld [vmem:[%s5358_s0 + $0xac] ss:$20 sps:$4 sm:$0xff]  }
  0x44   :  { %1759 = vmatprep.mubr.bf16.mxu1 %v3836_v24  ;;  %3706 = vmatprep.subr.bf16.mxu0 %v3880_v25  ;;  %v3919_v23 = vld [vmem:[%s5358_s0 + $0x1e0] ss:$20 sps:$4 sm:$0xff]   ;;  %v3920_v24 = vld [vmem:[%s5358_s0 + $0xa8] ss:$20 sps:$4 sm:$0xff]  }
  0x46   :  { %1819 = vmatpush1.bf16.msra.mxu1 %v3833_v26  ;;  %3707 = vmatpush3.bf16.msra.mxu0 %v3880_v25  ;;  %v3922_v25 = vld [vmem:[%s5358_s0 + $0x20c] ss:$20 sps:$4 sm:$0xff]   ;;  %v3924_v26 = vld [vmem:[%s5358_s0 + $0xd4] ss:$20 sps:$4 sm:$0xff]  }
  0x47   :  { %1820 = vmatprep.subr.bf16.mxu1 %v4069_v0  ;;  %3708 = vmatprep.subr.bf16.mxu0 %v3921_v30 }
  0x49   :  { %1568 = vmatmul.mubr.bf16.gmra.mxu0 %v3838_v27  ;;  %1760 = vmatmul.mubr.bf16.gmra.mxu1 %v3839_v28  ;;  %v3926_v27 = vld [vmem:[%s5358_s0 + $0x208] ss:$20 sps:$4 sm:$0xff]   ;;  %v3927_v28 = vld [vmem:[%s5358_s0 + $0xd0] ss:$20 sps:$4 sm:$0xff]  }
  0x4a   :  { %1821 = vmatpush1.bf16.msra.mxu1 %v3840_v29  ;;  %1575 = vmatprep.mubr.bf16.mxu0 %v3842_v31  ;;  %v3928_v29 = vld [vmem:[%s5358_s0 + $0x234] ss:$20 sps:$4 sm:$0xff]   ;;  %v3932_v31 = vld [vmem:[%s5358_s0 + $0x230] ss:$20 sps:$4 sm:$0xff]  }
  0x4b   :  { %1822 = vmatprep.subr.bf16.mxu1 %v4069_v0  ;;  %1767 = vmatprep.mubr.bf16.mxu1 %v3844_v32  ;;  %v3933_v32 = vld [vmem:[%s5358_s0 + $0xf8] ss:$20 sps:$4 sm:$0xff]  }
  0x4c   :  { %3709 = vmatpush3.bf16.msra.mxu0 %v3921_v30  ;;  %v3930_v30 = vld [vmem:[%s5358_s0 + $0xfc] ss:$20 sps:$4 sm:$0xff]  }
  0x4d   :  { %3710 = vmatprep.subr.bf16.mxu0 %v3958_v44 }
  0x4e   :  { %1823 = vmatpush1.bf16.msra.mxu1 %v3841_v33  ;;  %v3934_v33 = vld [vmem:[%s5358_s0 + $0x25c] ss:$20 sps:$4 sm:$0xff]  }
  0x4f   :  { %1824 = vmatprep.subr.bf16.mxu1 %v4069_v0 }
  0x50   :  { %3711 = vmatpush3.bf16.msra.mxu0 %v3958_v44  ;;  %v3951_v44 = vld [vmem:[%s5358_s0 + $0x170] ss:$20 sps:$4 sm:$0xff]  }
  0x51   :  { %1576 = vmatmul.mubr.bf16.gmra.mxu0 %v3846_v34  ;;  %1768 = vmatmul.mubr.bf16.gmra.mxu1 %v3847_v35  ;;  %v3936_v34 = vld [vmem:[%s5358_s0 + $0x124] ss:$20 sps:$4 sm:$0xff]  }
  0x52   :  { %1825 = vmatpush1.bf16.msra.mxu1 %v3848_v36  ;;  %1583 = vmatprep.mubr.bf16.mxu0 %v3850_v37  ;;  %v3938_v35 = vld [vmem:[%s5358_s0 + $0x258] ss:$20 sps:$4 sm:$0xff]   ;;  %v3939_v36 = vld [vmem:[%s5358_s0 + $0x120] ss:$20 sps:$4 sm:$0xff]  }
  0x53   :  { %1826 = vmatprep.subr.bf16.mxu1 %v4069_v0  ;;  %1775 = vmatprep.mubr.bf16.mxu1 %v3852_v38  ;;  %v3940_v37 = vld [vmem:[%s5358_s0 + $0x284] ss:$20 sps:$4 sm:$0xff]   ;;  %v3942_v38 = vld [vmem:[%s5358_s0 + $0x14c] ss:$20 sps:$4 sm:$0xff]  }
  0x56   :  { %1827 = vmatpush1.bf16.msra.mxu1 %v3849_v39  ;;  %v3944_v39 = vld [vmem:[%s5358_s0 + $0x280] ss:$20 sps:$4 sm:$0xff]  }
  0x57   :  { %1828 = vmatprep.subr.bf16.mxu1 %v4069_v0 }
  0x59   :  { %1584 = vmatmul.mubr.bf16.gmra.mxu0 %v3854_v40  ;;  %1776 = vmatmul.mubr.bf16.gmra.mxu1 %v3855_v41  ;;  %v3945_v40 = vld [vmem:[%s5358_s0 + $0x148] ss:$20 sps:$4 sm:$0xff]   ;;  %v3946_v41 = vld [vmem:[%s5358_s0 + $0x2ac] ss:$20 sps:$4 sm:$0xff]  }
  0x5a   :  { %1829 = vmatpush1.bf16.msra.mxu1 %v3856_v42  ;;  %1591 = vmatprep.mubr.bf16.mxu0 %v3858_v43  ;;  %v3948_v42 = vld [vmem:[%s5358_s0 + $0x174] ss:$20 sps:$4 sm:$0xff]  }
  0x5b   :  { %1830 = vmatprep.subr.bf16.mxu1 %v4069_v0  ;;  %1783 = vmatprep.mubr.bf16.mxu1 %v3860_v45  ;;  %v3950_v43 = vld [vmem:[%s5358_s0 + $0x2a8] ss:$20 sps:$4 sm:$0xff]  }
  0x5c   :  { %v3952_v45 = vld [vmem:[%s5358_s0 + $0x2d4] ss:$20 sps:$4 sm:$0xff]  }
  0x5e   :  { %1831 = vmatpush1.bf16.msra.mxu1 %v3857_v46  ;;  %v3954_v46 = vld [vmem:[%s5358_s0 + $0x19c] ss:$20 sps:$4 sm:$0xff]  }
  0x5f   :  { %1832 = vmatprep.subr.bf16.mxu1 %v4069_v0 }
  0x61   :  { %1592 = vmatmul.mubr.bf16.gmra.mxu0 %v3862_v47  ;;  %1784 = vmatmul.mubr.bf16.gmra.mxu1 %v3863_v48  ;;  %v3956_v47 = vld [vmem:[%s5358_s0 + $0x2d0] ss:$20 sps:$4 sm:$0xff]   ;;  %v3957_v48 = vld [vmem:[%s5358_s0 + $0x198] ss:$20 sps:$4 sm:$0xff]  }
  0x62   :  { %1833 = vmatpush2.bf16.msra.mxu1 %v3864_v49  ;;  %1599 = vmatprep.mubr.bf16.mxu0 %v3866_v50  ;;  %v3959_v49 = vld [vmem:[%s5358_s0 + $0x2fc] ss:$20 sps:$4 sm:$0xff]   ;;  %v3961_v50 = vld [vmem:[%s5358_s0 + $0x1c4] ss:$20 sps:$4 sm:$0xff]  }
  0x63   :  { %1834 = vmatprep.subr.bf16.mxu1 %v4069_v0  ;;  %1791 = vmatprep.mubr.bf16.mxu1 %v3868_v51  ;;  %v3963_v51 = vld [vmem:[%s5358_s0 + $0x2f8] ss:$20 sps:$4 sm:$0xff]  }
  0x66   :  { %1835 = vmatpush2.bf16.msra.mxu1 %v3865_v52  ;;  %v3964_v52 = vld [vmem:[%s5358_s0 + $0x1c0] ss:$20 sps:$4 sm:$0xff]  }
  0x67   :  { %1836 = vmatprep.subr.bf16.mxu1 %v4069_v0 }
  0x69   :  { %1600 = vmatmul.mubr.bf16.gmra.mxu0 %v3870_v53  ;;  %1792 = vmatmul.mubr.bf16.gmra.mxu1 %v3871_v54  ;;  %v3965_v53 = vld [vmem:[%s5358_s0 + $0x324] ss:$20 sps:$4 sm:$0xff]   ;;  %v3967_v54 = vld [vmem:[%s5358_s0 + $0x1ec] ss:$20 sps:$4 sm:$0xff]  }
  0x6a   :  { %1837 = vmatpush2.bf16.msra.mxu1 %v3872_v55  ;;  %1607 = vmatprep.mubr.bf16.mxu0 %v3874_v56  ;;  %v3969_v55 = vld [vmem:[%s5358_s0 + $0x320] ss:$20 sps:$4 sm:$0xff]   ;;  %v3970_v56 = vld [vmem:[%s5358_s0 + $0x1e8] ss:$20 sps:$4 sm:$0xff]  }
  0x6b   :  { %1838 = vmatprep.subr.bf16.mxu1 %v4069_v0  ;;  %1799 = vmatprep.mubr.bf16.mxu1 %v3876_v57  ;;  %v3971_v57 = vld [vmem:[%s5358_s0 + $0x34c] ss:$20 sps:$4 sm:$0xff]  }
  0x6e   :  { %1839 = vmatpush2.bf16.msra.mxu1 %v3873_v58  ;;  %v3973_v58 = vld [vmem:[%s5358_s0 + $0x214] ss:$20 sps:$4 sm:$0xff]  }
  0x6f   :  { %1840 = vmatprep.subr.bf16.mxu1 %v4069_v0 }
  0x71   :  { %1608 = vmatmul.mubr.bf16.gmra.mxu0 %v3878_v59  ;;  %1800 = vmatmul.mubr.bf16.gmra.mxu1 %v3879_v60  ;;  %v3975_v59 = vld [vmem:[%s5358_s0 + $0x348] ss:$20 sps:$4 sm:$0xff]   ;;  %v3976_v60 = vld [vmem:[%s5358_s0 + $0x210] ss:$20 sps:$4 sm:$0xff]  }
  0x72   :  { %1841 = vmatpush2.bf16.msra.mxu1 %v3881_v61  ;;  %1615 = vmatprep.mubr.bf16.mxu0 %v3883_v62  ;;  %v3977_v61 = vld [vmem:[%s5358_s0 + $0x374] ss:$20 sps:$4 sm:$0xff]   ;;  %v3979_v62 = vld [vmem:[%s5358_s0 + $0x23c] ss:$20 sps:$4 sm:$0xff]  }
  0x73   :  { %1842 = vmatprep.subr.bf16.mxu1 %v4069_v0  ;;  %1807 = vmatprep.mubr.bf16.mxu1 %v3885_v63  ;;  %v3981_v63 = vld [vmem:[%s5358_s0 + $0x370] ss:$20 sps:$4 sm:$0xff]  }
  0x76   :  { %1843 = vmatpush2.bf16.msra.mxu1 %v3882_v1  ;;  %v3982_v1 = vld [vmem:[%s5358_s0 + $0x238] ss:$20 sps:$4 sm:$0xff]  }
  0x77   :  { %1844 = vmatprep.subr.bf16.mxu1 %v4069_v0 }
  0x79   :  { %1616 = vmatmul.mubr.bf16.gmra.mxu0 %v3887_v2  ;;  %1808 = vmatmul.mubr.bf16.gmra.mxu1 %v3888_v3  ;;  %v3983_v2 = vld [vmem:[%s5358_s0 + $0x39c] ss:$20 sps:$4 sm:$0xff]   ;;  %v3985_v3 = vld [vmem:[%s5358_s0 + $0x264] ss:$20 sps:$4 sm:$0xff]  }
  0x7a   :  { %1845 = vmatpush2.bf16.msra.mxu1 %v3889_v4  ;;  %1623 = vmatprep.mubr.bf16.mxu0 %v3891_v5  ;;  %v3987_v4 = vld [vmem:[%s5358_s0 + $0x398] ss:$20 sps:$4 sm:$0xff]   ;;  %v3988_v5 = vld [vmem:[%s5358_s0 + $0x260] ss:$20 sps:$4 sm:$0xff]  }
  0x7b   :  { %1846 = vmatprep.subr.bf16.mxu1 %v4069_v0  ;;  %1848 = vmatprep.mubr.bf16.mxu1 %v3895_v6  ;;  %v3901_v0 = vld [vmem:[%s5358_s0 + $0x168] ss:$20 sps:$4 sm:$0xff]   ;;  %v3989_v6 = vld [vmem:[%s5358_s0 + $0x28c] ss:$20 sps:$4 sm:$0xff]  }
  0x7e   :  { %1847 = vmatpush2.bf16.msra.mxu1 %v3890_v7  ;;  %v3991_v7 = vld [vmem:[%s5358_s0 + $0x10] ss:$20 sps:$4 sm:$0xff]  }
  0x81   :  { %1624 = vmatmul.mubr.bf16.gmra.mxu0 %v3896_v9  ;;  %1849 = vmatmul.mubr.bf16.vlgmr.msra.gmra.mxu1 %v3893_v8  ;;  %v3992_v8 = vld [vmem:[%s5358_s0 + $0x288] ss:$20 sps:$4 sm:$0xff]   ;;  %v3993_v9 = vld [vmem:[%s5358_s0 + $0x38] ss:$20 sps:$4 sm:$0xff]  }
  0x82   :  { %1631 = vmatprep.mubr.bf16.mxu0 %v3897_v10  ;;  %1856 = vmatprep.mubr.bf16.mxu1 %v3899_v11  ;;  %v3994_v10 = vld [vmem:[%s5358_s0 + $0x2b4] ss:$20 sps:$4 sm:$0xff]  }
  0x83   :  { %v3996_v11 = vld [vmem:[%s5358_s0 + $0x60] ss:$20 sps:$4 sm:$0xff]  }
  0x89   :  { %1632 = vmatmul.mubr.bf16.gmra.mxu0 %v3901_v0  ;;  %1857 = vmatmul.mubr.bf16.gmra.mxu1 %v3902_v12 }
  0x8a   :  { %1639 = vmatprep.mubr.bf16.mxu0 %v3903_v13  ;;  %1864 = vmatprep.mubr.bf16.mxu1 %v3905_v14 }
  0x91   :  { %1640 = vmatmul.mubr.bf16.gmra.mxu0 %v3907_v15  ;;  %1865 = vmatmul.mubr.bf16.gmra.mxu1 %v3908_v16 }
  0x92   :  { %1647 = vmatprep.mubr.bf16.mxu0 %v3909_v17  ;;  %1872 = vmatprep.mubr.bf16.mxu1 %v3911_v18  ;;  %v3997_v17 = vld [vmem:[%s5358_s0 + $0x2b0] ss:$20 sps:$4 sm:$0xff]   ;;  %v3998_v18 = vld [vmem:[%s5358_s0 + $0x88] ss:$20 sps:$4 sm:$0xff]  }
  0x99   :  { %1648 = vmatmul.mubr.bf16.gmra.mxu0 %v3913_v19  ;;  %1873 = vmatmul.mubr.bf16.gmra.mxu1 %v3914_v20  ;;  %v3999_v19 = vld [vmem:[%s5358_s0 + $0x2dc] ss:$20 sps:$4 sm:$0xff]  }
  0x9a   :  { %1655 = vmatprep.mubr.bf16.mxu0 %v3915_v21  ;;  %1880 = vmatprep.mubr.bf16.mxu1 %v3917_v22  ;;  %v4001_v20 = vld [vmem:[%s5358_s0 + $0xb0] ss:$20 sps:$4 sm:$0xff]  }
  0xa1   :  { %1656 = vmatmul.mubr.bf16.gmra.mxu0 %v3919_v23  ;;  %1881 = vmatmul.mubr.bf16.gmra.mxu1 %v3920_v24 }
  0xa2   :  { %1663 = vmatprep.mubr.bf16.mxu0 %v3922_v25  ;;  %1888 = vmatprep.mubr.bf16.mxu1 %v3924_v26 }
  0xa9   :  { %1664 = vmatmul.mubr.bf16.gmra.mxu0 %v3926_v27  ;;  %1889 = vmatmul.mubr.bf16.gmra.mxu1 %v3927_v28 }
  0xaa   :  { %1671 = vmatprep.mubr.bf16.mxu0 %v3928_v29  ;;  %1896 = vmatprep.mubr.bf16.mxu1 %v3930_v30  ;;  %v4002_v29 = vld [vmem:[%s5358_s0 + $0x2d8] ss:$20 sps:$4 sm:$0xff]  }
  0xab   :  { %v4003_v30 = vld [vmem:[%s5358_s0 + $0xd8] ss:$20 sps:$4 sm:$0xff]  }
  0xb1   :  { %1672 = vmatmul.mubr.bf16.gmra.mxu0 %v3932_v31  ;;  %1897 = vmatmul.mubr.bf16.gmra.mxu1 %v3933_v32  ;;  %v4004_v31 = vld [vmem:[%s5358_s0 + $0x304] ss:$20 sps:$4 sm:$0xff]   ;;  %v4006_v32 = vld [vmem:[%s5358_s0 + $0x100] ss:$20 sps:$4 sm:$0xff]  }
  0xb2   :  { %1679 = vmatprep.mubr.bf16.mxu0 %v3934_v33  ;;  %1904 = vmatprep.mubr.bf16.mxu1 %v3936_v34 }
  0xb9   :  { %1680 = vmatmul.mubr.bf16.gmra.mxu0 %v3938_v35  ;;  %1905 = vmatmul.mubr.bf16.gmra.mxu1 %v3939_v36 }
  0xba   :  { %1687 = vmatprep.mubr.bf16.mxu0 %v3940_v37  ;;  %1912 = vmatprep.mubr.bf16.mxu1 %v3942_v38 }
  0xc1   :  { %1688 = vmatmul.mubr.bf16.gmra.mxu0 %v3944_v39  ;;  %1913 = vmatmul.mubr.bf16.gmra.mxu1 %v3945_v40 }
  0xc2   :  { %1695 = vmatprep.mubr.bf16.mxu0 %v3946_v41  ;;  %1920 = vmatprep.mubr.bf16.mxu1 %v3948_v42  ;;  %v4007_v41 = vld [vmem:[%s5358_s0 + $0x300] ss:$20 sps:$4 sm:$0xff]   ;;  %v4008_v42 = vld [vmem:[%s5358_s0 + $0x128] ss:$20 sps:$4 sm:$0xff]  }
  0xc9   :  { %1696 = vmatmul.mubr.bf16.gmra.mxu0 %v3950_v43  ;;  %1921 = vmatmul.mubr.bf16.gmra.mxu1 %v3951_v44  ;;  %v4011_v43 = vld [vmem:[%s5358_s0 + $0x32c] ss:$20 sps:$4 sm:$0xff]   ;;  %v4012_v44 = vld [vmem:[%s5358_s0 + $0x150] ss:$20 sps:$4 sm:$0xff]  }
  0xca   :  { %1703 = vmatprep.mubr.bf16.mxu0 %v3952_v45  ;;  %1928 = vmatprep.mubr.bf16.mxu1 %v3954_v46 }
  0xd1   :  { %1704 = vmatmul.mubr.bf16.gmra.mxu0 %v3956_v47  ;;  %1929 = vmatmul.mubr.bf16.gmra.mxu1 %v3957_v48 }
  0xd2   :  { %1711 = vmatprep.mubr.bf16.mxu0 %v3959_v49  ;;  %1936 = vmatprep.mubr.bf16.mxu1 %v3961_v50 }
  0xd9   :  { %1712 = vmatmul.mubr.bf16.gmra.mxu0 %v3963_v51  ;;  %1937 = vmatmul.mubr.bf16.gmra.mxu1 %v3964_v52 }
  0xda   :  { %1719 = vmatprep.mubr.bf16.mxu0 %v3965_v53  ;;  %1944 = vmatprep.mubr.bf16.mxu1 %v3967_v54  ;;  %v4009_v53 = vld [vmem:[%s5358_s0 + $0x328] ss:$20 sps:$4 sm:$0xff]   ;;  %v4013_v54 = vld [vmem:[%s5358_s0 + $0x178] ss:$20 sps:$4 sm:$0xff]  }
  0xe1   :  { %1720 = vmatmul.mubr.bf16.gmra.mxu0 %v3969_v55  ;;  %1945 = vmatmul.mubr.bf16.gmra.mxu1 %v3970_v56  ;;  %v4016_v55 = vld [vmem:[%s5358_s0 + $0x354] ss:$20 sps:$4 sm:$0xff]  }
  0xe2   :  { %1727 = vmatprep.mubr.bf16.mxu0 %v3971_v57  ;;  %1952 = vmatprep.mubr.bf16.mxu1 %v3973_v58  ;;  %v4017_v56 = vld [vmem:[%s5358_s0 + $0x1a0] ss:$20 sps:$4 sm:$0xff]  }
  0xe9   :  { %1728 = vmatmul.mubr.bf16.gmra.mxu0 %v3975_v59  ;;  %1953 = vmatmul.mubr.bf16.gmra.mxu1 %v3976_v60 }
  0xea   :  { %1735 = vmatprep.mubr.bf16.mxu0 %v3977_v61  ;;  %1960 = vmatprep.mubr.bf16.mxu1 %v3979_v62 }
  0xf1   :  { %1736 = vmatmul.mubr.bf16.gmra.mxu0 %v3981_v63  ;;  %1961 = vmatmul.mubr.bf16.gmra.mxu1 %v3982_v1 }
  0xf2   :  { %1743 = vmatprep.mubr.bf16.mxu0 %v3983_v2  ;;  %1968 = vmatprep.mubr.bf16.mxu1 %v3985_v3  ;;  %v4014_v2 = vld [vmem:[%s5358_s0 + $0x350] ss:$20 sps:$4 sm:$0xff]   ;;  %v4018_v3 = vld [vmem:[%s5358_s0 + $0x1c8] ss:$20 sps:$4 sm:$0xff]  }
  0xf9   :  { %1744 = vmatmul.mubr.bf16.gmra.mxu0 %v3987_v4  ;;  %1969 = vmatmul.mubr.bf16.gmra.mxu1 %v3988_v5  ;;  %v4021_v4 = vld [vmem:[%s5358_s0 + $0x37c] ss:$20 sps:$4 sm:$0xff]  }
  0xfa   :  { %1976 = vmatprep.mubr.bf16.mxu1 %v3989_v6  ;;  %3712 = vmatprep.mubr.msk.bf16.mxu0 %vm1430_vm0, %v3991_v7  ;;  %v4022_v5 = vld [vmem:[%s5358_s0 + $0x1f0] ss:$20 sps:$4 sm:$0xff]  }
 0x101   :  { %v4558_v0 = vpop.f32.mrf.mxu0  ;;  %v4560_v12 = vpop.f32.mrf.mxu1  ;;  %1977 = vmatmul.mubr.bf16.gmra.mxu1 %v3992_v8  ;;  %3713 = vmatmul.mubr.msk.bf16.vlgmr.msra.gmra.mxu0 %vm1430_vm0, %v3993_v9 }
 0x102   :  { %5362 = vst [vmem:[#allocation3_spill] sm:$0xff] %v4560_v12  ;;  %1984 = vmatprep.mubr.bf16.mxu1 %v3994_v10  ;;  %3716 = vmatprep.mubr.msk.bf16.mxu0 %vm1430_vm0, %v3996_v11 }
 0x103   :  { %v1563_v13 = vpop.f32.mrf.mxu0  ;;  %v1755_v14 = vpop.f32.mrf.mxu1 }
 0x105   :  { %v4564_v15 = vpop.f32.mrf.mxu0  ;;  %v4566_v16 = vpop.f32.mrf.mxu1 }
 0x106   :  { %5363 = vst [vmem:[#allocation4_spill] sm:$0xff] %v4566_v16 }
 0x107   :  { %v1566_v21 = vpop.f32.mrf.mxu0  ;;  %v1758_v22 = vpop.f32.mrf.mxu1 }
 0x109   :  { %v4580_v23 = vpop.f32.mrf.mxu0  ;;  %v4582_v24 = vpop.f32.mrf.mxu1  ;;  %1985 = vmatmul.mubr.bf16.gmra.mxu1 %v3997_v17  ;;  %3717 = vmatmul.mubr.msk.bf16.gmra.mxu0 %vm1430_vm0, %v3998_v18  ;;  %v4019_v17 = vld [vmem:[%s5358_s0 + $0x378] ss:$20 sps:$4 sm:$0xff]  }
 0x10a   :  { %5364 = vst [vmem:[#allocation5_spill] sm:$0xff] %v4582_v24  ;;  %1992 = vmatprep.mubr.bf16.mxu1 %v3999_v19  ;;  %3720 = vmatprep.mubr.msk.bf16.mxu0 %vm1430_vm0, %v4001_v20  ;;  %v4023_v18 = vld [vmem:[%s5358_s0 + $0x218] ss:$20 sps:$4 sm:$0xff]   ;;  %v4027_v20 = vld [vmem:[%s5358_s0 + $0x240] ss:$20 sps:$4 sm:$0xff]  }
 0x10b   :  { %v1571_v25 = vpop.f32.mrf.mxu0  ;;  %v1763_v26 = vpop.f32.mrf.mxu1  ;;  %v4026_v19 = vld [vmem:[%s5358_s0 + $0x3a4] ss:$20 sps:$4 sm:$0xff]  }
 0x10d   :  { %v4586_v27 = vpop.f32.mrf.mxu0  ;;  %v4588_v28 = vpop.f32.mrf.mxu1 }
 0x10e   :  { %5365 = vst [vmem:[#allocation6_spill] sm:$0xff] %v4588_v28 }
 0x10f   :  { %v1574_v33 = vpop.f32.mrf.mxu0  ;;  %v1766_v34 = vpop.f32.mrf.mxu1 }
 0x110   :  { %v4024_v33 = vld [vmem:[%s5358_s0 + $0x3a0] ss:$20 sps:$4 sm:$0xff]   ;;  %v4028_v34 = vld [vmem:[%s5358_s0 + $0x268] ss:$20 sps:$4 sm:$0xff]  }
 0x111   :  { %v4602_v35 = vpop.f32.mrf.mxu0  ;;  %v4604_v36 = vpop.f32.mrf.mxu1  ;;  %1993 = vmatmul.mubr.bf16.gmra.mxu1 %v4002_v29  ;;  %3721 = vmatmul.mubr.msk.bf16.gmra.mxu0 %vm1430_vm0, %v4003_v30 }
 0x112   :  { %5366 = vst [vmem:[#allocation7_spill] sm:$0xff] %v4604_v36  ;;  %2000 = vmatprep.mubr.bf16.mxu1 %v4004_v31  ;;  %3724 = vmatprep.mubr.msk.bf16.mxu0 %vm1430_vm0, %v4006_v32 }
 0x113   :  { %v1579_v37 = vpop.f32.mrf.mxu0  ;;  %v1771_v38 = vpop.f32.mrf.mxu1 }
 0x114   :  { %v4031_v37 = vld [vmem:[%s5358_s0 + $0x3cc] ss:$20 sps:$4 sm:$0xff]   ;;  %v4032_v38 = vld [vmem:[%s5358_s0 + $0x290] ss:$20 sps:$4 sm:$0xff]  }
 0x115   :  { %v4608_v39 = vpop.f32.mrf.mxu0  ;;  %v4610_v40 = vpop.f32.mrf.mxu1 }
 0x116   :  { %5367 = vst [vmem:[#allocation8_spill] sm:$0xff] %v4610_v40 }
 0x117   :  { %v1582_v45 = vpop.f32.mrf.mxu0  ;;  %v1774_v46 = vpop.f32.mrf.mxu1 }
 0x119   :  { %v4624_v47 = vpop.f32.mrf.mxu0  ;;  %v4626_v48 = vpop.f32.mrf.mxu1  ;;  %2001 = vmatmul.mubr.bf16.gmra.mxu1 %v4007_v41  ;;  %3725 = vmatmul.mubr.msk.bf16.gmra.mxu0 %vm1430_vm0, %v4008_v42 }
 0x11a   :  { %5368 = vst [vmem:[#allocation9_spill] sm:$0xff] %v4626_v48  ;;  %2008 = vmatprep.mubr.bf16.mxu1 %v4011_v43  ;;  %3728 = vmatprep.mubr.msk.bf16.mxu0 %vm1430_vm0, %v4012_v44 }
 0x11b   :  { %v1587_v49 = vpop.f32.mrf.mxu0  ;;  %v1779_v50 = vpop.f32.mrf.mxu1 }
 0x11d   :  { %v4630_v51 = vpop.f32.mrf.mxu0  ;;  %v4632_v52 = vpop.f32.mrf.mxu1 }
 0x11e   :  { %5369 = vst [vmem:[#allocation10_spill] sm:$0xff] %v4632_v52 }
 0x11f   :  { %v1590_v57 = vpop.f32.mrf.mxu0  ;;  %v1782_v58 = vpop.f32.mrf.mxu1 }
 0x121   :  { %v4646_v59 = vpop.f32.mrf.mxu0  ;;  %v4648_v60 = vpop.f32.mrf.mxu1  ;;  %2009 = vmatmul.mubr.bf16.gmra.mxu1 %v4009_v53  ;;  %3729 = vmatmul.mubr.msk.bf16.gmra.mxu0 %vm1430_vm0, %v4013_v54  ;;  %v4029_v53 = vld [vmem:[%s5358_s0 + $0x3c8] ss:$20 sps:$4 sm:$0xff]   ;;  %v4033_v54 = vld [vmem:[%s5358_s0 + $0x2b8] ss:$20 sps:$4 sm:$0xff]  }
 0x122   :  { %5370 = vst [vmem:[#allocation11_spill] sm:$0xff] %v4648_v60  ;;  %2016 = vmatprep.mubr.bf16.mxu1 %v4016_v55  ;;  %3732 = vmatprep.mubr.msk.bf16.mxu0 %vm1430_vm0, %v4017_v56  ;;  %v4036_v55 = vld [vmem:[%s5358_s0 + $0x3f4] ss:$20 sps:$4 sm:$0xff]  }
 0x123   :  { %v1595_v61 = vpop.f32.mrf.mxu0  ;;  %v1787_v62 = vpop.f32.mrf.mxu1  ;;  %v4037_v56 = vld [vmem:[%s5358_s0 + $0x2e0] ss:$20 sps:$4 sm:$0xff]  }
 0x125   :  { %v4652_v63 = vpop.f32.mrf.mxu0  ;;  %v4654_v1 = vpop.f32.mrf.mxu1 }
 0x126   :  { %5371 = vst [vmem:[#allocation12_spill] sm:$0xff] %v4654_v1 }
 0x127   :  { %v1598_v6 = vpop.f32.mrf.mxu0  ;;  %v1790_v7 = vpop.f32.mrf.mxu1 }
 0x128   :  { %v4034_v7 = vld [vmem:[%s5358_s0 + $0x3f0] ss:$20 sps:$4 sm:$0xff]  }
 0x129   :  { %v4668_v8 = vpop.f32.mrf.mxu0  ;;  %v4670_v9 = vpop.f32.mrf.mxu1  ;;  %2017 = vmatmul.mubr.bf16.gmra.mxu1 %v4014_v2  ;;  %3733 = vmatmul.mubr.msk.bf16.gmra.mxu0 %vm1430_vm0, %v4018_v3 }
 0x12a   :  { %5372 = vst [vmem:[#allocation13_spill] sm:$0xff] %v4670_v9  ;;  %2024 = vmatprep.mubr.bf16.mxu1 %v4021_v4  ;;  %3736 = vmatprep.mubr.msk.bf16.mxu0 %vm1430_vm0, %v4022_v5 }
 0x12b   :  { %v1603_v10 = vpop.f32.mrf.mxu0  ;;  %v1795_v11 = vpop.f32.mrf.mxu1 }
 0x12c   :  { %v4038_v10 = vld [vmem:[%s5358_s0 + $0x308] ss:$20 sps:$4 sm:$0xff]  }
 0x12d   :  { %v4674_v13 = vpop.f32.mrf.mxu0  ;;  %v4676_v14 = vpop.f32.mrf.mxu1 }
 0x12e   :  { %5373 = vst [vmem:[#allocation14_spill] sm:$0xff] %v4676_v14 }
 0x12f   :  { %v1606_v21 = vpop.f32.mrf.mxu0  ;;  %v1798_v22 = vpop.f32.mrf.mxu1 }
 0x131   :  { %v4690_v25 = vpop.f32.mrf.mxu0  ;;  %v4692_v26 = vpop.f32.mrf.mxu1  ;;  %2025 = vmatmul.mubr.bf16.gmra.mxu1 %v4019_v17  ;;  %3737 = vmatmul.mubr.msk.bf16.gmra.mxu0 %vm1430_vm0, %v4023_v18  ;;  %v4042_v17 = vld [vmem:[%s5358_s0 + $0x330] ss:$20 sps:$4 sm:$0xff]  }
 0x132   :  { %5374 = vst [vmem:[#allocation15_spill] sm:$0xff] %v4692_v26  ;;  %2032 = vmatprep.mubr.bf16.mxu1 %v4026_v19  ;;  %3740 = vmatprep.mubr.msk.bf16.mxu0 %vm1430_vm0, %v4027_v20 }
 0x133   :  { %v1611_v29 = vpop.f32.mrf.mxu0  ;;  %v1803_v30 = vpop.f32.mrf.mxu1 }
 0x135   :  { %v4696_v31 = vpop.f32.mrf.mxu0  ;;  %v4698_v32 = vpop.f32.mrf.mxu1 }
 0x136   :  { %5375 = vst [vmem:[#allocation16_spill] sm:$0xff] %v4698_v32 }
 0x137   :  { %v1614_v41 = vpop.f32.mrf.mxu0  ;;  %v1806_v42 = vpop.f32.mrf.mxu1 }
 0x138   :  { %v4047_v41 = vld [vmem:[%s5358_s0 + $0x380] ss:$20 sps:$4 sm:$0xff]  }
 0x139   :  { %v4712_v43 = vpop.f32.mrf.mxu0  ;;  %v4714_v44 = vpop.f32.mrf.mxu1  ;;  %2033 = vmatmul.mubr.bf16.gmra.mxu1 %v4024_v33  ;;  %3741 = vmatmul.mubr.msk.bf16.gmra.mxu0 %vm1430_vm0, %v4028_v34  ;;  %v4039_v34 = vld [vmem:[%s5358_s0 + $0x418] ss:$20 sps:$4 sm:$0xff]  }
 0x13a   :  { %5376 = vst [vmem:[#allocation17_spill] sm:$0xff] %v4714_v44  ;;  %2040 = vmatprep.mubr.bf16.mxu1 %v4031_v37  ;;  %3744 = vmatprep.mubr.msk.bf16.mxu0 %vm1430_vm0, %v4032_v38  ;;  %v4043_v37 = vld [vmem:[%s5358_s0 + $0x358] ss:$20 sps:$4 sm:$0xff]  }
 0x13b   :  { %v1619_v45 = vpop.f32.mrf.mxu0  ;;  %v1811_v46 = vpop.f32.mrf.mxu1 }
 0x13d   :  { %v4718_v49 = vpop.f32.mrf.mxu0  ;;  %v4720_v50 = vpop.f32.mrf.mxu1 }
 0x13e   :  { %5377 = vst [vmem:[#allocation18_spill] sm:$0xff] %v4720_v50 }
 0x13f   :  { %v1622_v57 = vpop.f32.mrf.mxu0  ;;  %v1814_v58 = vpop.f32.mrf.mxu1 }
 0x140   :  { %v4044_v58 = vld [vmem:[%s5358_s0 + $0x440] ss:$20 sps:$4 sm:$0xff]  }
 0x141   :  { %v4734_v61 = vpop.f32.mrf.mxu0  ;;  %v1850_v62 = vpop.f32.mrf.mxu1  ;;  %2041 = vmatmul.mubr.bf16.gmra.mxu1 %v4029_v53  ;;  %3745 = vmatmul.mubr.msk.bf16.gmra.mxu0 %vm1430_vm0, %v4033_v54 }
 0x142   :  { %v4738_v2 = vadd.f32 %v1850_v62, %v4558_v0  ;;  %2048 = vmatprep.mubr.bf16.mxu1 %v4036_v55  ;;  %3748 = vmatprep.mubr.msk.bf16.mxu0 %vm1430_vm0, %v4037_v56  ;;  %v4041_v0 = vld [vmem:[%s5358_s0 + $0x41c] ss:$20 sps:$4 sm:$0xff]  }
 0x143   :  { %v1627_v3 = vpop.f32.mrf.mxu0  ;;  %v1852_v4 = vpop.f32.mrf.mxu1  ;;  %v4048_v62 = vld [vmem:[%s5358_s0 + $0x3a8] ss:$20 sps:$4 sm:$0xff]  }
 0x144   :  { %v4052_v4 = vld [vmem:[%s5358_s0 + $0x3d0] ss:$20 sps:$4 sm:$0xff]  }
 0x145   :  { %v4741_v5 = vpop.f32.mrf.mxu0  ;;  %v1853_v6 = vpop.f32.mrf.mxu1 }
 0x146   :  { %v4750_v11 = vadd.f32 %v1853_v6, %v4564_v15 }
 0x147   :  { %v1630_v18 = vpop.f32.mrf.mxu0  ;;  %v1855_v19 = vpop.f32.mrf.mxu1 }
 0x149   :  { %v4758_v20 = vpop.f32.mrf.mxu0  ;;  %v1858_v21 = vpop.f32.mrf.mxu1  ;;  %2049 = vmatmul.mubr.bf16.gmra.mxu1 %v4034_v7  ;;  %3749 = vmatmul.mubr.msk.bf16.gmra.mxu0 %vm1430_vm0, %v4038_v10 }
 0x14a   :  { %v4762_v22 = vadd.f32 %v1858_v21, %v4580_v23  ;;  %2056 = vmatprep.mubr.bf16.mxu1 %v4041_v0  ;;  %3752 = vmatprep.mubr.msk.bf16.mxu0 %vm1430_vm0, %v4042_v17  ;;  %v4046_v23 = vld [vmem:[%s5358_s0 + $0x444] ss:$20 sps:$4 sm:$0xff]  }
 0x14b   :  { %v1635_v15 = vpop.f32.mrf.mxu0  ;;  %v1860_v29 = vpop.f32.mrf.mxu1 }
 0x14c   :  { %v4049_v15 = vld [vmem:[%s5358_s0 + $0x468] ss:$20 sps:$4 sm:$0xff]   ;;  %v4053_v29 = vld [vmem:[%s5358_s0 + $0x3f8] ss:$20 sps:$4 sm:$0xff]  }
 0x14d   :  { %v4765_v30 = vpop.f32.mrf.mxu0  ;;  %v1861_v33 = vpop.f32.mrf.mxu1 }
 0x14e   :  { %v4774_v38 = vadd.f32 %v1861_v33, %v4586_v27 }
 0x14f   :  { %v1638_v42 = vpop.f32.mrf.mxu0  ;;  %v1863_v45 = vpop.f32.mrf.mxu1 }
 0x151   :  { %v4782_v46 = vpop.f32.mrf.mxu0  ;;  %v1866_v53 = vpop.f32.mrf.mxu1  ;;  %2057 = vmatmul.mubr.bf16.gmra.mxu1 %v4039_v34  ;;  %3753 = vmatmul.mubr.msk.bf16.gmra.mxu0 %vm1430_vm0, %v4043_v37  ;;  %v4057_v34 = vld [vmem:[%s5358_s0 + $0x420] ss:$20 sps:$4 sm:$0xff]  }
 0x152   :  { %v4786_v54 = vadd.f32 %v1866_v53, %v4602_v35  ;;  %2064 = vmatprep.mubr.bf16.mxu1 %v4046_v23  ;;  %3756 = vmatprep.mubr.msk.bf16.mxu0 %vm1430_vm0, %v4047_v41  ;;  %v4051_v35 = vld [vmem:[%s5358_s0 + $0x46c] ss:$20 sps:$4 sm:$0xff]  }
 0x153   :  { %v1643_v27 = vpop.f32.mrf.mxu0  ;;  %v1868_v55 = vpop.f32.mrf.mxu1 }
 0x155   :  { %v4789_v56 = vpop.f32.mrf.mxu0  ;;  %v1869_v57 = vpop.f32.mrf.mxu1 }
 0x156   :  { %v4798_v3 = vadd.f32 %v1869_v57, %v4608_v39  ;;  %v4054_v57 = vld [vmem:[%s5358_s0 + $0x490] ss:$20 sps:$4 sm:$0xff]  }
 0x157   :  { %v1646_v6 = vpop.f32.mrf.mxu0  ;;  %v1871_v7 = vpop.f32.mrf.mxu1 }
 0x159   :  { %v4806_v10 = vpop.f32.mrf.mxu0  ;;  %v1874_v0 = vpop.f32.mrf.mxu1  ;;  %2065 = vmatmul.mubr.bf16.gmra.mxu1 %v4044_v58  ;;  %3757 = vmatmul.mubr.msk.bf16.gmra.mxu0 %vm1430_vm0, %v4048_v62  ;;  %v4058_v58 = vld [vmem:[%s5358_s0 + $0x448] ss:$20 sps:$4 sm:$0xff]  }
 0x15a   :  { %v4810_v17 = vadd.f32 %v1874_v0, %v4624_v47  ;;  %2072 = vmatprep.mubr.bf16.mxu1 %v4051_v35  ;;  %3760 = vmatprep.mubr.msk.bf16.mxu0 %vm1430_vm0, %v4052_v4  ;;  %v4056_v47 = vld [vmem:[%s5358_s0 + $0x494] ss:$20 sps:$4 sm:$0xff]   ;;  %v4062_v35 = vld [vmem:[%s5358_s0 + $0x470] ss:$20 sps:$4 sm:$0xff]  }
 0x15b   :  { %v1651_v39 = vpop.f32.mrf.mxu0  ;;  %v1876_v18 = vpop.f32.mrf.mxu1 }
 0x15d   :  { %v4813_v19 = vpop.f32.mrf.mxu0  ;;  %v1877_v21 = vpop.f32.mrf.mxu1 }
 0x15e   :  { %v4822_v33 = vadd.f32 %v1877_v21, %v4630_v51 }
 0x15f   :  { %v1654_v37 = vpop.f32.mrf.mxu0  ;;  %v1879_v23 = vpop.f32.mrf.mxu1 }
 0x160   :  { %v4067_v37 = vld [vmem:[%s5358_s0 + $0x4c0] ss:$20 sps:$4 sm:$0xff]  }
 0x161   :  { %v4830_v41 = vpop.f32.mrf.mxu0  ;;  %v1882_v42 = vpop.f32.mrf.mxu1  ;;  %2073 = vmatmul.mubr.bf16.gmra.mxu1 %v4049_v15  ;;  %3761 = vmatmul.mubr.msk.bf16.gmra.mxu0 %vm1430_vm0, %v4053_v29  ;;  %v4059_v29 = vld [vmem:[%s5358_s0 + $0x4b8] ss:$20 sps:$4 sm:$0xff]  }
 0x162   :  { %v4834_v45 = vadd.f32 %v1882_v42, %v4646_v59  ;;  %2080 = vmatprep.mubr.bf16.mxu1 %v4056_v47  ;;  %3764 = vmatprep.mubr.msk.bf16.mxu0 %vm1430_vm0, %v4057_v34  ;;  %v4061_v59 = vld [vmem:[%s5358_s0 + $0x4bc] ss:$20 sps:$4 sm:$0xff]   ;;  %v4063_v47 = vld [vmem:[%s5358_s0 + $0x498] ss:$20 sps:$4 sm:$0xff]  }
 0x163   :  { %v1659_v51 = vpop.f32.mrf.mxu0  ;;  %v1884_v53 = vpop.f32.mrf.mxu1 }
 0x165   :  { %v4837_v27 = vpop.f32.mrf.mxu0  ;;  %v1885_v55 = vpop.f32.mrf.mxu1 }
 0x166   :  { %v4846_v62 = vadd.f32 %v1885_v55, %v4652_v63 }
 0x167   :  { %v1662_v4 = vpop.f32.mrf.mxu0  ;;  %v1887_v6 = vpop.f32.mrf.mxu1 }
 0x168   :  { %v4068_v4 = vld [vmem:[%s5358_s0 + $0x4e8] ss:$20 sps:$4 sm:$0xff]  }
 0x169   :  { %v4854_v7 = vpop.f32.mrf.mxu0  ;;  %v1890_v0 = vpop.f32.mrf.mxu1  ;;  %2081 = vmatmul.mubr.bf16.gmra.mxu1 %v4054_v57  ;;  %3765 = vmatmul.mubr.msk.bf16.gmra.mxu0 %vm1430_vm0, %v4058_v58 }
 0x16a   :  { %v4858_v39 = vadd.f32 %v1890_v0, %v4668_v8  ;;  %2088 = vmatprep.mubr.bf16.mxu1 %v4061_v59  ;;  %3768 = vmatprep.mubr.msk.bf16.mxu0 %vm1430_vm0, %v4062_v35  ;;  %v4066_v8 = vld [vmem:[%s5358_s0 + $0x4e4] ss:$20 sps:$4 sm:$0xff]   ;;  %v4064_v35 = vld [vmem:[%s5358_s0 + $0x4e0] ss:$20 sps:$4 sm:$0xff]  }
 0x16b   :  { %v1667_v63 = vpop.f32.mrf.mxu0  ;;  %v1892_v18 = vpop.f32.mrf.mxu1 }
 0x16d   :  { %v4861_v21 = vpop.f32.mrf.mxu0  ;;  %v1893_v15 = vpop.f32.mrf.mxu1 }
 0x16e   :  { %v4870_v34 = vadd.f32 %v1893_v15, %v4674_v13 }
 0x16f   :  { %v1670_v23 = vpop.f32.mrf.mxu0  ;;  %v1895_v42 = vpop.f32.mrf.mxu1 }
 0x171   :  { %v4878_v51 = vpop.f32.mrf.mxu0  ;;  %v1898_v53 = vpop.f32.mrf.mxu1  ;;  %2089 = vmatmul.mubr.bf16.gmra.mxu1 %v4059_v29  ;;  %3769 = vmatmul.mubr.msk.bf16.gmra.mxu0 %vm1430_vm0, %v4063_v47 }
 0x172   :  { %v4882_v55 = vadd.f32 %v1898_v53, %v4690_v25  ;;  %2096 = vmatprep.mubr.bf16.mxu1 %v4066_v8  ;;  %3772 = vmatprep.mubr.msk.bf16.mxu0 %vm1430_vm0, %v4067_v37 }
 0x173   :  { %v1675_v13 = vpop.f32.mrf.mxu0  ;;  %v1900_v57 = vpop.f32.mrf.mxu1 }
 0x175   :  { %v4885_v58 = vpop.f32.mrf.mxu0  ;;  %v1901_v59 = vpop.f32.mrf.mxu1 }
 0x176   :  { %v4894_v6 = vadd.f32 %v1901_v59, %v4696_v31 }
 0x177   :  { %v1678_v25 = vpop.f32.mrf.mxu0  ;;  %v1903_v0 = vpop.f32.mrf.mxu1 }
 0x179   :  { %v4896_v63 = vpop.f32.mrf.mxu0  ;;  %v1906_v18 = vpop.f32.mrf.mxu1  ;;  %2097 = vmatmul.mubr.bf16.gmra.mxu1 %v4064_v35  ;;  %3773 = vmatmul.mubr.msk.bf16.gmra.mxu0 %vm1430_vm0, %v4068_v4 }
 0x17a   :  { %v4900_v15 = vadd.f32 %v1906_v18, %v4712_v43 }
 0x17b   :  { %v1683_v29 = vpop.f32.mrf.mxu0  ;;  %v1908_v47 = vpop.f32.mrf.mxu1 }
 0x17d   :  { %v4902_v8 = vpop.f32.mrf.mxu0  ;;  %v1909_v37 = vpop.f32.mrf.mxu1 }
 0x17e   :  { %v4905_v23 = vadd.f32 %v1909_v37, %v4718_v49 }
 0x17f   :  { %v1686_v31 = vpop.f32.mrf.mxu0  ;;  %v1911_v42 = vpop.f32.mrf.mxu1 }
 0x181   :  { %v4907_v53 = vpop.f32.mrf.mxu0  ;;  %v1914_v13 = vpop.f32.mrf.mxu1 }
 0x182   :  { %v4910_v57 = vadd.f32 %v1914_v13, %v4734_v61 }
 0x183   :  { %v1691_v59 = vpop.f32.mrf.mxu0  ;;  %v1916_v35 = vpop.f32.mrf.mxu1 }
 0x185   :  { %v4912_v43 = vpop.f32.mrf.mxu0  ;;  %v1917_v4 = vpop.f32.mrf.mxu1 }
 0x186   :  { %v4915_v25 = vadd.f32 %v1917_v4, %v4741_v5 }
 0x187   :  { %v1694_v0 = vpop.f32.mrf.mxu0  ;;  %v1919_v18 = vpop.f32.mrf.mxu1 }
 0x189   :  { %v4917_v49 = vpop.f32.mrf.mxu0  ;;  %v1922_v29 = vpop.f32.mrf.mxu1 }
 0x18a   :  { %v4920_v47 = vadd.f32 %v1922_v29, %v4758_v20 }
 0x18b   :  { %v1699_v37 = vpop.f32.mrf.mxu0  ;;  %v1924_v31 = vpop.f32.mrf.mxu1 }
 0x18d   :  { %v4922_v61 = vpop.f32.mrf.mxu0  ;;  %v1925_v42 = vpop.f32.mrf.mxu1 }
 0x18e   :  { %v4925_v13 = vadd.f32 %v1925_v42, %v4765_v30 }
 0x18f   :  { %v1702_v59 = vpop.f32.mrf.mxu0  ;;  %v1927_v35 = vpop.f32.mrf.mxu1 }
 0x191   :  { %v4927_v5 = vpop.f32.mrf.mxu0  ;;  %v1930_v4 = vpop.f32.mrf.mxu1 }
 0x192   :  { %v4930_v0 = vadd.f32 %v1930_v4, %v4782_v46 }
 0x193   :  { %v1707_v18 = vpop.f32.mrf.mxu0  ;;  %v1932_v32 = vpop.f32.mrf.mxu1 }
 0x195   :  { %v4932_v20 = vpop.f32.mrf.mxu0  ;;  %v1933_v29 = vpop.f32.mrf.mxu1 }
 0x196   :  { %v4935_v37 = vadd.f32 %v1933_v29, %v4789_v56 }
 0x197   :  { %v1710_v31 = vpop.f32.mrf.mxu0  ;;  %v1935_v50 = vpop.f32.mrf.mxu1 }
 0x199   :  { %v4937_v30 = vpop.f32.mrf.mxu0  ;;  %v1938_v42 = vpop.f32.mrf.mxu1 }
 0x19a   :  { %v4940_v59 = vadd.f32 %v1938_v42, %v4806_v10 }
 0x19b   :  { %v1715_v35 = vpop.f32.mrf.mxu0  ;;  %v1940_v44 = vpop.f32.mrf.mxu1 }
 0x19d   :  { %v4942_v46 = vpop.f32.mrf.mxu0  ;;  %v1941_v4 = vpop.f32.mrf.mxu1 }
 0x19e   :  { %v4945_v32 = vadd.f32 %v1941_v4, %v4813_v19 }
 0x19f   :  { %v1718_v18 = vpop.f32.mrf.mxu0  ;;  %v1943_v26 = vpop.f32.mrf.mxu1 }
 0x1a1   :  { %v4947_v56 = vpop.f32.mrf.mxu0  ;;  %v1946_v29 = vpop.f32.mrf.mxu1 }
 0x1a2   :  { %v4950_v50 = vadd.f32 %v1946_v29, %v4830_v41 }
 0x1a3   :  { %v1723_v31 = vpop.f32.mrf.mxu0  ;;  %v1948_v1 = vpop.f32.mrf.mxu1 }
 0x1a5   :  { %v4952_v10 = vpop.f32.mrf.mxu0  ;;  %v1949_v42 = vpop.f32.mrf.mxu1 }
 0x1a6   :  { %v4955_v44 = vadd.f32 %v1949_v42, %v4837_v27 }
 0x1a7   :  { %v1726_v35 = vpop.f32.mrf.mxu0  ;;  %v1951_v14 = vpop.f32.mrf.mxu1 }
 0x1a9   :  { %v4957_v19 = vpop.f32.mrf.mxu0  ;;  %v1954_v4 = vpop.f32.mrf.mxu1 }
 0x1aa   :  { %v4960_v26 = vadd.f32 %v1954_v4, %v4854_v7 }
 0x1ab   :  { %v1731_v18 = vpop.f32.mrf.mxu0  ;;  %v1956_v60 = vpop.f32.mrf.mxu1 }
 0x1ad   :  { %v4962_v41 = vpop.f32.mrf.mxu0  ;;  %v1957_v29 = vpop.f32.mrf.mxu1 }
 0x1ae   :  { %v4965_v1 = vadd.f32 %v1957_v29, %v4861_v21 }
 0x1af   :  { %v1734_v31 = vpop.f32.mrf.mxu0  ;;  %v1959_v9 = vpop.f32.mrf.mxu1 }
 0x1b1   :  { %v4967_v27 = vpop.f32.mrf.mxu0  ;;  %v1962_v42 = vpop.f32.mrf.mxu1 }
 0x1b2   :  { %5378 = vst [vmem:[#allocation19_spill] sm:$0xff] %v4967_v27  ;;  %v4970_v14 = vadd.f32 %v1962_v42, %v4878_v51 }
 0x1b3   :  { %v1739_v35 = vpop.f32.mrf.mxu0  ;;  %v1964_v40 = vpop.f32.mrf.mxu1 }
 0x1b5   :  { %v4972_v7 = vpop.f32.mrf.mxu0  ;;  %v1965_v4 = vpop.f32.mrf.mxu1 }
 0x1b6   :  { %5379 = vst [vmem:[#allocation20_spill] sm:$0xff] %v4972_v7  ;;  %v4975_v60 = vadd.f32 %v1965_v4, %v4885_v58 }
 0x1b7   :  { %v1742_v18 = vpop.f32.mrf.mxu0  ;;  %v1967_v52 = vpop.f32.mrf.mxu1 }
 0x1b8   :  { %v4989_v52 = vld [vmem:[%s5359_s2] ss:$0 sm:$0xff] }
 0x1b9   :  { %v4977_v21 = vpop.f32.mrf.mxu0  ;;  %v1970_v29 = vpop.f32.mrf.mxu1 }
 0x1ba   :  { %v4980_v9 = vadd.f32 %v1970_v29, %v4896_v63 }
 0x1bb   :  { %v1747_v31 = vpop.f32.mrf.mxu0  ;;  %v1972_v36 = vpop.f32.mrf.mxu1 }
 0x1bc   :  { %v5000_v31 = vld [vmem:[%s5360_s3] ss:$0 sm:$0xff] }
 0x1bd   :  { %v4982_v51 = vpop.f32.mrf.mxu0  ;;  %v4984_v42 = vpop.f32.mrf.mxu1 }
 0x1be   :  { %5380 = vst [vmem:[#allocation21_spill] sm:$0xff] %v4982_v51 }
 0x1bf   :  { %v1750_v40 = vpop.f32.mrf.mxu0  ;;  %v1975_v35 = vpop.f32.mrf.mxu1 }
 0x1c1   :  { %v1978_v48 = vpop.f32.mrf.mxu1  ;;  %v3714_v16 = vpop.f32.mrf.mxu0 }
 0x1c2   :  { %v4992_v58 = vadd.f32 %v1978_v48, %v4907_v53  ;;  %v2148_v63 = vadd.f32 %v3714_v16, %v4762_v22 }
 0x1c3   :  { %v1980_v4 = vpop.f32.mrf.mxu1  ;;  %v2139_v36 = vpop.f32.mrf.mxu0 }
 0x1c4   :  { %v2598_v18 = vmul.f32 %v4989_v52, %v2148_v63  ;;  %v2140_v29 = vadd.f32 %v2139_v36, %v4738_v2 }
 0x1c5   :  { %v1981_v40 = vpop.f32.mrf.mxu1  ;;  %v3715_v35 = vpop.f32.mrf.mxu0 }
 0x1c6   :  { %v2596_v28 = vmul.f32 %v4989_v52, %v2140_v29  ;;  %v5004_v48 = vadd.f32 %v1981_v40, %v4912_v43  ;;  %v2151_v16 = vadd.f32 %v3715_v35, %v4774_v38  ;;  %v2669_v63 = vadd.f32 %v5000_v31, %v2598_v18 }
 0x1c7   :  { %v1983_v22 = vpop.f32.mrf.mxu1  ;;  %v2142_v53 = vpop.f32.mrf.mxu0 }
 0x1c8   :  { %v2599_v2 = vmul.f32 %v4989_v52, %v2151_v16  ;;  %v2143_v4 = vadd.f32 %v2142_v53, %v4750_v11  ;;  %v2667_v24 = vadd.f32 %v5000_v31, %v2596_v28  ;;  %v2733_v22 = vmax.f32 %v2669_v63, 0.0 }
 0x1c9   :  { %v5010_v36 = vpop.f32.mrf.mxu1  ;;  %v3718_v12 = vpop.f32.mrf.mxu0 }
 0x1ca   :  { %v2670_v29 = vadd.f32 %v5000_v31, %v2599_v2  ;;  %v2597_v43 = vmul.f32 %v4989_v52, %v2143_v4  ;;  %v2164_v40 = vadd.f32 %v3718_v12, %v4810_v17  ;;  %v2731_v28 = vmax.f32 %v2667_v24, 0.0 }
 0x1cb   :  { %v1988_v38 = vpop.f32.mrf.mxu1  ;;  %v2155_v35 = vpop.f32.mrf.mxu0 }
 0x1cc   :  { %v2734_v7 = vmax.f32 %v2670_v29, 0.0  ;;  %v2668_v18 = vadd.f32 %v5000_v31, %v2597_v43  ;;  %v2156_v16 = vadd.f32 %v2155_v35, %v4786_v54  ;;  %v2602_v11 = vmul.f32 %v4989_v52, %v2164_v40 }
 0x1cd   :  { %v5019_v53 = vpop.f32.mrf.mxu1  ;;  %v3719_v51 = vpop.f32.mrf.mxu0 }
 0x1ce   :  { %v3485_v27 = vpack.c.bf16 %v2734_v7, %v2733_v22  ;;  %v2732_v2 = vmax.f32 %v2668_v18, 0.0  ;;  %v2600_v4 = vmul.f32 %v4989_v52, %v2156_v16  ;;  %v2167_v12 = vadd.f32 %v3719_v51, %v4822_v33 }
 0x1cf   :  { %v1991_v17 = vpop.f32.mrf.mxu1  ;;  %v2158_v38 = vpop.f32.mrf.mxu0  ;;  %v2673_v29 = vadd.f32 %v5000_v31, %v2602_v11 }
 0x1d0   :  { %3637 = vst [vmem:[%s5361_s4 + $0x8] sm:$0xff] %v3485_v27   ;;  %v3480_v63 = vpack.c.bf16 %v2732_v2, %v2731_v28  ;;  %v2159_v54 = vadd.f32 %v2158_v38, %v4798_v3  ;;  %v2603_v43 = vmul.f32 %v4989_v52, %v2167_v12  ;;  %v2671_v33 = vadd.f32 %v5000_v31, %v2600_v4 }
 0x1d1   :  { %v5029_v24 = vpop.f32.mrf.mxu1  ;;  %v3722_v7 = vpop.f32.mrf.mxu0  ;;  %v2737_v16 = vmax.f32 %v2673_v29, 0.0 }
 0x1d2   :  { %3481 = vst [vmem:[%s5361_s4] sm:$0xff] %v3480_v63   ;;  %v2601_v51 = vmul.f32 %v4989_v52, %v2159_v54  ;;  %v2180_v27 = vadd.f32 %v3722_v7, %v4858_v39  ;;  %v2674_v40 = vadd.f32 %v5000_v31, %v2603_v43  ;;  %v2735_v4 = vmax.f32 %v2671_v33, 0.0 }
 0x1d3   :  { %v1996_v3 = vpop.f32.mrf.mxu1  ;;  %v2171_v35 = vpop.f32.mrf.mxu0 }
 0x1d4   :  { %v2672_v22 = vadd.f32 %v5000_v31, %v2601_v51  ;;  %v2172_v18 = vadd.f32 %v2171_v35, %v4834_v45  ;;  %v2738_v11 = vmax.f32 %v2674_v40, 0.0  ;;  %v2606_v28 = vmul.f32 %v4989_v52, %v2180_v27 }
 0x1d5   :  { %v5041_v2 = vpop.f32.mrf.mxu1  ;;  %v3723_v12 = vpop.f32.mrf.mxu0 }
 0x1d6   :  { %v2736_v17 = vmax.f32 %v2672_v22, 0.0  ;;  %v2604_v38 = vmul.f32 %v4989_v52, %v2172_v18  ;;  %v3495_v39 = vpack.c.bf16 %v2738_v11, %v2737_v16  ;;  %v2183_v63 = vadd.f32 %v3723_v12, %v4870_v34 }
 0x1d7   :  { %v1999_v54 = vpop.f32.mrf.mxu1  ;;  %v2174_v43 = vpop.f32.mrf.mxu0  ;;  %v2677_v45 = vadd.f32 %v5000_v31, %v2606_v28 }
 0x1d8   :  { %v3490_v7 = vpack.c.bf16 %v2736_v17, %v2735_v4  ;;  %v2175_v51 = vadd.f32 %v2174_v43, %v4846_v62  ;;  %3639 = vst [vmem:[%s5361_s4 + $0x18] sm:$0xff] %v3495_v39   ;;  %v2607_v29 = vmul.f32 %v4989_v52, %v2183_v63  ;;  %v2675_v34 = vadd.f32 %v5000_v31, %v2604_v38 }
 0x1d9   :  { %v5051_v33 = vpop.f32.mrf.mxu1  ;;  %v3726_v27 = vpop.f32.mrf.mxu0  ;;  %v2741_v11 = vmax.f32 %v2677_v45, 0.0 }
 0x1da   :  { %3638 = vst [vmem:[%s5361_s4 + $0x10] sm:$0xff] %v3490_v7   ;;  %v2605_v40 = vmul.f32 %v4989_v52, %v2175_v51  ;;  %v2196_v62 = vadd.f32 %v3726_v27, %v4900_v15  ;;  %v2678_v3 = vadd.f32 %v5000_v31, %v2607_v29  ;;  %v2739_v38 = vmax.f32 %v2675_v34, 0.0 }
 0x1db   :  { %v2004_v35 = vpop.f32.mrf.mxu1  ;;  %v2187_v22 = vpop.f32.mrf.mxu0 }
 0x1dc   :  { %v2676_v18 = vadd.f32 %v5000_v31, %v2605_v40  ;;  %v2188_v16 = vadd.f32 %v2187_v22, %v4882_v55  ;;  %v2742_v28 = vmax.f32 %v2678_v3, 0.0  ;;  %v2610_v12 = vmul.f32 %v4989_v52, %v2196_v62 }
 0x1dd   :  { %v5063_v4 = vpop.f32.mrf.mxu1  ;;  %v3727_v17 = vpop.f32.mrf.mxu0 }
 0x1de   :  { %v2740_v39 = vmax.f32 %v2676_v18, 0.0  ;;  %v2608_v63 = vmul.f32 %v4989_v52, %v2188_v16  ;;  %v3505_v15 = vpack.c.bf16 %v2742_v28, %v2741_v11  ;;  %v2199_v54 = vadd.f32 %v3727_v17, %v4905_v23 }
 0x1df   :  { %v2007_v43 = vpop.f32.mrf.mxu1  ;;  %v2190_v7 = vpop.f32.mrf.mxu0  ;;  %v2681_v55 = vadd.f32 %v5000_v31, %v2610_v12 }
 0x1e0   :  { %v3500_v51 = vpack.c.bf16 %v2740_v39, %v2739_v38  ;;  %v2191_v29 = vadd.f32 %v2190_v7, %v4894_v6  ;;  %3641 = vst [vmem:[%s5361_s4 + $0x28] sm:$0xff] %v3505_v15   ;;  %v2611_v45 = vmul.f32 %v4989_v52, %v2199_v54  ;;  %v2679_v23 = vadd.f32 %v5000_v31, %v2608_v63 }
 0x1e1   :  { %v5073_v27 = vpop.f32.mrf.mxu1  ;;  %v3730_v34 = vpop.f32.mrf.mxu0  ;;  %v2745_v16 = vmax.f32 %v2681_v55, 0.0 }
 0x1e2   :  { %3640 = vst [vmem:[%s5361_s4 + $0x20] sm:$0xff] %v3500_v51   ;;  %v2609_v40 = vmul.f32 %v4989_v52, %v2191_v29  ;;  %v2212_v6 = vadd.f32 %v3730_v34, %v4920_v47  ;;  %v2682_v62 = vadd.f32 %v5000_v31, %v2611_v45  ;;  %v2743_v38 = vmax.f32 %v2679_v23, 0.0 }
 0x1e3   :  { %v2012_v3 = vpop.f32.mrf.mxu1  ;;  %v2203_v35 = vpop.f32.mrf.mxu0 }
 0x1e4   :  { %v2680_v22 = vadd.f32 %v5000_v31, %v2609_v40  ;;  %v2204_v18 = vadd.f32 %v2203_v35, %v4910_v57  ;;  %v2746_v11 = vmax.f32 %v2682_v62, 0.0  ;;  %v2614_v28 = vmul.f32 %v4989_v52, %v2212_v6 }
 0x1e5   :  { %v5085_v12 = vpop.f32.mrf.mxu1  ;;  %v3731_v17 = vpop.f32.mrf.mxu0 }
 0x1e6   :  { %v2744_v39 = vmax.f32 %v2680_v22, 0.0  ;;  %v2612_v63 = vmul.f32 %v4989_v52, %v2204_v18  ;;  %v3515_v47 = vpack.c.bf16 %v2746_v11, %v2745_v16  ;;  %v2215_v15 = vadd.f32 %v3731_v17, %v4925_v13 }
 0x1e7   :  { %v2015_v54 = vpop.f32.mrf.mxu1  ;;  %v2206_v43 = vpop.f32.mrf.mxu0  ;;  %v2685_v57 = vadd.f32 %v5000_v31, %v2614_v28 }
 0x1e8   :  { %v3510_v7 = vpack.c.bf16 %v2744_v39, %v2743_v38  ;;  %v2207_v51 = vadd.f32 %v2206_v43, %v4915_v25  ;;  %3643 = vst [vmem:[%s5361_s4 + $0x38] sm:$0xff] %v3515_v47   ;;  %v2615_v29 = vmul.f32 %v4989_v52, %v2215_v15  ;;  %v2683_v13 = vadd.f32 %v5000_v31, %v2612_v63 }
 0x1e9   :  { %v5095_v55 = vpop.f32.mrf.mxu1  ;;  %v3734_v45 = vpop.f32.mrf.mxu0  ;;  %v2749_v35 = vmax.f32 %v2685_v57, 0.0 }
 0x1ea   :  { %3642 = vst [vmem:[%s5361_s4 + $0x30] sm:$0xff] %v3510_v7   ;;  %v2613_v34 = vmul.f32 %v4989_v52, %v2207_v51  ;;  %v2228_v25 = vadd.f32 %v3734_v45, %v4940_v59  ;;  %v2686_v23 = vadd.f32 %v5000_v31, %v2615_v29  ;;  %v2747_v28 = vmax.f32 %v2683_v13, 0.0 }
 0x1eb   :  { %v2020_v40 = vpop.f32.mrf.mxu1  ;;  %v2219_v6 = vpop.f32.mrf.mxu0 }
 0x1ec   :  { %v2684_v62 = vadd.f32 %v5000_v31, %v2613_v34  ;;  %v2220_v3 = vadd.f32 %v2219_v6, %v4930_v0  ;;  %v2750_v22 = vmax.f32 %v2686_v23, 0.0  ;;  %v2618_v18 = vmul.f32 %v4989_v52, %v2228_v25 }
 0x1ed   :  { %v5107_v16 = vpop.f32.mrf.mxu1  ;;  %v3735_v11 = vpop.f32.mrf.mxu0 }
 0x1ee   :  { %v2748_v17 = vmax.f32 %v2684_v62, 0.0  ;;  %v2616_v38 = vmul.f32 %v4989_v52, %v2220_v3  ;;  %v3525_v59 = vpack.c.bf16 %v2750_v22, %v2749_v35  ;;  %v2231_v39 = vadd.f32 %v3735_v11, %v4945_v32 }
 0x1ef   :  { %v2023_v63 = vpop.f32.mrf.mxu1  ;;  %v2222_v47 = vpop.f32.mrf.mxu0  ;;  %v2689_v0 = vadd.f32 %v5000_v31, %v2618_v18 }
 0x1f0   :  { %v3520_v15 = vpack.c.bf16 %v2748_v17, %v2747_v28  ;;  %v2223_v54 = vadd.f32 %v2222_v47, %v4935_v37  ;;  %3645 = vst [vmem:[%s5361_s4 + $0x48] sm:$0xff] %v3525_v59   ;;  %v2619_v43 = vmul.f32 %v4989_v52, %v2231_v39  ;;  %v2687_v32 = vadd.f32 %v5000_v31, %v2616_v38 }
 0x1f1   :  { %v5117_v7 = vpop.f32.mrf.mxu1  ;;  %v3738_v51 = vpop.f32.mrf.mxu0  ;;  %v2753_v23 = vmax.f32 %v2689_v0, 0.0 }
 0x1f2   :  { %3644 = vst [vmem:[%s5361_s4 + $0x40] sm:$0xff] %v3520_v15   ;;  %v2617_v57 = vmul.f32 %v4989_v52, %v2223_v54  ;;  %v2244_v37 = vadd.f32 %v3738_v51, %v4960_v26  ;;  %v2690_v29 = vadd.f32 %v5000_v31, %v2619_v43  ;;  %v2751_v35 = vmax.f32 %v2687_v32, 0.0 }
 0x1f3   :  { %v2028_v45 = vpop.f32.mrf.mxu1  ;;  %v2235_v13 = vpop.f32.mrf.mxu0 }
 0x1f4   :  { %v2688_v34 = vadd.f32 %v5000_v31, %v2617_v57  ;;  %v2236_v25 = vadd.f32 %v2235_v13, %v4950_v50  ;;  %v2754_v40 = vmax.f32 %v2690_v29, 0.0  ;;  %v2622_v6 = vmul.f32 %v4989_v52, %v2244_v37 }
 0x1f5   :  { %v5129_v62 = vpop.f32.mrf.mxu1  ;;  %v3739_v3 = vpop.f32.mrf.mxu0  ;;  %v1974_v57 = vadd.f32 %v4984_v42, %v4902_v8 }
 0x1f6   :  { %v2752_v22 = vmax.f32 %v2688_v34, 0.0  ;;  %v2620_v18 = vmul.f32 %v4989_v52, %v2236_v25  ;;  %v3535_v26 = vpack.c.bf16 %v2754_v40, %v2753_v23  ;;  %v2247_v11 = vadd.f32 %v3739_v3, %v4965_v1 }
 0x1f7   :  { %v2031_v28 = vpop.f32.mrf.mxu1  ;;  %v2238_v17 = vpop.f32.mrf.mxu0  ;;  %v2693_v50 = vadd.f32 %v5000_v31, %v2622_v6 }
 0x1f8   :  { %v3530_v38 = vpack.c.bf16 %v2752_v22, %v2751_v35  ;;  %v2239_v59 = vadd.f32 %v2238_v17, %v4955_v44  ;;  %3647 = vst [vmem:[%s5361_s4 + $0x58] sm:$0xff] %v3535_v26   ;;  %v2623_v39 = vmul.f32 %v4989_v52, %v2247_v11  ;;  %v2691_v1 = vadd.f32 %v5000_v31, %v2620_v18 }
 0x1f9   :  { %v5139_v63 = vpop.f32.mrf.mxu1  ;;  %v3742_v47 = vpop.f32.mrf.mxu0  ;;  %v2757_v37 = vmax.f32 %v2693_v50, 0.0 }
 0x1fa   :  { %3646 = vst [vmem:[%s5361_s4 + $0x50] sm:$0xff] %v3530_v38   ;;  %v2621_v15 = vmul.f32 %v4989_v52, %v2239_v59  ;;  %v2260_v44 = vadd.f32 %v3742_v47, %v4980_v9  ;;  %v2694_v54 = vadd.f32 %v5000_v31, %v2623_v39  ;;  %v2755_v25 = vmax.f32 %v2691_v1, 0.0 }
 0x1fb   :  { %v2036_v0 = vpop.f32.mrf.mxu1  ;;  %v2251_v43 = vpop.f32.mrf.mxu0  ;;  %v1990_v39 = vadd.f32 %v5019_v53, %v4922_v61 }
 0x1fc   :  { %v2692_v51 = vadd.f32 %v5000_v31, %v2621_v15  ;;  %v2252_v32 = vadd.f32 %v2251_v43, %v4970_v14  ;;  %v2758_v29 = vmax.f32 %v2694_v54, 0.0  ;;  %v2626_v45 = vmul.f32 %v4989_v52, %v2260_v44 }
 0x1fd   :  { %v5153_v13 = vpop.f32.mrf.mxu1  ;;  %v3743_v34 = vpop.f32.mrf.mxu0  ;;  %v1987_v14 = vadd.f32 %v5010_v36, %v4917_v49 }
 0x1fe   :  { %v2756_v9 = vmax.f32 %v2692_v51, 0.0  ;;  %v2624_v23 = vmul.f32 %v4989_v52, %v2252_v32  ;;  %v3545_v40 = vpack.c.bf16 %v2758_v29, %v2757_v37  ;;  %v2263_v6 = vadd.f32 %v3743_v34, %v1974_v57 }
 0x1ff   :  { %v2039_v3 = vpop.f32.mrf.mxu1  ;;  %v2254_v35 = vpop.f32.mrf.mxu0  ;;  %v2697_v42 = vadd.f32 %v5000_v31, %v2626_v45 }
 0x200   :  { %v3540_v22 = vpack.c.bf16 %v2756_v9, %v2755_v25  ;;  %v2255_v8 = vadd.f32 %v2254_v35, %v4975_v60  ;;  %3649 = vst [vmem:[%s5361_s4 + $0x68] sm:$0xff] %v3545_v40   ;;  %v2627_v18 = vmul.f32 %v4989_v52, %v2263_v6  ;;  %v2695_v49 = vadd.f32 %v5000_v31, %v2624_v23 }
 0x201   :  { %v5164_v26 = vpop.f32.mrf.mxu1  ;;  %v3746_v11 = vpop.f32.mrf.mxu0  ;;  %v2761_v47 = vmax.f32 %v2697_v42, 0.0  ;;  %v1995_v23 = vadd.f32 %v5029_v24, %v4927_v5 }
 0x202   :  { %3648 = vst [vmem:[%s5361_s4 + $0x60] sm:$0xff] %v3540_v22   ;;  %v2625_v36 = vmul.f32 %v4989_v52, %v2255_v8  ;;  %v2276_v60 = vadd.f32 %v3746_v11, %v1987_v14  ;;  %v2698_v28 = vadd.f32 %v5000_v31, %v2627_v18  ;;  %v2759_v0 = vmax.f32 %v2695_v49, 0.0 }
 0x203   :  { %v2044_v17 = vpop.f32.mrf.mxu1  ;;  %v2267_v38 = vpop.f32.mrf.mxu0  ;;  %v2006_v22 = vadd.f32 %v5063_v4, %v4942_v46  ;;  %v1998_v11 = vadd.f32 %v5041_v2, %v4932_v20  ;;  %v2019_v46 = vadd.f32 %v5095_v55, %v4957_v19 }
 0x204   :  { %v2696_v59 = vadd.f32 %v5000_v31, %v2625_v36  ;;  %v2268_v50 = vadd.f32 %v2267_v38, %v4992_v58  ;;  %v2762_v1 = vmax.f32 %v2698_v28, 0.0  ;;  %v2630_v15 = vmul.f32 %v4989_v52, %v2276_v60 }
 0x205   :  { %v5177_v44 = vpop.f32.mrf.mxu1  ;;  %v3747_v54 = vpop.f32.mrf.mxu0  ;;  %v2003_v58 = vadd.f32 %v5051_v33, %v4937_v30 }
 0x206   :  { %v2760_v43 = vmax.f32 %v2696_v59, 0.0  ;;  %v2628_v51 = vmul.f32 %v4989_v52, %v2268_v50  ;;  %v3555_v32 = vpack.c.bf16 %v2762_v1, %v2761_v47  ;;  %v2279_v57 = vadd.f32 %v3747_v54, %v1990_v39 }
 0x207   :  { %v2047_v37 = vpop.f32.mrf.mxu1  ;;  %v2270_v29 = vpop.f32.mrf.mxu0  ;;  %v2701_v53 = vadd.f32 %v5000_v31, %v2630_v15  ;;  %v2011_v1 = vadd.f32 %v5073_v27, %v4947_v56 }
 0x208   :  { %v3550_v45 = vpack.c.bf16 %v2760_v43, %v2759_v0  ;;  %v2271_v61 = vadd.f32 %v2270_v29, %v5004_v48  ;;  %3651 = vst [vmem:[%s5361_s4 + $0x78] sm:$0xff] %v3555_v32   ;;  %v2631_v34 = vmul.f32 %v4989_v52, %v2279_v57  ;;  %v2699_v30 = vadd.f32 %v5000_v31, %v2628_v51 }
 0x209   :  { %v5188_v25 = vpop.f32.mrf.mxu1  ;;  %v3750_v9 = vpop.f32.mrf.mxu0  ;;  %v2765_v5 = vmax.f32 %v2701_v53, 0.0  ;;  %v2022_v57 = vadd.f32 %v5107_v16, %v4962_v41  ;;  %v2035_v41 = vadd.f32 %v5139_v63, %v4977_v21 }
 0x20a   :  { %3650 = vst [vmem:[%s5361_s4 + $0x70] sm:$0xff] %v3550_v45   ;;  %v2629_v48 = vmul.f32 %v4989_v52, %v2271_v61  ;;  %v2292_v33 = vadd.f32 %v3750_v9, %v2003_v58  ;;  %v2702_v40 = vadd.f32 %v5000_v31, %v2631_v34  ;;  %v2763_v49 = vmax.f32 %v2699_v30, 0.0 }
 0x20b   :  { %v2052_v6 = vpop.f32.mrf.mxu1  ;;  %v2283_v3 = vpop.f32.mrf.mxu0  ;;  %v2014_v45 = vadd.f32 %v5085_v12, %v4952_v10 }
 0x20c   :  { %v2700_v35 = vadd.f32 %v5000_v31, %v2629_v48  ;;  %v2284_v14 = vadd.f32 %v2283_v3, %v1995_v23  ;;  %v2766_v24 = vmax.f32 %v2702_v40, 0.0  ;;  %v2634_v8 = vmul.f32 %v4989_v52, %v2292_v33  ;;  %v5381_v3 = vld [vmem:[#allocation19_spill] sm:$0xff] }
 0x20d   :  { %v5202_v42 = vpop.f32.mrf.mxu1  ;;  %v3751_v18 = vpop.f32.mrf.mxu0 }
 0x20e   :  { %v2764_v36 = vmax.f32 %v2700_v35, 0.0  ;;  %v2632_v60 = vmul.f32 %v4989_v52, %v2284_v14  ;;  %v3565_v28 = vpack.c.bf16 %v2766_v24, %v2765_v5  ;;  %v2295_v17 = vadd.f32 %v3751_v18, %v2006_v22 }
 0x20f   :  { %v2055_v38 = vpop.f32.mrf.mxu1  ;;  %v2286_v59 = vpop.f32.mrf.mxu0  ;;  %v2705_v39 = vadd.f32 %v5000_v31, %v2634_v8  ;;  %v2027_v35 = vadd.f32 %v5117_v7, %v5381_v3 }
 0x210   :  { %v3560_v4 = vpack.c.bf16 %v2764_v36, %v2763_v49  ;;  %v2287_v50 = vadd.f32 %v2286_v59, %v1998_v11  ;;  %3653 = vst [vmem:[%s5361_s4 + $0x88] sm:$0xff] %v3565_v28   ;;  %v2635_v20 = vmul.f32 %v4989_v52, %v2295_v17  ;;  %v2703_v19 = vadd.f32 %v5000_v31, %v2632_v60  ;;  %v5382_v11 = vld [vmem:[#allocation21_spill] sm:$0xff]  ;;  %v5383_v38 = vld [vmem:[#allocation20_spill] sm:$0xff] }
 0x211   :  { %v5214_v2 = vpop.f32.mrf.mxu1  ;;  %v3754_v47 = vpop.f32.mrf.mxu0  ;;  %v2769_v56 = vmax.f32 %v2705_v39, 0.0  ;;  %v2038_v49 = vadd.f32 %v5153_v13, %v5382_v11  ;;  %v2030_v59 = vadd.f32 %v5129_v62, %v5383_v38 }
 0x212   :  { %3652 = vst [vmem:[%s5361_s4 + $0x80] sm:$0xff] %v3560_v4   ;;  %v2633_v55 = vmul.f32 %v4989_v52, %v2287_v50  ;;  %v2308_v15 = vadd.f32 %v3754_v47, %v2019_v46  ;;  %v2706_v54 = vadd.f32 %v5000_v31, %v2635_v20  ;;  %v2767_v61 = vmax.f32 %v2703_v19, 0.0  ;;  %v5384_v19 = vld [vmem:[#allocation5_spill] sm:$0xff] }
 0x213   :  { %v2060_v0 = vpop.f32.mrf.mxu1  ;;  %v2299_v43 = vpop.f32.mrf.mxu0  ;;  %v2051_v13 = vadd.f32 %v5188_v25, %v5384_v19 }
 0x214   :  { %v2704_v51 = vadd.f32 %v5000_v31, %v2633_v55  ;;  %v2300_v32 = vadd.f32 %v2299_v43, %v2011_v1  ;;  %v2770_v27 = vmax.f32 %v2706_v54, 0.0  ;;  %v2638_v37 = vmul.f32 %v4989_v52, %v2308_v15 }
 0x215   :  { %v5228_v29 = vpop.f32.mrf.mxu1  ;;  %v3755_v58 = vpop.f32.mrf.mxu0 }
 0x216   :  { %v2768_v53 = vmax.f32 %v2704_v51, 0.0  ;;  %v2636_v34 = vmul.f32 %v4989_v52, %v2300_v32  ;;  %v3575_v9 = vpack.c.bf16 %v2770_v27, %v2769_v56  ;;  %v2311_v23 = vadd.f32 %v3755_v58, %v2022_v57  ;;  %v5385_v51 = vld [vmem:[#allocation3_spill] sm:$0xff] }
 0x217   :  { %v2063_v30 = vpop.f32.mrf.mxu1  ;;  %v2302_v48 = vpop.f32.mrf.mxu0  ;;  %v2709_v40 = vadd.f32 %v5000_v31, %v2638_v37  ;;  %v2043_v32 = vadd.f32 %v5164_v26, %v5385_v51 }
 0x218   :  { %v3570_v16 = vpack.c.bf16 %v2768_v53, %v2767_v61  ;;  %v2303_v33 = vadd.f32 %v2302_v48, %v2014_v45  ;;  %3655 = vst [vmem:[%s5361_s4 + $0x98] sm:$0xff] %v3575_v9   ;;  %v2639_v10 = vmul.f32 %v4989_v52, %v2311_v23  ;;  %v2707_v21 = vadd.f32 %v5000_v31, %v2636_v34  ;;  %v5386_v53 = vld [vmem:[#allocation6_spill] sm:$0xff] }
 0x219   :  { %v2066_v12 = vpop.f32.mrf.mxu1  ;;  %v3758_v6 = vpop.f32.mrf.mxu0  ;;  %v2773_v7 = vmax.f32 %v2709_v40, 0.0  ;;  %v2054_v34 = vadd.f32 %v5202_v42, %v5386_v53 }
 0x21a   :  { %3654 = vst [vmem:[%s5361_s4 + $0x90] sm:$0xff] %v3570_v16   ;;  %v2637_v63 = vmul.f32 %v4989_v52, %v2303_v33  ;;  %v2324_v14 = vadd.f32 %v3758_v6, %v2035_v41  ;;  %v2710_v22 = vadd.f32 %v5000_v31, %v2639_v10  ;;  %v2771_v46 = vmax.f32 %v2707_v21, 0.0  ;;  %v5387_v41 = vld [vmem:[#allocation4_spill] sm:$0xff] }
 0x21b   :  { %v2068_v5 = vpop.f32.mrf.mxu1  ;;  %v2315_v24 = vpop.f32.mrf.mxu0  ;;  %v2046_v16 = vadd.f32 %v5177_v44, %v5387_v41 }
 0x21c   :  { %v2708_v8 = vadd.f32 %v5000_v31, %v2637_v63  ;;  %v2316_v18 = vadd.f32 %v2315_v24, %v2027_v35  ;;  %v2774_v36 = vmax.f32 %v2710_v22, 0.0  ;;  %v2642_v60 = vmul.f32 %v4989_v52, %v2324_v14  ;;  %v5388_v63 = vld [vmem:[#allocation9_spill] sm:$0xff] }
 0x21d   :  { %v2069_v28 = vpop.f32.mrf.mxu1  ;;  %v3759_v17 = vpop.f32.mrf.mxu0  ;;  %v2067_v42 = vadd.f32 %v2066_v12, %v5388_v63 }
 0x21e   :  { %v2772_v4 = vmax.f32 %v2708_v8, 0.0  ;;  %v2640_v50 = vmul.f32 %v4989_v52, %v2316_v18  ;;  %v3585_v39 = vpack.c.bf16 %v2774_v36, %v2773_v7  ;;  %v2327_v20 = vadd.f32 %v3759_v17, %v2038_v49  ;;  %v5389_v18 = vld [vmem:[#allocation7_spill] sm:$0xff] }
 0x21f   :  { %v2071_v47 = vpop.f32.mrf.mxu1  ;;  %v2318_v1 = vpop.f32.mrf.mxu0  ;;  %v2713_v54 = vadd.f32 %v5000_v31, %v2642_v60  ;;  %v2059_v11 = vadd.f32 %v5214_v2, %v5389_v18 }
 0x220   :  { %v3580_v55 = vpack.c.bf16 %v2772_v4, %v2771_v46  ;;  %v2319_v15 = vadd.f32 %v2318_v1, %v2030_v59  ;;  %3657 = vst [vmem:[%s5361_s4 + $0xa8] sm:$0xff] %v3585_v39   ;;  %v2643_v62 = vmul.f32 %v4989_v52, %v2327_v20  ;;  %v2711_v25 = vadd.f32 %v5000_v31, %v2640_v50  ;;  %v5390_v46 = vld [vmem:[#allocation10_spill] sm:$0xff]  ;;  %v5391_v1 = vld [vmem:[#allocation8_spill] sm:$0xff] }
 0x221   :  { %v5262_v0 = vpop.f32.mrf.mxu1  ;;  %v3762_v43 = vpop.f32.mrf.mxu0  ;;  %v2777_v26 = vmax.f32 %v2713_v54, 0.0  ;;  %v2070_v4 = vadd.f32 %v2069_v28, %v5390_v46  ;;  %v2062_v19 = vadd.f32 %v5228_v29, %v5391_v1 }
 0x222   :  { %3656 = vst [vmem:[%s5361_s4 + $0xa0] sm:$0xff] %v3580_v55   ;;  %v2641_v57 = vmul.f32 %v4989_v52, %v2319_v15  ;;  %v2340_v56 = vadd.f32 %v3762_v43, %v2051_v13  ;;  %v2714_v27 = vadd.f32 %v5000_v31, %v2643_v62  ;;  %v2775_v33 = vmax.f32 %v2711_v25, 0.0  ;;  %v5392_v25 = vld [vmem:[#allocation13_spill] sm:$0xff] }
 0x223   :  { %v2076_v37 = vpop.f32.mrf.mxu1  ;;  %v2331_v58 = vpop.f32.mrf.mxu0 }
 0x224   :  { %v2712_v45 = vadd.f32 %v5000_v31, %v2641_v57  ;;  %v2332_v61 = vadd.f32 %v2331_v58, %v2043_v32  ;;  %v2778_v9 = vmax.f32 %v2714_v27, 0.0  ;;  %v2646_v23 = vmul.f32 %v4989_v52, %v2340_v56  ;;  %v5393_v58 = vld [vmem:[#allocation11_spill] sm:$0xff] }
 0x225   :  { %v5276_v30 = vpop.f32.mrf.mxu1  ;;  %v3763_v48 = vpop.f32.mrf.mxu0 }
 0x226   :  { %v2776_v40 = vmax.f32 %v2712_v45, 0.0  ;;  %v2644_v10 = vmul.f32 %v4989_v52, %v2332_v61  ;;  %v3595_v6 = vpack.c.bf16 %v2778_v9, %v2777_v26  ;;  %v2343_v3 = vadd.f32 %v3763_v48, %v2054_v34 }
 0x227   :  { %v2079_v35 = vpop.f32.mrf.mxu1  ;;  %v2334_v21 = vpop.f32.mrf.mxu0  ;;  %v2717_v5 = vadd.f32 %v5000_v31, %v2646_v23  ;;  %v2075_v45 = vadd.f32 %v5262_v0, %v5393_v58 }
 0x228   :  { %v3590_v14 = vpack.c.bf16 %v2776_v40, %v2775_v33  ;;  %v2335_v22 = vadd.f32 %v2334_v21, %v2046_v16  ;;  %3659 = vst [vmem:[%s5361_s4 + $0xb8] sm:$0xff] %v3595_v6   ;;  %v2647_v44 = vmul.f32 %v4989_v52, %v2343_v3  ;;  %v2715_v12 = vadd.f32 %v5000_v31, %v2644_v10  ;;  %v5394_v33 = vld [vmem:[#allocation14_spill] sm:$0xff]  ;;  %v5395_v35 = vld [vmem:[#allocation12_spill] sm:$0xff] }
 0x229   :  { %v2082_v24 = vpop.f32.mrf.mxu1  ;;  %v3766_v8 = vpop.f32.mrf.mxu0  ;;  %v2781_v50 = vmax.f32 %v2717_v5, 0.0  ;;  %v2078_v21 = vadd.f32 %v5276_v30, %v5395_v35 }
 0x22a   :  { %3658 = vst [vmem:[%s5361_s4 + $0xb0] sm:$0xff] %v3590_v14   ;;  %v2645_v49 = vmul.f32 %v4989_v52, %v2335_v22  ;;  %v2356_v7 = vadd.f32 %v3766_v8, %v2067_v42  ;;  %v2718_v36 = vadd.f32 %v5000_v31, %v2647_v44  ;;  %v2779_v13 = vmax.f32 %v2715_v12, 0.0 }
 0x22b   :  { %v2084_v60 = vpop.f32.mrf.mxu1  ;;  %v2347_v17 = vpop.f32.mrf.mxu0  ;;  %v2083_v28 = vadd.f32 %v2082_v24, %v5392_v25 }
 0x22c   :  { %v2716_v38 = vadd.f32 %v5000_v31, %v2645_v49  ;;  %v2348_v59 = vadd.f32 %v2347_v17, %v2059_v11  ;;  %v2782_v2 = vmax.f32 %v2718_v36, 0.0  ;;  %v2650_v39 = vmul.f32 %v4989_v52, %v2356_v7  ;;  %v5396_v7 = vld [vmem:[#allocation15_spill] sm:$0xff] }
 0x22d   :  { %v2085_v20 = vpop.f32.mrf.mxu1  ;;  %v3767_v47 = vpop.f32.mrf.mxu0 }
 0x22e   :  { %v2780_v55 = vmax.f32 %v2716_v38, 0.0  ;;  %v2648_v15 = vmul.f32 %v4989_v52, %v2348_v59  ;;  %v3605_v54 = vpack.c.bf16 %v2782_v2, %v2781_v50  ;;  %v2359_v62 = vadd.f32 %v3767_v47, %v2070_v4  ;;  %v5397_v38 = vld [vmem:[#allocation17_spill] sm:$0xff] }
 0x22f   :  { %v2087_v43 = vpop.f32.mrf.mxu1  ;;  %v2350_v51 = vpop.f32.mrf.mxu0  ;;  %v2721_v56 = vadd.f32 %v5000_v31, %v2650_v39  ;;  %v2086_v40 = vadd.f32 %v2085_v20, %v5394_v33 }
 0x230   :  { %v3600_v32 = vpack.c.bf16 %v2780_v55, %v2779_v13  ;;  %v2351_v57 = vadd.f32 %v2350_v51, %v2062_v19  ;;  %3661 = vst [vmem:[%s5361_s4 + $0xc8] sm:$0xff] %v3605_v54   ;;  %v2651_v29 = vmul.f32 %v4989_v52, %v2359_v62  ;;  %v2719_v61 = vadd.f32 %v5000_v31, %v2648_v15  ;;  %v5398_v62 = vld [vmem:[#allocation18_spill] sm:$0xff]  ;;  %v5399_v51 = vld [vmem:[#allocation16_spill] sm:$0xff] }
 0x231   :  { %v2090_v27 = vpop.f32.mrf.mxu1  ;;  %v3770_v37 = vpop.f32.mrf.mxu0  ;;  %v2785_v16 = vmax.f32 %v2721_v56, 0.0 }
 0x232   :  { %3660 = vst [vmem:[%s5361_s4 + $0xc0] sm:$0xff] %v3600_v32   ;;  %v2649_v53 = vmul.f32 %v4989_v52, %v2351_v57  ;;  %v2372_v34 = vadd.f32 %v3770_v37, %v2083_v28  ;;  %v2722_v26 = vadd.f32 %v5000_v31, %v2651_v29  ;;  %v2783_v63 = vmax.f32 %v2719_v61, 0.0 }
 0x233   :  { %v2092_v9 = vpop.f32.mrf.mxu1  ;;  %v2363_v23 = vpop.f32.mrf.mxu0  ;;  %v2091_v36 = vadd.f32 %v2090_v27, %v5396_v7 }
 0x234   :  { %v2720_v48 = vadd.f32 %v5000_v31, %v2649_v53  ;;  %v2364_v41 = vadd.f32 %v2363_v23, %v2075_v45  ;;  %v2786_v0 = vmax.f32 %v2722_v26, 0.0  ;;  %v2654_v10 = vmul.f32 %v4989_v52, %v2372_v34 }
 0x235   :  { %v2093_v6 = vpop.f32.mrf.mxu1  ;;  %v3771_v3 = vpop.f32.mrf.mxu0 }
 0x236   :  { %v2784_v42 = vmax.f32 %v2720_v48, 0.0  ;;  %v2652_v14 = vmul.f32 %v4989_v52, %v2364_v41  ;;  %v3615_v22 = vpack.c.bf16 %v2786_v0, %v2785_v16  ;;  %v2375_v5 = vadd.f32 %v3771_v3, %v2086_v40 }
 0x237   :  { %v2095_v44 = vpop.f32.mrf.mxu1  ;;  %v2366_v24 = vpop.f32.mrf.mxu0  ;;  %v2725_v11 = vadd.f32 %v5000_v31, %v2654_v10  ;;  %v2094_v32 = vadd.f32 %v2093_v6, %v5399_v51 }
 0x238   :  { %v3610_v8 = vpack.c.bf16 %v2784_v42, %v2783_v63  ;;  %v2367_v18 = vadd.f32 %v2366_v24, %v2078_v21  ;;  %3663 = vst [vmem:[%s5361_s4 + $0xd8] sm:$0xff] %v3615_v22   ;;  %v2655_v12 = vmul.f32 %v4989_v52, %v2375_v5  ;;  %v2723_v60 = vadd.f32 %v5000_v31, %v2652_v14 }
 0x239   :  { %v2098_v49 = vpop.f32.mrf.mxu1  ;;  %v3774_v30 = vpop.f32.mrf.mxu0  ;;  %v2789_v47 = vmax.f32 %v2725_v11, 0.0 }
 0x23a   :  { %3662 = vst [vmem:[%s5361_s4 + $0xd0] sm:$0xff] %v3610_v8   ;;  %v2653_v17 = vmul.f32 %v4989_v52, %v2367_v18  ;;  %v2099_v59 = vadd.f32 %v2098_v49, %v5397_v38  ;;  %v2726_v46 = vadd.f32 %v5000_v31, %v2655_v12  ;;  %v2787_v55 = vmax.f32 %v2723_v60, 0.0 }
 0x23b   :  { %v2100_v4 = vpop.f32.mrf.mxu1  ;;  %v2379_v50 = vpop.f32.mrf.mxu0 }
 0x23c   :  { %v2724_v2 = vadd.f32 %v5000_v31, %v2653_v17  ;;  %v2388_v39 = vadd.f32 %v3774_v30, %v2099_v59  ;;  %v2380_v20 = vadd.f32 %v2379_v50, %v2091_v36  ;;  %v2790_v1 = vmax.f32 %v2726_v46, 0.0 }
 0x23d   :  { %v2101_v19 = vpop.f32.mrf.mxu1  ;;  %v3775_v13 = vpop.f32.mrf.mxu0 }
 0x23e   :  { %v2788_v15 = vmax.f32 %v2724_v2, 0.0  ;;  %v2658_v54 = vmul.f32 %v4989_v52, %v2388_v39  ;;  %v2102_v43 = vadd.f32 %v2101_v19, %v5398_v62  ;;  %v3625_v25 = vpack.c.bf16 %v2790_v1, %v2789_v47 }
 0x23f   :  { %v2656_v28 = vmul.f32 %v4989_v52, %v2380_v20  ;;  %v2103_v57 = vpop.f32.mrf.mxu1  ;;  %v2382_v56 = vpop.f32.mrf.mxu0 }
 0x240   :  { %v3620_v29 = vpack.c.bf16 %v2788_v15, %v2787_v55  ;;  %v2391_v27 = vadd.f32 %v3775_v13, %v2102_v43  ;;  %3665 = vst [vmem:[%s5361_s4 + $0xe8] sm:$0xff] %v3625_v25   ;;  %v2383_v37 = vadd.f32 %v2382_v56, %v2094_v32  ;;  %v2729_v58 = vadd.f32 %v5000_v31, %v2658_v54 }
 0x241   :  { %v2727_v61 = vadd.f32 %v5000_v31, %v2656_v28 }
 0x242   :  { %3664 = vst [vmem:[%s5361_s4 + $0xe0] sm:$0xff] %v3620_v29   ;;  %v2659_v45 = vmul.f32 %v4989_v52, %v2391_v27  ;;  %v2657_v53 = vmul.f32 %v4989_v52, %v2383_v37  ;;  %v2793_v9 = vmax.f32 %v2729_v58, 0.0 }
 0x243   :  { %v2791_v48 = vmax.f32 %v2727_v61, 0.0 }
 0x244   :  { %v2730_v34 = vadd.f32 %v5000_v31, %v2659_v45  ;;  %v2728_v26 = vadd.f32 %v5000_v31, %v2657_v53 }
 0x246   :  { %v2794_v23 = vmax.f32 %v2730_v34, 0.0  ;;  %v2792_v41 = vmax.f32 %v2728_v26, 0.0 }
 0x248   :  { %v3635_v16 = vpack.c.bf16 %v2794_v23, %v2793_v9  ;;  %v3630_v33 = vpack.c.bf16 %v2792_v41, %v2791_v48 }
 0x24a   :  { %3667 = vst [vmem:[%s5361_s4 + $0xf8] sm:$0xff] %v3635_v16   ;;  %3666 = vst [vmem:[%s5361_s4 + $0xf0] sm:$0xff] %v3630_v33  }

</bundles_post_ra>
